<compile_context>
chip_gen: v5e
topology: v5e:2x2
jax: 0.10.0
libtpu: 0.0.40
codegen_flags: <defaults>
</compile_context>

<pallas_src>
import functools

import numpy as np
import jax
import jax.numpy as jnp
from jax.experimental import pallas as pl
from jax.experimental.pallas import tpu as pltpu

LRELU_SLOPE = 0.2
SEGMENT_SIZE = 8192
_VMEM_LIMIT = 32 * 1024 * 1024


# ---------------------------------------------------------------------------
# Fused SBD kernel: all MDC blocks + final 1-channel head in one kernel
# ---------------------------------------------------------------------------
def make_sbd_kernel(layer_hps, t0):
    """layer_hps: list of dicts {c_in, c_out, k, stride, dilations} (static)."""
    L = len(layer_hps)

    def kernel(*refs):
        x_ref = refs[0]
        wrefs = refs[1:1 + 4 * L]
        whead_ref = refs[1 + 4 * L]
        bhead_ref = refs[2 + 4 * L]
        y_refs = refs[3 + 4 * L:3 + 5 * L]
        head_ref = refs[3 + 5 * L]

        x = x_ref[...]                                   # (C0, T0)
        t = t0
        for l, hp in enumerate(layer_hps):
            c_in, c_out = hp["c_in"], hp["c_out"]
            kk, s, dils = hp["k"], hp["stride"], hp["dilations"]
            wdil = wrefs[4 * l][...]                     # (c_out, n*k*c_in) bf16
            bdil = wrefs[4 * l + 1][...]                 # (c_out, 1) f32
            wproj = wrefs[4 * l + 2][...]                # (c_out, 3*c_out) bf16
            bproj = wrefs[4 * l + 3][...]                # (c_out, 1) f32

            # ---- dilated stack: in-VMEM im2col + ONE deep MXU matmul
            #      (mean over dilations folded into wdil / bdil).
            xb = x.astype(jnp.bfloat16)
            pad = max(d * (kk - 1) // 2 for d in dils)
            if pad > 0:
                zer = jnp.zeros((c_in, pad), jnp.bfloat16)
                xp = jnp.concatenate([zer, xb, zer], axis=1)
            else:
                xp = xb
            slabs = []
            for d in dils:
                off0 = pad - d * (kk - 1) // 2
                for ki in range(kk):
                    slabs.append(xp[:, off0 + ki * d: off0 + ki * d + t])
            patch = jnp.concatenate(slabs, axis=0)       # (n*k*c_in, t)
            z = jnp.dot(wdil, patch,
                        preferred_element_type=jnp.float32) + bdil

            # ---- proj conv (k=3, pad=1) at stride 1 on the MXU
            zb = z.astype(jnp.bfloat16)
            zer1 = jnp.zeros((c_out, 1), jnp.bfloat16)
            zp = jnp.concatenate([zer1, zb, zer1], axis=1)          # (c_out, t+2)
            ppatch = jnp.concatenate([zp[:, ki:ki + t] for ki in range(3)],
                                     axis=0)                        # (3*c_out, t)
            y = jnp.dot(wproj, ppatch, preferred_element_type=jnp.float32)

            # ---- stride-s downsample via exact 0/1 selection matmul
            if s > 1:
                t_out = (t - 1) // s + 1
                row = jax.lax.broadcasted_iota(jnp.int32, (t, t_out), 0)
                col = jax.lax.broadcasted_iota(jnp.int32, (t, t_out), 1)
                sel = (row == s * col).astype(jnp.float32)
                y = jnp.dot(y, sel, preferred_element_type=jnp.float32)
                t = t_out

            y = y + bproj
            y = jnp.where(y >= 0, y, LRELU_SLOPE * y)    # fused leaky-ReLU
            y_refs[l][...] = y.astype(y_refs[l].dtype)
            x = y                                        # next layer input (f32)

        # ---- final SBD head: Conv1d(C_last -> 1, k=3, pad=1), no activation.
        #      Done as a VPU/XLU weighted-channel reduction (no 1-row matmul).
        c_last = layer_hps[-1]["c_out"]
        wh = whead_ref[...]                              # (c_last, 3) f32
        zer1 = jnp.zeros((c_last, 1), jnp.float32)
        yp = jnp.concatenate([zer1, x, zer1], axis=1)    # (c_last, t+2)
        acc = jnp.zeros((1, t), jnp.float32)
        for ki in range(3):
            acc = acc + jnp.sum(wh[:, ki:ki + 1] * yp[:, ki:ki + t],
                                axis=0, keepdims=True)
        head_ref[...] = (acc + bhead_ref[...]).astype(head_ref.dtype)

    return kernel


def sbd_pallas(packed, x, layer_hps):
    """Run one (possibly branch-stacked) SBD tower.

    packed: per-layer lists wdil/bdil/wproj/bproj + whead/bhead, each with a
            leading branch dim nb.
    x:      (B, C0, T0) activations (bf16 or f32), shared by all branches.
    Returns (y_layer0, ..., y_layerL-1, y_head), each (nb, B, C, T) f32.
    """
    nb = packed["whead"].shape[0]
    B, c0, t0 = x.shape
    L = len(layer_hps)
    assert c0 == layer_hps[0]["c_in"]

    inputs = [x]
    in_specs = [pl.BlockSpec((None, c0, t0), lambda b, br: (b, 0, 0))]
    for l in range(L):
        for arr in (packed["wdil"][l], packed["bdil"][l],
                    packed["wproj"][l], packed["bproj"][l]):
            inputs.append(arr)
            in_specs.append(pl.BlockSpec((None,) + arr.shape[1:],
                                         lambda b, br: (br, 0, 0)))
    for arr in (packed["whead"], packed["bhead"]):
        inputs.append(arr)
        in_specs.append(pl.BlockSpec((None,) + arr.shape[1:],
                                     lambda b, br: (br, 0, 0)))

    ts, t = [], t0
    for hp in layer_hps:
        if hp["stride"] > 1:
            t = (t - 1) // hp["stride"] + 1
        ts.append(t)
    cs = [hp["c_out"] for hp in layer_hps]

    out_shape = tuple([jax.ShapeDtypeStruct((nb, B, cs[l], ts[l]), jnp.float32)
                       for l in range(L)]
                      + [jax.ShapeDtypeStruct((nb, B, 1, ts[-1]), jnp.float32)])
    out_specs = tuple([pl.BlockSpec((None, None, cs[l], ts[l]),
                                    lambda b, br: (br, b, 0, 0))
                       for l in range(L)]
                      + [pl.BlockSpec((None, None, 1, ts[-1]),
                                      lambda b, br: (br, b, 0, 0))])

    # Advisory cost estimate (helps XLA schedule the small custom calls).
    flops, t = 0, t0
    for hp in layer_hps:
        n = len(hp["dilations"])
        flops += 2 * hp["c_out"] * n * hp["k"] * hp["c_in"] * t
        flops += 2 * hp["c_out"] * 3 * hp["c_out"] * t
        if hp["stride"] > 1:
            t_new = (t - 1) // hp["stride"] + 1
            flops += 2 * hp["c_out"] * t * t_new
            t = t_new
    flops += 2 * 3 * layer_hps[-1]["c_out"] * t
    flops *= B * nb
    bytes_accessed = sum(int(a.size) * a.dtype.itemsize for a in inputs) * nb
    bytes_accessed += sum(int(np.prod(s.shape)) * 4 for s in out_shape)

    return pl.pallas_call(
        make_sbd_kernel(layer_hps, t0),
        out_shape=out_shape,
        grid=(B, nb),
        in_specs=in_specs,
        out_specs=out_specs,
        compiler_params=pltpu.CompilerParams(
            dimension_semantics=("parallel", "parallel"),
            vmem_limit_bytes=_VMEM_LIMIT),
        cost_estimate=pl.CostEstimate(flops=int(flops), transcendentals=0,
                                      bytes_accessed=int(bytes_accessed)),
    )(*inputs)


# ---------------------------------------------------------------------------
# PQMF analysis: one dense MXU matmul per batch element (bf16 out)
# ---------------------------------------------------------------------------
def _pqmf_kernel(w_ref, a_ref, o_ref):
    o_ref[...] = jnp.dot(w_ref[...], a_ref[...],
                         preferred_element_type=jnp.float32).astype(o_ref.dtype)


def pqmf_pallas(w, a):
    """w: (C, Kc) bf16, a: (B, Kc, T) bf16 -> (B, C, T) bf16."""
    B, kc, t = a.shape
    c = w.shape[0]
    flops = 2 * c * kc * t * B
    bytes_accessed = int(w.size) * 2 * B + int(a.size) * 2 + B * c * t * 2
    return pl.pallas_call(
        _pqmf_kernel,
        out_shape=jax.ShapeDtypeStruct((B, c, t), jnp.bfloat16),
        grid=(B,),
        in_specs=[pl.BlockSpec((c, kc), lambda b: (0, 0)),
                  pl.BlockSpec((None, kc, t), lambda b: (b, 0, 0))],
        out_specs=pl.BlockSpec((None, c, t), lambda b: (b, 0, 0)),
        compiler_params=pltpu.CompilerParams(
            dimension_semantics=("parallel",),
            vmem_limit_bytes=_VMEM_LIMIT),
        cost_estimate=pl.CostEstimate(flops=int(flops), transcendentals=0,
                                      bytes_accessed=int(bytes_accessed)),
    )(w, a)


def _pqmf_im2col(x, taps, stride):
    # PQMF analysis patches (C_in=1, K=taps+1, pad=taps//2, stride), built with
    # a reshape trick: only ceil(K/stride) slices.  Cheap XLA ops, bf16.
    # TODO(synk): could be moved in-kernel, but it is ~1 MB total and 2 calls.
    B, _, T = x.shape
    K, s, pad = taps + 1, stride, taps // 2
    T_out = (T + 2 * pad - K) // s + 1
    nblk = -(-K // s)
    rows = T_out + nblk - 1
    need = rows * s
    xp = jnp.pad(x[:, 0, :], ((0, 0), (pad, pad)))
    cur = xp.shape[1]
    xp = jnp.pad(xp, ((0, 0), (0, need - cur))) if need > cur else xp[:, :need]
    xr = jnp.transpose(xp.reshape(B, rows, s), (0, 2, 1))     # (B, s, rows)
    cols = [xr[:, :, a:a + T_out] for a in range(nblk)]       # row = a*s + r
    return jnp.concatenate(cols, axis=1)                      # (B, nblk*s, T_out)


def pqmf_filters_flat(N, taps, cutoff, beta):
    numtaps = taps + 1
    alpha = 0.5 * (numtaps - 1)
    coeff = np.arange(numtaps, dtype=np.float64) - alpha
    xv = np.pi * cutoff * coeff
    with np.errstate(divide="ignore", invalid="ignore"):
        sinc = np.sin(xv) / xv
    sinc = np.nan_to_num(sinc, nan=1.0)
    window = np.kaiser(numtaps, beta)          # torch.kaiser_window(periodic=False)
    qmf = cutoff * sinc * window
    qmf = qmf / qmf.sum()
    H = np.zeros((N, numtaps), np.float64)
    n = np.arange(numtaps) - (taps - 1) / 2.0
    for k in range(N):
        cf = (2 * k + 1) * (np.pi / (2 * N)) * n
        phase = ((-1) ** k) * np.pi / 4.0
        H[k] = 2.0 * qmf * np.cos(cf + phase)
    nblk = -(-numtaps // N)                    # stride == N for PQMF
    Hp = np.zeros((N, nblk * N), np.float64)
    Hp[:, :numtaps] = H
    return jnp.asarray(Hp, jnp.float32)        # (N, nblk*N)


# ---------------------------------------------------------------------------
# Deterministic parameter init (weight_norm at init == plain conv weights)
# ---------------------------------------------------------------------------
def init_conv(key, c_out, c_in, k):
    kw, kb = jax.random.split(key)
    w = jax.random.normal(kw, (c_out, c_in, k), jnp.float32) / np.sqrt(c_in * k)
    b = jax.random.normal(kb, (c_out,), jnp.float32) * 0.01
    return {"w": w, "b": b}


def init_mdc(key, c_in, c_out, kernel, stride, dilations):
    keys = jax.random.split(key, len(dilations) + 1)
    layers = [{"conv": init_conv(kk, c_out, c_in, kernel), "dilation": int(d)}
              for kk, d in zip(keys[:-1], dilations)]
    proj = {"conv": init_conv(keys[-1], c_out, c_out, 3), "stride": int(stride)}
    return {"layers": layers, "proj": proj}


def init_sbd(key, init_channel, channels, kernel, strides, dilations):
    keys = jax.random.split(key, len(channels) + 1)
    layers, c_in = [], init_channel
    for kk, (c, s, d) in zip(keys[:-1], zip(channels, strides, dilations)):
        layers.append(init_mdc(kk, c_in, c, kernel, s, d))
        c_in = c
    proj = init_conv(keys[-1], 1, c_in, 3)
    return {"layers": layers, "proj": proj}


def init_msbd(key, cfg):
    k1, k2, k3, k4 = jax.random.split(key, 4)
    return {
        "fsbd": init_sbd(k1, SEGMENT_SIZE // 64, cfg["freq_channels"],
                         cfg["freq_kernel"], cfg["freq_stride"],
                         cfg["freq_dilations"]),
        "tsbd1": init_sbd(k2, cfg["time_subband"][0], cfg["time_channels"],
                          cfg["time_kernels"][0], cfg["time_strides"][0],
                          cfg["time_dilations"][0]),
        "tsbd2": init_sbd(k3, cfg["time_subband"][1], cfg["time_channels"],
                          cfg["time_kernels"][1], cfg["time_strides"][1],
                          cfg["time_dilations"][1]),
        "tsbd3": init_sbd(k4, cfg["time_subband"][2], cfg["time_channels"],
                          cfg["time_kernels"][2], cfg["time_strides"][2],
                          cfg["time_dilations"][2]),
    }


# ---------------------------------------------------------------------------
# One-time parameter packing: flatten, fold mean, zero-pad C_in, cast to bf16
# ---------------------------------------------------------------------------
def _flatten_dil_weight(w, c_in_pad):
    # (C_out, C_in, K) -> (C_out, K*c_in_pad), column order (k, ci).
    c_out, c_in, K = w.shape
    if c_in_pad > c_in:
        w = jnp.pad(w, ((0, 0), (0, c_in_pad - c_in), (0, 0)))
    return jnp.transpose(w, (0, 2, 1)).reshape(c_out, K * c_in_pad)


def pack_sbd(p, c_in0_pad):
    packed = {"wdil": [], "bdil": [], "wproj": [], "bproj": []}
    hps = []
    c_pad = c_in0_pad
    for mdc in p["layers"]:
        layers = mdc["layers"]
        n = len(layers)
        c_out, _, K = layers[0]["conv"]["w"].shape
        ws = [_flatten_dil_weight(lp["conv"]["w"], c_pad) for lp in layers]
        wdil = (jnp.concatenate(ws, axis=1) / n).astype(jnp.bfloat16)
        bdil = (sum(lp["conv"]["b"] for lp in layers) / n
                ).reshape(c_out, 1).astype(jnp.float32)
        pw = mdc["proj"]["conv"]["w"]                     # (c_out, c_out, 3)
        wproj = jnp.transpose(pw, (0, 2, 1)).reshape(c_out, 3 * c_out
                                                     ).astype(jnp.bfloat16)
        bproj = mdc["proj"]["conv"]["b"].reshape(c_out, 1).astype(jnp.float32)
        for kname, v in zip(("wdil", "bdil", "wproj", "bproj"),
                            (wdil, bdil, wproj, bproj)):
            packed[kname].append(v)
        hps.append(dict(c_in=c_pad, c_out=c_out, k=K,
                        stride=mdc["proj"]["stride"],
                        dilations=tuple(lp["dilation"] for lp in layers)))
        c_pad = c_out
    packed["whead"] = p["proj"]["w"][0].astype(jnp.float32)   # (C_last, 3)
    packed["bhead"] = p["proj"]["b"].reshape(1, 1).astype(jnp.float32)
    return packed, hps


def stack_packed(packed_list):
    out = {"wdil": [], "bdil": [], "wproj": [], "bproj": []}
    L = len(packed_list[0]["wdil"])
    for l in range(L):
        for k in ("wdil", "bdil", "wproj", "bproj"):
            out[k].append(jnp.stack([pk[k][l] for pk in packed_list], axis=0))
    out["whead"] = jnp.stack([pk["whead"] for pk in packed_list], axis=0)
    out["bhead"] = jnp.stack([pk["bhead"] for pk in packed_list], axis=0)
    return out


def prepare_msbd(params, cfg):
    packed = {
        "Hm": pqmf_filters_flat(64, 256, 0.1, 9.0).astype(jnp.bfloat16),
        "Hn": pqmf_filters_flat(16, 256, 0.03, 10.0).astype(jnp.bfloat16),
    }
    fpk, fhps = pack_sbd(params["fsbd"], SEGMENT_SIZE // 64)
    packed["fsbd"] = stack_packed([fpk])
    packed["fsbd_hps"] = fhps

    # tsbd branches in reference evaluation order: tsbd3 (:16), tsbd2 (:8), tsbd1 (:4)
    sb = cfg["time_subband"]
    order = [("tsbd3", sb[2]), ("tsbd2", sb[1]), ("tsbd1", sb[0])]
    c_pad = max(sb)
    pks, hps_list = [], []
    for name, _ in order:
        pk, hps = pack_sbd(params[name], c_pad)
        pks.append(pk)
        hps_list.append(hps)
    if all(h == hps_list[0] for h in hps_list[1:]):
        packed["tsbd_stacked"] = True
        packed["tsbd"] = stack_packed(pks)
        packed["tsbd_hps"] = hps_list[0]
        packed["tsbd_cin"] = c_pad
    else:
        packed["tsbd_stacked"] = False
        singles = []
        for name, c_in in order:
            pk, hps = pack_sbd(params[name], c_in)
            singles.append((stack_packed([pk]), hps, c_in))
        packed["tsbd_single"] = singles
    return packed


# ---------------------------------------------------------------------------
# Forward pass: 4 pallas_calls total
# ---------------------------------------------------------------------------
def msbd_forward(packed, xs):
    B = xs.shape[0]
    xb = xs.astype(jnp.bfloat16)                        # cast once, before im2col

    am = _pqmf_im2col(xb, 256, 64)                      # (B, 320, 128)
    xm = pqmf_pallas(packed["Hm"], am)                  # (B, 64, 128) bf16
    xm = jnp.transpose(xm, (0, 2, 1))                   # reference transpose(2,1)

    an = _pqmf_im2col(xb, 256, 16)                      # (B, 272, 512)
    xn = pqmf_pallas(packed["Hn"], an)                  # (B, 16, 512) bf16

    disc_outs, fmap_outs = [], []

    outs = sbd_pallas(packed["fsbd"], xm, packed["fsbd_hps"])
    fmap = [o[0] for o in outs]
    disc_outs.append(fmap[-1].reshape(B, -1))
    fmap_outs.append(fmap)

    if packed["tsbd_stacked"]:
        outs = sbd_pallas(packed["tsbd"], xn[:, :packed["tsbd_cin"], :],
                          packed["tsbd_hps"])
        for br in range(3):                             # tsbd3, tsbd2, tsbd1
            fmap = [o[br] for o in outs]
            disc_outs.append(fmap[-1].reshape(B, -1))
            fmap_outs.append(fmap)
    else:
        for pk, hps, c_in in packed["tsbd_single"]:
            outs = sbd_pallas(pk, xn[:, :c_in, :], hps)
            fmap = [o[0] for o in outs]
            disc_outs.append(fmap[-1].reshape(B, -1))
            fmap_outs.append(fmap)

    return disc_outs, fmap_outs


if __name__ == "__main__":
    cfg = dict(
        time_kernels=[5, 5, 5],
        freq_kernel=3,
        time_channels=[32, 32],
        freq_channels=[32, 32],
        time_strides=[[1, 2], [1, 2], [1, 2]],
        freq_stride=[1, 2],
        time_dilations=[[[1, 2], [1, 2]], [[1, 2], [1, 2]], [[1, 2], [1, 2]]],
        freq_dilations=[[1, 2], [1, 2]],
        time_subband=[4, 8, 16],
    )
    key = jax.random.PRNGKey(0)
    kp, kx = jax.random.split(key)
    params = init_msbd(kp, cfg)
    packed = prepare_msbd(params, cfg)
    # SEGMENT_SIZE is hard-coded in the module (M=64 => fsbd init_channel=128)
    xs = jax.random.normal(kx, (2, 1, SEGMENT_SIZE), jnp.float32)

    fwd = jax.jit(functools.partial(msbd_forward, packed))
    disc_outs, fmap_outs = fwd(xs)
    jax.block_until_ready((disc_outs, fmap_outs))

    assert disc_outs[0].shape == (2, 32)                 # fsbd head
    assert all(q.shape == (2, 256) for q in disc_outs[1:])
    assert len(fmap_outs) == 4 and all(len(f) == 3 for f in fmap_outs)
    print("KERNEL_OK")
</pallas_src>

<mosaic_0001>
module attributes {stable_mosaic.version = 11 : i64} {
  func.func @_pqmf_kernel(%arg0: i32, %arg1: memref<16x272xbf16, #tpu.memory_space<vmem>>, %arg2: memref<1x272x512xbf16, #tpu.memory_space<vmem>>, %arg3: memref<1x16x512xbf16, #tpu.memory_space<vmem>>) attributes {dimension_semantics = [#tpu.dimension_semantics<parallel>], iteration_bounds = array<i64: 2>, scalar_prefetch = 0 : i64, scratch_operands = 0 : i64, tpu.core_type = #tpu.core_type<tc>, window_params = [{pipeline_mode = #tpu.pipeline_mode<synchronous>, transform_indices = @transform_0, window_bounds = array<i64: 16, 272>}, {transform_indices = @transform_1, window_bounds = array<i64: 1, 272, 512>}, {transform_indices = @transform_2, window_bounds = array<i64: 1, 16, 512>}]} {
    %c0 = arith.constant 0 : index
    %c0_0 = arith.constant 0 : index
    %0 = vector.load %arg1[%c0, %c0_0] : memref<16x272xbf16, #tpu.memory_space<vmem>>, vector<16x272xbf16>
    %c0_1 = arith.constant 0 : index
    %c0_2 = arith.constant 0 : index
    %c0_3 = arith.constant 0 : index
    %1 = vector.load %arg2[%c0_1, %c0_2, %c0_3] : memref<1x272x512xbf16, #tpu.memory_space<vmem>>, vector<1x272x512xbf16>
    %2 = vector.shape_cast %1 : vector<1x272x512xbf16> to vector<272x512xbf16>
    %cst = arith.constant dense<0.000000e+00> : vector<16x512xf32>
    %3 = tpu.matmul %0, %2, %cst {dimension_numbers = #tpu.dot_dimension_numbers<[1], [0], [0], [1], [0, 0, 1, 1], [], []>} : vector<16x272xbf16>, vector<272x512xbf16>, vector<16x512xf32> -> vector<16x512xf32>
    %4 = arith.truncf %3 : vector<16x512xf32> to vector<16x512xbf16>
    %c0_4 = arith.constant 0 : index
    %c0_5 = arith.constant 0 : index
    %c0_6 = arith.constant 0 : index
    %5 = vector.load %arg3[%c0_4, %c0_5, %c0_6] : memref<1x16x512xbf16, #tpu.memory_space<vmem>>, vector<1x16x512xbf16>
    %6 = vector.shape_cast %5 : vector<1x16x512xbf16> to vector<16x512xbf16>
    %7 = vector.shape_cast %4 : vector<16x512xbf16> to vector<1x16x512xbf16>
    tpu.vector_store %arg3[%c0_4, %c0_5, %c0_6], %7 {strides = array<i32>} : memref<1x16x512xbf16, #tpu.memory_space<vmem>>, vector<1x16x512xbf16>,
    return
  }
  func.func @transform_0(%arg0: i32) -> (i32, i32) {
    %c0_i32 = arith.constant 0 : i32
    %c0_i32_0 = arith.constant 0 : i32
    %c0_i32_1 = arith.constant 0 : i32
    return %c0_i32, %c0_i32_0 : i32, i32
  }
  func.func @transform_1(%arg0: i32) -> (i32, i32, i32) {
    %c0_i32 = arith.constant 0 : i32
    %c0_i32_0 = arith.constant 0 : i32
    %c0_i32_1 = arith.constant 0 : i32
    return %arg0, %c0_i32, %c0_i32_0 : i32, i32, i32
  }
  func.func @transform_2(%arg0: i32) -> (i32, i32, i32) {
    %c0_i32 = arith.constant 0 : i32
    %c0_i32_0 = arith.constant 0 : i32
    %c0_i32_1 = arith.constant 0 : i32
    return %arg0, %c0_i32, %c0_i32_0 : i32, i32, i32
  }
}

module attributes {stable_mosaic.version = 11 : i64} {
  func.func @kernel(%arg0: i32, %arg1: i32, %arg2: memref<1x16x512xbf16, #tpu.memory_space<vmem>>, %arg3: memref<1x32x160xbf16, #tpu.memory_space<vmem>>, %arg4: memref<1x32x1xf32, #tpu.memory_space<vmem>>, %arg5: memref<1x32x96xbf16, #tpu.memory_space<vmem>>, %arg6: memref<1x32x1xf32, #tpu.memory_space<vmem>>, %arg7: memref<1x32x320xbf16, #tpu.memory_space<vmem>>, %arg8: memref<1x32x1xf32, #tpu.memory_space<vmem>>, %arg9: memref<1x32x96xbf16, #tpu.memory_space<vmem>>, %arg10: memref<1x32x1xf32, #tpu.memory_space<vmem>>, %arg11: memref<1x32x3xf32, #tpu.memory_space<vmem>>, %arg12: memref<1x1x1xf32, #tpu.memory_space<vmem>>, %arg13: memref<1x1x32x512xf32, #tpu.memory_space<vmem>>, %arg14: memref<1x1x32x256xf32, #tpu.memory_space<vmem>>, %arg15: memref<1x1x1x256xf32, #tpu.memory_space<vmem>>) attributes {dimension_semantics = [#tpu.dimension_semantics<parallel>, #tpu.dimension_semantics<parallel>], iteration_bounds = array<i64: 2, 3>, scalar_prefetch = 0 : i64, scratch_operands = 0 : i64, tpu.core_type = #tpu.core_type<tc>, window_params = [{transform_indices = @transform_0, window_bounds = array<i64: 1, 16, 512>}, {transform_indices = @transform_1, window_bounds = array<i64: 1, 32, 160>}, {transform_indices = @transform_2, window_bounds = array<i64: 1, 32, 1>}, {transform_indices = @transform_3, window_bounds = array<i64: 1, 32, 96>}, {transform_indices = @transform_4, window_bounds = array<i64: 1, 32, 1>}, {transform_indices = @transform_5, window_bounds = array<i64: 1, 32, 320>}, {transform_indices = @transform_6, window_bounds = array<i64: 1, 32, 1>}, {transform_indices = @transform_7, window_bounds = array<i64: 1, 32, 96>}, {transform_indices = @transform_8, window_bounds = array<i64: 1, 32, 1>}, {transform_indices = @transform_9, window_bounds = array<i64: 1, 32, 3>}, {transform_indices = @transform_10, window_bounds = array<i64: 1, 1, 1>}, {transform_indices = @transform_11, window_bounds = array<i64: 1, 1, 32, 512>}, {transform_indices = @transform_12, window_bounds = array<i64: 1, 1, 32, 256>}, {transform_indices = @transform_13, window_bounds = array<i64: 1, 1, 1, 256>}]} {
    %c0 = arith.constant 0 : index
    %c0_0 = arith.constant 0 : index
    %c0_1 = arith.constant 0 : index
    %0 = vector.load %arg2[%c0, %c0_0, %c0_1] : memref<1x16x512xbf16, #tpu.memory_space<vmem>>, vector<1x16x512xbf16>
    %1 = vector.shape_cast %0 : vector<1x16x512xbf16> to vector<16x512xbf16>
    %c0_2 = arith.constant 0 : index
    %c0_3 = arith.constant 0 : index
    %c0_4 = arith.constant 0 : index
    %2 = vector.load %arg3[%c0_2, %c0_3, %c0_4] : memref<1x32x160xbf16, #tpu.memory_space<vmem>>, vector<1x32x160xbf16>
    %3 = vector.shape_cast %2 : vector<1x32x160xbf16> to vector<32x160xbf16>
    %c0_5 = arith.constant 0 : index
    %c0_6 = arith.constant 0 : index
    %c0_7 = arith.constant 0 : index
    %4 = vector.load %arg4[%c0_5, %c0_6, %c0_7] : memref<1x32x1xf32, #tpu.memory_space<vmem>>, vector<1x32x1xf32>
    %5 = vector.shape_cast %4 : vector<1x32x1xf32> to vector<32x1xf32>
    %c0_8 = arith.constant 0 : index
    %c0_9 = arith.constant 0 : index
    %c0_10 = arith.constant 0 : index
    %6 = vector.load %arg5[%c0_8, %c0_9, %c0_10] : memref<1x32x96xbf16, #tpu.memory_space<vmem>>, vector<1x32x96xbf16>
    %7 = vector.shape_cast %6 : vector<1x32x96xbf16> to vector<32x96xbf16>
    %c0_11 = arith.constant 0 : index
    %c0_12 = arith.constant 0 : index
    %c0_13 = arith.constant 0 : index
    %8 = vector.load %arg6[%c0_11, %c0_12, %c0_13] : memref<1x32x1xf32, #tpu.memory_space<vmem>>, vector<1x32x1xf32>
    %9 = vector.shape_cast %8 : vector<1x32x1xf32> to vector<32x1xf32>
    %cst = arith.constant 0.000000e+00 : bf16
    %10 = vector.broadcast %cst : bf16 to vector<16x4xbf16>
    %11 = tpu.concatenate %10, %1, %10 in 1 : vector<16x4xbf16>, vector<16x512xbf16>, vector<16x4xbf16> -> vector<16x520xbf16>
    %12 = vector.extract_strided_slice %11 {offsets = [0, 2], sizes = [16, 512], strides = [1, 1]} : vector<16x520xbf16> to vector<16x512xbf16>
    %13 = vector.extract_strided_slice %11 {offsets = [0, 3], sizes = [16, 512], strides = [1, 1]} : vector<16x520xbf16> to vector<16x512xbf16>
    %14 = vector.extract_strided_slice %11 {offsets = [0, 4], sizes = [16, 512], strides = [1, 1]} : vector<16x520xbf16> to vector<16x512xbf16>
    %15 = vector.extract_strided_slice %11 {offsets = [0, 5], sizes = [16, 512], strides = [1, 1]} : vector<16x520xbf16> to vector<16x512xbf16>
    %16 = vector.extract_strided_slice %11 {offsets = [0, 6], sizes = [16, 512], strides = [1, 1]} : vector<16x520xbf16> to vector<16x512xbf16>
    %17 = vector.extract_strided_slice %11 {offsets = [0, 0], sizes = [16, 512], strides = [1, 1]} : vector<16x520xbf16> to vector<16x512xbf16>
    %18 = vector.extract_strided_slice %11 {offsets = [0, 2], sizes = [16, 512], strides = [1, 1]} : vector<16x520xbf16> to vector<16x512xbf16>
    %19 = vector.extract_strided_slice %11 {offsets = [0, 4], sizes = [16, 512], strides = [1, 1]} : vector<16x520xbf16> to vector<16x512xbf16>
    %20 = vector.extract_strided_slice %11 {offsets = [0, 6], sizes = [16, 512], strides = [1, 1]} : vector<16x520xbf16> to vector<16x512xbf16>
    %21 = vector.extract_strided_slice %11 {offsets = [0, 8], sizes = [16, 512], strides = [1, 1]} : vector<16x520xbf16> to vector<16x512xbf16>
    %22 = tpu.concatenate %12, %13, %14, %15, %16, %17, %18, %19, %20, %21 in 0 : vector<16x512xbf16>, vector<16x512xbf16>, vector<16x512xbf16>, vector<16x512xbf16>, vector<16x512xbf16>, vector<16x512xbf16>, vector<16x512xbf16>, vector<16x512xbf16>, vector<16x512xbf16>, vector<16x512xbf16> -> vector<160x512xbf16>
    %cst_14 = arith.constant dense<0.000000e+00> : vector<32x512xf32>
    %23 = tpu.matmul %3, %22, %cst_14 {dimension_numbers = #tpu.dot_dimension_numbers<[1], [0], [0], [1], [0, 0, 1, 1], [], []>} : vector<32x160xbf16>, vector<160x512xbf16>, vector<32x512xf32> -> vector<32x512xf32>
    %24 = vector.broadcast %5 : vector<32x1xf32> to vector<32x512xf32>
    %25 = arith.addf %23, %24 : vector<32x512xf32>
    %26 = arith.truncf %25 : vector<32x512xf32> to vector<32x512xbf16>
    %cst_15 = arith.constant 0.000000e+00 : bf16
    %27 = vector.broadcast %cst_15 : bf16 to vector<32x1xbf16>
    %28 = tpu.concatenate %27, %26, %27 in 1 : vector<32x1xbf16>, vector<32x512xbf16>, vector<32x1xbf16> -> vector<32x514xbf16>
    %29 = vector.extract_strided_slice %28 {offsets = [0, 0], sizes = [32, 512], strides = [1, 1]} : vector<32x514xbf16> to vector<32x512xbf16>
    %30 = vector.extract_strided_slice %28 {offsets = [0, 1], sizes = [32, 512], strides = [1, 1]} : vector<32x514xbf16> to vector<32x512xbf16>
    %31 = vector.extract_strided_slice %28 {offsets = [0, 2], sizes = [32, 512], strides = [1, 1]} : vector<32x514xbf16> to vector<32x512xbf16>
    %32 = tpu.concatenate %29, %30, %31 in 0 : vector<32x512xbf16>, vector<32x512xbf16>, vector<32x512xbf16> -> vector<96x512xbf16>
    %cst_16 = arith.constant dense<0.000000e+00> : vector<32x512xf32>
    %33 = tpu.matmul %7, %32, %cst_16 {dimension_numbers = #tpu.dot_dimension_numbers<[1], [0], [0], [1], [0, 0, 1, 1], [], []>} : vector<32x96xbf16>, vector<96x512xbf16>, vector<32x512xf32> -> vector<32x512xf32>
    %34 = vector.broadcast %9 : vector<32x1xf32> to vector<32x512xf32>
    %35 = arith.addf %33, %34 : vector<32x512xf32>
    %cst_17 = arith.constant 0.000000e+00 : f32
    %36 = vector.broadcast %cst_17 : f32 to vector<32x512xf32>
    %37 = arith.cmpf oge, %35, %36 : vector<32x512xf32>
    %cst_18 = arith.constant 2.000000e-01 : f32
    %38 = vector.broadcast %cst_18 : f32 to vector<32x512xf32>
    %39 = arith.mulf %38, %35 : vector<32x512xf32>
    %40 = arith.select %37, %35, %39 : vector<32x512xi1>, vector<32x512xf32>
    %c0_19 = arith.constant 0 : index
    %c0_20 = arith.constant 0 : index
    %c0_21 = arith.constant 0 : index
    %c0_22 = arith.constant 0 : index
    %41 = vector.load %arg13[%c0_19, %c0_20, %c0_21, %c0_22] : memref<1x1x32x512xf32, #tpu.memory_space<vmem>>, vector<1x1x32x512xf32>
    %42 = vector.shape_cast %41 : vector<1x1x32x512xf32> to vector<32x512xf32>
    %43 = vector.shape_cast %40 : vector<32x512xf32> to vector<1x1x32x512xf32>
    tpu.vector_store %arg13[%c0_19, %c0_20, %c0_21, %c0_22], %43 {strides = array<i32>} : memref<1x1x32x512xf32, #tpu.memory_space<vmem>>, vector<1x1x32x512xf32>,
    %c0_23 = arith.constant 0 : index
    %c0_24 = arith.constant 0 : index
    %c0_25 = arith.constant 0 : index
    %44 = vector.load %arg7[%c0_23, %c0_24, %c0_25] : memref<1x32x320xbf16, #tpu.memory_space<vmem>>, vector<1x32x320xbf16>
    %45 = vector.shape_cast %44 : vector<1x32x320xbf16> to vector<32x320xbf16>
    %c0_26 = arith.constant 0 : index
    %c0_27 = arith.constant 0 : index
    %c0_28 = arith.constant 0 : index
    %46 = vector.load %arg8[%c0_26, %c0_27, %c0_28] : memref<1x32x1xf32, #tpu.memory_space<vmem>>, vector<1x32x1xf32>
    %47 = vector.shape_cast %46 : vector<1x32x1xf32> to vector<32x1xf32>
    %c0_29 = arith.constant 0 : index
    %c0_30 = arith.constant 0 : index
    %c0_31 = arith.constant 0 : index
    %48 = vector.load %arg9[%c0_29, %c0_30, %c0_31] : memref<1x32x96xbf16, #tpu.memory_space<vmem>>, vector<1x32x96xbf16>
    %49 = vector.shape_cast %48 : vector<1x32x96xbf16> to vector<32x96xbf16>
    %c0_32 = arith.constant 0 : index
    %c0_33 = arith.constant 0 : index
    %c0_34 = arith.constant 0 : index
    %50 = vector.load %arg10[%c0_32, %c0_33, %c0_34] : memref<1x32x1xf32, #tpu.memory_space<vmem>>, vector<1x32x1xf32>
    %51 = vector.shape_cast %50 : vector<1x32x1xf32> to vector<32x1xf32>
    %52 = arith.truncf %40 : vector<32x512xf32> to vector<32x512xbf16>
    %cst_35 = arith.constant 0.000000e+00 : bf16
    %53 = vector.broadcast %cst_35 : bf16 to vector<32x4xbf16>
    %54 = tpu.concatenate %53, %52, %53 in 1 : vector<32x4xbf16>, vector<32x512xbf16>, vector<32x4xbf16> -> vector<32x520xbf16>
    %55 = vector.extract_strided_slice %54 {offsets = [0, 2], sizes = [32, 512], strides = [1, 1]} : vector<32x520xbf16> to vector<32x512xbf16>
    %56 = vector.extract_strided_slice %54 {offsets = [0, 3], sizes = [32, 512], strides = [1, 1]} : vector<32x520xbf16> to vector<32x512xbf16>
    %57 = vector.extract_strided_slice %54 {offsets = [0, 4], sizes = [32, 512], strides = [1, 1]} : vector<32x520xbf16> to vector<32x512xbf16>
    %58 = vector.extract_strided_slice %54 {offsets = [0, 5], sizes = [32, 512], strides = [1, 1]} : vector<32x520xbf16> to vector<32x512xbf16>
    %59 = vector.extract_strided_slice %54 {offsets = [0, 6], sizes = [32, 512], strides = [1, 1]} : vector<32x520xbf16> to vector<32x512xbf16>
    %60 = vector.extract_strided_slice %54 {offsets = [0, 0], sizes = [32, 512], strides = [1, 1]} : vector<32x520xbf16> to vector<32x512xbf16>
    %61 = vector.extract_strided_slice %54 {offsets = [0, 2], sizes = [32, 512], strides = [1, 1]} : vector<32x520xbf16> to vector<32x512xbf16>
    %62 = vector.extract_strided_slice %54 {offsets = [0, 4], sizes = [32, 512], strides = [1, 1]} : vector<32x520xbf16> to vector<32x512xbf16>
    %63 = vector.extract_strided_slice %54 {offsets = [0, 6], sizes = [32, 512], strides = [1, 1]} : vector<32x520xbf16> to vector<32x512xbf16>
    %64 = vector.extract_strided_slice %54 {offsets = [0, 8], sizes = [32, 512], strides = [1, 1]} : vector<32x520xbf16> to vector<32x512xbf16>
    %65 = tpu.concatenate %55, %56, %57, %58, %59, %60, %61, %62, %63, %64 in 0 : vector<32x512xbf16>, vector<32x512xbf16>, vector<32x512xbf16>, vector<32x512xbf16>, vector<32x512xbf16>, vector<32x512xbf16>, vector<32x512xbf16>, vector<32x512xbf16>, vector<32x512xbf16>, vector<32x512xbf16> -> vector<320x512xbf16>
    %cst_36 = arith.constant dense<0.000000e+00> : vector<32x512xf32>
    %66 = tpu.matmul %45, %65, %cst_36 {dimension_numbers = #tpu.dot_dimension_numbers<[1], [0], [0], [1], [0, 0, 1, 1], [], []>} : vector<32x320xbf16>, vector<320x512xbf16>, vector<32x512xf32> -> vector<32x512xf32>
    %67 = vector.broadcast %47 : vector<32x1xf32> to vector<32x512xf32>
    %68 = arith.addf %66, %67 : vector<32x512xf32>
    %69 = arith.truncf %68 : vector<32x512xf32> to vector<32x512xbf16>
    %cst_37 = arith.constant 0.000000e+00 : bf16
    %70 = vector.broadcast %cst_37 : bf16 to vector<32x1xbf16>
    %71 = tpu.concatenate %70, %69, %70 in 1 : vector<32x1xbf16>, vector<32x512xbf16>, vector<32x1xbf16> -> vector<32x514xbf16>
    %72 = vector.extract_strided_slice %71 {offsets = [0, 0], sizes = [32, 512], strides = [1, 1]} : vector<32x514xbf16> to vector<32x512xbf16>
    %73 = vector.extract_strided_slice %71 {offsets = [0, 1], sizes = [32, 512], strides = [1, 1]} : vector<32x514xbf16> to vector<32x512xbf16>
    %74 = vector.extract_strided_slice %71 {offsets = [0, 2], sizes = [32, 512], strides = [1, 1]} : vector<32x514xbf16> to vector<32x512xbf16>
    %75 = tpu.concatenate %72, %73, %74 in 0 : vector<32x512xbf16>, vector<32x512xbf16>, vector<32x512xbf16> -> vector<96x512xbf16>
    %cst_38 = arith.constant dense<0.000000e+00> : vector<32x512xf32>
    %76 = tpu.matmul %49, %75, %cst_38 {dimension_numbers = #tpu.dot_dimension_numbers<[1], [0], [0], [1], [0, 0, 1, 1], [], []>} : vector<32x96xbf16>, vector<96x512xbf16>, vector<32x512xf32> -> vector<32x512xf32>
    %77 = tpu.iota {dimensions = array<i32: 0>} : vector<512x256xi32>
    %78 = tpu.iota {dimensions = array<i32: 1>} : vector<512x256xi32>
    %c2_i32 = arith.constant 2 : i32
    %79 = vector.broadcast %c2_i32 : i32 to vector<512x256xi32>
    %80 = arith.muli %79, %78 : vector<512x256xi32>
    %81 = arith.cmpi eq, %77, %80 : vector<512x256xi32>
    %82 = arith.extui %81 : vector<512x256xi1> to vector<512x256xi32>
    %83 = arith.sitofp %82 : vector<512x256xi32> to vector<512x256xf32>
    %cst_39 = arith.constant dense<0.000000e+00> : vector<32x256xf32>
    %84 = tpu.matmul %76, %83, %cst_39 {dimension_numbers = #tpu.dot_dimension_numbers<[1], [0], [0], [1], [0, 0, 1, 1], [], []>} : vector<32x512xf32>, vector<512x256xf32>, vector<32x256xf32> -> vector<32x256xf32>
    %85 = vector.broadcast %51 : vector<32x1xf32> to vector<32x256xf32>
    %86 = arith.addf %84, %85 : vector<32x256xf32>
    %cst_40 = arith.constant 0.000000e+00 : f32
    %87 = vector.broadcast %cst_40 : f32 to vector<32x256xf32>
    %88 = arith.cmpf oge, %86, %87 : vector<32x256xf32>
    %cst_41 = arith.constant 2.000000e-01 : f32
    %89 = vector.broadcast %cst_41 : f32 to vector<32x256xf32>
    %90 = arith.mulf %89, %86 : vector<32x256xf32>
    %91 = arith.select %88, %86, %90 : vector<32x256xi1>, vector<32x256xf32>
    %c0_42 = arith.constant 0 : index
    %c0_43 = arith.constant 0 : index
    %c0_44 = arith.constant 0 : index
    %c0_45 = arith.constant 0 : index
    %92 = vector.load %arg14[%c0_42, %c0_43, %c0_44, %c0_45] : memref<1x1x32x256xf32, #tpu.memory_space<vmem>>, vector<1x1x32x256xf32>
    %93 = vector.shape_cast %92 : vector<1x1x32x256xf32> to vector<32x256xf32>
    %94 = vector.shape_cast %91 : vector<32x256xf32> to vector<1x1x32x256xf32>
    tpu.vector_store %arg14[%c0_42, %c0_43, %c0_44, %c0_45], %94 {strides = array<i32>} : memref<1x1x32x256xf32, #tpu.memory_space<vmem>>, vector<1x1x32x256xf32>,
    %c0_46 = arith.constant 0 : index
    %c0_47 = arith.constant 0 : index
    %c0_48 = arith.constant 0 : index
    %95 = vector.load %arg11[%c0_46, %c0_47, %c0_48] : memref<1x32x3xf32, #tpu.memory_space<vmem>>, vector<1x32x3xf32>
    %96 = vector.shape_cast %95 : vector<1x32x3xf32> to vector<32x3xf32>
    %cst_49 = arith.constant 0.000000e+00 : f32
    %97 = vector.broadcast %cst_49 : f32 to vector<32x1xf32>
    %98 = tpu.concatenate %97, %91, %97 in 1 : vector<32x1xf32>, vector<32x256xf32>, vector<32x1xf32> -> vector<32x258xf32>
    %cst_50 = arith.constant 0.000000e+00 : f32
    %99 = vector.broadcast %cst_50 : f32 to vector<1x256xf32>
    %100 = vector.extract_strided_slice %96 {offsets = [0, 0], sizes = [32, 1], strides = [1, 1]} : vector<32x3xf32> to vector<32x1xf32>
    %101 = vector.extract_strided_slice %98 {offsets = [0, 0], sizes = [32, 256], strides = [1, 1]} : vector<32x258xf32> to vector<32x256xf32>
    %102 = vector.broadcast %100 : vector<32x1xf32> to vector<32x256xf32>
    %103 = arith.mulf %102, %101 : vector<32x256xf32>
    %cst_51 = arith.constant dense<0.000000e+00> : vector<256xf32>
    %104 = vector.multi_reduction <add>, %103, %cst_51 [0] : vector<32x256xf32> to vector<256xf32>
    %105 = vector.shape_cast %104 : vector<256xf32> to vector<1x256xf32>
    %106 = arith.addf %99, %105 : vector<1x256xf32>
    %107 = vector.extract_strided_slice %96 {offsets = [0, 1], sizes = [32, 1], strides = [1, 1]} : vector<32x3xf32> to vector<32x1xf32>
    %108 = vector.extract_strided_slice %98 {offsets = [0, 1], sizes = [32, 256], strides = [1, 1]} : vector<32x258xf32> to vector<32x256xf32>
    %109 = vector.broadcast %107 : vector<32x1xf32> to vector<32x256xf32>
    %110 = arith.mulf %109, %108 : vector<32x256xf32>
    %cst_52 = arith.constant dense<0.000000e+00> : vector<256xf32>
    %111 = vector.multi_reduction <add>, %110, %cst_52 [0] : vector<32x256xf32> to vector<256xf32>
    %112 = vector.shape_cast %111 : vector<256xf32> to vector<1x256xf32>
    %113 = arith.addf %106, %112 : vector<1x256xf32>
    %114 = vector.extract_strided_slice %96 {offsets = [0, 2], sizes = [32, 1], strides = [1, 1]} : vector<32x3xf32> to vector<32x1xf32>
    %115 = vector.extract_strided_slice %98 {offsets = [0, 2], sizes = [32, 256], strides = [1, 1]} : vector<32x258xf32> to vector<32x256xf32>
    %116 = vector.broadcast %114 : vector<32x1xf32> to vector<32x256xf32>
    %117 = arith.mulf %116, %115 : vector<32x256xf32>
    %cst_53 = arith.constant dense<0.000000e+00> : vector<256xf32>
    %118 = vector.multi_reduction <add>, %117, %cst_53 [0] : vector<32x256xf32> to vector<256xf32>
    %119 = vector.shape_cast %118 : vector<256xf32> to vector<1x256xf32>
    %120 = arith.addf %113, %119 : vector<1x256xf32>
    %c0_54 = arith.constant 0 : index
    %c0_55 = arith.constant 0 : index
    %c0_56 = arith.constant 0 : index
    %121 = vector.load %arg12[%c0_54, %c0_55, %c0_56] : memref<1x1x1xf32, #tpu.memory_space<vmem>>, vector<1x1x1xf32>
    %122 = vector.shape_cast %121 : vector<1x1x1xf32> to vector<1x1xf32>
    %123 = vector.broadcast %122 : vector<1x1xf32> to vector<1x256xf32>
    %124 = arith.addf %120, %123 : vector<1x256xf32>
    %c0_57 = arith.constant 0 : index
    %c0_58 = arith.constant 0 : index
    %c0_59 = arith.constant 0 : index
    %c0_60 = arith.constant 0 : index
    %125 = vector.load %arg15[%c0_57, %c0_58, %c0_59, %c0_60] : memref<1x1x1x256xf32, #tpu.memory_space<vmem>>, vector<1x1x1x256xf32>
    %126 = vector.shape_cast %125 : vector<1x1x1x256xf32> to vector<1x256xf32>
    %127 = vector.shape_cast %124 : vector<1x256xf32> to vector<1x1x1x256xf32>
    tpu.vector_store %arg15[%c0_57, %c0_58, %c0_59, %c0_60], %127 {strides = array<i32>} : memref<1x1x1x256xf32, #tpu.memory_space<vmem>>, vector<1x1x1x256xf32>,
    return
  }
  func.func @transform_0(%arg0: i32, %arg1: i32) -> (i32, i32, i32) {
    %c0_i32 = arith.constant 0 : i32
    %c0_i32_0 = arith.constant 0 : i32
    %c0_i32_1 = arith.constant 0 : i32
    return %arg0, %c0_i32, %c0_i32_0 : i32, i32, i32
  }
  func.func @transform_1(%arg0: i32, %arg1: i32) -> (i32, i32, i32) {
    %c0_i32 = arith.constant 0 : i32
    %c0_i32_0 = arith.constant 0 : i32
    %c0_i32_1 = arith.constant 0 : i32
    return %arg1, %c0_i32, %c0_i32_0 : i32, i32, i32
  }
  func.func @transform_2(%arg0: i32, %arg1: i32) -> (i32, i32, i32) {
    %c0_i32 = arith.constant 0 : i32
    %c0_i32_0 = arith.constant 0 : i32
    %c0_i32_1 = arith.constant 0 : i32
    return %arg1, %c0_i32, %c0_i32_0 : i32, i32, i32
  }
  func.func @transform_3(%arg0: i32, %arg1: i32) -> (i32, i32, i32) {
    %c0_i32 = arith.constant 0 : i32
    %c0_i32_0 = arith.constant 0 : i32
    %c0_i32_1 = arith.constant 0 : i32
    return %arg1, %c0_i32, %c0_i32_0 : i32, i32, i32
  }
  func.func @transform_4(%arg0: i32, %arg1: i32) -> (i32, i32, i32) {
    %c0_i32 = arith.constant 0 : i32
    %c0_i32_0 = arith.constant 0 : i32
    %c0_i32_1 = arith.constant 0 : i32
    return %arg1, %c0_i32, %c0_i32_0 : i32, i32, i32
  }
  func.func @transform_5(%arg0: i32, %arg1: i32) -> (i32, i32, i32) {
    %c0_i32 = arith.constant 0 : i32
    %c0_i32_0 = arith.constant 0 : i32
    %c0_i32_1 = arith.constant 0 : i32
    return %arg1, %c0_i32, %c0_i32_0 : i32, i32, i32
  }
  func.func @transform_6(%arg0: i32, %arg1: i32) -> (i32, i32, i32) {
    %c0_i32 = arith.constant 0 : i32
    %c0_i32_0 = arith.constant 0 : i32
    %c0_i32_1 = arith.constant 0 : i32
    return %arg1, %c0_i32, %c0_i32_0 : i32, i32, i32
  }
  func.func @transform_7(%arg0: i32, %arg1: i32) -> (i32, i32, i32) {
    %c0_i32 = arith.constant 0 : i32
    %c0_i32_0 = arith.constant 0 : i32
    %c0_i32_1 = arith.constant 0 : i32
    return %arg1, %c0_i32, %c0_i32_0 : i32, i32, i32
  }
  func.func @transform_8(%arg0: i32, %arg1: i32) -> (i32, i32, i32) {
    %c0_i32 = arith.constant 0 : i32
    %c0_i32_0 = arith.constant 0 : i32
    %c0_i32_1 = arith.constant 0 : i32
    return %arg1, %c0_i32, %c0_i32_0 : i32, i32, i32
  }
  func.func @transform_9(%arg0: i32, %arg1: i32) -> (i32, i32, i32) {
    %c0_i32 = arith.constant 0 : i32
    %c0_i32_0 = arith.constant 0 : i32
    %c0_i32_1 = arith.constant 0 : i32
    return %arg1, %c0_i32, %c0_i32_0 : i32, i32, i32
  }
  func.func @transform_10(%arg0: i32, %arg1: i32) -> (i32, i32, i32) {
    %c0_i32 = arith.constant 0 : i32
    %c0_i32_0 = arith.constant 0 : i32
    %c0_i32_1 = arith.constant 0 : i32
    return %arg1, %c0_i32, %c0_i32_0 : i32, i32, i32
  }
  func.func @transform_11(%arg0: i32, %arg1: i32) -> (i32, i32, i32, i32) {
    %c0_i32 = arith.constant 0 : i32
    %c0_i32_0 = arith.constant 0 : i32
    %c0_i32_1 = arith.constant 0 : i32
    return %arg1, %arg0, %c0_i32, %c0_i32_0 : i32, i32, i32, i32
  }
  func.func @transform_12(%arg0: i32, %arg1: i32) -> (i32, i32, i32, i32) {
    %c0_i32 = arith.constant 0 : i32
    %c0_i32_0 = arith.constant 0 : i32
    %c0_i32_1 = arith.constant 0 : i32
    return %arg1, %arg0, %c0_i32, %c0_i32_0 : i32, i32, i32, i32
  }
  func.func @transform_13(%arg0: i32, %arg1: i32) -> (i32, i32, i32, i32) {
    %c0_i32 = arith.constant 0 : i32
    %c0_i32_0 = arith.constant 0 : i32
    %c0_i32_1 = arith.constant 0 : i32
    return %arg1, %arg0, %c0_i32, %c0_i32_0 : i32, i32, i32, i32
  }
}

module attributes {stable_mosaic.version = 11 : i64} {
  func.func @_pqmf_kernel(%arg0: i32, %arg1: memref<64x320xbf16, #tpu.memory_space<vmem>>, %arg2: memref<1x320x128xbf16, #tpu.memory_space<vmem>>, %arg3: memref<1x64x128xbf16, #tpu.memory_space<vmem>>) attributes {dimension_semantics = [#tpu.dimension_semantics<parallel>], iteration_bounds = array<i64: 2>, scalar_prefetch = 0 : i64, scratch_operands = 0 : i64, tpu.core_type = #tpu.core_type<tc>, window_params = [{pipeline_mode = #tpu.pipeline_mode<synchronous>, transform_indices = @transform_0, window_bounds = array<i64: 64, 320>}, {transform_indices = @transform_1, window_bounds = array<i64: 1, 320, 128>}, {transform_indices = @transform_2, window_bounds = array<i64: 1, 64, 128>}]} {
    %c0 = arith.constant 0 : index
    %c0_0 = arith.constant 0 : index
    %0 = vector.load %arg1[%c0, %c0_0] : memref<64x320xbf16, #tpu.memory_space<vmem>>, vector<64x320xbf16>
    %c0_1 = arith.constant 0 : index
    %c0_2 = arith.constant 0 : index
    %c0_3 = arith.constant 0 : index
    %1 = vector.load %arg2[%c0_1, %c0_2, %c0_3] : memref<1x320x128xbf16, #tpu.memory_space<vmem>>, vector<1x320x128xbf16>
    %2 = vector.shape_cast %1 : vector<1x320x128xbf16> to vector<320x128xbf16>
    %cst = arith.constant dense<0.000000e+00> : vector<64x128xf32>
    %3 = tpu.matmul %0, %2, %cst {dimension_numbers = #tpu.dot_dimension_numbers<[1], [0], [0], [1], [0, 0, 1, 1], [], []>} : vector<64x320xbf16>, vector<320x128xbf16>, vector<64x128xf32> -> vector<64x128xf32>
    %4 = arith.truncf %3 : vector<64x128xf32> to vector<64x128xbf16>
    %c0_4 = arith.constant 0 : index
    %c0_5 = arith.constant 0 : index
    %c0_6 = arith.constant 0 : index
    %5 = vector.load %arg3[%c0_4, %c0_5, %c0_6] : memref<1x64x128xbf16, #tpu.memory_space<vmem>>, vector<1x64x128xbf16>
    %6 = vector.shape_cast %5 : vector<1x64x128xbf16> to vector<64x128xbf16>
    %7 = vector.shape_cast %4 : vector<64x128xbf16> to vector<1x64x128xbf16>
    tpu.vector_store %arg3[%c0_4, %c0_5, %c0_6], %7 {strides = array<i32>} : memref<1x64x128xbf16, #tpu.memory_space<vmem>>, vector<1x64x128xbf16>,
    return
  }
  func.func @transform_0(%arg0: i32) -> (i32, i32) {
    %c0_i32 = arith.constant 0 : i32
    %c0_i32_0 = arith.constant 0 : i32
    %c0_i32_1 = arith.constant 0 : i32
    return %c0_i32, %c0_i32_0 : i32, i32
  }
  func.func @transform_1(%arg0: i32) -> (i32, i32, i32) {
    %c0_i32 = arith.constant 0 : i32
    %c0_i32_0 = arith.constant 0 : i32
    %c0_i32_1 = arith.constant 0 : i32
    return %arg0, %c0_i32, %c0_i32_0 : i32, i32, i32
  }
  func.func @transform_2(%arg0: i32) -> (i32, i32, i32) {
    %c0_i32 = arith.constant 0 : i32
    %c0_i32_0 = arith.constant 0 : i32
    %c0_i32_1 = arith.constant 0 : i32
    return %arg0, %c0_i32, %c0_i32_0 : i32, i32, i32
  }
}

module attributes {stable_mosaic.version = 11 : i64} {
  func.func @kernel(%arg0: i32, %arg1: i32, %arg2: memref<1x128x64xbf16, #tpu.memory_space<vmem>>, %arg3: memref<1x32x768xbf16, #tpu.memory_space<vmem>>, %arg4: memref<1x32x1xf32, #tpu.memory_space<vmem>>, %arg5: memref<1x32x96xbf16, #tpu.memory_space<vmem>>, %arg6: memref<1x32x1xf32, #tpu.memory_space<vmem>>, %arg7: memref<1x32x192xbf16, #tpu.memory_space<vmem>>, %arg8: memref<1x32x1xf32, #tpu.memory_space<vmem>>, %arg9: memref<1x32x96xbf16, #tpu.memory_space<vmem>>, %arg10: memref<1x32x1xf32, #tpu.memory_space<vmem>>, %arg11: memref<1x32x3xf32, #tpu.memory_space<vmem>>, %arg12: memref<1x1x1xf32, #tpu.memory_space<vmem>>, %arg13: memref<1x1x32x64xf32, #tpu.memory_space<vmem>>, %arg14: memref<1x1x32x32xf32, #tpu.memory_space<vmem>>, %arg15: memref<1x1x1x32xf32, #tpu.memory_space<vmem>>) attributes {dimension_semantics = [#tpu.dimension_semantics<parallel>, #tpu.dimension_semantics<parallel>], iteration_bounds = array<i64: 2, 1>, scalar_prefetch = 0 : i64, scratch_operands = 0 : i64, tpu.core_type = #tpu.core_type<tc>, window_params = [{transform_indices = @transform_0, window_bounds = array<i64: 1, 128, 64>}, {transform_indices = @transform_1, window_bounds = array<i64: 1, 32, 768>}, {transform_indices = @transform_2, window_bounds = array<i64: 1, 32, 1>}, {transform_indices = @transform_3, window_bounds = array<i64: 1, 32, 96>}, {transform_indices = @transform_4, window_bounds = array<i64: 1, 32, 1>}, {transform_indices = @transform_5, window_bounds = array<i64: 1, 32, 192>}, {transform_indices = @transform_6, window_bounds = array<i64: 1, 32, 1>}, {transform_indices = @transform_7, window_bounds = array<i64: 1, 32, 96>}, {transform_indices = @transform_8, window_bounds = array<i64: 1, 32, 1>}, {transform_indices = @transform_9, window_bounds = array<i64: 1, 32, 3>}, {transform_indices = @transform_10, window_bounds = array<i64: 1, 1, 1>}, {transform_indices = @transform_11, window_bounds = array<i64: 1, 1, 32, 64>}, {transform_indices = @transform_12, window_bounds = array<i64: 1, 1, 32, 32>}, {transform_indices = @transform_13, window_bounds = array<i64: 1, 1, 1, 32>}]} {
    %c0 = arith.constant 0 : index
    %c0_0 = arith.constant 0 : index
    %c0_1 = arith.constant 0 : index
    %0 = vector.load %arg2[%c0, %c0_0, %c0_1] : memref<1x128x64xbf16, #tpu.memory_space<vmem>>, vector<1x128x64xbf16>
    %1 = vector.shape_cast %0 : vector<1x128x64xbf16> to vector<128x64xbf16>
    %c0_2 = arith.constant 0 : index
    %c0_3 = arith.constant 0 : index
    %c0_4 = arith.constant 0 : index
    %2 = vector.load %arg3[%c0_2, %c0_3, %c0_4] : memref<1x32x768xbf16, #tpu.memory_space<vmem>>, vector<1x32x768xbf16>
    %3 = vector.shape_cast %2 : vector<1x32x768xbf16> to vector<32x768xbf16>
    %c0_5 = arith.constant 0 : index
    %c0_6 = arith.constant 0 : index
    %c0_7 = arith.constant 0 : index
    %4 = vector.load %arg4[%c0_5, %c0_6, %c0_7] : memref<1x32x1xf32, #tpu.memory_space<vmem>>, vector<1x32x1xf32>
    %5 = vector.shape_cast %4 : vector<1x32x1xf32> to vector<32x1xf32>
    %c0_8 = arith.constant 0 : index
    %c0_9 = arith.constant 0 : index
    %c0_10 = arith.constant 0 : index
    %6 = vector.load %arg5[%c0_8, %c0_9, %c0_10] : memref<1x32x96xbf16, #tpu.memory_space<vmem>>, vector<1x32x96xbf16>
    %7 = vector.shape_cast %6 : vector<1x32x96xbf16> to vector<32x96xbf16>
    %c0_11 = arith.constant 0 : index
    %c0_12 = arith.constant 0 : index
    %c0_13 = arith.constant 0 : index
    %8 = vector.load %arg6[%c0_11, %c0_12, %c0_13] : memref<1x32x1xf32, #tpu.memory_space<vmem>>, vector<1x32x1xf32>
    %9 = vector.shape_cast %8 : vector<1x32x1xf32> to vector<32x1xf32>
    %cst = arith.constant 0.000000e+00 : bf16
    %10 = vector.broadcast %cst : bf16 to vector<128x2xbf16>
    %11 = tpu.concatenate %10, %1, %10 in 1 : vector<128x2xbf16>, vector<128x64xbf16>, vector<128x2xbf16> -> vector<128x68xbf16>
    %12 = vector.extract_strided_slice %11 {offsets = [0, 1], sizes = [128, 64], strides = [1, 1]} : vector<128x68xbf16> to vector<128x64xbf16>
    %13 = vector.extract_strided_slice %11 {offsets = [0, 2], sizes = [128, 64], strides = [1, 1]} : vector<128x68xbf16> to vector<128x64xbf16>
    %14 = vector.extract_strided_slice %11 {offsets = [0, 3], sizes = [128, 64], strides = [1, 1]} : vector<128x68xbf16> to vector<128x64xbf16>
    %15 = vector.extract_strided_slice %11 {offsets = [0, 0], sizes = [128, 64], strides = [1, 1]} : vector<128x68xbf16> to vector<128x64xbf16>
    %16 = vector.extract_strided_slice %11 {offsets = [0, 2], sizes = [128, 64], strides = [1, 1]} : vector<128x68xbf16> to vector<128x64xbf16>
    %17 = vector.extract_strided_slice %11 {offsets = [0, 4], sizes = [128, 64], strides = [1, 1]} : vector<128x68xbf16> to vector<128x64xbf16>
    %18 = tpu.concatenate %12, %13, %14, %15, %16, %17 in 0 : vector<128x64xbf16>, vector<128x64xbf16>, vector<128x64xbf16>, vector<128x64xbf16>, vector<128x64xbf16>, vector<128x64xbf16> -> vector<768x64xbf16>
    %cst_14 = arith.constant dense<0.000000e+00> : vector<32x64xf32>
    %19 = tpu.matmul %3, %18, %cst_14 {dimension_numbers = #tpu.dot_dimension_numbers<[1], [0], [0], [1], [0, 0, 1, 1], [], []>} : vector<32x768xbf16>, vector<768x64xbf16>, vector<32x64xf32> -> vector<32x64xf32>
    %20 = vector.broadcast %5 : vector<32x1xf32> to vector<32x64xf32>
    %21 = arith.addf %19, %20 : vector<32x64xf32>
    %22 = arith.truncf %21 : vector<32x64xf32> to vector<32x64xbf16>
    %cst_15 = arith.constant 0.000000e+00 : bf16
    %23 = vector.broadcast %cst_15 : bf16 to vector<32x1xbf16>
    %24 = tpu.concatenate %23, %22, %23 in 1 : vector<32x1xbf16>, vector<32x64xbf16>, vector<32x1xbf16> -> vector<32x66xbf16>
    %25 = vector.extract_strided_slice %24 {offsets = [0, 0], sizes = [32, 64], strides = [1, 1]} : vector<32x66xbf16> to vector<32x64xbf16>
    %26 = vector.extract_strided_slice %24 {offsets = [0, 1], sizes = [32, 64], strides = [1, 1]} : vector<32x66xbf16> to vector<32x64xbf16>
    %27 = vector.extract_strided_slice %24 {offsets = [0, 2], sizes = [32, 64], strides = [1, 1]} : vector<32x66xbf16> to vector<32x64xbf16>
    %28 = tpu.concatenate %25, %26, %27 in 0 : vector<32x64xbf16>, vector<32x64xbf16>, vector<32x64xbf16> -> vector<96x64xbf16>
    %cst_16 = arith.constant dense<0.000000e+00> : vector<32x64xf32>
    %29 = tpu.matmul %7, %28, %cst_16 {dimension_numbers = #tpu.dot_dimension_numbers<[1], [0], [0], [1], [0, 0, 1, 1], [], []>} : vector<32x96xbf16>, vector<96x64xbf16>, vector<32x64xf32> -> vector<32x64xf32>
    %30 = vector.broadcast %9 : vector<32x1xf32> to vector<32x64xf32>
    %31 = arith.addf %29, %30 : vector<32x64xf32>
    %cst_17 = arith.constant 0.000000e+00 : f32
    %32 = vector.broadcast %cst_17 : f32 to vector<32x64xf32>
    %33 = arith.cmpf oge, %31, %32 : vector<32x64xf32>
    %cst_18 = arith.constant 2.000000e-01 : f32
    %34 = vector.broadcast %cst_18 : f32 to vector<32x64xf32>
    %35 = arith.mulf %34, %31 : vector<32x64xf32>
    %36 = arith.select %33, %31, %35 : vector<32x64xi1>, vector<32x64xf32>
    %c0_19 = arith.constant 0 : index
    %c0_20 = arith.constant 0 : index
    %c0_21 = arith.constant 0 : index
    %c0_22 = arith.constant 0 : index
    %37 = vector.load %arg13[%c0_19, %c0_20, %c0_21, %c0_22] : memref<1x1x32x64xf32, #tpu.memory_space<vmem>>, vector<1x1x32x64xf32>
    %38 = vector.shape_cast %37 : vector<1x1x32x64xf32> to vector<32x64xf32>
    %39 = vector.shape_cast %36 : vector<32x64xf32> to vector<1x1x32x64xf32>
    tpu.vector_store %arg13[%c0_19, %c0_20, %c0_21, %c0_22], %39 {strides = array<i32>} : memref<1x1x32x64xf32, #tpu.memory_space<vmem>>, vector<1x1x32x64xf32>,
    %c0_23 = arith.constant 0 : index
    %c0_24 = arith.constant 0 : index
    %c0_25 = arith.constant 0 : index
    %40 = vector.load %arg7[%c0_23, %c0_24, %c0_25] : memref<1x32x192xbf16, #tpu.memory_space<vmem>>, vector<1x32x192xbf16>
    %41 = vector.shape_cast %40 : vector<1x32x192xbf16> to vector<32x192xbf16>
    %c0_26 = arith.constant 0 : index
    %c0_27 = arith.constant 0 : index
    %c0_28 = arith.constant 0 : index
    %42 = vector.load %arg8[%c0_26, %c0_27, %c0_28] : memref<1x32x1xf32, #tpu.memory_space<vmem>>, vector<1x32x1xf32>
    %43 = vector.shape_cast %42 : vector<1x32x1xf32> to vector<32x1xf32>
    %c0_29 = arith.constant 0 : index
    %c0_30 = arith.constant 0 : index
    %c0_31 = arith.constant 0 : index
    %44 = vector.load %arg9[%c0_29, %c0_30, %c0_31] : memref<1x32x96xbf16, #tpu.memory_space<vmem>>, vector<1x32x96xbf16>
    %45 = vector.shape_cast %44 : vector<1x32x96xbf16> to vector<32x96xbf16>
    %c0_32 = arith.constant 0 : index
    %c0_33 = arith.constant 0 : index
    %c0_34 = arith.constant 0 : index
    %46 = vector.load %arg10[%c0_32, %c0_33, %c0_34] : memref<1x32x1xf32, #tpu.memory_space<vmem>>, vector<1x32x1xf32>
    %47 = vector.shape_cast %46 : vector<1x32x1xf32> to vector<32x1xf32>
    %48 = arith.truncf %36 : vector<32x64xf32> to vector<32x64xbf16>
    %cst_35 = arith.constant 0.000000e+00 : bf16
    %49 = vector.broadcast %cst_35 : bf16 to vector<32x2xbf16>
    %50 = tpu.concatenate %49, %48, %49 in 1 : vector<32x2xbf16>, vector<32x64xbf16>, vector<32x2xbf16> -> vector<32x68xbf16>
    %51 = vector.extract_strided_slice %50 {offsets = [0, 1], sizes = [32, 64], strides = [1, 1]} : vector<32x68xbf16> to vector<32x64xbf16>
    %52 = vector.extract_strided_slice %50 {offsets = [0, 2], sizes = [32, 64], strides = [1, 1]} : vector<32x68xbf16> to vector<32x64xbf16>
    %53 = vector.extract_strided_slice %50 {offsets = [0, 3], sizes = [32, 64], strides = [1, 1]} : vector<32x68xbf16> to vector<32x64xbf16>
    %54 = vector.extract_strided_slice %50 {offsets = [0, 0], sizes = [32, 64], strides = [1, 1]} : vector<32x68xbf16> to vector<32x64xbf16>
    %55 = vector.extract_strided_slice %50 {offsets = [0, 2], sizes = [32, 64], strides = [1, 1]} : vector<32x68xbf16> to vector<32x64xbf16>
    %56 = vector.extract_strided_slice %50 {offsets = [0, 4], sizes = [32, 64], strides = [1, 1]} : vector<32x68xbf16> to vector<32x64xbf16>
    %57 = tpu.concatenate %51, %52, %53, %54, %55, %56 in 0 : vector<32x64xbf16>, vector<32x64xbf16>, vector<32x64xbf16>, vector<32x64xbf16>, vector<32x64xbf16>, vector<32x64xbf16> -> vector<192x64xbf16>
    %cst_36 = arith.constant dense<0.000000e+00> : vector<32x64xf32>
    %58 = tpu.matmul %41, %57, %cst_36 {dimension_numbers = #tpu.dot_dimension_numbers<[1], [0], [0], [1], [0, 0, 1, 1], [], []>} : vector<32x192xbf16>, vector<192x64xbf16>, vector<32x64xf32> -> vector<32x64xf32>
    %59 = vector.broadcast %43 : vector<32x1xf32> to vector<32x64xf32>
    %60 = arith.addf %58, %59 : vector<32x64xf32>
    %61 = arith.truncf %60 : vector<32x64xf32> to vector<32x64xbf16>
    %cst_37 = arith.constant 0.000000e+00 : bf16
    %62 = vector.broadcast %cst_37 : bf16 to vector<32x1xbf16>
    %63 = tpu.concatenate %62, %61, %62 in 1 : vector<32x1xbf16>, vector<32x64xbf16>, vector<32x1xbf16> -> vector<32x66xbf16>
    %64 = vector.extract_strided_slice %63 {offsets = [0, 0], sizes = [32, 64], strides = [1, 1]} : vector<32x66xbf16> to vector<32x64xbf16>
    %65 = vector.extract_strided_slice %63 {offsets = [0, 1], sizes = [32, 64], strides = [1, 1]} : vector<32x66xbf16> to vector<32x64xbf16>
    %66 = vector.extract_strided_slice %63 {offsets = [0, 2], sizes = [32, 64], strides = [1, 1]} : vector<32x66xbf16> to vector<32x64xbf16>
    %67 = tpu.concatenate %64, %65, %66 in 0 : vector<32x64xbf16>, vector<32x64xbf16>, vector<32x64xbf16> -> vector<96x64xbf16>
    %cst_38 = arith.constant dense<0.000000e+00> : vector<32x64xf32>
    %68 = tpu.matmul %45, %67, %cst_38 {dimension_numbers = #tpu.dot_dimension_numbers<[1], [0], [0], [1], [0, 0, 1, 1], [], []>} : vector<32x96xbf16>, vector<96x64xbf16>, vector<32x64xf32> -> vector<32x64xf32>
    %69 = tpu.iota {dimensions = array<i32: 0>} : vector<64x32xi32>
    %70 = tpu.iota {dimensions = array<i32: 1>} : vector<64x32xi32>
    %c2_i32 = arith.constant 2 : i32
    %71 = vector.broadcast %c2_i32 : i32 to vector<64x32xi32>
    %72 = arith.muli %71, %70 : vector<64x32xi32>
    %73 = arith.cmpi eq, %69, %72 : vector<64x32xi32>
    %74 = arith.extui %73 : vector<64x32xi1> to vector<64x32xi32>
    %75 = arith.sitofp %74 : vector<64x32xi32> to vector<64x32xf32>
    %cst_39 = arith.constant dense<0.000000e+00> : vector<32x32xf32>
    %76 = tpu.matmul %68, %75, %cst_39 {dimension_numbers = #tpu.dot_dimension_numbers<[1], [0], [0], [1], [0, 0, 1, 1], [], []>} : vector<32x64xf32>, vector<64x32xf32>, vector<32x32xf32> -> vector<32x32xf32>
    %77 = vector.broadcast %47 : vector<32x1xf32> to vector<32x32xf32>
    %78 = arith.addf %76, %77 : vector<32x32xf32>
    %cst_40 = arith.constant 0.000000e+00 : f32
    %79 = vector.broadcast %cst_40 : f32 to vector<32x32xf32>
    %80 = arith.cmpf oge, %78, %79 : vector<32x32xf32>
    %cst_41 = arith.constant 2.000000e-01 : f32
    %81 = vector.broadcast %cst_41 : f32 to vector<32x32xf32>
    %82 = arith.mulf %81, %78 : vector<32x32xf32>
    %83 = arith.select %80, %78, %82 : vector<32x32xi1>, vector<32x32xf32>
    %c0_42 = arith.constant 0 : index
    %c0_43 = arith.constant 0 : index
    %c0_44 = arith.constant 0 : index
    %c0_45 = arith.constant 0 : index
    %84 = vector.load %arg14[%c0_42, %c0_43, %c0_44, %c0_45] : memref<1x1x32x32xf32, #tpu.memory_space<vmem>>, vector<1x1x32x32xf32>
    %85 = vector.shape_cast %84 : vector<1x1x32x32xf32> to vector<32x32xf32>
    %86 = vector.shape_cast %83 : vector<32x32xf32> to vector<1x1x32x32xf32>
    tpu.vector_store %arg14[%c0_42, %c0_43, %c0_44, %c0_45], %86 {strides = array<i32>} : memref<1x1x32x32xf32, #tpu.memory_space<vmem>>, vector<1x1x32x32xf32>,
    %c0_46 = arith.constant 0 : index
    %c0_47 = arith.constant 0 : index
    %c0_48 = arith.constant 0 : index
    %87 = vector.load %arg11[%c0_46, %c0_47, %c0_48] : memref<1x32x3xf32, #tpu.memory_space<vmem>>, vector<1x32x3xf32>
    %88 = vector.shape_cast %87 : vector<1x32x3xf32> to vector<32x3xf32>
    %cst_49 = arith.constant 0.000000e+00 : f32
    %89 = vector.broadcast %cst_49 : f32 to vector<32x1xf32>
    %90 = tpu.concatenate %89, %83, %89 in 1 : vector<32x1xf32>, vector<32x32xf32>, vector<32x1xf32> -> vector<32x34xf32>
    %cst_50 = arith.constant 0.000000e+00 : f32
    %91 = vector.broadcast %cst_50 : f32 to vector<1x32xf32>
    %92 = vector.extract_strided_slice %88 {offsets = [0, 0], sizes = [32, 1], strides = [1, 1]} : vector<32x3xf32> to vector<32x1xf32>
    %93 = vector.extract_strided_slice %90 {offsets = [0, 0], sizes = [32, 32], strides = [1, 1]} : vector<32x34xf32> to vector<32x32xf32>
    %94 = vector.broadcast %92 : vector<32x1xf32> to vector<32x32xf32>
    %95 = arith.mulf %94, %93 : vector<32x32xf32>
    %cst_51 = arith.constant dense<0.000000e+00> : vector<32xf32>
    %96 = vector.multi_reduction <add>, %95, %cst_51 [0] : vector<32x32xf32> to vector<32xf32>
    %97 = vector.shape_cast %96 : vector<32xf32> to vector<1x32xf32>
    %98 = arith.addf %91, %97 : vector<1x32xf32>
    %99 = vector.extract_strided_slice %88 {offsets = [0, 1], sizes = [32, 1], strides = [1, 1]} : vector<32x3xf32> to vector<32x1xf32>
    %100 = vector.extract_strided_slice %90 {offsets = [0, 1], sizes = [32, 32], strides = [1, 1]} : vector<32x34xf32> to vector<32x32xf32>
    %101 = vector.broadcast %99 : vector<32x1xf32> to vector<32x32xf32>
    %102 = arith.mulf %101, %100 : vector<32x32xf32>
    %cst_52 = arith.constant dense<0.000000e+00> : vector<32xf32>
    %103 = vector.multi_reduction <add>, %102, %cst_52 [0] : vector<32x32xf32> to vector<32xf32>
    %104 = vector.shape_cast %103 : vector<32xf32> to vector<1x32xf32>
    %105 = arith.addf %98, %104 : vector<1x32xf32>
    %106 = vector.extract_strided_slice %88 {offsets = [0, 2], sizes = [32, 1], strides = [1, 1]} : vector<32x3xf32> to vector<32x1xf32>
    %107 = vector.extract_strided_slice %90 {offsets = [0, 2], sizes = [32, 32], strides = [1, 1]} : vector<32x34xf32> to vector<32x32xf32>
    %108 = vector.broadcast %106 : vector<32x1xf32> to vector<32x32xf32>
    %109 = arith.mulf %108, %107 : vector<32x32xf32>
    %cst_53 = arith.constant dense<0.000000e+00> : vector<32xf32>
    %110 = vector.multi_reduction <add>, %109, %cst_53 [0] : vector<32x32xf32> to vector<32xf32>
    %111 = vector.shape_cast %110 : vector<32xf32> to vector<1x32xf32>
    %112 = arith.addf %105, %111 : vector<1x32xf32>
    %c0_54 = arith.constant 0 : index
    %c0_55 = arith.constant 0 : index
    %c0_56 = arith.constant 0 : index
    %113 = vector.load %arg12[%c0_54, %c0_55, %c0_56] : memref<1x1x1xf32, #tpu.memory_space<vmem>>, vector<1x1x1xf32>
    %114 = vector.shape_cast %113 : vector<1x1x1xf32> to vector<1x1xf32>
    %115 = vector.broadcast %114 : vector<1x1xf32> to vector<1x32xf32>
    %116 = arith.addf %112, %115 : vector<1x32xf32>
    %c0_57 = arith.constant 0 : index
    %c0_58 = arith.constant 0 : index
    %c0_59 = arith.constant 0 : index
    %c0_60 = arith.constant 0 : index
    %117 = vector.load %arg15[%c0_57, %c0_58, %c0_59, %c0_60] : memref<1x1x1x32xf32, #tpu.memory_space<vmem>>, vector<1x1x1x32xf32>
    %118 = vector.shape_cast %117 : vector<1x1x1x32xf32> to vector<1x32xf32>
    %119 = vector.shape_cast %116 : vector<1x32xf32> to vector<1x1x1x32xf32>
    tpu.vector_store %arg15[%c0_57, %c0_58, %c0_59, %c0_60], %119 {strides = array<i32>} : memref<1x1x1x32xf32, #tpu.memory_space<vmem>>, vector<1x1x1x32xf32>,
    return
  }
  func.func @transform_0(%arg0: i32, %arg1: i32) -> (i32, i32, i32) {
    %c0_i32 = arith.constant 0 : i32
    %c0_i32_0 = arith.constant 0 : i32
    %c0_i32_1 = arith.constant 0 : i32
    return %arg0, %c0_i32, %c0_i32_0 : i32, i32, i32
  }
  func.func @transform_1(%arg0: i32, %arg1: i32) -> (i32, i32, i32) {
    %c0_i32 = arith.constant 0 : i32
    %c0_i32_0 = arith.constant 0 : i32
    %c0_i32_1 = arith.constant 0 : i32
    return %arg1, %c0_i32, %c0_i32_0 : i32, i32, i32
  }
  func.func @transform_2(%arg0: i32, %arg1: i32) -> (i32, i32, i32) {
    %c0_i32 = arith.constant 0 : i32
    %c0_i32_0 = arith.constant 0 : i32
    %c0_i32_1 = arith.constant 0 : i32
    return %arg1, %c0_i32, %c0_i32_0 : i32, i32, i32
  }
  func.func @transform_3(%arg0: i32, %arg1: i32) -> (i32, i32, i32) {
    %c0_i32 = arith.constant 0 : i32
    %c0_i32_0 = arith.constant 0 : i32
    %c0_i32_1 = arith.constant 0 : i32
    return %arg1, %c0_i32, %c0_i32_0 : i32, i32, i32
  }
  func.func @transform_4(%arg0: i32, %arg1: i32) -> (i32, i32, i32) {
    %c0_i32 = arith.constant 0 : i32
    %c0_i32_0 = arith.constant 0 : i32
    %c0_i32_1 = arith.constant 0 : i32
    return %arg1, %c0_i32, %c0_i32_0 : i32, i32, i32
  }
  func.func @transform_5(%arg0: i32, %arg1: i32) -> (i32, i32, i32) {
    %c0_i32 = arith.constant 0 : i32
    %c0_i32_0 = arith.constant 0 : i32
    %c0_i32_1 = arith.constant 0 : i32
    return %arg1, %c0_i32, %c0_i32_0 : i32, i32, i32
  }
  func.func @transform_6(%arg0: i32, %arg1: i32) -> (i32, i32, i32) {
    %c0_i32 = arith.constant 0 : i32
    %c0_i32_0 = arith.constant 0 : i32
    %c0_i32_1 = arith.constant 0 : i32
    return %arg1, %c0_i32, %c0_i32_0 : i32, i32, i32
  }
  func.func @transform_7(%arg0: i32, %arg1: i32) -> (i32, i32, i32) {
    %c0_i32 = arith.constant 0 : i32
    %c0_i32_0 = arith.constant 0 : i32
    %c0_i32_1 = arith.constant 0 : i32
    return %arg1, %c0_i32, %c0_i32_0 : i32, i32, i32
  }
  func.func @transform_8(%arg0: i32, %arg1: i32) -> (i32, i32, i32) {
    %c0_i32 = arith.constant 0 : i32
    %c0_i32_0 = arith.constant 0 : i32
    %c0_i32_1 = arith.constant 0 : i32
    return %arg1, %c0_i32, %c0_i32_0 : i32, i32, i32
  }
  func.func @transform_9(%arg0: i32, %arg1: i32) -> (i32, i32, i32) {
    %c0_i32 = arith.constant 0 : i32
    %c0_i32_0 = arith.constant 0 : i32
    %c0_i32_1 = arith.constant 0 : i32
    return %arg1, %c0_i32, %c0_i32_0 : i32, i32, i32
  }
  func.func @transform_10(%arg0: i32, %arg1: i32) -> (i32, i32, i32) {
    %c0_i32 = arith.constant 0 : i32
    %c0_i32_0 = arith.constant 0 : i32
    %c0_i32_1 = arith.constant 0 : i32
    return %arg1, %c0_i32, %c0_i32_0 : i32, i32, i32
  }
  func.func @transform_11(%arg0: i32, %arg1: i32) -> (i32, i32, i32, i32) {
    %c0_i32 = arith.constant 0 : i32
    %c0_i32_0 = arith.constant 0 : i32
    %c0_i32_1 = arith.constant 0 : i32
    return %arg1, %arg0, %c0_i32, %c0_i32_0 : i32, i32, i32, i32
  }
  func.func @transform_12(%arg0: i32, %arg1: i32) -> (i32, i32, i32, i32) {
    %c0_i32 = arith.constant 0 : i32
    %c0_i32_0 = arith.constant 0 : i32
    %c0_i32_1 = arith.constant 0 : i32
    return %arg1, %arg0, %c0_i32, %c0_i32_0 : i32, i32, i32, i32
  }
  func.func @transform_13(%arg0: i32, %arg1: i32) -> (i32, i32, i32, i32) {
    %c0_i32 = arith.constant 0 : i32
    %c0_i32_0 = arith.constant 0 : i32
    %c0_i32_1 = arith.constant 0 : i32
    return %arg1, %arg0, %c0_i32, %c0_i32_0 : i32, i32, i32, i32
  }
}

</mosaic_0001>

<bundles_post_ra>
// kernel: msbd_forward.5
= control target key start
LH: loop header
LB: loop body
LE: loop exit
PB: predicated region body
PF: predicated region fallthrough
CT: control target
= control target key end

     0   :  { %s1209_s9 = smov 0   ;;  %s1414_s0 = inlined_call_operand.vmem [shape: bf16[16,272], index: 0, kind: input, shape index: {}]   ;;  %s1415_s1 = inlined_call_operand.vmem [shape: bf16[2,272,512], index: 1, kind: input, shape index: {}]   ;;  %s1416_s2 = inlined_call_operand.vmem [shape: bf16[2,16,512], index: 2, kind: output, shape index: {}]  }
   0x1 LB: > { %s807_s10 = sadd.s32 4294967295, %s1192_s9   ;;  %p811_p0 = scmp.ge.s32.totalorder %s1192_s9, 1  ;;  %s1192_s9 = sphi %s1209_s9, %s12_s9  }
   0x2   : > { %p112_p1 = scmp.lt.s32.totalorder %s1192_s9, 3 }
   0x4   : > { %p113_p2 = pnand %p811_p0, %p112_p1 }
   0x5   : > { %p134_p3 = scmp.lt.s32.totalorder (!%p113_p2), %s807_s10, 1 }
   0x6   : > { %116 = sbr.rel (%p113_p2) target bundleno = 237 (0xed), region = 28 }
   0xb   : > { %s1418_s10 = smov (!%p134_p3, %s807_s10), 1  ;;  %v825_v0 = vld [vmem:[%s1414_s0 + $0x8] sm:$0xf]  ;;  %v1108_v1 = vld [vmem:[%s1414_s0 + $0x10] sm:$0xf0]  ;;  %vm572_vm0 = vcmask 130048  }
   0xc   : > { %s1177_s11 = smul.u32 544, %s1418_s10  ;;  %v1243_v18 = vor.u32 %v1108_v1, %v825_v0  ;;  %s1105_s27 = sshll.u32 %s1418_s10, 5 }
   0xd   : > { %s1405_s30 = scalar_lea.vmem %s1416_s2, %s1105_s27 }
   0xe   : > { %s1223_s14 = scalar_lea.vmem %s1415_s1, %s1177_s11 }
   0xf   : > { %v941_v2 = vld [vmem:[%s1223_s14 + $0xe0] sm:$0xf]  ;;  %v1139_v3 = vld [vmem:[%s1223_s14 + $0xec] sm:$0xf0]  ;;  %v1169_v11 = vld [vmem:[%s1223_s14 + $0x1e4] sm:$0xf] }
  0x10   : > { %v1069_v4 = vld [vmem:[%s1223_s14 + $0x1e0] sm:$0xf]  ;;  %v942_v5 = vor.u32 %v1139_v3, %v941_v2  ;;  %v1171_v6 = vld [vmem:[%s1223_s14 + $0x1ec] sm:$0xf0]  ;;  %v1071_v12 = vld [vmem:[%s1223_s14 + $0x1f0] sm:$0xf0] }
  0x11   : > { %v1085_v7 = vld [vmem:[%s1223_s14 + $0x200] sm:$0xf]  ;;  %v1175_v8 = vld [vmem:[%s1223_s14 + $0x20c] sm:$0xf0]  ;;  %v1070_v9 = vor.u32 %v1171_v6, %v1069_v4  ;;  %v1137_v13 = vld [vmem:[%s1223_s14 + $0xe4] sm:$0xf]  ;;  %v1074_v14 = vor.u32 %v1169_v11, %v1071_v12 }
  0x12   : > { %v1086_v10 = vor.u32 %v1175_v8, %v1085_v7  ;;  %576 = vmatpush.bf16.msra.mxu0 %v942_v5  ;;  %v943_v15 = vld [vmem:[%s1223_s14 + $0xf0] sm:$0xf0]  ;;  %v925_v16 = vld [vmem:[%s1223_s14 + $0xc0] sm:$0xf]  ;;  %v1135_v17 = vld [vmem:[%s1223_s14 + $0xcc] sm:$0xf0] }
  0x13   : > { %590 = vmatpush.bf16.msra.mxu1 %v1070_v9  ;;  %v946_v19 = vor.u32 %v1137_v13, %v943_v15  ;;  %v926_v20 = vor.u32 %v1135_v17, %v925_v16  ;;  %v1053_v21 = vld [vmem:[%s1223_s14 + $0x1c0] sm:$0xf]  ;;  %v1167_v22 = vld [vmem:[%s1223_s14 + $0x1cc] sm:$0xf0]  ;;  %v1165_v23 = vld [vmem:[%s1223_s14 + $0x1c4] sm:$0xf]  ;;  %632 = vmatpush.bf16.msra.mxu2 %v1074_v14 }
  0x14   : > { %611 = vmatpush.bf16.msra.mxu3 %v1086_v10  ;;  %v1054_v24 = vor.u32 %v1167_v22, %v1053_v21  ;;  %v1055_v25 = vld [vmem:[%s1223_s14 + $0x1d0] sm:$0xf0]  ;;  %v1133_v26 = vld [vmem:[%s1223_s14 + $0xc4] sm:$0xf]  ;;  %v909_v30 = vld [vmem:[%s1223_s14 + $0xa0] sm:$0xf] }
  0x15   : > { %v927_v27 = vld [vmem:[%s1223_s14 + $0xd0] sm:$0xf0]  ;;  %v1058_v28 = vor.u32 %v1165_v23, %v1055_v25  ;;  %v1131_v31 = vld [vmem:[%s1223_s14 + $0xac] sm:$0xf0]  ;;  %v1037_v32 = vld [vmem:[%s1223_s14 + $0x1a0] sm:$0xf] }
  0x16   : > { %v930_v29 = vor.u32 %v1133_v26, %v927_v27  ;;  %577 = vmatpush.bf16.msra.mxu0 %v926_v20  ;;  %v910_v33 = vor.u32 %v1131_v31, %v909_v30  ;;  %v1163_v34 = vld [vmem:[%s1223_s14 + $0x1ac] sm:$0xf0]  ;;  %v1161_v35 = vld [vmem:[%s1223_s14 + $0x1a4] sm:$0xf]  ;;  %v1039_v36 = vld [vmem:[%s1223_s14 + $0x1b0] sm:$0xf0] }
  0x17   : > { %1099 = vmatmul.msk.bf16.vlgmr.msra.gmra.mxu3 %vm572_vm0, %v1243_v18  ;;  %591 = vmatpush.bf16.msra.mxu1 %v1054_v24  ;;  %v1038_v37 = vor.u32 %v1163_v34, %v1037_v32  ;;  %v1129_v38 = vld [vmem:[%s1223_s14 + $0xa4] sm:$0xf]  ;;  %v911_v39 = vld [vmem:[%s1223_s14 + $0xb0] sm:$0xf0]  ;;  %v893_v40 = vld [vmem:[%s1223_s14 + $0x80] sm:$0xf]  ;;  %v1042_v41 = vor.u32 %v1161_v35, %v1039_v36 }
  0x18   : > { %618 = vmatpush.bf16.msrb.mxu3 %v946_v19  ;;  %633 = vmatpush.bf16.msra.mxu2 %v1058_v28  ;;  %v1127_v42 = vld [vmem:[%s1223_s14 + $0x8c] sm:$0xf0]  ;;  %v1021_v43 = vld [vmem:[%s1223_s14 + $0x180] sm:$0xf]  ;;  %v914_v45 = vor.u32 %v1129_v38, %v911_v39  ;;  %v1157_v46 = vld [vmem:[%s1223_s14 + $0x184] sm:$0xf] }
  0x19   : > { %v1159_v44 = vld [vmem:[%s1223_s14 + $0x18c] sm:$0xf0]  ;;  %v1023_v47 = vld [vmem:[%s1223_s14 + $0x190] sm:$0xf0]  ;;  %v894_v48 = vor.u32 %v1127_v42, %v893_v40  ;;  %v1125_v49 = vld [vmem:[%s1223_s14 + $0x84] sm:$0xf] }
  0x1a   : > { %578 = vmatpush.bf16.msra.mxu0 %v910_v33  ;;  %v895_v50 = vld [vmem:[%s1223_s14 + $0x90] sm:$0xf0]  ;;  %v1022_v51 = vor.u32 %v1159_v44, %v1021_v43  ;;  %v877_v52 = vld [vmem:[%s1223_s14 + $0x60] sm:$0xf]  ;;  %v1123_v53 = vld [vmem:[%s1223_s14 + $0x6c] sm:$0xf0]  ;;  %v1026_v54 = vor.u32 %v1157_v46, %v1023_v47 }
  0x1b   : > { %592 = vmatpush.bf16.msra.mxu1 %v1038_v37  ;;  %v1005_v55 = vld [vmem:[%s1223_s14 + $0x160] sm:$0xf]  ;;  %v1155_v56 = vld [vmem:[%s1223_s14 + $0x16c] sm:$0xf0]  ;;  %v898_v57 = vor.u32 %v1125_v49, %v895_v50  ;;  %v1153_v58 = vld [vmem:[%s1223_s14 + $0x164] sm:$0xf]  ;;  %v878_v60 = vor.u32 %v1123_v53, %v877_v52 }
  0x1c   : > { %619 = vmatpush.bf16.msrb.mxu3 %v930_v29  ;;  %634 = vmatpush.bf16.msra.mxu2 %v1042_v41  ;;  %v1007_v59 = vld [vmem:[%s1223_s14 + $0x170] sm:$0xf0]  ;;  %v1121_v61 = vld [vmem:[%s1223_s14 + $0x64] sm:$0xf]  ;;  %v1006_v63 = vor.u32 %v1155_v56, %v1005_v55  ;;  %v861_v0 = vld [vmem:[%s1223_s14 + $0x40] sm:$0xf] }
  0x1d   : > { %v879_v62 = vld [vmem:[%s1223_s14 + $0x70] sm:$0xf0]  ;;  %v1119_v1 = vld [vmem:[%s1223_s14 + $0x4c] sm:$0xf0]  ;;  %v1010_v2 = vor.u32 %v1153_v58, %v1007_v59  ;;  %v989_v3 = vld [vmem:[%s1223_s14 + $0x140] sm:$0xf] }
  0x1e   : > { %579 = vmatpush.bf16.msra.mxu0 %v894_v48  ;;  %v1151_v4 = vld [vmem:[%s1223_s14 + $0x14c] sm:$0xf0]  ;;  %v882_v5 = vor.u32 %v1121_v61, %v879_v62  ;;  %v1149_v6 = vld [vmem:[%s1223_s14 + $0x144] sm:$0xf]  ;;  %v991_v7 = vld [vmem:[%s1223_s14 + $0x150] sm:$0xf0]  ;;  %v862_v8 = vor.u32 %v1119_v1, %v861_v0 }
  0x1f   : > { %593 = vmatpush.bf16.msra.mxu1 %v1022_v51  ;;  %v1117_v9 = vld [vmem:[%s1223_s14 + $0x44] sm:$0xf]  ;;  %v863_v10 = vld [vmem:[%s1223_s14 + $0x50] sm:$0xf0]  ;;  %v990_v11 = vor.u32 %v1151_v4, %v989_v3  ;;  %v845_v12 = vld [vmem:[%s1223_s14 + $0x20] sm:$0xf]  ;;  %v994_v14 = vor.u32 %v1149_v6, %v991_v7 }
  0x20   : > { %620 = vmatpush.bf16.msrb.mxu3 %v914_v45  ;;  %635 = vmatpush.bf16.msra.mxu2 %v1026_v54  ;;  %v1115_v13 = vld [vmem:[%s1223_s14 + $0x2c] sm:$0xf0]  ;;  %v973_v15 = vld [vmem:[%s1223_s14 + $0x120] sm:$0xf]  ;;  %v1145_v17 = vld [vmem:[%s1223_s14 + $0x124] sm:$0xf]  ;;  %v866_v19 = vor.u32 %v1117_v9, %v863_v10 }
  0x21   : > { %v1147_v16 = vld [vmem:[%s1223_s14 + $0x12c] sm:$0xf0]  ;;  %v975_v20 = vld [vmem:[%s1223_s14 + $0x130] sm:$0xf0]  ;;  %v1113_v21 = vld [vmem:[%s1223_s14 + $0x24] sm:$0xf]  ;;  %v846_v23 = vor.u32 %v1115_v13, %v845_v12 }
  0x22   : > { %580 = vmatpush.bf16.msra.mxu0 %v878_v60  ;;  %v847_v22 = vld [vmem:[%s1223_s14 + $0x30] sm:$0xf0]  ;;  %v829_v24 = vld [vmem:[%s1223_s14] sm:$0xf]  ;;  %v1111_v25 = vld [vmem:[%s1223_s14 + $0xc] sm:$0xf0]  ;;  %v974_v27 = vor.u32 %v1147_v16, %v973_v15  ;;  %v978_v31 = vor.u32 %v1145_v17, %v975_v20 }
  0x23   : > { %594 = vmatpush.bf16.msra.mxu1 %v1006_v63  ;;  %v957_v26 = vld [vmem:[%s1223_s14 + $0x100] sm:$0xf]  ;;  %v1143_v28 = vld [vmem:[%s1223_s14 + $0x10c] sm:$0xf0]  ;;  %v1141_v29 = vld [vmem:[%s1223_s14 + $0x104] sm:$0xf]  ;;  %v850_v35 = vor.u32 %v1113_v21, %v847_v22  ;;  %v830_v39 = vor.u32 %v1111_v25, %v829_v24 }
  0x24   : > { %621 = vmatpush.bf16.msrb.mxu3 %v898_v57  ;;  %636 = vmatpush.bf16.msra.mxu2 %v1010_v2  ;;  %v959_v30 = vld [vmem:[%s1223_s14 + $0x110] sm:$0xf0]  ;;  %v1109_v32 = vld [vmem:[%s1223_s14 + $0x4] sm:$0xf]  ;;  %v949_v34 = vld [vmem:[%s1223_s14 + $0xe8] sm:$0xf]  ;;  %v958_v43 = vor.u32 %v1143_v28, %v957_v26 }
  0x25   : > { %v831_v33 = vld [vmem:[%s1223_s14 + $0x10] sm:$0xf0]  ;;  %v1140_v36 = vld [vmem:[%s1223_s14 + $0xf4] sm:$0xf0]  ;;  %v1077_v37 = vld [vmem:[%s1223_s14 + $0x1e8] sm:$0xf]  ;;  %v962_v48 = vor.u32 %v1141_v29, %v959_v30 }
  0x26   : > { %581 = vmatpush.bf16.msra.mxu0 %v862_v8  ;;  %v1173_v38 = vld [vmem:[%s1223_s14 + $0x204] sm:$0xf]  ;;  %v817_v40 = vld [vmem:[%s1414_s0] sm:$0xf]  ;;  %v1107_v41 = vld [vmem:[%s1414_s0 + $0x8] sm:$0xf0]  ;;  %v950_v49 = vor.u32 %v1140_v36, %v949_v34  ;;  %v834_v52 = vor.u32 %v1109_v32, %v831_v33 }
  0x27   : > { %595 = vmatpush.bf16.msra.mxu1 %v990_v11  ;;  %v1087_v42 = vld [vmem:[%s1223_s14 + $0x210] sm:$0xf0]  ;;  %v1172_v44 = vld [vmem:[%s1223_s14 + $0x1f4] sm:$0xf0]  ;;  %v1093_v45 = vld [vmem:[%s1223_s14 + $0x208] sm:$0xf]  ;;  %v1321_v53 = vor.u32 %v1107_v41, %v817_v40 }
  0x28   : > { %622 = vmatpush.bf16.msrb.mxu3 %v882_v5  ;;  %637 = vmatpush.bf16.msra.mxu2 %v994_v14  ;;  %v1176_v46 = vld [vmem:[%s1223_s14 + $0x214] sm:$0xf0]  ;;  %v1090_v47 = vor.u32 %v1173_v38, %v1087_v42  ;;  %v1106_v50 = vld [vmem:[%s1414_s0 + $0x4] sm:$0xf]  ;;  %v819_v51 = vld [vmem:[%s1414_s0 + $0xc] sm:$0xf0]  ;;  %v1078_v57 = vor.u32 %v1172_v44, %v1077_v37 }
  0x29   : > { %v1170_v54 = vld [vmem:[%s1223_s14 + $0x1ec] sm:$0xf]  ;;  %v1079_v55 = vld [vmem:[%s1223_s14 + $0x1f8] sm:$0xf0]  ;;  %v933_v56 = vld [vmem:[%s1223_s14 + $0xc8] sm:$0xf]  ;;  %v1094_v58 = vor.u32 %v1176_v46, %v1093_v45  ;;  %v1329_v62 = vor.u32 %v1106_v50, %v819_v51 }
  0x2a   : > { %582 = vmatpush.bf16.msra.mxu0 %v846_v23  ;;  %v1136_v59 = vld [vmem:[%s1223_s14 + $0xd4] sm:$0xf0]  ;;  %v1138_v60 = vld [vmem:[%s1223_s14 + $0xec] sm:$0xf]  ;;  %v951_v61 = vld [vmem:[%s1223_s14 + $0xf8] sm:$0xf0]  ;;  %v1082_v1 = vor.u32 %v1170_v54, %v1079_v55 }
  0x2b   : > { %596 = vmatpush.bf16.msra.mxu1 %v974_v27  ;;  %v1061_v63 = vld [vmem:[%s1223_s14 + $0x1c8] sm:$0xf]  ;;  %v1168_v0 = vld [vmem:[%s1223_s14 + $0x1d4] sm:$0xf0]  ;;  %v934_v2 = vor.u32 %v1136_v59, %v933_v56  ;;  %v954_v3 = vor.u32 %v1138_v60, %v951_v61  ;;  %v1166_v4 = vld [vmem:[%s1223_s14 + $0x1cc] sm:$0xf] }
  0x2c   : > { %623 = vmatpush.bf16.msrb.mxu3 %v866_v19  ;;  %638 = vmatpush.bf16.msra.mxu2 %v978_v31  ;;  %v1063_v5 = vld [vmem:[%s1223_s14 + $0x1d8] sm:$0xf0]  ;;  %v917_v6 = vld [vmem:[%s1223_s14 + $0xa8] sm:$0xf]  ;;  %v1062_v7 = vor.u32 %v1168_v0, %v1061_v63  ;;  %v1132_v8 = vld [vmem:[%s1223_s14 + $0xb4] sm:$0xf0] }
  0x2d   : > { %v1134_v9 = vld [vmem:[%s1223_s14 + $0xcc] sm:$0xf]  ;;  %v935_v10 = vld [vmem:[%s1223_s14 + $0xd8] sm:$0xf0]  ;;  %v1045_v11 = vld [vmem:[%s1223_s14 + $0x1a8] sm:$0xf]  ;;  %v1066_v13 = vor.u32 %v1166_v4, %v1063_v5  ;;  %v918_v14 = vor.u32 %v1132_v8, %v917_v6 }
  0x2e   : > { %583 = vmatpush.bf16.msra.mxu0 %v830_v39  ;;  %v1164_v12 = vld [vmem:[%s1223_s14 + $0x1b4] sm:$0xf0]  ;;  %v938_v15 = vor.u32 %v1134_v9, %v935_v10  ;;  %v1162_v16 = vld [vmem:[%s1223_s14 + $0x1ac] sm:$0xf]  ;;  %v1047_v17 = vld [vmem:[%s1223_s14 + $0x1b8] sm:$0xf0] }
  0x2f   : > { %597 = vmatpush.bf16.msra.mxu1 %v958_v43  ;;  %v901_v19 = vld [vmem:[%s1223_s14 + $0x88] sm:$0xf]  ;;  %v1046_v20 = vor.u32 %v1164_v12, %v1045_v11  ;;  %v1128_v21 = vld [vmem:[%s1223_s14 + $0x94] sm:$0xf0]  ;;  %v1130_v22 = vld [vmem:[%s1223_s14 + $0xac] sm:$0xf]  ;;  %v1050_v26 = vor.u32 %v1162_v16, %v1047_v17 }
  0x30   : > { %624 = vmatpush.bf16.msrb.mxu3 %v850_v35  ;;  %639 = vmatpush.bf16.msra.mxu2 %v962_v48  ;;  %v919_v23 = vld [vmem:[%s1223_s14 + $0xb8] sm:$0xf0]  ;;  %v1029_v24 = vld [vmem:[%s1223_s14 + $0x188] sm:$0xf]  ;;  %v1160_v25 = vld [vmem:[%s1223_s14 + $0x194] sm:$0xf0]  ;;  %v902_v27 = vor.u32 %v1128_v21, %v901_v19 }
  0x31   : > { %584 = vmatmul.bf16.vlgmr.msra.gmra.mxu0 %v1321_v53  ;;  %v922_v28 = vor.u32 %v1130_v22, %v919_v23  ;;  %v1158_v29 = vld [vmem:[%s1223_s14 + $0x18c] sm:$0xf]  ;;  %v1031_v30 = vld [vmem:[%s1223_s14 + $0x198] sm:$0xf0]  ;;  %v1030_v31 = vor.u32 %v1160_v25, %v1029_v24  ;;  %v885_v32 = vld [vmem:[%s1223_s14 + $0x68] sm:$0xf] }
  0x32   : > { %653 = vmatpush.bf16.msrb.mxu0 %v1090_v47  ;;  %598 = vmatmul.bf16.vlgmr.msra.gmra.mxu1 %v1329_v62  ;;  %v1124_v33 = vld [vmem:[%s1223_s14 + $0x74] sm:$0xf0]  ;;  %v1013_v34 = vld [vmem:[%s1223_s14 + $0x168] sm:$0xf]  ;;  %v1126_v36 = vld [vmem:[%s1223_s14 + $0x8c] sm:$0xf]  ;;  %v1034_v38 = vor.u32 %v1158_v29, %v1031_v30 }
  0x33   : > { %660 = vmatpush.bf16.msrb.mxu1 %v950_v49  ;;  %640 = vmatmul.bf16.vlgmr.msra.gmra.mxu2 %v1329_v62  ;;  %v1156_v35 = vld [vmem:[%s1223_s14 + $0x174] sm:$0xf0]  ;;  %v903_v37 = vld [vmem:[%s1223_s14 + $0x98] sm:$0xf0]  ;;  %v886_v39 = vor.u32 %v1124_v33, %v885_v32  ;;  %v1154_v40 = vld [vmem:[%s1223_s14 + $0x16c] sm:$0xf] }
  0x34   : > { %625 = vmatpush.bf16.msrb.mxu3 %v834_v52  ;;  %695 = vmatpush.bf16.msrb.mxu2 %v1094_v58  ;;  %v1015_v41 = vld [vmem:[%s1223_s14 + $0x178] sm:$0xf0]  ;;  %v1014_v42 = vor.u32 %v1156_v35, %v1013_v34  ;;  %v906_v43 = vor.u32 %v1126_v36, %v903_v37  ;;  %v869_v44 = vld [vmem:[%s1223_s14 + $0x48] sm:$0xf]  ;;  %v1120_v45 = vld [vmem:[%s1223_s14 + $0x54] sm:$0xf0] }
  0x35   : > { %v997_v46 = vld [vmem:[%s1223_s14 + $0x148] sm:$0xf]  ;;  %v1152_v47 = vld [vmem:[%s1223_s14 + $0x154] sm:$0xf0]  ;;  %v1122_v48 = vld [vmem:[%s1223_s14 + $0x6c] sm:$0xf]  ;;  %v1018_v50 = vor.u32 %v1154_v40, %v1015_v41  ;;  %v870_v51 = vor.u32 %v1120_v45, %v869_v44 }
  0x36   : > { %702 = vmatpush.bf16.msra.mxu0 %v954_v3  ;;  %v887_v49 = vld [vmem:[%s1223_s14 + $0x78] sm:$0xf0]  ;;  %v1150_v52 = vld [vmem:[%s1223_s14 + $0x14c] sm:$0xf]  ;;  %v998_v55 = vor.u32 %v1152_v47, %v997_v46  ;;  %v1116_v58 = vld [vmem:[%s1223_s14 + $0x34] sm:$0xf0] }
  0x37   : > { %626 = vmatmul.bf16.vlgmr.msrb.gmra.mxu3 %v1321_v53  ;;  %661 = vmatpush.bf16.msrb.mxu1 %v934_v2  ;;  %v999_v54 = vld [vmem:[%s1223_s14 + $0x158] sm:$0xf0]  ;;  %v890_v56 = vor.u32 %v1122_v48, %v887_v49  ;;  %v981_v59 = vld [vmem:[%s1223_s14 + $0x128] sm:$0xf]  ;;  %v1148_v60 = vld [vmem:[%s1223_s14 + $0x134] sm:$0xf0] }
  0x38   : > { %674 = vmatpush.bf16.msra.mxu3 %v1078_v57  ;;  %716 = vmatpush.bf16.msra.mxu2 %v1082_v1  ;;  %v853_v57 = vld [vmem:[%s1223_s14 + $0x28] sm:$0xf]  ;;  %v1118_v61 = vld [vmem:[%s1223_s14 + $0x4c] sm:$0xf]  ;;  %v871_v63 = vld [vmem:[%s1223_s14 + $0x58] sm:$0xf0]  ;;  %v1002_v0 = vor.u32 %v1150_v52, %v999_v54  ;;  %v982_v4 = vor.u32 %v1148_v60, %v981_v59 }
  0x39   : > { %v854_v1 = vor.u32 %v1116_v58, %v853_v57  ;;  %v1146_v2 = vld [vmem:[%s1223_s14 + $0x12c] sm:$0xf]  ;;  %v983_v3 = vld [vmem:[%s1223_s14 + $0x138] sm:$0xf0]  ;;  %v874_v5 = vor.u32 %v1118_v61, %v871_v63  ;;  %v837_v6 = vld [vmem:[%s1223_s14 + $0x8] sm:$0xf] }
  0x3a   : > { %703 = vmatpush.bf16.msra.mxu0 %v938_v15  ;;  %v965_v8 = vld [vmem:[%s1223_s14 + $0x108] sm:$0xf]  ;;  %v1144_v9 = vld [vmem:[%s1223_s14 + $0x114] sm:$0xf0]  ;;  %v1114_v10 = vld [vmem:[%s1223_s14 + $0x2c] sm:$0xf]  ;;  %v986_v12 = vor.u32 %v1146_v2, %v983_v3 }
  0x3b   : > { %662 = vmatpush.bf16.msrb.mxu1 %v918_v14  ;;  %v855_v11 = vld [vmem:[%s1223_s14 + $0x38] sm:$0xf0]  ;;  %v1142_v16 = vld [vmem:[%s1223_s14 + $0x10c] sm:$0xf]  ;;  %v966_v19 = vor.u32 %v1144_v9, %v965_v8 }
  0x3c   : > { %675 = vmatpush.bf16.msra.mxu3 %v1062_v7  ;;  %717 = vmatpush.bf16.msra.mxu2 %v1066_v13  ;;  %v1112_v7 = vld [vmem:[%s1223_s14 + $0x14] sm:$0xf0]  ;;  %v1174_v13 = vld [vmem:[%s1223_s14 + $0x20c] sm:$0xf]  ;;  %v1095_v14 = vld [vmem:[%s1223_s14 + $0x218] sm:$0xf0] }
  0x3d   : > { %v838_v15 = vor.u32 %v1112_v7, %v837_v6  ;;  %v967_v17 = vld [vmem:[%s1223_s14 + $0x118] sm:$0xf0]  ;;  %v1098_v21 = vor.u32 %v1174_v13, %v1095_v14  ;;  %v1110_v22 = vld [vmem:[%s1223_s14 + $0xc] sm:$0xf] }
  0x3e   : > { %704 = vmatpush.bf16.msra.mxu0 %v922_v28  ;;  %v839_v23 = vld [vmem:[%s1223_s14 + $0x18] sm:$0xf0]  ;;  %v970_v24 = vor.u32 %v1142_v16, %v967_v17 }
  0x3f   : > { %663 = vmatpush.bf16.msrb.mxu1 %v902_v27  ;;  %v842_v25 = vor.u32 %v1110_v22, %v839_v23 }
  0x40   : > { %676 = vmatpush.bf16.msra.mxu3 %v1046_v20  ;;  %718 = vmatpush.bf16.msra.mxu2 %v1050_v26  ;;  %v858_v20 = vor.u32 %v1114_v10, %v855_v11 }
  0x41   : > { %1100 = vmatmul.msk.bf16.vlgmr.msrb.gmra.mxu0 %vm572_vm0, %v1243_v18 }
  0x42   : > { %705 = vmatpush.bf16.msra.mxu0 %v906_v43 }
  0x43   : > { %664 = vmatpush.bf16.msrb.mxu1 %v886_v39  ;;  %1101 = vmatmul.msk.bf16.vlgmr.msrb.gmra.mxu2 %vm572_vm0, %v1243_v18 }
  0x44   : > { %677 = vmatpush.bf16.msra.mxu3 %v1030_v31  ;;  %719 = vmatpush.bf16.msra.mxu2 %v1034_v38 }
  0x46   : > { %706 = vmatpush.bf16.msra.mxu0 %v890_v56 }
  0x47   : > { %665 = vmatpush.bf16.msrb.mxu1 %v870_v51 }
  0x48   : > { %678 = vmatpush.bf16.msra.mxu3 %v1014_v42  ;;  %720 = vmatpush.bf16.msra.mxu2 %v1018_v50 }
  0x4a   : > { %707 = vmatpush.bf16.msra.mxu0 %v874_v5 }
  0x4b   : > { %666 = vmatpush.bf16.msrb.mxu1 %v854_v1 }
  0x4c   : > { %679 = vmatpush.bf16.msra.mxu3 %v998_v55  ;;  %721 = vmatpush.bf16.msra.mxu2 %v1002_v0 }
  0x4e   : > { %708 = vmatpush.bf16.msra.mxu0 %v858_v20 }
  0x4f   : > { %667 = vmatpush.bf16.msrb.mxu1 %v838_v15 }
  0x50   : > { %680 = vmatpush.bf16.msra.mxu3 %v982_v4  ;;  %722 = vmatpush.bf16.msra.mxu2 %v986_v12 }
  0x52   : > { %668 = vmatmul.bf16.vlgmr.msrb.gmra.mxu1 %v1321_v53  ;;  %709 = vmatpush.bf16.msra.mxu0 %v842_v25 }
  0x53   : > { %737 = vmatpush.bf16.msra.mxu1 %v1098_v21 }
  0x54   : > { %681 = vmatpush.bf16.msra.mxu3 %v966_v19  ;;  %723 = vmatpush.bf16.msra.mxu2 %v970_v24 }
  0x55   : > { %710 = vmatmul.bf16.vlgmr.msra.gmra.mxu0 %v1321_v53 }
  0x57   : > { %682 = vmatmul.bf16.vlgmr.msra.gmra.mxu3 %v1329_v62  ;;  %724 = vmatmul.bf16.vlgmr.msra.gmra.mxu2 %v1329_v62 }
  0x62   : > { %1102 = vmatmul.msk.bf16.vlgmr.msra.gmra.mxu1 %vm572_vm0, %v1243_v18 }
  0x9a   : > { %v613_v26 = vpop.f32.mrf.mxu3 }
  0xa2   : > { %v615_v27 = vpop.f32.mrf.mxu3 }
  0xae   : > { %v585_v28 = vpop.f32.mrf.mxu0 }
  0xaf   : > { %v599_v29 = vpop.f32.mrf.mxu1 }
  0xb0   : > { %v600_v33 = vadd.f32 %v599_v29, %v585_v28 }
  0xb2   : > { %v614_v37 = vadd.f32 %v613_v26, %v600_v33 }
  0xb6   : > { %v641_v30 = vpop.f32.mrf.mxu2  ;;  %v587_v31 = vpop.f32.mrf.mxu0 }
  0xb7   : > { %v601_v62 = vpop.f32.mrf.mxu1 }
  0xb8   : > { %v602_v39 = vadd.f32 %v601_v62, %v587_v31 }
  0xba   : > { %v627_v32 = vpop.f32.mrf.mxu3  ;;  %v616_v43 = vadd.f32 %v615_v27, %v602_v39 }
  0xbb   : > { %v642_v34 = vadd.f32 %v641_v30, %v627_v32 }
  0xbe   : > { %v643_v35 = vpop.f32.mrf.mxu2  ;;  %v655_v36 = vpop.f32.mrf.mxu0 }
  0xbf   : > { %v656_v38 = vadd.f32 %v655_v36, %v642_v34 }
  0xc1   : > { %v744_v18 = vpack.c.bf16 %v656_v38, %v614_v37 }
  0xc2   : > { %v629_v53 = vpop.f32.mrf.mxu3 }
  0xc3   : > { %748 = vst [vmem:[%s1405_s30] sm:$0xff] %v744_v18  ;;  %v644_v40 = vadd.f32 %v643_v35, %v629_v53 }
  0xc6   : > { %v697_v41 = vpop.f32.mrf.mxu2  ;;  %v657_v42 = vpop.f32.mrf.mxu0 }
  0xc7   : > { %v658_v44 = vadd.f32 %v657_v42, %v644_v40 }
  0xc9   : > { %v746_v45 = vpack.c.bf16 %v658_v44, %v616_v43 }
  0xcb   : > { %750 = vst [vmem:[%s1405_s30 + $0x10] sm:$0xff] %v746_v45 }
  0xce   : > { %v699_v47 = vpop.f32.mrf.mxu2 }
  0xcf   : > { %v669_v46 = vpop.f32.mrf.mxu1 }
  0xd2   : > { %v711_v51 = vpop.f32.mrf.mxu0 }
  0xd7   : > { %v671_v49 = vpop.f32.mrf.mxu1 }
  0xda   : > { %v683_v48 = vpop.f32.mrf.mxu3  ;;  %v725_v50 = vpop.f32.mrf.mxu2 }
  0xdb   : > { %v684_v52 = vadd.f32 %v683_v48, %v669_v46  ;;  %v726_v54 = vadd.f32 %v725_v50, %v711_v51  ;;  %v713_v63 = vpop.f32.mrf.mxu0 }
  0xdd   : > { %v698_v56 = vadd.f32 %v697_v41, %v684_v52 }
  0xdf   : > { %v739_v55 = vpop.f32.mrf.mxu1 }
  0xe0   : > { %v740_v57 = vadd.f32 %v739_v55, %v726_v54 }
  0xe2   : > { %v685_v58 = vpop.f32.mrf.mxu3  ;;  %v745_v59 = vpack.c.bf16 %v740_v57, %v698_v56  ;;  %v727_v60 = vpop.f32.mrf.mxu2 }
  0xe3   : > { %v686_v61 = vadd.f32 %v685_v58, %v671_v49  ;;  %v728_v0 = vadd.f32 %v727_v60, %v713_v63 }
  0xe4   : > { %749 = vst [vmem:[%s1405_s30 + $0x8] sm:$0xff] %v745_v59 }
  0xe5   : > { %v700_v2 = vadd.f32 %v699_v47, %v686_v61 }
  0xe7   : > { %v741_v1 = vpop.f32.mrf.mxu1 }
  0xe8   : > { %v742_v3 = vadd.f32 %v741_v1, %v728_v0 }
  0xea   : > { %v747_v4 = vpack.c.bf16 %v742_v3, %v700_v2 }
  0xec   : > { %751 = vst [vmem:[%s1405_s30 + $0x18] sm:$0xff] %v747_v4 }
  0xed PF: > { %s12_s9 = sadd.s32 1, %s1192_s9  }
  0xee   : > { %p9_p4 = scmp.ge.s32.totalorder %s12_s9, 4  }
  0xf0   :  { %11 = sbr.rel (!%p9_p4) target bundleno = 1 (0x1), region = 58 }

// kernel: msbd_forward.7
= control target key start
LH: loop header
LB: loop body
LE: loop exit
PB: predicated region body
PF: predicated region fallthrough
CT: control target
= control target key end

     0   :  { %s4466_s25 = smov 0   ;;  %s4468_s26 = smov 0   ;;  %s6614_s0 = inlined_call_operand.vmem [shape: bf16[2,16,512], index: 0, kind: input, shape index: {}]   ;;  %s6615_s1 = inlined_call_operand.vmem [shape: bf16[3,32,160], index: 1, kind: input, shape index: {}]   ;;  %s6616_s2 = inlined_call_operand.vmem [shape: f32[3,32,1], index: 2, kind: input, shape index: {}]   ;;  %s6617_s3 = inlined_call_operand.vmem [shape: bf16[3,32,96], index: 3, kind: input, shape index: {}]   ;;  %s6618_s4 = inlined_call_operand.vmem [shape: f32[3,32,1], index: 4, kind: input, shape index: {}]   ;;  %s6619_s5 = inlined_call_operand.vmem [shape: bf16[3,32,320], index: 5, kind: input, shape index: {}]   ;;  %s6620_s6 = inlined_call_operand.vmem [shape: f32[3,32,1], index: 6, kind: input, shape index: {}]   ;;  %s6621_s7 = inlined_call_operand.vmem [shape: bf16[3,32,96], index: 7, kind: input, shape index: {}]   ;;  %s6622_s8 = inlined_call_operand.vmem [shape: f32[3,32,1], index: 8, kind: input, shape index: {}]   ;;  %s6623_s9 = inlined_call_operand.vmem [shape: f32[3,32,3], index: 9, kind: input, shape index: {}]   ;;  %s6624_s10 = inlined_call_operand.vmem [shape: f32[3,1,1], index: 10, kind: input, shape index: {}]   ;;  %s6625_s11 = inlined_call_operand.vmem [shape: f32[3,2,32,512], index: 11, kind: output, shape index: {0}]   ;;  %s6626_s12 = inlined_call_operand.vmem [shape: f32[3,2,32,256], index: 12, kind: output, shape index: {1}]   ;;  %s6627_s13 = inlined_call_operand.vmem [shape: f32[3,2,1,256], index: 13, kind: output, shape index: {2}]  }
   0x1   :  { %s4470_s27 = smov 0   ;;  %s4472_s28 = smov 0  }
   0x2   :  { %s4474_s29 = smov 0  }
   0x3 LB: > { %s33_s30 = sadd.s32 1, %s4374_s27  ;;  %s36_s14 = sadd.s32 1, %s4378_s28  ;;  %s4382_s29 = sphi %s4474_s29, %s24_s29   ;;  %s4378_s28 = sphi %s4472_s28, %s6696_s28   ;;  %s4374_s27 = sphi %s4470_s27, %s6695_s27   ;;  %s4370_s26 = sphi %s4468_s26, %s6694_s26   ;;  %s4366_s25 = sphi %s4466_s25, %s6693_s25  }
   0x4   : > { %p34_p0 = scmp.ge.s32.totalorder %s33_s30, 3  ;;  %p3823_p1 = scmp.ge.s32.totalorder %s4382_s29, 1 }
   0x5   : > { %p508_p2 = scmp.lt.s32.totalorder %s4382_s29, 7 }
   0x6   : > { %s6698_s30 = smov (%p34_p0, %s33_s30), 0  ;;  %s6700_s14 = smov (!%p34_p0, %s36_s14), %s4378_s28 }
   0x7   : > { %p509_p3 = pnand %p3823_p1, %p508_p2  ;;  %p38_p4 = scmp.ge.s32.totalorder %s6700_s14, 2 }
   0x8   : > { %p621_p5 = scmp.lt.s32.totalorder (!%p509_p3), %s4370_s26, 1  ;;  %s4384_s19 = smov (!%p509_p3), 4  }
   0x9   : > { %s6702_s14 = smov (%p38_p4, %s6700_s14), 0  ;;  %512 = sbr.rel (%p509_p3) target bundleno = 2657 (0xa61), region = 64 }
   0xa   : > { %s6651_s20 = smov (!%p509_p3), 126   ;;  %s6636_s21 = smov (!%p509_p3), 2  }
   0xb   : > { %s6630_s22 = smov (!%p509_p3), 124   ;;  %s6638_s23 = smov (!%p509_p3), 125  }
   0xc   : > { %s6634_s24 = smov (!%p509_p3), 127   ;;  %p626_p6 = scmp.lt.s32.totalorder (!%p509_p3), %s4366_s25, 2 }
   0xe   : > { %s6704_s26 = smov (!%p621_p5, %s4370_s26), 1  ;;  %vm745_vm0 = vcmask 31744   ;;  %vm6640_vm1 = vcmask 1031168   ;;  %vm6642_vm2 = vcmask 15360   ;;  %vm812_vm3 = vcmask 1014784   ;;  %s6706_s25 = smov (!%p626_p6, %s4366_s25), 2 }
   0xf   : > { %s4221_s15 = sshll.u32 %s6704_s26, 5  ;;  %vm797_vm4 = vcmask 1022976   ;;  %vm6641_vm5 = vcmask 1039360   ;;  %vm839_vm6 = vcmask 998400   ;;  %s4630_s16 = sshll.u32 %s6706_s25, 5  ;;  %vm994_vm7 = vcmask 261120  }
  0x10   : > { %s625_s18 = scalar_lea.vmem %s6614_s0, %s4221_s15  ;;  %s6628_s15 = smov 122   ;;  %vm6643_vm8 = vcmask 7168   ;;  %vm1339_vm9 = vcmask 785408  }
  0x11   : > { %v3861_v0 = vld [vmem:[%s625_s18 + $0x8] sm:$0xf]  ;;  %v4233_v1 = vld [vmem:[%s625_s18 + $0x14] sm:$0xf0]  ;;  %v3853_v2 = vld [vmem:[%s625_s18] sm:$0xf] }
  0x12   : > { %v3862_v3 = vor.u32 %v4233_v1, %v3861_v0  ;;  %v4232_v4 = vld [vmem:[%s625_s18 + $0xc] sm:$0xf0]  ;;  %v4231_v6 = vld [vmem:[%s625_s18 + $0xc] sm:$0xf]  ;;  %v3863_v7 = vld [vmem:[%s625_s18 + $0x18] sm:$0xf0] }
  0x13   : > { %v3854_v5 = vor.u32 %v4232_v4, %v3853_v2  ;;  %v4230_v8 = vld [vmem:[%s625_s18 + $0x4] sm:$0xf]  ;;  %v3855_v9 = vld [vmem:[%s625_s18 + $0x10] sm:$0xf0]  ;;  %v3866_v10 = vor.u32 %v4231_v6, %v3863_v7  ;;  %s645_s18 = scalar_lea.vmem %s6618_s4, %s4630_s16  ;;  %vm4828_vm10 = vmneg %vm6643_vm8 }
  0x14   : > { %741 = vrot.lane.b32.xlu1 %v3862_v3, %s4384_s19  ;;  %v3858_v11 = vor.u32 %v4230_v8, %v3855_v9 }
  0x15   : > { %737 = vrot.lane.b32.xlu0 %v3854_v5, %s4384_s19 }
  0x1c   : > { %743 = vrot.lane.b32.xlu1 %v3866_v10, %s4384_s19 }
  0x1d   : > { %739 = vrot.lane.b32.xlu0 %v3858_v11, %s4384_s19 }
  0x86   : > { %v742_v12 = vpop.permute.xlu1 %741 }
  0x87   : > { %v738_v13 = vpop.permute.xlu0 %737 }
  0x88   : > { %v752_v14 = vsel %vm745_vm0, 0, %v738_v13 }
  0x89   : > { %772 = vrot.lane.b32.xlu1 %v752_v14, %s6651_s20 }
  0x8e   : > { %v744_v15 = vpop.permute.xlu1 %743 }
  0x8f   : > { %v748_v16 = vsel %vm745_vm0, %v742_v12, %v744_v15  ;;  %v740_v17 = vpop.permute.xlu0 %739  ;;  %v754_v20 = vsel %vm745_vm0, %v744_v15, 0 }
  0x90   : > { %v746_v18 = vsel %vm745_vm0, %v738_v13, %v740_v17  ;;  %v747_v19 = vsel %vm745_vm0, %v740_v17, %v742_v12  ;;  %778 = vrot.lane.b32.xlu0 %v748_v16, %s6651_s20 }
  0x91   : > { %821 = vrot.lane.b32.xlu1 %v747_v19, %s6636_s21  ;;  %774 = vrot.lane.b32.xlu2 %v746_v18, %s6651_s20 }
  0x98   : > { %819 = vrot.lane.b32.xlu0 %v746_v18, %s6636_s21 }
  0x99   : > { %808 = vrot.lane.b32.xlu1 %v748_v16, %s6630_s22  ;;  %776 = vrot.lane.b32.xlu2 %v747_v19, %s6651_s20 }
  0xa0   : > { %806 = vrot.lane.b32.xlu0 %v747_v19, %s6630_s22 }
  0xa1   : > { %793 = vrot.lane.b32.xlu1 %v748_v16, %s6638_s23  ;;  %817 = vrot.lane.b32.xlu2 %v752_v14, %s6636_s21 }
  0xa8   : > { %791 = vrot.lane.b32.xlu0 %v747_v19, %s6638_s23 }
  0xa9   : > { %759 = vrot.lane.b32.xlu1 %v746_v18, %s6634_s24  ;;  %804 = vrot.lane.b32.xlu2 %v746_v18, %s6630_s22 }
  0xb0   : > { %787 = vrot.lane.b32.xlu0 %v752_v14, %s6638_s23 }
  0xb1   : > { %831 = vrot.lane.b32.xlu1 %v746_v18, %s6628_s15  ;;  %789 = vrot.lane.b32.xlu2 %v746_v18, %s6638_s23 }
  0xb8   : > { %763 = vrot.lane.b32.xlu0 %v748_v16, %s6634_s24 }
  0xb9   : > { %757 = vrot.lane.b32.xlu1 %v752_v14, %s6634_s24  ;;  %802 = vrot.lane.b32.xlu2 %v752_v14, %s6630_s22 }
  0xc0   : > { %835 = vrot.lane.b32.xlu0 %v748_v16, %s6628_s15 }
  0xc1   : > { %765 = vrot.lane.b32.xlu1 %v754_v20, %s6634_s24  ;;  %761 = vrot.lane.b32.xlu2 %v747_v19, %s6634_s24 }
  0xc8   : > { %780 = vrot.lane.b32.xlu0 %v754_v20, %s6651_s20 }
  0xc9   : > { %833 = vrot.lane.b32.xlu2 %v747_v19, %s6628_s15 }
  0xd0   : > { %823 = vrot.lane.b32.xlu0 %v748_v16, %s6636_s21  ;;  %s6655_s21 = smov 125  }
  0xd1   : > { %829 = vrot.lane.b32.xlu2 %v752_v14, %s6628_s15 }
  0xd8   : > { %837 = vrot.lane.b32.xlu0 %v754_v20, %s6628_s15  ;;  %s4637_s15 = scalar_lea.vmem %s6615_s1, %s4630_s16 }
  0xd9   : > { %810 = vrot.lane.b32.xlu2 %v754_v20, %s6630_s22  ;;  %s4651_s22 = scalar_lea.vmem %s6616_s2, %s4630_s16 }
  0xe1   : > { %795 = vrot.lane.b32.xlu2 %v754_v20, %s6638_s23 }
  0xeb   : > { %v775_v21 = vpop.permute.xlu2 %774 }
  0xf3   : > { %v777_v22 = vpop.permute.xlu2 %776 }
  0xf4   : > { %v4543_v23 = vsel %vm6640_vm1, %v775_v21, %v777_v22 }
  0xf5   : > { %894 = vrot.lane.b32.xlu1 %v4543_v23, %s6651_s20 }
  0xfb   : > { %v773_v24 = vpop.permute.xlu1 %772  ;;  %v818_v25 = vpop.permute.xlu2 %817 }
  0xfc   : > { %922 = vrot.lane.b32.xlu2 %v818_v25, %s6651_s20  ;;  %v4549_v26 = vsel %vm6640_vm1, %v773_v24, %v775_v21 }
  0xfd   : > { %892 = vrot.lane.b32.xlu1 %v4549_v26, %s6651_s20 }
 0x102   : > { %v779_v27 = vpop.permute.xlu0 %778 }
 0x103   : > { %v822_v28 = vpop.permute.xlu1 %821  ;;  %v805_v29 = vpop.permute.xlu2 %804  ;;  %v4554_v30 = vsel %vm6640_vm1, %v777_v22, %v779_v27 }
 0x104   : > { %896 = vrot.lane.b32.xlu2 %v4554_v30, %s6651_s20 }
 0x10a   : > { %v820_v31 = vpop.permute.xlu0 %819 }
 0x10b   : > { %v809_v32 = vpop.permute.xlu1 %808  ;;  %v790_v33 = vpop.permute.xlu2 %789  ;;  %v827_v34 = vsel %vm6642_vm2, %v820_v31, %v822_v28  ;;  %v826_v35 = vsel %vm6642_vm2, %v818_v25, %v820_v31 }
 0x10c   : > { %926 = vrot.lane.b32.xlu1 %v827_v34, %s6651_s20  ;;  %924 = vrot.lane.b32.xlu0 %v826_v35, %s6651_s20  ;;  %v4234_v34 = vld [vmem:[%s4637_s15 + $0x4] sm:$0xf]  ;;  %v3871_v35 = vld [vmem:[%s4637_s15 + $0x8] sm:$0xf0] }
 0x112   : > { %v807_v36 = vpop.permute.xlu0 %806 }
 0x113   : > { %v794_v37 = vpop.permute.xlu1 %793  ;;  %v803_v38 = vpop.permute.xlu2 %802  ;;  %v815_v39 = vsel %vm812_vm3, %v807_v36, %v809_v32  ;;  %v814_v40 = vsel %vm812_vm3, %v805_v29, %v807_v36  ;;  %v4644_v36 = vor.u32 %v4234_v34, %v3871_v35 }
 0x114   : > { %916 = vrot.lane.b32.xlu1 %v815_v39, %s6651_s20  ;;  %914 = vrot.lane.b32.xlu0 %v814_v40, %s6651_s20  ;;  %v813_v42 = vsel %vm812_vm3, %v803_v38, %v805_v29  ;;  %v4391_v39 = vmov 0   ;;  %v712_v40 = vld [vmem:[%s4651_s22 + $0x18] sm:$0xff] }
 0x115   : > { %4334 = vset.pattern.permute.xlu1 %v4391_v39  ;;  %4333 = vset.pattern.permute.xlu0 %v4391_v39 }
 0x116   : > { %4335 = vset.pattern.permute.xlu2 %v4391_v39 }
 0x11a   : > { %v792_v41 = vpop.permute.xlu0 %791 }
 0x11b   : > { %v800_v43 = vsel %vm797_vm4, %v792_v41, %v794_v37  ;;  %v799_v44 = vsel %vm797_vm4, %v790_v33, %v792_v41  ;;  %v760_v45 = vpop.permute.xlu1 %759  ;;  %v762_v46 = vpop.permute.xlu2 %761 }
 0x11c   : > { %912 = vrot.lane.b32.xlu0 %v813_v42, %s6651_s20  ;;  %906 = vrot.lane.b32.xlu2 %v800_v43, %s6651_s20  ;;  %v769_v48 = vsel %vm6641_vm5, %v760_v45, %v762_v46 }
 0x11d   : > { %904 = vrot.lane.b32.xlu1 %v799_v44, %s6651_s20  ;;  %v3869_v44 = vld [vmem:[%s4637_s15] sm:$0xf] }
 0x122   : > { %v788_v47 = vpop.permute.xlu0 %787 }
 0x123   : > { %v798_v49 = vsel %vm797_vm4, %v788_v47, %v790_v33  ;;  %v832_v50 = vpop.permute.xlu1 %831  ;;  %v834_v51 = vpop.permute.xlu2 %833  ;;  %v4236_v47 = vld [vmem:[%s4637_s15 + $0x14] sm:$0xf] }
 0x124   : > { %884 = vrot.lane.b32.xlu0 %v769_v48, %s6651_s20  ;;  %902 = vrot.lane.b32.xlu2 %v798_v49, %s6651_s20  ;;  %v841_v53 = vsel %vm839_vm6, %v832_v50, %v834_v51  ;;  %v3879_v48 = vld [vmem:[%s4637_s15 + $0x18] sm:$0xf0]  ;;  %v710_v49 = vld [vmem:[%s4651_s22 + $0x8] sm:$0xff] }
 0x12a   : > { %v764_v52 = vpop.permute.xlu0 %763 }
 0x12b   : > { %v770_v54 = vsel %vm6641_vm5, %v762_v46, %v764_v52  ;;  %v758_v55 = vpop.permute.xlu1 %757  ;;  %v830_v56 = vpop.permute.xlu2 %829 }
 0x12c   : > { %934 = vrot.lane.b32.xlu2 %v841_v53, %s6651_s20  ;;  %886 = vrot.lane.b32.xlu1 %v770_v54, %s6651_s20  ;;  %v840_v58 = vsel %vm839_vm6, %v830_v56, %v832_v50  ;;  %v768_v59 = vsel %vm6641_vm5, %v758_v55, %v760_v45  ;;  %v4235_v45 = vld [vmem:[%s4637_s15 + $0x4] sm:$0xf0] }
 0x12d   : > { %v4670_v50 = vor.u32 %v4235_v45, %v3869_v44 }
 0x132   : > { %v836_v57 = vpop.permute.xlu0 %835 }
 0x133   : > { %v842_v60 = vsel %vm839_vm6, %v834_v51, %v836_v57  ;;  %v811_v62 = vpop.permute.xlu2 %810  ;;  %v766_v7 = vpop.permute.xlu1 %765  ;;  %v4672_v51 = vor.u32 %v4236_v47, %v3879_v48 }
 0x134   : > { %932 = vrot.lane.b32.xlu2 %v840_v58, %s6651_s20  ;;  %882 = vrot.lane.b32.xlu1 %v768_v59, %s6651_s20  ;;  %v816_v1 = vsel %vm812_vm3, %v809_v32, %v811_v62  ;;  %v771_v8 = vsel %vm6641_vm5, %v764_v52, %v766_v7 }
 0x135   : > { %936 = vrot.lane.b32.xlu0 %v842_v60, %s6651_s20 }
 0x13a   : > { %v781_v61 = vpop.permute.xlu0 %780 }
 0x13b   : > { %v4587_v63 = vsel %vm6640_vm1, %v779_v27, %v781_v61  ;;  %v796_v3 = vpop.permute.xlu2 %795 }
 0x13c   : > { %920 = vrot.lane.b32.xlu2 %v811_v62, %s6651_s20  ;;  %900 = vrot.lane.b32.xlu1 %v781_v61, %s6651_s20  ;;  %v801_v6 = vsel %vm797_vm4, %v794_v37, %v796_v3  ;;  %v4237_v62 = vld [vmem:[%s4637_s15 + $0x14] sm:$0xf0] }
 0x13d   : > { %898 = vrot.lane.b32.xlu0 %v4587_v63, %s6651_s20 }
 0x142   : > { %v824_v0 = vpop.permute.xlu0 %823 }
 0x143   : > { %v828_v2 = vsel %vm6642_vm2, %v822_v28, %v824_v0 }
 0x144   : > { %918 = vrot.lane.b32.xlu1 %v816_v1, %s6651_s20  ;;  %928 = vrot.lane.b32.xlu2 %v828_v2, %s6651_s20 }
 0x145   : > { %930 = vrot.lane.b32.xlu0 %v824_v0, %s6651_s20  ;;  %v709_v0 = vld [vmem:[%s4651_s22] sm:$0xff] }
 0x14a   : > { %v838_v4 = vpop.permute.xlu0 %837 }
 0x14b   : > { %v843_v5 = vsel %vm839_vm6, %v836_v57, %v838_v4  ;;  %v711_v57 = vld [vmem:[%s4651_s22 + $0x10] sm:$0xff]  ;;  %s6632_s22 = smov 1  }
 0x14c   : > { %910 = vrot.lane.b32.xlu1 %v796_v3, %s6651_s20  ;;  %938 = vrot.lane.b32.xlu2 %v843_v5, %s6651_s20 }
 0x14d   : > { %908 = vrot.lane.b32.xlu0 %v801_v6, %s6651_s20 }
 0x154   : > { %888 = vrot.lane.b32.xlu1 %v771_v8, %s6651_s20  ;;  %890 = vrot.lane.b32.xlu2 %v766_v7, %s6651_s20 }
 0x155   : > { %940 = vrot.lane.b32.xlu0 %v838_v4, %s6651_s20 }
 0x156   : > { %v923_v9 = vpop.permute.xlu2 %922 }
 0x15c   : > { %861 = vperm.xlu1 %4334, %v712_v40   ;;  %846 = vperm.xlu2 %4335, %v709_v0  }
 0x15d   : > { %856 = vperm.xlu0 %4333, %v711_v57  }
 0x15e   : > { %v4607_v10 = vpop.permute.xlu2 %896 }
 0x164   : > { %851 = vperm.xlu1 %4334, %v710_v49  }
 0x167   : > { %v895_v11 = vpop.permute.xlu1 %894 }
 0x168   : > { %v947_v12 = vsel %vm6640_vm1, %v895_v11, %v4607_v10 }
 0x169   : > { %1039 = vmatpush.bf16.msra.mxu2 %v947_v12 }
 0x16d   : > { %1040 = vmatpush.bf16.msra.mxu2 %v4543_v23 }
 0x16f   : > { %v893_v13 = vpop.permute.xlu1 %892 }
 0x170   : > { %v946_v14 = vsel %vm6640_vm1, %v893_v13, %v895_v11 }
 0x171   : > { %1001 = vmatpush.bf16.msra.mxu0 %v946_v14 }
 0x175   : > { %1002 = vmatpush.bf16.msra.mxu0 %v4549_v26 }
 0x176   : > { %v4614_v15 = vpop.permute.xlu2 %906 }
 0x17e   : > { %v4616_v16 = vpop.permute.xlu1 %926  ;;  %v903_v17 = vpop.permute.xlu2 %902 }
 0x17f   : > { %v925_v18 = vpop.permute.xlu0 %924 }
 0x180   : > { %v958_v19 = vsel %vm6640_vm1, %v923_v9, %v925_v18  ;;  %v959_v20 = vsel %vm6640_vm1, %v925_v18, %v4616_v16 }
 0x181   : > { %1003 = vmatpush.bf16.msra.mxu0 %v958_v19  ;;  %1041 = vmatpush.bf16.msra.mxu2 %v959_v20 }
 0x186   : > { %v4622_v21 = vpop.permute.xlu1 %916  ;;  %v935_v22 = vpop.permute.xlu2 %934 }
 0x187   : > { %v915_v24 = vpop.permute.xlu0 %914 }
 0x188   : > { %v955_v25 = vsel %vm6640_vm1, %v915_v24, %v4622_v21 }
 0x189   : > { %1042 = vmatpush.bf16.msra.mxu2 %v955_v25 }
 0x18e   : > { %v933_v27 = vpop.permute.xlu2 %932 }
 0x18f   : > { %v905_v28 = vpop.permute.xlu1 %904  ;;  %v913_v29 = vpop.permute.xlu0 %912  ;;  %v962_v31 = vsel %vm6640_vm1, %v933_v27, %v935_v22 }
 0x190   : > { %v954_v32 = vsel %vm6640_vm1, %v913_v29, %v915_v24  ;;  %1026 = vmatpush.bf16.msra.mxu1 %v962_v31  ;;  %v951_v33 = vsel %vm6640_vm1, %v905_v28, %v4614_v15  ;;  %v950_v37 = vsel %vm6640_vm1, %v903_v17, %v905_v28 }
 0x191   : > { %1004 = vmatpush.bf16.msra.mxu0 %v954_v32  ;;  %1043 = vmatpush.bf16.msra.mxu2 %v951_v33 }
 0x194   : > { %1027 = vmatpush.bf16.msra.mxu1 %v954_v32 }
 0x195   : > { %1005 = vmatpush.bf16.msra.mxu0 %v950_v37  ;;  %1044 = vmatpush.bf16.msra.mxu2 %v947_v12 }
 0x196   : > { %v4653_v38 = vpop.permute.xlu2 %920 }
 0x197   : > { %3883 = vmatmul.msk.bf16.vlgmr.msra.gmra.mxu1 %vm994_vm7, %v4644_v36  ;;  %v885_v41 = vpop.permute.xlu0 %884 }
 0x199   : > { %1006 = vmatpush.bf16.msra.mxu0 %v946_v14 }
 0x19e   : > { %v4661_v42 = vpop.permute.xlu1 %886  ;;  %v929_v46 = vpop.permute.xlu2 %928 }
 0x19f   : > { %v943_v43 = vsel %vm6640_vm1, %v885_v41, %v4661_v42  ;;  %v960_v5 = vsel %vm6640_vm1, %v4616_v16, %v929_v46 }
 0x1a0   : > { %1045 = vmatpush.bf16.msra.mxu2 %v943_v43 }
 0x1a4   : > { %1046 = vmatpush.bf16.msra.mxu2 %v4543_v23 }
 0x1a6   : > { %v883_v52 = vpop.permute.xlu1 %882  ;;  %v939_v56 = vpop.permute.xlu2 %938 }
 0x1a7   : > { %v937_v53 = vpop.permute.xlu0 %936  ;;  %v942_v54 = vsel %vm6640_vm1, %v883_v52, %v885_v41  ;;  %1047 = vmatmul.bf16.vlgmr.msra.gmra.mxu2 %v4670_v50  ;;  %3884 = vmatmul.msk.bf16.gmra.mxu1 %vm994_vm7, %v4672_v51 }
 0x1a8   : > { %1007 = vmatpush.bf16.msra.mxu0 %v942_v54  ;;  %v963_v55 = vsel %vm6640_vm1, %v935_v22, %v937_v53  ;;  %v964_v23 = vsel %vm6640_vm1, %v937_v53, %v939_v56 }
 0x1a9   : > { %1064 = vmatpush.bf16.msra.mxu3 %v963_v55 }
 0x1ac   : > { %1008 = vmatpush.bf16.msra.mxu0 %v4549_v26  ;;  %v3877_v26 = vld [vmem:[%s4637_s15 + $0x10] sm:$0xf]  ;;  %s4805_s15 = sshll.u32 %s6706_s25, 4 }
 0x1ad   : > { %1065 = vmatpush.bf16.msra.mxu3 %v955_v25  ;;  %v3878_v1 = vor.u32 %v4237_v62, %v3877_v26 }
 0x1ae   : > { %v901_v58 = vpop.permute.xlu1 %900  ;;  %v891_v12 = vpop.permute.xlu2 %890 }
 0x1af   : > { %v899_v59 = vpop.permute.xlu0 %898  ;;  %1009 = vmatmul.bf16.vlgmr.msra.gmra.mxu0 %v4670_v50 }
 0x1b0   : > { %3885 = vmatmul.msk.bf16.vlgmr.msra.gmra.mxu3 %vm994_vm7, %v4644_v36  ;;  %v948_v60 = vsel %vm6640_vm1, %v4607_v10, %v899_v59  ;;  %v949_v61 = vsel %vm6640_vm1, %v899_v59, %v901_v58 }
 0x1b1   : > { %1102 = vmatpush.bf16.msrb.mxu3 %v964_v23  ;;  %1077 = vmatpush.bf16.msrb.mxu1 %v948_v60 }
 0x1b2   : > { %1115 = vmatpush.bf16.msrb.mxu0 %v949_v61 }
 0x1b5   : > { %1078 = vmatpush.bf16.msrb.mxu1 %v4554_v30 }
 0x1b6   : > { %1116 = vmatpush.bf16.msrb.mxu0 %v4587_v63  ;;  %v919_v2 = vpop.permute.xlu1 %918 }
 0x1b7   : > { %v931_v3 = vpop.permute.xlu0 %930  ;;  %v956_v4 = vsel %vm6640_vm1, %v4622_v21, %v919_v2  ;;  %1052 = vmatmul.bf16.gmra.mxu2 %v3878_v1  ;;  %v957_v7 = vsel %vm6640_vm1, %v919_v2, %v4653_v38  ;;  %v847_v21 = vpop.permute.xlu2 %846 }
 0x1b8   : > { %1103 = vmatpush.bf16.msrb.mxu3 %v956_v4  ;;  %v961_v6 = vsel %vm6640_vm1, %v929_v46, %v931_v3 }
 0x1b9   : > { %1079 = vmatpush.bf16.msrb.mxu1 %v960_v5 }
 0x1ba   : > { %1117 = vmatpush.bf16.msrb.mxu0 %v961_v6 }
 0x1bd   : > { %1080 = vmatpush.bf16.msrb.mxu1 %v956_v4 }
 0x1be   : > { %1118 = vmatpush.bf16.msrb.mxu0 %v957_v7  ;;  %v911_v8 = vpop.permute.xlu1 %910 }
 0x1bf   : > { %v909_v9 = vpop.permute.xlu0 %908  ;;  %1014 = vmatmul.bf16.gmra.mxu0 %v3878_v1 }
 0x1c0   : > { %3886 = vmatmul.msk.bf16.gmra.mxu3 %vm994_vm7, %v4672_v51  ;;  %v952_v10 = vsel %vm6640_vm1, %v4614_v15, %v909_v9  ;;  %v953_v11 = vsel %vm6640_vm1, %v909_v9, %v911_v8 }
 0x1c1   : > { %1081 = vmatpush.bf16.msrb.mxu1 %v952_v10 }
 0x1c2   : > { %1119 = vmatpush.bf16.msrb.mxu0 %v953_v11 }
 0x1c5   : > { %1082 = vmatpush.bf16.msrb.mxu1 %v948_v60 }
 0x1c6   : > { %1120 = vmatpush.bf16.msrb.mxu0 %v949_v61  ;;  %v889_v13 = vpop.permute.xlu1 %888 }
 0x1c7   : > { %v941_v14 = vpop.permute.xlu0 %940  ;;  %v944_v16 = vsel %vm6640_vm1, %v4661_v42, %v889_v13  ;;  %v945_v17 = vsel %vm6640_vm1, %v889_v13, %v891_v12 }
 0x1c8   : > { %v965_v18 = vsel %vm6640_vm1, %v939_v56, %v941_v14 }
 0x1c9   : > { %1083 = vmatpush.bf16.msrb.mxu1 %v944_v16  ;;  %1140 = vmatpush.bf16.msrb.mxu2 %v965_v18 }
 0x1ca   : > { %1121 = vmatpush.bf16.msrb.mxu0 %v945_v17 }
 0x1cd   : > { %1084 = vmatpush.bf16.msrb.mxu1 %v4554_v30  ;;  %1141 = vmatpush.bf16.msrb.mxu2 %v957_v7 }
 0x1ce   : > { %1122 = vmatpush.bf16.msrb.mxu0 %v4587_v63  ;;  %v4722_v19 = vpop.permute.xlu1 %861 }
 0x1d0   : > { %1085 = vmatmul.bf16.vlgmr.msrb.gmra.mxu1 %v4670_v50  ;;  %3887 = vmatmul.msk.bf16.vlgmr.msrb.gmra.mxu3 %vm994_vm7, %v4644_v36 }
 0x1d1   : > { %1123 = vmatmul.bf16.vlgmr.msrb.gmra.mxu0 %v4670_v50  ;;  %3889 = vmatmul.msk.bf16.vlgmr.msrb.gmra.mxu2 %vm994_vm7, %v4644_v36 }
 0x1d6   : > { %v852_v29 = vpop.permute.xlu1 %851 }
 0x1e0   : > { %1090 = vmatmul.bf16.gmra.mxu1 %v3878_v1  ;;  %3888 = vmatmul.msk.bf16.gmra.mxu3 %vm994_vm7, %v4672_v51 }
 0x1e1   : > { %1128 = vmatmul.bf16.gmra.mxu0 %v3878_v1  ;;  %3890 = vmatmul.msk.bf16.gmra.mxu2 %vm994_vm7, %v4672_v51  ;;  %v857_v51 = vpop.permute.xlu0 %856 }
 0x214   : > { %v1029_v30 = vpop.f32.mrf.mxu1 }
 0x21c   : > { %v1031_v20 = vpop.f32.mrf.mxu1 }
 0x224   : > { %v1034_v36 = vpop.f32.mrf.mxu1 }
 0x22a   : > { %v1048_v63 = vpop.f32.mrf.mxu2 }
 0x22b   : > { %v1049_v27 = vadd.f32 %v1048_v63, %v847_v21 }
 0x22c   : > { %v1010_v15 = vpop.f32.mrf.mxu0  ;;  %v1036_v54 = vpop.f32.mrf.mxu1 }
 0x22d   : > { %v1011_v28 = vadd.f32 %v1010_v15, %v847_v21 }
 0x22f   : > { %v1030_v34 = vadd.f32 %v1029_v30, %v1011_v28 }
 0x232   : > { %v1050_v24 = vpop.f32.mrf.mxu2 }
 0x233   : > { %v1067_v22 = vpop.f32.mrf.mxu3  ;;  %v1051_v33 = vadd.f32 %v1050_v24, %v852_v29 }
 0x234   : > { %v1012_v25 = vpop.f32.mrf.mxu0  ;;  %v1068_v32 = vadd.f32 %v1067_v22, %v1049_v27 }
 0x235   : > { %v1013_v31 = vadd.f32 %v1012_v25, %v852_v29 }
 0x236   : > { %v1153_v41 = vpack.c.bf16 %v1068_v32, %v1030_v34 }
 0x237   : > { %v1032_v37 = vadd.f32 %v1031_v20, %v1013_v31 }
 0x238   : > { %v1170_v46 = vunpack.c.h.b16 %v1153_v41  ;;  %v1169_v47 = vunpack.c.l.b16 %v1153_v41 }
 0x23a   : > { %v1053_v42 = vpop.f32.mrf.mxu2 }
 0x23b   : > { %v1069_v35 = vpop.f32.mrf.mxu3  ;;  %v1054_v53 = vadd.f32 %v1053_v42, %v857_v51 }
 0x23c   : > { %v1070_v38 = vadd.f32 %v1069_v35, %v1051_v33  ;;  %v1015_v40 = vpop.f32.mrf.mxu0 }
 0x23d   : > { %v1016_v55 = vadd.f32 %v1015_v40, %v857_v51 }
 0x23e   : > { %v1155_v43 = vpack.c.bf16 %v1070_v38, %v1032_v37 }
 0x23f   : > { %v1035_v59 = vadd.f32 %v1034_v36, %v1016_v55 }
 0x240   : > { %v1173_v44 = vunpack.c.l.b16 %v1155_v43  ;;  %v1174_v45 = vunpack.c.h.b16 %v1155_v43 }
 0x242   : > { %v1186_v48 = vpack.c.b16 %v1174_v45, %v1170_v46  ;;  %v1185_v49 = vpack.c.b16 %v1173_v44, %v1169_v47  ;;  %v1055_v56 = vpop.f32.mrf.mxu2 }
 0x243   : > { %v1072_v50 = vpop.f32.mrf.mxu3  ;;  %v1056_v58 = vadd.f32 %v1055_v56, %v4722_v19 }
 0x244   : > { %1195 = vrot.lane.b32.xlu1 %v1186_v48, %s6632_s22  ;;  %1193 = vrot.lane.b32.xlu0 %v1185_v49, %s6632_s22  ;;  %v1017_v52 = vpop.f32.mrf.mxu0  ;;  %v1073_v57 = vadd.f32 %v1072_v50, %v1054_v53 }
 0x245   : > { %v1018_v23 = vadd.f32 %v1017_v52, %v4722_v19 }
 0x246   : > { %v1157_v62 = vpack.c.bf16 %v1073_v57, %v1035_v59 }
 0x247   : > { %v1037_v61 = vadd.f32 %v1036_v54, %v1018_v23 }
 0x248   : > { %v1178_v5 = vunpack.c.h.b16 %v1157_v62  ;;  %v1177_v6 = vunpack.c.l.b16 %v1157_v62 }
 0x24b   : > { %v1074_v60 = vpop.f32.mrf.mxu3 }
 0x24c   : > { %v1075_v26 = vadd.f32 %v1074_v60, %v1056_v58 }
 0x24d   : > { %v1086_v0 = vpop.f32.mrf.mxu1 }
 0x24e   : > { %v1159_v1 = vpack.c.bf16 %v1075_v26, %v1037_v61  ;;  %v1124_v2 = vpop.f32.mrf.mxu0  ;;  %v1087_v13 = vadd.f32 %v1086_v0, %v847_v21 }
 0x24f   : > { %v1125_v14 = vadd.f32 %v1124_v2, %v847_v21 }
 0x250   : > { %v1181_v3 = vunpack.c.l.b16 %v1159_v1  ;;  %v1182_v4 = vunpack.c.h.b16 %v1159_v1 }
 0x252   : > { %v1190_v7 = vpack.c.b16 %v1182_v4, %v1178_v5  ;;  %v1189_v8 = vpack.c.b16 %v1181_v3, %v1177_v6 }
 0x253   : > { %v1105_v9 = vpop.f32.mrf.mxu3 }
 0x254   : > { %v1143_v10 = vpop.f32.mrf.mxu2  ;;  %1203 = vrot.lane.b32.xlu0 %v1190_v7, %s6632_s22  ;;  %1201 = vrot.lane.b32.xlu2 %v1189_v8, %s6632_s22  ;;  %v1106_v16 = vadd.f32 %v1105_v9, %v1087_v13  ;;  %v717_v13 = vld [vmem:[%s645_s18] sm:$0xff] }
 0x255   : > { %v1088_v11 = vpop.f32.mrf.mxu1  ;;  %v1144_v17 = vadd.f32 %v1143_v10, %v1125_v14  ;;  %v719_v10 = vld [vmem:[%s645_s18 + $0x10] sm:$0xff] }
 0x256   : > { %v1126_v12 = vpop.f32.mrf.mxu0  ;;  %v1089_v18 = vadd.f32 %v1088_v11, %v852_v29  ;;  %v720_v11 = vld [vmem:[%s645_s18 + $0x18] sm:$0xff] }
 0x257   : > { %v1127_v30 = vadd.f32 %v1126_v12, %v852_v29  ;;  %v1154_v22 = vpack.c.bf16 %v1144_v17, %v1106_v16  ;;  %v718_v12 = vld [vmem:[%s645_s18 + $0x8] sm:$0xff] }
 0x259   : > { %v1172_v31 = vunpack.c.h.b16 %v1154_v22  ;;  %v1171_v56 = vunpack.c.l.b16 %v1154_v22 }
 0x25b   : > { %v1107_v63 = vpop.f32.mrf.mxu3 }
 0x25c   : > { %v1108_v15 = vadd.f32 %v1107_v63, %v1089_v18  ;;  %v1145_v20 = vpop.f32.mrf.mxu2 }
 0x25d   : > { %v1146_v24 = vadd.f32 %v1145_v20, %v1127_v30  ;;  %v1091_v25 = vpop.f32.mrf.mxu1 }
 0x25e   : > { %v1129_v27 = vpop.f32.mrf.mxu0  ;;  %v1092_v21 = vadd.f32 %v1091_v25, %v857_v51 }
 0x25f   : > { %v1156_v28 = vpack.c.bf16 %v1146_v24, %v1108_v15  ;;  %v1130_v36 = vadd.f32 %v1129_v27, %v857_v51 }
 0x261   : > { %v1176_v32 = vunpack.c.h.b16 %v1156_v28  ;;  %v1175_v55 = vunpack.c.l.b16 %v1156_v28 }
 0x263   : > { %v1110_v33 = vpop.f32.mrf.mxu3  ;;  %v1188_v34 = vpack.c.b16 %v1176_v32, %v1172_v31  ;;  %v1187_v23 = vpack.c.b16 %v1175_v55, %v1171_v56 }
 0x264   : > { %v1148_v35 = vpop.f32.mrf.mxu2  ;;  %v1111_v29 = vadd.f32 %v1110_v33, %v1092_v21 }
 0x265   : > { %1199 = vrot.lane.b32.xlu0 %v1188_v34, %s6632_s22  ;;  %v1093_v37 = vpop.f32.mrf.mxu1  ;;  %v1149_v40 = vadd.f32 %v1148_v35, %v1130_v36 }
 0x266   : > { %v1131_v38 = vpop.f32.mrf.mxu0  ;;  %v1094_v41 = vadd.f32 %v1093_v37, %v4722_v19 }
 0x267   : > { %v1132_v42 = vadd.f32 %v1131_v38, %v4722_v19  ;;  %v1158_v46 = vpack.c.bf16 %v1149_v40, %v1111_v29 }
 0x269   : > { %v1179_v49 = vunpack.c.l.b16 %v1158_v46  ;;  %v1180_v50 = vunpack.c.h.b16 %v1158_v46 }
 0x26b   : > { %v1112_v43 = vpop.f32.mrf.mxu3 }
 0x26c   : > { %v1113_v44 = vadd.f32 %v1112_v43, %v1094_v41  ;;  %v1150_v45 = vpop.f32.mrf.mxu2 }
 0x26d   : > { %v1151_v47 = vadd.f32 %v1150_v45, %v1132_v42 }
 0x26f   : > { %v1160_v48 = vpack.c.bf16 %v1151_v47, %v1113_v44 }
 0x271   : > { %v1183_v52 = vunpack.c.l.b16 %v1160_v48  ;;  %v1184_v53 = vunpack.c.h.b16 %v1160_v48 }
 0x273   : > { %v1191_v54 = vpack.c.b16 %v1183_v52, %v1179_v49  ;;  %v1192_v51 = vpack.c.b16 %v1184_v53, %v1180_v50 }
 0x275   : > { %1205 = vrot.lane.b32.xlu1 %v1191_v54, %s6632_s22  ;;  %1207 = vrot.lane.b32.xlu2 %v1192_v51, %s6632_s22 }
 0x27d   : > { %1197 = vrot.lane.b32.xlu2 %v1187_v23, %s6632_s22  ;;  %s640_s22 = scalar_lea.vmem %s6617_s3, %s4805_s15 }
 0x27e   : > { %v4238_v29 = vld [vmem:[%s640_s22] sm:$0xff]  ;;  %v4239_v53 = vld [vmem:[%s640_s22 + $0x8] sm:$0xff]  ;;  %s3843_s22 = sshll.u32 %s6704_s26, 4 }
 0x27f   : > { %s680_s17 = sadd.s32 %s4630_s16, %s3843_s22  ;;  %s6659_s22 = smov 122  }
 0x280   : > { %s3845_s18 = sshll.u32 %s680_s17, 3 }
 0x281   : > { %s4852_s23 = scalar_lea.vmem %s6625_s11, %s3845_s18  ;;  %s6660_s18 = smov 1  }
 0x2ae   : > { %v4746_v59 = vpop.permute.xlu2 %1201 }
 0x2af   : > { %v1227_v60 = vsel %vm6643_vm8, 0, %v4746_v59 }
 0x2b6   : > { %v1196_v19 = vpop.permute.xlu1 %1195  ;;  %v4736_v57 = vpop.permute.xlu0 %1193 }
 0x2b7   : > { %v4740_v58 = vsel %vm6643_vm8, %v4736_v57, %v1196_v19  ;;  %v1224_v61 = vsel %vm6643_vm8, 0, %v4736_v57 }
 0x2b8   : > { %1239 = vrot.lane.b32.xlu0 %v4740_v58, %s6634_s24  ;;  %1275 = vrot.lane.b32.xlu2 %v4740_v58, %s6651_s20 }
 0x2c0   : > { %1283 = vrot.lane.b32.xlu0 %v1227_v60, %s6651_s20  ;;  %1273 = vrot.lane.b32.xlu2 %v1224_v61, %s6651_s20 }
 0x2c6   : > { %v1204_v26 = vpop.permute.xlu0 %1203 }
 0x2c7   : > { %v1213_v62 = vsel %vm6643_vm8, %v4746_v59, %v1204_v26 }
 0x2c8   : > { %1285 = vrot.lane.b32.xlu1 %v1213_v62, %s6651_s20 }
 0x2cf   : > { %v1208_v0 = vpop.permute.xlu2 %1207 }
 0x2d0   : > { %1249 = vrot.lane.b32.xlu1 %v1213_v62, %s6634_s24  ;;  %v1232_v9 = vsel %vm6643_vm8, %v1208_v0, 0 }
 0x2d7   : > { %v1198_v1 = vpop.permute.xlu2 %1197  ;;  %v1200_v2 = vpop.permute.xlu0 %1199 }
 0x2d8   : > { %v4759_v3 = vsel %vm6643_vm8, %v1196_v19, %v1198_v1  ;;  %v1230_v4 = vsel %vm6643_vm8, %v1200_v2, 0  ;;  %v4763_v5 = vsel %vm6643_vm8, %v1198_v1, %v1200_v2 }
 0x2d9   : > { %1277 = vrot.lane.b32.xlu0 %v4759_v3, %s6651_s20  ;;  %1281 = vrot.lane.b32.xlu2 %v1230_v4, %s6651_s20 }
 0x2da   : > { %1279 = vrot.lane.b32.xlu1 %v4763_v5, %s6651_s20 }
 0x2e2   : > { %1241 = vrot.lane.b32.xlu1 %v4759_v3, %s6634_s24 }
 0x2e7   : > { %v1206_v6 = vpop.permute.xlu1 %1205 }
 0x2e8   : > { %v4773_v7 = vsel %vm6643_vm8, %v1206_v6, %v1208_v0  ;;  %v4776_v8 = vsel %vm6643_vm8, %v1204_v26, %v1206_v6 }
 0x2e9   : > { %1289 = vrot.lane.b32.xlu0 %v4773_v7, %s6651_s20  ;;  %1287 = vrot.lane.b32.xlu2 %v4776_v8, %s6651_s20 }
 0x2ea   : > { %1291 = vrot.lane.b32.xlu1 %v1232_v9, %s6651_s20 }
 0x2f1   : > { %1253 = vrot.lane.b32.xlu0 %v4773_v7, %s6634_s24  ;;  %1251 = vrot.lane.b32.xlu2 %v4776_v8, %s6634_s24 }
 0x2f2   : > { %1255 = vrot.lane.b32.xlu1 %v1232_v9, %s6634_s24 }
 0x2f9   : > { %1245 = vrot.lane.b32.xlu0 %v1230_v4, %s6634_s24  ;;  %1243 = vrot.lane.b32.xlu2 %v4763_v5, %s6634_s24 }
 0x2fa   : > { %1247 = vrot.lane.b32.xlu1 %v1227_v60, %s6634_s24 }
 0x301   : > { %1321 = vperm.xlu0 %4333, %v719_v10   ;;  %1237 = vrot.lane.b32.xlu2 %v1224_v61, %s6634_s24  ;;  %s6658_s24 = smov 124  }
 0x302   : > { %1326 = vperm.xlu1 %4334, %v720_v11  }
 0x309   : > { %1316 = vperm.xlu0 %4333, %v718_v12   ;;  %1311 = vperm.xlu2 %4335, %v717_v13  }
 0x312   : > { %v1276_v14 = vpop.permute.xlu2 %1275 }
 0x31a   : > { %v1274_v17 = vpop.permute.xlu2 %1273 }
 0x31b   : > { %v1293_v20 = vsel %vm6640_vm1, %v1274_v17, %v1276_v14 }
 0x32a   : > { %v1240_v16 = vpop.permute.xlu0 %1239 }
 0x332   : > { %v1284_v18 = vpop.permute.xlu0 %1283 }
 0x333   : > { %v1282_v63 = vpop.permute.xlu2 %1281 }
 0x33a   : > { %v1286_v30 = vpop.permute.xlu1 %1285 }
 0x33b   : > { %v1297_v15 = vsel %vm6640_vm1, %v1284_v18, %v1286_v30 }
 0x33c   : > { %1348 = vmatpush.bf16.msra.mxu1 %v1297_v15 }
 0x340   : > { %1349 = vmatpush.bf16.msra.mxu1 %v1293_v20 }
 0x342   : > { %v1250_v22 = vpop.permute.xlu1 %1249 }
 0x343   : > { %v1288_v24 = vpop.permute.xlu2 %1287 }
 0x344   : > { %v1298_v25 = vsel %vm6640_vm1, %v1286_v30, %v1288_v24 }
 0x345   : > { %1367 = vmatpush.bf16.msra.mxu3 %v1298_v25 }
 0x34b   : > { %v1278_v27 = vpop.permute.xlu0 %1277  ;;  %v1252_v32 = vpop.permute.xlu2 %1251 }
 0x34c   : > { %v1280_v28 = vpop.permute.xlu1 %1279  ;;  %v1294_v31 = vsel %vm6640_vm1, %v1276_v14, %v1278_v27  ;;  %v1262_v33 = vsel %vm6641_vm5, %v1250_v22, %v1252_v32 }
 0x34d   : > { %1368 = vmatpush.bf16.msra.mxu3 %v1294_v31  ;;  %v1295_v40 = vsel %vm6640_vm1, %v1278_v27, %v1280_v28  ;;  %v1296_v41 = vsel %vm6640_vm1, %v1280_v28, %v1282_v63 }
 0x351   : > { %1369 = vmatpush.bf16.msra.mxu3 %v1262_v33 }
 0x353   : > { %v1244_v43 = vpop.permute.xlu2 %1243 }
 0x354   : > { %v1242_v34 = vpop.permute.xlu1 %1241 }
 0x355   : > { %v1258_v35 = vsel %vm6641_vm5, %v1240_v16, %v1242_v34  ;;  %v1259_v47 = vsel %vm6641_vm5, %v1242_v34, %v1244_v43 }
 0x356   : > { %1370 = vmatpush.bf16.msra.mxu3 %v1258_v35 }
 0x35a   : > { %1371 = vmatpush.bf16.msra.mxu3 %v1213_v62 }
 0x35b   : > { %v1290_v21 = vpop.permute.xlu0 %1289  ;;  %v1238_v54 = vpop.permute.xlu2 %1237 }
 0x35c   : > { %v1292_v36 = vpop.permute.xlu1 %1291  ;;  %v1299_v37 = vsel %vm6640_vm1, %v1288_v24, %v1290_v21  ;;  %v1257_v51 = vsel %vm6641_vm5, %v1238_v54, %v1240_v16 }
 0x35d   : > { %1386 = vmatpush.bf16.msra.mxu0 %v1299_v37  ;;  %v1300_v38 = vsel %vm6640_vm1, %v1290_v21, %v1292_v36 }
 0x35e   : > { %1372 = vmatpush.bf16.msra.mxu3 %v4740_v58  ;;  %1405 = vmatpush.bf16.msra.mxu2 %v1300_v38 }
 0x361   : > { %3905 = vmatmul.msk.bf16.vlgmr.msra.gmra.mxu3 %vm1339_vm9, %v4238_v29  ;;  %1387 = vmatpush.bf16.msra.mxu0 %v1295_v40 }
 0x362   : > { %1406 = vmatpush.bf16.msra.mxu2 %v1296_v41 }
 0x363   : > { %v1254_v42 = vpop.permute.xlu0 %1253  ;;  %v1312_v23 = vpop.permute.xlu2 %1311 }
 0x364   : > { %v1256_v44 = vpop.permute.xlu1 %1255  ;;  %v1263_v45 = vsel %vm6641_vm5, %v1252_v32, %v1254_v42 }
 0x365   : > { %1388 = vmatpush.bf16.msra.mxu0 %v1263_v45  ;;  %v1264_v46 = vsel %vm6641_vm5, %v1254_v42, %v1256_v44 }
 0x366   : > { %1407 = vmatpush.bf16.msra.mxu2 %v1264_v46 }
 0x369   : > { %1389 = vmatpush.bf16.msra.mxu0 %v1259_v47 }
 0x36b   : > { %v1246_v48 = vpop.permute.xlu0 %1245 }
 0x36c   : > { %v1248_v49 = vpop.permute.xlu1 %1247  ;;  %v1260_v50 = vsel %vm6641_vm5, %v1244_v43, %v1246_v48 }
 0x36d   : > { %v1261_v52 = vsel %vm6641_vm5, %v1248_v49, %v1250_v22  ;;  %1390 = vmatpush.bf16.msra.mxu0 %v4776_v8  ;;  %1408 = vmatpush.bf16.msra.mxu2 %v1260_v50 }
 0x36e   : > { %1350 = vmatpush.bf16.msra.mxu1 %v1261_v52 }
 0x371   : > { %3906 = vmatmul.msk.bf16.gmra.mxu3 %vm1339_vm9, %v4239_v53  ;;  %1391 = vmatpush.bf16.msra.mxu0 %v4759_v3 }
 0x372   : > { %1351 = vmatpush.bf16.msra.mxu1 %v1257_v51  ;;  %1409 = vmatpush.bf16.msra.mxu2 %v4773_v7 }
 0x373   : > { %v4847_v56 = vpop.permute.xlu0 %1321 }
 0x374   : > { %3907 = vmatmul.msk.bf16.vlgmr.msra.gmra.mxu0 %vm1339_vm9, %v4238_v29  ;;  %v4862_v12 = vpop.permute.xlu1 %1326 }
 0x376   : > { %3900 = vmatpush.bf16.msk.msra.mxu1 %vm4828_vm10, %v4746_v59  ;;  %1410 = vmatpush.bf16.msra.mxu2 %v4763_v5 }
 0x379   : > { %3909 = vmatmul.msk.bf16.vlgmr.msra.gmra.mxu2 %vm1339_vm9, %v4238_v29 }
 0x37a   : > { %3902 = vmatpush.bf16.msk.msra.mxu1 %vm4828_vm10, %v4736_v57 }
 0x37b   : > { %v1317_v60 = vpop.permute.xlu0 %1316 }
 0x37d   : > { %3903 = vmatmul.msk.bf16.vlgmr.msra.gmra.mxu1 %vm1339_vm9, %v4238_v29 }
 0x384   : > { %3908 = vmatmul.msk.bf16.gmra.mxu0 %vm1339_vm9, %v4239_v53 }
 0x389   : > { %3910 = vmatmul.msk.bf16.gmra.mxu2 %vm1339_vm9, %v4239_v53 }
 0x38d   : > { %3904 = vmatmul.msk.bf16.gmra.mxu1 %vm1339_vm9, %v4239_v53 }
 0x3e4   : > { %v1374_v19 = vpop.f32.mrf.mxu3 }
 0x3e5   : > { %v1375_v58 = vadd.f32 %v1374_v19, %v1312_v23 }
 0x3e7   : > { %vm1423_vm11 = vcmp.ge.f32.partialorder %v1375_v58, 0.0  ;;  %v1439_v57 = vmul.f32 0.2, %v1375_v58 }
 0x3e9   : > { %v1455_v59 = vsel %vm1423_vm11, %v1375_v58, %v1439_v57 }
 0x3ea   : > { %1471 = vst [vmem:[%s4852_s23 + $0x8] sm:$0xff] %v1455_v59 }
 0x3ec   : > { %v1376_v61 = vpop.f32.mrf.mxu3 }
 0x3ed   : > { %v1377_v26 = vadd.f32 %v1376_v61, %v1317_v60 }
 0x3ef   : > { %vm1427_vm12 = vcmp.ge.f32.partialorder %v1377_v26, 0.0  ;;  %v1443_v62 = vmul.f32 0.2, %v1377_v26 }
 0x3f1   : > { %v1459_v0 = vsel %vm1427_vm12, %v1377_v26, %v1443_v62  ;;  %v1393_v1 = vpop.f32.mrf.mxu0 }
 0x3f2   : > { %1475 = vst [vmem:[%s4852_s23 + $0x28] sm:$0xff] %v1459_v0  ;;  %v1394_v2 = vadd.f32 %v1393_v1, %v1312_v23 }
 0x3f4   : > { %vm1424_vm13 = vcmp.ge.f32.partialorder %v1394_v2, 0.0  ;;  %v1440_v3 = vmul.f32 0.2, %v1394_v2  ;;  %v1379_v4 = vpop.f32.mrf.mxu3 }
 0x3f5   : > { %v1380_v5 = vadd.f32 %v1379_v4, %v4847_v56 }
 0x3f6   : > { %v1456_v6 = vsel %vm1424_vm13, %v1394_v2, %v1440_v3 }
 0x3f7   : > { %1472 = vst [vmem:[%s4852_s23 + $0x10] sm:$0xff] %v1456_v6  ;;  %vm1431_vm14 = vcmp.ge.f32.partialorder %v1380_v5, 0.0  ;;  %v1447_v7 = vmul.f32 0.2, %v1380_v5 }
 0x3f9   : > { %v4858_v8 = vsel %vm1431_vm14, %v1380_v5, %v1447_v7  ;;  %v1395_v9 = vpop.f32.mrf.mxu0 }
 0x3fa   : > { %1479 = vst [vmem:[%s4852_s23 + $0x48] sm:$0xff] %v4858_v8  ;;  %v1355_v10 = vpop.f32.mrf.mxu1  ;;  %v1396_v11 = vadd.f32 %v1395_v9, %v1317_v60 }
 0x3fb   : > { %v1356_v13 = vadd.f32 %v1355_v10, %v1312_v23 }
 0x3fc   : > { %vm1428_vm15 = vcmp.ge.f32.partialorder %v1396_v11, 0.0  ;;  %v1444_v14 = vmul.f32 0.2, %v1396_v11  ;;  %v1381_v16 = vpop.f32.mrf.mxu3  ;;  %v1412_v17 = vpop.f32.mrf.mxu2 }
 0x3fd   : > { %vm1422_vm7 = vcmp.ge.f32.partialorder %v1356_v13, 0.0  ;;  %v1438_v18 = vmul.f32 0.2, %v1356_v13  ;;  %v1382_v30 = vadd.f32 %v1381_v16, %v4862_v12  ;;  %v1413_v63 = vadd.f32 %v1412_v17, %v1312_v23 }
 0x3fe   : > { %v1460_v15 = vsel %vm1428_vm15, %v1396_v11, %v1444_v14 }
 0x3ff   : > { %v1454_v20 = vsel %vm1422_vm7, %v1356_v13, %v1438_v18  ;;  %1476 = vst [vmem:[%s4852_s23 + $0x30] sm:$0xff] %v1460_v15  ;;  %vm1435_vm11 = vcmp.ge.f32.partialorder %v1382_v30, 0.0  ;;  %v1451_v22 = vmul.f32 0.2, %v1382_v30  ;;  %vm1425_vm12 = vcmp.ge.f32.partialorder %v1413_v63, 0.0 }
 0x400   : > { %1470 = vst [vmem:[%s4852_s23] sm:$0xff] %v1454_v20  ;;  %v1441_v24 = vmul.f32 0.2, %v1413_v63  ;;  %v1506_v21 = vpack.c.bf16 %v1455_v59, %v1454_v20 }
 0x401   : > { %v4867_v25 = vsel %vm1435_vm11, %v1382_v30, %v1451_v22  ;;  %v1398_v27 = vpop.f32.mrf.mxu0 }
 0x402   : > { %1483 = vst [vmem:[%s4852_s23 + $0x68] sm:$0xff] %v4867_v25  ;;  %v1457_v28 = vsel %vm1425_vm12, %v1413_v63, %v1441_v24  ;;  %v1357_v31 = vpop.f32.mrf.mxu1  ;;  %v1399_v32 = vadd.f32 %v1398_v27, %v4847_v56  ;;  %v1523_v45 = vunpack.c.h.b16 %v1506_v21  ;;  %v1522_v46 = vunpack.c.l.b16 %v1506_v21 }
 0x403   : > { %1473 = vst [vmem:[%s4852_s23 + $0x18] sm:$0xff] %v1457_v28  ;;  %v1358_v33 = vadd.f32 %v1357_v31, %v1317_v60  ;;  %v1507_v29 = vpack.c.bf16 %v1457_v28, %v1456_v6 }
 0x404   : > { %vm1432_vm13 = vcmp.ge.f32.partialorder %v1399_v32, 0.0  ;;  %v1448_v34 = vmul.f32 0.2, %v1399_v32  ;;  %v1414_v35 = vpop.f32.mrf.mxu2 }
 0x405   : > { %vm1426_vm14 = vcmp.ge.f32.partialorder %v1358_v33, 0.0  ;;  %v1442_v36 = vmul.f32 0.2, %v1358_v33  ;;  %v1415_v37 = vadd.f32 %v1414_v35, %v1317_v60  ;;  %v1524_v54 = vunpack.c.l.b16 %v1507_v29 }
 0x406   : > { %v1464_v38 = vsel %vm1432_vm13, %v1399_v32, %v1448_v34 }
 0x407   : > { %v1458_v40 = vsel %vm1426_vm14, %v1358_v33, %v1442_v36  ;;  %1480 = vst [vmem:[%s4852_s23 + $0x50] sm:$0xff] %v1464_v38  ;;  %vm1429_vm15 = vcmp.ge.f32.partialorder %v1415_v37, 0.0  ;;  %v1445_v41 = vmul.f32 0.2, %v1415_v37 }
 0x408   : > { %1474 = vst [vmem:[%s4852_s23 + $0x20] sm:$0xff] %v1458_v40  ;;  %v1508_v42 = vpack.c.bf16 %v1459_v0, %v1458_v40 }
 0x409   : > { %v1461_v43 = vsel %vm1429_vm15, %v1415_v37, %v1445_v41  ;;  %v1400_v44 = vpop.f32.mrf.mxu0 }
 0x40a   : > { %1477 = vst [vmem:[%s4852_s23 + $0x38] sm:$0xff] %v1461_v43  ;;  %v1509_v47 = vpack.c.bf16 %v1461_v43, %v1460_v15  ;;  %v1360_v48 = vpop.f32.mrf.mxu1  ;;  %v1401_v49 = vadd.f32 %v1400_v44, %v4862_v12  ;;  %v1527_v50 = vunpack.c.h.b16 %v1508_v42  ;;  %v1526_v52 = vunpack.c.l.b16 %v1508_v42 }
 0x40b   : > { %v1361_v53 = vadd.f32 %v1360_v48, %v4847_v56 }
 0x40c   : > { %vm1436_vm7 = vcmp.ge.f32.partialorder %v1401_v49, 0.0  ;;  %v1452_v51 = vmul.f32 0.2, %v1401_v49  ;;  %v1417_v23 = vpop.f32.mrf.mxu2  ;;  %v1539_v19 = vpack.c.b16 %v1527_v50, %v1523_v45  ;;  %v1538_v58 = vpack.c.b16 %v1526_v52, %v1522_v46 }
 0x40d   : > { %vm1430_vm11 = vcmp.ge.f32.partialorder %v1361_v53, 0.0  ;;  %v1446_v57 = vmul.f32 0.2, %v1361_v53  ;;  %v1418_v59 = vadd.f32 %v1417_v23, %v4847_v56  ;;  %v1528_v60 = vunpack.c.l.b16 %v1509_v47 }
 0x40e   : > { %v1468_v61 = vsel %vm1436_vm7, %v1401_v49, %v1452_v51  ;;  %1548 = vrot.lane.b32.xlu2 %v1539_v19, %s4384_s19  ;;  %1546 = vrot.lane.b32.xlu1 %v1538_v58, %s4384_s19  ;;  %v1529_v1 = vunpack.c.h.b16 %v1509_v47  ;;  %v1525_v56 = vunpack.c.h.b16 %v1507_v29 }
 0x40f   : > { %v1462_v26 = vsel %vm1430_vm11, %v1361_v53, %v1446_v57  ;;  %1484 = vst [vmem:[%s4852_s23 + $0x70] sm:$0xff] %v1468_v61  ;;  %vm1433_vm12 = vcmp.ge.f32.partialorder %v1418_v59, 0.0  ;;  %v1449_v62 = vmul.f32 0.2, %v1418_v59  ;;  %v1540_v0 = vpack.c.b16 %v1528_v60, %v1524_v54 }
 0x410   : > { %1478 = vst [vmem:[%s4852_s23 + $0x40] sm:$0xff] %v1462_v26  ;;  %v1541_v6 = vpack.c.b16 %v1529_v1, %v1525_v56  ;;  %v1510_v7 = vpack.c.bf16 %v4858_v8, %v1462_v26 }
 0x411   : > { %v1465_v2 = vsel %vm1433_vm12, %v1418_v59, %v1449_v62  ;;  %1550 = vrot.lane.b32.xlu0 %v1540_v0, %s4384_s19 }
 0x412   : > { %1481 = vst [vmem:[%s4852_s23 + $0x58] sm:$0xff] %v1465_v2  ;;  %v1362_v3 = vpop.f32.mrf.mxu1  ;;  %v1511_v14 = vpack.c.bf16 %v1465_v2, %v1464_v38  ;;  %v1531_v18 = vunpack.c.h.b16 %v1510_v7  ;;  %v1530_v15 = vunpack.c.l.b16 %v1510_v7 }
 0x413   : > { %v1363_v4 = vadd.f32 %v1362_v3, %v4862_v12 }
 0x414   : > { %v1419_v5 = vpop.f32.mrf.mxu2  ;;  %v1532_v24 = vunpack.c.l.b16 %v1511_v14 }
 0x415   : > { %vm1434_vm13 = vcmp.ge.f32.partialorder %v1363_v4, 0.0  ;;  %v1450_v9 = vmul.f32 0.2, %v1363_v4  ;;  %v1420_v10 = vadd.f32 %v1419_v5, %v4862_v12 }
 0x416   : > { %1552 = vrot.lane.b32.xlu2 %v1541_v6, %s4384_s19 }
 0x417   : > { %v1466_v11 = vsel %vm1434_vm13, %v1363_v4, %v1450_v9  ;;  %vm1437_vm14 = vcmp.ge.f32.partialorder %v1420_v10, 0.0  ;;  %v1453_v13 = vmul.f32 0.2, %v1420_v10 }
 0x418   : > { %1482 = vst [vmem:[%s4852_s23 + $0x60] sm:$0xff] %v1466_v11  ;;  %v1512_v16 = vpack.c.bf16 %v4867_v25, %v1466_v11  ;;  %v1533_v25 = vunpack.c.h.b16 %v1511_v14 }
 0x419   : > { %v1469_v17 = vsel %vm1437_vm14, %v1420_v10, %v1453_v13 }
 0x41a   : > { %1485 = vst [vmem:[%s4852_s23 + $0x78] sm:$0xff] %v1469_v17  ;;  %v1513_v30 = vpack.c.bf16 %v1469_v17, %v1468_v61  ;;  %v1535_v63 = vunpack.c.h.b16 %v1512_v16  ;;  %v1534_v8 = vunpack.c.l.b16 %v1512_v16  ;;  %s6657_s23 = smov 127  }
 0x41c   : > { %v1543_v20 = vpack.c.b16 %v1535_v63, %v1531_v18  ;;  %v1542_v22 = vpack.c.b16 %v1534_v8, %v1530_v15  ;;  %v1536_v12 = vunpack.c.l.b16 %v1513_v30  ;;  %v1537_v28 = vunpack.c.h.b16 %v1513_v30 }
 0x41e   : > { %1556 = vrot.lane.b32.xlu2 %v1543_v20, %s4384_s19  ;;  %1554 = vrot.lane.b32.xlu1 %v1542_v22, %s4384_s19  ;;  %v1544_v27 = vpack.c.b16 %v1536_v12, %v1532_v24  ;;  %v1545_v31 = vpack.c.b16 %v1537_v28, %v1533_v25 }
 0x420   : > { %1558 = vrot.lane.b32.xlu0 %v1544_v27, %s4384_s19 }
 0x426   : > { %1560 = vrot.lane.b32.xlu1 %v1545_v31, %s4384_s19  ;;  %s6656_s19 = smov 2  }
 0x468   : > { %v1549_v32 = vpop.permute.xlu2 %1548 }
 0x470   : > { %v1553_v37 = vpop.permute.xlu2 %1552 }
 0x471   : > { %v1573_v29 = vsel %vm745_vm0, %v1553_v37, 0 }
 0x478   : > { %v1557_v42 = vpop.permute.xlu2 %1556 }
 0x480   : > { %v1547_v33 = vpop.permute.xlu1 %1546 }
 0x481   : > { %v1562_v34 = vsel %vm745_vm0, %v1547_v33, %v1549_v32  ;;  %v1569_v35 = vsel %vm745_vm0, 0, %v1547_v33 }
 0x482   : > { %1608 = vrot.lane.b32.xlu0 %v1569_v35, %s6651_s20  ;;  %1610 = vrot.lane.b32.xlu1 %v1562_v34, %s6651_s20 }
 0x483   : > { %v1551_v21 = vpop.permute.xlu0 %1550 }
 0x484   : > { %v1563_v36 = vsel %vm745_vm0, %v1549_v32, %v1551_v21  ;;  %v1564_v38 = vsel %vm745_vm0, %v1551_v21, %v1553_v37 }
 0x485   : > { %1612 = vrot.lane.b32.xlu2 %v1563_v36, %s6651_s20 }
 0x48a   : > { %1638 = vrot.lane.b32.xlu0 %v1562_v34, %s6655_s21  ;;  %1640 = vrot.lane.b32.xlu1 %v1563_v36, %s6655_s21 }
 0x48d   : > { %1642 = vrot.lane.b32.xlu2 %v1564_v38, %s6655_s21 }
 0x490   : > { %v1555_v40 = vpop.permute.xlu1 %1554 }
 0x491   : > { %v1565_v44 = vsel %vm745_vm0, %v1555_v40, %v1557_v42  ;;  %v1571_v45 = vsel %vm745_vm0, 0, %v1555_v40 }
 0x492   : > { %1614 = vrot.lane.b32.xlu0 %v1564_v38, %s6651_s20  ;;  %1694 = vrot.lane.b32.xlu1 %v1562_v34, %s6656_s19  ;;  %v1559_v41 = vpop.permute.xlu0 %1558 }
 0x493   : > { %v1566_v43 = vsel %vm745_vm0, %v1557_v42, %v1559_v41 }
 0x495   : > { %1636 = vrot.lane.b32.xlu2 %v1569_v35, %s6655_s21 }
 0x498   : > { %v1561_v46 = vpop.permute.xlu1 %1560 }
 0x499   : > { %v1567_v47 = vsel %vm745_vm0, %v1559_v41, %v1561_v46  ;;  %v1575_v58 = vsel %vm745_vm0, %v1561_v46, 0  ;;  %vm2016_vm0 = vcmask 523264  }
 0x49a   : > { %1692 = vrot.lane.b32.xlu0 %v1569_v35, %s6656_s19  ;;  %1586 = vrot.lane.b32.xlu1 %v1564_v38, %s6657_s23 }
 0x49d   : > { %1582 = vrot.lane.b32.xlu2 %v1562_v34, %s6657_s23 }
 0x4a2   : > { %1584 = vrot.lane.b32.xlu0 %v1563_v36, %s6657_s23  ;;  %1666 = vrot.lane.b32.xlu1 %v1562_v34, %s6658_s24 }
 0x4a5   : > { %1668 = vrot.lane.b32.xlu2 %v1563_v36, %s6658_s24 }
 0x4aa   : > { %1664 = vrot.lane.b32.xlu0 %v1569_v35, %s6658_s24  ;;  %1716 = vrot.lane.b32.xlu1 %v1562_v34, %s6659_s22 }
 0x4ad   : > { %1718 = vrot.lane.b32.xlu2 %v1563_v36, %s6659_s22 }
 0x4b2   : > { %1714 = vrot.lane.b32.xlu0 %v1569_v35, %s6659_s22  ;;  %1696 = vrot.lane.b32.xlu1 %v1563_v36, %s6656_s19 }
 0x4b5   : > { %1616 = vrot.lane.b32.xlu2 %v1573_v29, %s6651_s20 }
 0x4ba   : > { %1580 = vrot.lane.b32.xlu0 %v1569_v35, %s6657_s23  ;;  %1670 = vrot.lane.b32.xlu1 %v1564_v38, %s6658_s24 }
 0x4bd   : > { %1720 = vrot.lane.b32.xlu2 %v1564_v38, %s6659_s22 }
 0x4c2   : > { %1644 = vrot.lane.b32.xlu0 %v1573_v29, %s6655_s21  ;;  %1672 = vrot.lane.b32.xlu1 %v1573_v29, %s6658_s24 }
 0x4c5   : > { %1698 = vrot.lane.b32.xlu2 %v1564_v38, %s6656_s19 }
 0x4ca   : > { %1588 = vrot.lane.b32.xlu0 %v1573_v29, %s6657_s23  ;;  %1722 = vrot.lane.b32.xlu1 %v1573_v29, %s6659_s22 }
 0x4cd   : > { %1622 = vrot.lane.b32.xlu2 %v1566_v43, %s6651_s20 }
 0x4d2   : > { %1618 = vrot.lane.b32.xlu0 %v1571_v45, %s6651_s20  ;;  %1620 = vrot.lane.b32.xlu1 %v1565_v44, %s6651_s20 }
 0x4d5   : > { %1652 = vrot.lane.b32.xlu2 %v1567_v47, %s6655_s21 }
 0x4da   : > { %1648 = vrot.lane.b32.xlu0 %v1565_v44, %s6655_s21  ;;  %1650 = vrot.lane.b32.xlu1 %v1566_v43, %s6655_s21 }
 0x4dd   : > { %1702 = vrot.lane.b32.xlu2 %v1565_v44, %s6656_s19 }
 0x4df   : > { %v1613_v48 = vpop.permute.xlu2 %1612 }
 0x4e2   : > { %1646 = vrot.lane.b32.xlu0 %v1571_v45, %s6655_s21  ;;  %1624 = vrot.lane.b32.xlu1 %v1567_v47, %s6651_s20 }
 0x4e5   : > { %1596 = vrot.lane.b32.xlu2 %v1567_v47, %s6657_s23 }
 0x4e7   : > { %v4944_v49 = vpop.permute.xlu2 %1642 }
 0x4ea   : > { %1592 = vrot.lane.b32.xlu0 %v1565_v44, %s6657_s23  ;;  %1700 = vrot.lane.b32.xlu1 %v1571_v45, %s6656_s19 }
 0x4ed   : > { %1674 = vrot.lane.b32.xlu2 %v1571_v45, %s6658_s24 }
 0x4ef   : > { %v1637_v50 = vpop.permute.xlu2 %1636 }
 0x4f2   : > { %1676 = vrot.lane.b32.xlu0 %v1565_v44, %s6658_s24  ;;  %1594 = vrot.lane.b32.xlu1 %v1566_v43, %s6657_s23 }
 0x4f4   : > { %v1609_v52 = vpop.permute.xlu0 %1608  ;;  %v1611_v53 = vpop.permute.xlu1 %1610 }
 0x4f5   : > { %1724 = vrot.lane.b32.xlu2 %v1571_v45, %s6659_s22  ;;  %v4978_v3 = vsel %vm6640_vm1, %v1609_v52, %v1611_v53  ;;  %v5005_v18 = vsel %vm6640_vm1, %v1611_v53, %v1613_v48 }
 0x4f7   : > { %v1583_v54 = vpop.permute.xlu2 %1582 }
 0x4fa   : > { %1726 = vrot.lane.b32.xlu0 %v1565_v44, %s6659_s22  ;;  %1678 = vrot.lane.b32.xlu1 %v1566_v43, %s6658_s24 }
 0x4fc   : > { %v1639_v51 = vpop.permute.xlu0 %1638  ;;  %v1641_v23 = vpop.permute.xlu1 %1640 }
 0x4fd   : > { %1590 = vrot.lane.b32.xlu2 %v1571_v45, %s6657_s23  ;;  %v1657_v56 = vsel %vm797_vm4, %v1639_v51, %v1641_v23  ;;  %v1658_v7 = vsel %vm797_vm4, %v1641_v23, %v4944_v49  ;;  %v1656_v14 = vsel %vm797_vm4, %v1637_v50, %v1639_v51 }
 0x4ff   : > { %v4955_v19 = vpop.permute.xlu2 %1668 }
 0x502   : > { %1654 = vrot.lane.b32.xlu0 %v1575_v58, %s6655_s21  ;;  %1728 = vrot.lane.b32.xlu1 %v1566_v43, %s6659_s22  ;;  %s655_s21 = scalar_lea.vmem %s6620_s6, %s4630_s16 }
 0x504   : > { %v4960_v57 = vpop.permute.xlu0 %1614  ;;  %v4962_v59 = vpop.permute.xlu1 %1694 }
 0x505   : > { %1730 = vrot.lane.b32.xlu2 %v1567_v47, %s6659_s22  ;;  %v4991_v9 = vsel %vm6640_vm1, %v1613_v48, %v4960_v57 }
 0x507   : > { %v1719_v60 = vpop.permute.xlu2 %1718 }
 0x50a   : > { %1704 = vrot.lane.b32.xlu0 %v1566_v43, %s6656_s19  ;;  %1626 = vrot.lane.b32.xlu1 %v1575_v58, %s6651_s20 }
 0x50c   : > { %v1693_v61 = vpop.permute.xlu0 %1692  ;;  %v4967_v26 = vpop.permute.xlu1 %1586 }
 0x50d   : > { %1598 = vrot.lane.b32.xlu2 %v1575_v58, %s6657_s23  ;;  %v1708_v16 = vsel %vm6642_vm2, %v1693_v61, %v4962_v59 }
 0x50f   : > { %v4970_v62 = vpop.permute.xlu2 %1616 }
 0x510   : > { %v5047_v38 = vsel %vm6640_vm1, %v4960_v57, %v4970_v62 }
 0x512   : > { %1680 = vrot.lane.b32.xlu0 %v1567_v47, %s6658_s24  ;;  %1706 = vrot.lane.b32.xlu1 %v1567_v47, %s6656_s19  ;;  %s4280_s19 = smul.u32 48, %s6706_s25 }
 0x514   : > { %v1585_v0 = vpop.permute.xlu0 %1584  ;;  %v1667_v1 = vpop.permute.xlu1 %1666  ;;  %s5248_s17 = scalar_lea.vmem %s6619_s5, %s4280_s19 }
 0x515   : > { %1682 = vrot.lane.b32.xlu2 %v1575_v58, %s6658_s24  ;;  %v1602_v15 = vsel %vm6641_vm5, %v1585_v0, %v4967_v26  ;;  %v1685_v8 = vsel %vm812_vm3, %v1667_v1, %v4955_v19  ;;  %v1601_v22 = vsel %vm6641_vm5, %v1583_v54, %v1585_v0  ;;  %s665_s24 = scalar_lea.vmem %s6622_s8, %s4630_s16 }
 0x517   : > { %v4975_v2 = vpop.permute.xlu2 %1720 }
 0x518   : > { %v1736_v21 = vsel %vm839_vm6, %v1719_v60, %v4975_v2 }
 0x51a   : > { %1812 = vrot.lane.b32.xlu1 %v4978_v3, %s6651_s20  ;;  %1834 = vrot.lane.b32.xlu0 %v1657_v56, %s6651_s20 }
 0x51c   : > { %v1665_v4 = vpop.permute.xlu0 %1664  ;;  %v1717_v5 = vpop.permute.xlu1 %1716 }
 0x51d   : > { %1732 = vrot.lane.b32.xlu2 %v1575_v58, %s6659_s22  ;;  %v1684_v27 = vsel %vm812_vm3, %v1665_v4, %v1667_v1  ;;  %v1735_v34 = vsel %vm839_vm6, %v1717_v5, %v1719_v60  ;;  %s6449_s22 = scalar_lea.vmem %s6623_s9, %s4630_s16  ;;  %s3846_s16 = sshll.u32 %s6704_s26, 3 }
 0x51f   : > { %v4985_v6 = vpop.permute.xlu2 %1698 }
 0x522   : > { %1836 = vrot.lane.b32.xlu1 %v1658_v7, %s6651_s20  ;;  %1816 = vrot.lane.b32.xlu0 %v4991_v9, %s6651_s20 }
 0x524   : > { %v1715_v10 = vpop.permute.xlu0 %1714  ;;  %v4996_v11 = vpop.permute.xlu1 %1696 }
 0x525   : > { %1872 = vrot.lane.b32.xlu2 %v1693_v61, %s6651_s20  ;;  %v1734_v25 = vsel %vm839_vm6, %v1715_v10, %v1717_v5 }
 0x527   : > { %v1623_v13 = vpop.permute.xlu2 %1622 }
 0x52a   : > { %1832 = vrot.lane.b32.xlu1 %v1656_v14, %s6651_s20  ;;  %1874 = vrot.lane.b32.xlu0 %v1708_v16, %s6651_s20 }
 0x52c   : > { %v1581_v17 = vpop.permute.xlu0 %1580  ;;  %v5007_v30 = vpop.permute.xlu1 %1670 }
 0x52d   : > { %1814 = vrot.lane.b32.xlu2 %v5005_v18, %s6651_s20  ;;  %v1600_v28 = vsel %vm6641_vm5, %v1581_v17, %v1583_v54  ;;  %v1710_v17 = vsel %vm6642_vm2, %v4996_v11, %v4985_v6 }
 0x52f   : > { %v5011_v63 = vpop.permute.xlu2 %1652 }
 0x532   : > { %1796 = vrot.lane.b32.xlu0 %v1602_v15, %s6651_s20  ;;  %1854 = vrot.lane.b32.xlu1 %v1685_v8, %s6651_s20 }
 0x534   : > { %v5019_v20 = vpop.permute.xlu0 %1644  ;;  %v5022_v24 = vpop.permute.xlu1 %1672 }
 0x535   : > { %1794 = vrot.lane.b32.xlu2 %v1601_v22, %s6651_s20  ;;  %v1659_v43 = vsel %vm797_vm4, %v4944_v49, %v5019_v20  ;;  %v1709_v22 = vsel %vm6642_vm2, %v4962_v59, %v4996_v11 }
 0x537   : > { %v5025_v12 = vpop.permute.xlu2 %1702 }
 0x53a   : > { %1792 = vrot.lane.b32.xlu1 %v1600_v28, %s6651_s20  ;;  %1852 = vrot.lane.b32.xlu0 %v1684_v27, %s6651_s20 }
 0x53c   : > { %v5032_v31 = vpop.permute.xlu0 %1588  ;;  %v5034_v32 = vpop.permute.xlu1 %1722 }
 0x53d   : > { %1892 = vrot.lane.b32.xlu2 %v1734_v25, %s6651_s20 }
 0x53f   : > { %v5037_v33 = vpop.permute.xlu2 %1596 }
 0x542   : > { %1894 = vrot.lane.b32.xlu0 %v1735_v34, %s6651_s20 }
 0x544   : > { %v1619_v35 = vpop.permute.xlu0 %1618  ;;  %v1621_v36 = vpop.permute.xlu1 %1620 }
 0x545   : > { %1896 = vrot.lane.b32.xlu2 %v1736_v21, %s6651_s20  ;;  %v5052_v40 = vsel %vm6640_vm1, %v1621_v36, %v1623_v13  ;;  %v5076_v58 = vsel %vm6640_vm1, %v1619_v35, %v1621_v36  ;;  %v1603_v36 = vsel %vm6641_vm5, %v4967_v26, %v5032_v31 }
 0x547   : > { %v1675_v37 = vpop.permute.xlu2 %1674 }
 0x54a   : > { %1818 = vrot.lane.b32.xlu0 %v5047_v38, %s6651_s20 }
 0x54c   : > { %v1649_v29 = vpop.permute.xlu0 %1648  ;;  %v1651_v41 = vpop.permute.xlu1 %1650 }
 0x54d   : > { %1824 = vrot.lane.b32.xlu2 %v5052_v40, %s6651_s20  ;;  %v1661_v48 = vsel %vm797_vm4, %v1649_v29, %v1651_v41  ;;  %v1662_v1 = vsel %vm797_vm4, %v1651_v41, %v5011_v63 }
 0x54f   : > { %v1725_v42 = vpop.permute.xlu2 %1724 }
 0x552   : > { %1838 = vrot.lane.b32.xlu0 %v1659_v43, %s6651_s20  ;;  %v1686_v43 = vsel %vm812_vm3, %v4955_v19, %v5007_v30  ;;  %v1687_v19 = vsel %vm812_vm3, %v5007_v30, %v5022_v24 }
 0x554   : > { %v1647_v44 = vpop.permute.xlu0 %1646  ;;  %v1625_v45 = vpop.permute.xlu1 %1624 }
 0x555   : > { %v1660_v46 = vsel %vm797_vm4, %v1647_v44, %v1649_v29  ;;  %v5071_v54 = vsel %vm6640_vm1, %v1623_v13, %v1625_v45 }
 0x556   : > { %1842 = vrot.lane.b32.xlu2 %v1660_v46, %s6651_s20 }
 0x557   : > { %v1591_v47 = vpop.permute.xlu2 %1590 }
 0x55a   : > { %1844 = vrot.lane.b32.xlu0 %v1661_v48, %s6651_s20 }
 0x55c   : > { %v1593_v50 = vpop.permute.xlu0 %1592  ;;  %v1701_v52 = vpop.permute.xlu1 %1700 }
 0x55d   : > { %v1711_v53 = vsel %vm6642_vm2, %v1701_v52, %v5025_v12  ;;  %1882 = vrot.lane.b32.xlu1 %v1701_v52, %s6651_s20  ;;  %v1604_v13 = vsel %vm6641_vm5, %v1591_v47, %v1593_v50 }
 0x55e   : > { %1884 = vrot.lane.b32.xlu2 %v1711_v53, %s6651_s20 }
 0x55f   : > { %v5068_v49 = vpop.permute.xlu2 %1730 }
 0x562   : > { %1826 = vrot.lane.b32.xlu0 %v5071_v54, %s6651_s20 }
 0x564   : > { %v1677_v51 = vpop.permute.xlu0 %1676  ;;  %v1595_v23 = vpop.permute.xlu1 %1594 }
 0x565   : > { %1822 = vrot.lane.b32.xlu1 %v5076_v58, %s6651_s20  ;;  %v1605_v60 = vsel %vm6641_vm5, %v1593_v50, %v1595_v23  ;;  %v1606_v7 = vsel %vm6641_vm5, %v1595_v23, %v5037_v33  ;;  %v1688_v15 = vsel %vm812_vm3, %v1675_v37, %v1677_v51 }
 0x567   : > { %v1599_v57 = vpop.permute.xlu2 %1598 }
 0x568   : > { %v1607_v11 = vsel %vm6641_vm5, %v5037_v33, %v1599_v57 }
 0x56a   : > { %1804 = vrot.lane.b32.xlu0 %v1605_v60, %s6651_s20 }
 0x56c   : > { %v1727_v61 = vpop.permute.xlu0 %1726  ;;  %v1679_v0 = vpop.permute.xlu1 %1678 }
 0x56d   : > { %v1689_v56 = vsel %vm812_vm3, %v1677_v51, %v1679_v0  ;;  %1846 = vrot.lane.b32.xlu1 %v1662_v1, %s6651_s20  ;;  %v1738_v5 = vsel %vm839_vm6, %v1725_v42, %v1727_v61  ;;  %v1737_v51 = vsel %vm839_vm6, %v4975_v2, %v5034_v32 }
 0x56e   : > { %1864 = vrot.lane.b32.xlu2 %v1689_v56, %s6651_s20  ;;  %v1497_v56 = vld [vmem:[%s655_s21 + $0x18] sm:$0xff] }
 0x56f   : > { %v5087_v4 = vpop.permute.xlu2 %1682 }
 0x572   : > { %1902 = vrot.lane.b32.xlu0 %v1738_v5, %s6651_s20 }
 0x574   : > { %v1655_v10 = vpop.permute.xlu0 %1654  ;;  %v1729_v16 = vpop.permute.xlu1 %1728 }
 0x575   : > { %1806 = vrot.lane.b32.xlu1 %v1606_v7, %s6651_s20  ;;  %v1739_v34 = vsel %vm839_vm6, %v1727_v61, %v1729_v16  ;;  %v1740_v37 = vsel %vm839_vm6, %v1729_v16, %v5068_v49  ;;  %v1663_v41 = vsel %vm797_vm4, %v5011_v63, %v1655_v10  ;;  %v1496_v16 = vld [vmem:[%s655_s21 + $0x10] sm:$0xff] }
 0x576   : > { %1802 = vrot.lane.b32.xlu2 %v1604_v13, %s6651_s20 }
 0x577   : > { %v1733_v14 = vpop.permute.xlu2 %1732 }
 0x578   : > { %v1741_v60 = vsel %vm839_vm6, %v5068_v49, %v1733_v14  ;;  %v1494_v49 = vld [vmem:[%s655_s21] sm:$0xff] }
 0x57a   : > { %1878 = vrot.lane.b32.xlu0 %v1710_v17, %s6651_s20 }
 0x57c   : > { %v1705_v8 = vpop.permute.xlu0 %1704  ;;  %v1627_v25 = vpop.permute.xlu1 %1626 }
 0x57d   : > { %1862 = vrot.lane.b32.xlu1 %v1688_v15, %s6651_s20  ;;  %v1712_v28 = vsel %vm6642_vm2, %v5025_v12, %v1705_v8  ;;  %v5111_v21 = vsel %vm6640_vm1, %v1625_v45, %v1627_v25 }
 0x57e   : > { %1876 = vrot.lane.b32.xlu2 %v1709_v22, %s6651_s20 }
 0x57f   : > { %v1873_v27 = vpop.permute.xlu2 %1872 }
 0x582   : > { %1886 = vrot.lane.b32.xlu0 %v1712_v28, %s6651_s20 }
 0x584   : > { %v1681_v35 = vpop.permute.xlu0 %1680  ;;  %v1707_v26 = vpop.permute.xlu1 %1706 }
 0x585   : > { %1904 = vrot.lane.b32.xlu1 %v1739_v34, %s6651_s20  ;;  %v1691_v33 = vsel %vm812_vm3, %v1681_v35, %v5087_v4  ;;  %v1713_v63 = vsel %vm6642_vm2, %v1705_v8, %v1707_v26 }
 0x586   : > { %1828 = vrot.lane.b32.xlu2 %v5111_v21, %s6651_s20 }
 0x587   : > { %v5116_v59 = vpop.permute.xlu2 %1814 }
 0x58a   : > { %1808 = vrot.lane.b32.xlu0 %v1607_v11, %s6651_s20 }
 0x58c   : > { %v5121_v12 = vpop.permute.xlu0 %1834  ;;  %v1813_v48 = vpop.permute.xlu1 %1812 }
 0x58d   : > { %1798 = vrot.lane.b32.xlu1 %v1603_v36, %s6651_s20  ;;  %v1920_v28 = vsel %vm6640_vm1, %v1813_v48, %v5116_v59 }
 0x58e   : > { %1906 = vrot.lane.b32.xlu2 %v1740_v37, %s6651_s20 }
 0x58f   : > { %v5130_v29 = vpop.permute.xlu2 %1794 }
 0x592   : > { %1868 = vrot.lane.b32.xlu0 %v1691_v33, %s6651_s20 }
 0x594   : > { %v5137_v42 = vpop.permute.xlu0 %1816  ;;  %v5172_v30 = vpop.permute.xlu1 %1836 }
 0x595   : > { %1848 = vrot.lane.b32.xlu1 %v1663_v41, %s6651_s20  ;;  %v5146_v44 = vsel %vm6640_vm1, %v5116_v59, %v5137_v42  ;;  %v1929_v37 = vsel %vm6640_vm1, %v5121_v12, %v5172_v30 }
 0x596   : > { %1856 = vrot.lane.b32.xlu2 %v1686_v43, %s6651_s20  ;;  %v3913_v43 = vld [vmem:[%s5248_s17] sm:$0xf] }
 0x597   : > { %v1893_v45 = vpop.permute.xlu2 %1892 }
 0x59a   : > { %1840 = vrot.lane.b32.xlu0 %v5019_v20, %s6651_s20  ;;  %v1690_v20 = vsel %vm812_vm3, %v1679_v0, %v1681_v35 }
 0x59c   : > { %v5152_v46 = vpop.permute.xlu0 %1874 }
 0x59d   : > { %1888 = vrot.lane.b32.xlu1 %v1713_v63, %s6651_s20  ;;  %v5160_v47 = vsel %vm6640_vm1, %v1873_v27, %v5152_v46 }
 0x59e   : > { %1858 = vrot.lane.b32.xlu2 %v1687_v19, %s6651_s20 }
 0x59f   : > { %v5165_v50 = vpop.permute.xlu2 %1896 }
 0x5a2   : > { %1810 = vrot.lane.b32.xlu0 %v1599_v57, %s6651_s20 }
 0x5a4   : > { %v5167_v52 = vpop.permute.xlu0 %1796 }
 0x5a5   : > { %1866 = vrot.lane.b32.xlu1 %v1690_v20, %s6651_s20 }
 0x5a6   : > { %1820 = vrot.lane.b32.xlu2 %v4970_v62, %s6651_s20  ;;  %v1833_v62 = vpop.permute.xlu1 %1832 }
 0x5a7   : > { %v5181_v23 = vpop.permute.xlu2 %1824 }
 0x5aa   : > { %1910 = vrot.lane.b32.xlu0 %v1733_v14, %s6651_s20  ;;  %v1928_v14 = vsel %vm6640_vm1, %v1833_v62, %v5121_v12  ;;  %v1913_v62 = vsel %vm6640_vm1, %v5130_v29, %v5167_v52 }
 0x5ac   : > { %v5175_v53 = vpop.permute.xlu0 %1852 }
 0x5ad   : > { %1850 = vrot.lane.b32.xlu1 %v1655_v10, %s6651_s20 }
 0x5ae   : > { %1898 = vrot.lane.b32.xlu2 %v1737_v51, %s6651_s20  ;;  %v3915_v51 = vld [vmem:[%s5248_s17 + $0xc] sm:$0xf0] }
 0x5b0   : > { %v1843_v2 = vpop.permute.xlu2 %1842 }
 0x5b2   : > { %1900 = vrot.lane.b32.xlu0 %v5034_v32, %s6651_s20  ;;  %v5204_v32 = vpop.permute.xlu1 %1854 }
 0x5b4   : > { %v5186_v57 = vpop.permute.xlu0 %1894 }
 0x5b5   : > { %1830 = vrot.lane.b32.xlu1 %v1627_v25, %s6651_s20  ;;  %v5193_v61 = vsel %vm6640_vm1, %v1893_v45, %v5186_v57  ;;  %v4241_v45 = vld [vmem:[%s5248_s17 + $0x8] sm:$0xf0] }
 0x5b6   : > { %1908 = vrot.lane.b32.xlu2 %v1741_v60, %s6651_s20  ;;  %v5264_v19 = vor.u32 %v4241_v45, %v3913_v43  ;;  %v1936_v60 = vsel %vm6640_vm1, %v5175_v53, %v5204_v32 }
 0x5b8   : > { %v5210_v1 = vpop.permute.xlu2 %1884 }
 0x5ba   : > { %1860 = vrot.lane.b32.xlu0 %v5022_v24, %s6651_s20  ;;  %v1793_v5 = vpop.permute.xlu1 %1792 }
 0x5bb   : > { %v1912_v59 = vsel %vm6640_vm1, %v1793_v5, %v5130_v29  ;;  %v3925_v29 = vld [vmem:[%s5248_s17 + $0x18] sm:$0xf]  ;;  %v4244_v5 = vld [vmem:[%s5248_s17 + $0x20] sm:$0xf0] }
 0x5bc   : > { %v5198_v0 = vpop.permute.xlu0 %1818 }
 0x5bd   : > { %1800 = vrot.lane.b32.xlu1 %v5032_v31, %s6651_s20 }
 0x5be   : > { %1880 = vrot.lane.b32.xlu2 %v4985_v6, %s6651_s20 }
 0x5c2   : > { %1744 = vperm.xlu0 %4333, %v1494_v49  }
 0x5c4   : > { %v5212_v24 = vpop.permute.xlu0 %1838 }
 0x5c5   : > { %1890 = vrot.lane.b32.xlu1 %v1707_v26, %s6651_s20 }
 0x5c6   : > { %1759 = vperm.xlu2 %4335, %v1497_v56  }
 0x5c8   : > { %v5215_v7 = vpop.permute.xlu2 %1864 }
 0x5cc   : > { %v1845_v10 = vpop.permute.xlu0 %1844 }
 0x5cd   : > { %v1932_v13 = vsel %vm6640_vm1, %v1843_v2, %v1845_v10  ;;  %1870 = vrot.lane.b32.xlu1 %v5087_v4, %s6651_s20  ;;  %v1495_v4 = vld [vmem:[%s655_s21 + $0x8] sm:$0xff]  ;;  %s5547_s21 = scalar_lea.vmem %s6621_s7, %s4805_s15 }
 0x5ce   : > { %2023 = vmatpush.bf16.msrb.mxu1 %v1932_v13 }
 0x5cf   : > { %v1883_v6 = vpop.permute.xlu1 %1882 }
 0x5d0   : > { %v1803_v31 = vpop.permute.xlu2 %1802  ;;  %v1948_v12 = vsel %vm6640_vm1, %v1883_v6, %v5210_v1  ;;  %v1953_v6 = vsel %vm6640_vm1, %v5186_v57, %v5165_v50  ;;  %v3921_v57 = vld [vmem:[%s5248_s17 + $0x8] sm:$0xf] }
 0x5d2   : > { %2024 = vmatpush.bf16.msrb.mxu1 %v1928_v14 }
 0x5d4   : > { %v5222_v17 = vpop.permute.xlu0 %1826 }
 0x5d5   : > { %1754 = vperm.xlu1 %4334, %v1496_v16   ;;  %v1925_v41 = vsel %vm6640_vm1, %v5181_v23, %v5222_v17 }
 0x5d7   : > { %v1823_v15 = vpop.permute.xlu1 %1822 }
 0x5d8   : > { %v5224_v8 = vpop.permute.xlu2 %1876  ;;  %v1924_v22 = vsel %vm6640_vm1, %v1823_v15, %v5181_v23 }
 0x5d9   : > { %2025 = vmatpush.bf16.msrb.mxu1 %v1924_v22  ;;  %2042 = vmatpush.bf16.msrb.mxu3 %v1924_v22  ;;  %v1945_v16 = vsel %vm6640_vm1, %v5152_v46, %v5224_v8 }
 0x5dc   : > { %v1805_v27 = vpop.permute.xlu0 %1804 }
 0x5dd   : > { %1749 = vperm.xlu1 %4334, %v1495_v4   ;;  %2026 = vmatpush.bf16.msrb.mxu1 %v1920_v28  ;;  %v1916_v11 = vsel %vm6640_vm1, %v1803_v31, %v1805_v27 }
 0x5de   : > { %2043 = vmatpush.bf16.msrb.mxu3 %v1920_v28 }
 0x5df   : > { %v5230_v25 = vpop.permute.xlu1 %1846 }
 0x5e0   : > { %v1933_v34 = vsel %vm6640_vm1, %v1845_v10, %v5230_v25  ;;  %v5234_v35 = vpop.permute.xlu2 %1828  ;;  %v5298_v10 = vor.u32 %v4244_v5, %v3925_v29 }
 0x5e1   : > { %2027 = vmatpush.bf16.msrb.mxu1 %v1916_v11  ;;  %2080 = vmatpush.bf16.msrb.mxu2 %v1933_v34  ;;  %v1930_v34 = vsel %vm6640_vm1, %v5172_v30, %v5212_v24 }
 0x5e2   : > { %2044 = vmatpush.bf16.msrb.mxu3 %v5076_v58 }
 0x5e4   : > { %v1903_v36 = vpop.permute.xlu0 %1902 }
 0x5e5   : > { %2028 = vmatpush.bf16.msrb.mxu1 %v1912_v59  ;;  %2081 = vmatpush.bf16.msrb.mxu2 %v1929_v37  ;;  %v3933_v59 = vld [vmem:[%s5248_s17 + $0x20] sm:$0xf]  ;;  %v4245_v37 = vld [vmem:[%s5248_s17 + $0x28] sm:$0xf0] }
 0x5e6   : > { %2045 = vmatpush.bf16.msrb.mxu3 %v4978_v3 }
 0x5e7   : > { %v5250_v33 = vpop.permute.xlu1 %1806 }
 0x5e8   : > { %v5255_v26 = vpop.permute.xlu2 %1906  ;;  %v1917_v20 = vsel %vm6640_vm1, %v1805_v27, %v5250_v33 }
 0x5e9   : > { %2029 = vmatpush.bf16.msrb.mxu1 %v5076_v58  ;;  %2082 = vmatpush.bf16.msrb.mxu2 %v1925_v41 }
 0x5ea   : > { %2046 = vmatpush.bf16.msrb.mxu3 %v1948_v12  ;;  %v5351_v12 = vor.u32 %v4245_v37, %v3933_v59 }
 0x5ec   : > { %v5262_v63 = vpop.permute.xlu0 %1878 }
 0x5ed   : > { %2030 = vmatpush.bf16.msrb.mxu1 %v4978_v3  ;;  %2083 = vmatpush.bf16.msrb.mxu2 %v5146_v44  ;;  %v4240_v3 = vld [vmem:[%s5248_s17 + $0x4] sm:$0xf]  ;;  %v1946_v30 = vsel %vm6640_vm1, %v5224_v8, %v5262_v63 }
 0x5ee   : > { %2047 = vmatpush.bf16.msrb.mxu3 %v5160_v47  ;;  %v5285_v2 = vor.u32 %v4240_v3, %v3915_v51 }
 0x5ef   : > { %v1863_v58 = vpop.permute.xlu1 %1862 }
 0x5f0   : > { %2031 = vmatmul.bf16.vlgmr.msrb.gmra.mxu1 %v5264_v19  ;;  %v1940_v48 = vsel %vm6640_vm1, %v1863_v58, %v5215_v7  ;;  %v5277_v23 = vpop.permute.xlu2 %1856 }
 0x5f1   : > { %2099 = vmatpush.bf16.msra.mxu1 %v1925_v41  ;;  %2084 = vmatpush.bf16.msrb.mxu2 %v1917_v20  ;;  %v1937_v3 = vsel %vm6640_vm1, %v5204_v32, %v5277_v23 }
 0x5f2   : > { %2048 = vmatpush.bf16.msrb.mxu3 %v1940_v48 }
 0x5f4   : > { %v1887_v47 = vpop.permute.xlu0 %1886 }
 0x5f5   : > { %2100 = vmatpush.bf16.msra.mxu1 %v5146_v44  ;;  %2085 = vmatpush.bf16.msrb.mxu2 %v1913_v62  ;;  %v1949_v31 = vsel %vm6640_vm1, %v5210_v1, %v1887_v47  ;;  %v4243_v1 = vld [vmem:[%s5248_s17 + $0x1c] sm:$0xf] }
 0x5f6   : > { %2049 = vmatpush.bf16.msrb.mxu3 %v1936_v60 }
 0x5f7   : > { %v1905_v44 = vpop.permute.xlu1 %1904 }
 0x5f8   : > { %v1956_v49 = vsel %vm6640_vm1, %v1903_v36, %v1905_v44  ;;  %v1957_v56 = vsel %vm6640_vm1, %v1905_v44, %v5255_v26  ;;  %v5300_v13 = vpop.permute.xlu2 %1858 }
 0x5f9   : > { %2101 = vmatpush.bf16.msra.mxu1 %v5052_v40  ;;  %2050 = vmatmul.bf16.vlgmr.msrb.gmra.mxu3 %v5285_v2 }
 0x5fa   : > { %2065 = vmatpush.bf16.msrb.mxu0 %v1956_v49  ;;  %2086 = vmatpush.bf16.msrb.mxu2 %v5052_v40  ;;  %v1926_v40 = vsel %vm6640_vm1, %v5222_v17, %v5234_v35  ;;  %v3927_v17 = vld [vmem:[%s5248_s17 + $0x24] sm:$0xf0] }
 0x5fb   : > { %2122 = vmatpush.bf16.msra.mxu3 %v1957_v56  ;;  %v5330_v4 = vor.u32 %v4243_v1, %v3927_v17 }
 0x5fc   : > { %v5296_v53 = vpop.permute.xlu0 %1808 }
 0x5fd   : > { %2102 = vmatpush.bf16.msra.mxu1 %v5005_v18 }
 0x5fe   : > { %2066 = vmatpush.bf16.msrb.mxu0 %v5193_v61  ;;  %2087 = vmatpush.bf16.msrb.mxu2 %v5005_v18  ;;  %v4242_v61 = vld [vmem:[%s5248_s17 + $0x10] sm:$0xf0]  ;;  %v1922_v18 = vsel %vm6640_vm1, %v5137_v42, %v5198_v0  ;;  %s689_s17 = sadd.s32 %s4805_s15, %s3846_s16  ;;  %s3850_s16 = sshll.u32 %s6706_s25, 2 }
 0x5ff   : > { %2123 = vmatpush.bf16.msra.mxu3 %v1953_v6  ;;  %v5312_v14 = vpop.permute.xlu1 %1798  ;;  %v5328_v22 = vor.u32 %v4242_v61, %v3921_v57 }
 0x600   : > { %2036 = vmatmul.bf16.gmra.mxu1 %v5298_v10  ;;  %v5332_v27 = vpop.permute.xlu2 %1820 }
 0x601   : > { %2103 = vmatpush.bf16.msra.mxu1 %v1949_v31  ;;  %2088 = vmatmul.bf16.vlgmr.msrb.gmra.mxu2 %v5264_v19 }
 0x602   : > { %2156 = vmatpush.bf16.msra.mxu2 %v1926_v40  ;;  %2067 = vmatpush.bf16.msrb.mxu0 %v1940_v48  ;;  %v1918_v48 = vsel %vm6640_vm1, %v5250_v33, %v5296_v53  ;;  %v1938_v33 = vsel %vm6640_vm1, %v5277_v23, %v5300_v13 }
 0x604   : > { %v5326_v15 = vpop.permute.xlu0 %1868 }
 0x605   : > { %2104 = vmatpush.bf16.msra.mxu1 %v1945_v16 }
 0x606   : > { %2157 = vmatpush.bf16.msra.mxu2 %v1922_v18  ;;  %2068 = vmatpush.bf16.msrb.mxu0 %v1936_v60 }
 0x607   : > { %v1849_v46 = vpop.permute.xlu1 %1848 }
 0x608   : > { %v1934_v42 = vsel %vm6640_vm1, %v5230_v25, %v1849_v46  ;;  %v1899_v25 = vpop.permute.xlu2 %1898 }
 0x609   : > { %3935 = vmatmul.msk.bf16.vlgmr.msrb.gmra.mxu0 %vm2016_vm0, %v5328_v22  ;;  %2055 = vmatmul.bf16.gmra.mxu3 %v5330_v4 }
 0x60a   : > { %2158 = vmatpush.bf16.msra.mxu2 %v5071_v54  ;;  %2137 = vmatpush.bf16.msra.mxu0 %v1934_v42 }
 0x60c   : > { %v1841_v28 = vpop.permute.xlu0 %1840 }
 0x60d   : > { %v1931_v23 = vsel %vm6640_vm1, %v5212_v24, %v1841_v28 }
 0x60e   : > { %2159 = vmatpush.bf16.msra.mxu2 %v4991_v9  ;;  %2138 = vmatpush.bf16.msra.mxu0 %v1930_v34 }
 0x60f   : > { %v5344_v11 = vpop.permute.xlu1 %1888 }
 0x610   : > { %v1950_v36 = vsel %vm6640_vm1, %v1887_v47, %v5344_v11  ;;  %v1909_v8 = vpop.permute.xlu2 %1908 }
 0x611   : > { %2093 = vmatmul.bf16.gmra.mxu2 %v5298_v10  ;;  %v1958_v47 = vsel %vm6640_vm1, %v5255_v26, %v1909_v8 }
 0x612   : > { %2139 = vmatpush.bf16.msra.mxu0 %v1926_v40  ;;  %2160 = vmatpush.bf16.msra.mxu2 %v1950_v36 }
 0x614   : > { %v1811_v41 = vpop.permute.xlu0 %1810 }
 0x616   : > { %2140 = vmatpush.bf16.msra.mxu0 %v1922_v18  ;;  %2161 = vmatpush.bf16.msra.mxu2 %v1946_v30 }
 0x617   : > { %v1867_v43 = vpop.permute.xlu1 %1866 }
 0x618   : > { %v1941_v45 = vsel %vm6640_vm1, %v5215_v7, %v1867_v43  ;;  %v1942_v58 = vsel %vm6640_vm1, %v1867_v43, %v5326_v15  ;;  %v1914_v7 = vsel %vm6640_vm1, %v5167_v52, %v5312_v14  ;;  %v1954_v52 = vsel %vm6640_vm1, %v5165_v50, %v1899_v25  ;;  %v1881_v56 = vpop.permute.xlu2 %1880 }
 0x619   : > { %3936 = vmatmul.msk.bf16.gmra.mxu0 %vm2016_vm0, %v5351_v12  ;;  %2105 = vmatpush.bf16.msra.mxu1 %v1941_v45  ;;  %v1947_v29 = vsel %vm6640_vm1, %v5262_v63, %v1881_v56 }
 0x61a   : > { %2124 = vmatpush.bf16.msra.mxu3 %v1941_v45  ;;  %2141 = vmatpush.bf16.msra.mxu0 %v1918_v48 }
 0x61b   : > { %2162 = vmatpush.bf16.msra.mxu2 %v1942_v58 }
 0x61c   : > { %v1911_v20 = vpop.permute.xlu0 %1910 }
 0x61d   : > { %v1959_v51 = vsel %vm6640_vm1, %v1909_v8, %v1911_v20  ;;  %2106 = vmatpush.bf16.msra.mxu1 %v1937_v3 }
 0x61e   : > { %2125 = vmatpush.bf16.msra.mxu3 %v1937_v3  ;;  %2142 = vmatpush.bf16.msra.mxu0 %v1914_v7 }
 0x61f   : > { %2163 = vmatpush.bf16.msra.mxu2 %v1938_v33  ;;  %v1851_v32 = vpop.permute.xlu1 %1850 }
 0x620   : > { %v1935_v62 = vsel %vm6640_vm1, %v1849_v46, %v1851_v32  ;;  %2107 = vmatmul.bf16.vlgmr.msra.gmra.mxu1 %v5285_v2  ;;  %v5442_v43 = vpop.permute.xlu2 %1759 }
 0x621   : > { %2179 = vmatpush.bf16.msrb.mxu1 %v1958_v47  ;;  %3937 = vmatmul.msk.bf16.vlgmr.msra.gmra.mxu3 %vm2016_vm0, %v5328_v22 }
 0x622   : > { %2194 = vmatpush.bf16.msrb.mxu3 %v1935_v62  ;;  %2164 = vmatmul.bf16.vlgmr.msra.gmra.mxu2 %v5285_v2 }
 0x623   : > { %2236 = vmatpush.bf16.msrb.mxu2 %v1959_v51  ;;  %2143 = vmatpush.bf16.msra.mxu0 %v5071_v54  ;;  %v1923_v54 = vsel %vm6640_vm1, %v5198_v0, %v5332_v27 }
 0x624   : > { %v1901_v26 = vpop.permute.xlu0 %1900 }
 0x625   : > { %2180 = vmatpush.bf16.msrb.mxu1 %v1954_v52  ;;  %v1955_v60 = vsel %vm6640_vm1, %v1899_v25, %v1901_v26 }
 0x626   : > { %2195 = vmatpush.bf16.msrb.mxu3 %v1931_v23 }
 0x627   : > { %2144 = vmatpush.bf16.msra.mxu0 %v4991_v9  ;;  %2237 = vmatpush.bf16.msrb.mxu2 %v1955_v60  ;;  %v1831_v44 = vpop.permute.xlu1 %1830  ;;  %v1919_v9 = vsel %vm6640_vm1, %v5296_v53, %v1811_v41 }
 0x628   : > { %v1927_v49 = vsel %vm6640_vm1, %v5234_v35, %v1831_v44 }
 0x629   : > { %2181 = vmatpush.bf16.msrb.mxu1 %v1942_v58 }
 0x62a   : > { %2145 = vmatmul.bf16.vlgmr.msra.gmra.mxu0 %v5264_v19  ;;  %2196 = vmatpush.bf16.msrb.mxu3 %v1927_v49 }
 0x62b   : > { %2213 = vmatpush.bf16.msrb.mxu0 %v1927_v49 }
 0x62c   : > { %v1861_v6 = vpop.permute.xlu0 %1860 }
 0x62d   : > { %2182 = vmatpush.bf16.msrb.mxu1 %v1938_v33 }
 0x62e   : > { %2197 = vmatpush.bf16.msrb.mxu3 %v1923_v54 }
 0x62f   : > { %2214 = vmatpush.bf16.msrb.mxu0 %v1923_v54  ;;  %v1801_v50 = vpop.permute.xlu1 %1800 }
 0x630   : > { %2112 = vmatmul.bf16.gmra.mxu1 %v5330_v4  ;;  %v1915_v24 = vsel %vm6640_vm1, %v5312_v14, %v1801_v50 }
 0x631   : > { %3938 = vmatmul.msk.bf16.gmra.mxu3 %vm2016_vm0, %v5351_v12 }
 0x632   : > { %2198 = vmatpush.bf16.msrb.mxu3 %v1919_v9  ;;  %2169 = vmatmul.bf16.gmra.mxu2 %v5330_v4 }
 0x633   : > { %2215 = vmatpush.bf16.msrb.mxu0 %v5111_v21 }
 0x634   : > { %v1745_v7 = vpop.permute.xlu0 %1744 }
 0x636   : > { %2199 = vmatpush.bf16.msrb.mxu3 %v1915_v24 }
 0x637   : > { %2216 = vmatpush.bf16.msrb.mxu0 %v5047_v38  ;;  %v1891_v0 = vpop.permute.xlu1 %1890 }
 0x638   : > { %v1951_v35 = vsel %vm6640_vm1, %v5344_v11, %v1891_v0 }
 0x63a   : > { %2150 = vmatmul.bf16.gmra.mxu0 %v5298_v10  ;;  %2200 = vmatpush.bf16.msrb.mxu3 %v5111_v21  ;;  %v1939_v21 = vsel %vm6640_vm1, %v5300_v13, %v1861_v6 }
 0x63b   : > { %2217 = vmatpush.bf16.msrb.mxu0 %v1951_v35 }
 0x63e   : > { %2201 = vmatpush.bf16.msrb.mxu3 %v5047_v38 }
 0x63f   : > { %2218 = vmatpush.bf16.msrb.mxu0 %v1947_v29  ;;  %v1871_v5 = vpop.permute.xlu1 %1870 }
 0x640   : > { %3939 = vmatmul.msk.bf16.vlgmr.msrb.gmra.mxu1 %vm2016_vm0, %v5328_v22  ;;  %v1943_v53 = vsel %vm6640_vm1, %v5326_v15, %v1871_v5 }
 0x641   : > { %2202 = vmatmul.bf16.vlgmr.msrb.gmra.mxu3 %v5264_v19  ;;  %2238 = vmatpush.bf16.msrb.mxu2 %v1943_v53 }
 0x643   : > { %2219 = vmatpush.bf16.msrb.mxu0 %v1943_v53 }
 0x645   : > { %2239 = vmatpush.bf16.msrb.mxu2 %v1939_v21 }
 0x647   : > { %2220 = vmatpush.bf16.msrb.mxu0 %v1939_v21  ;;  %v5436_v25 = vpop.permute.xlu1 %1754 }
 0x648   : > { %3941 = vmatmul.msk.bf16.vlgmr.msrb.gmra.mxu2 %vm2016_vm0, %v5328_v22 }
 0x64a   : > { %2221 = vmatmul.bf16.vlgmr.msrb.gmra.mxu0 %v5285_v2 }
 0x64f   : > { %v1750_v51 = vpop.permute.xlu1 %1749 }
 0x650   : > { %3940 = vmatmul.msk.bf16.gmra.mxu1 %vm2016_vm0, %v5351_v12 }
 0x651   : > { %2207 = vmatmul.bf16.gmra.mxu3 %v5298_v10 }
 0x658   : > { %3942 = vmatmul.msk.bf16.gmra.mxu2 %vm2016_vm0, %v5351_v12 }
 0x65a   : > { %2226 = vmatmul.bf16.gmra.mxu0 %v5330_v4 }
 0x66d   : > { %v2032_v38 = vpop.f32.mrf.mxu1 }
 0x66e   : > { %v2033_v50 = vadd.f32 %v2032_v38, %v1745_v7 }
 0x675   : > { %v2034_v19 = vpop.f32.mrf.mxu1 }
 0x676   : > { %v2035_v52 = vadd.f32 %v2034_v19, %v1750_v51 }
 0x67c   : > { %v2051_v63 = vpop.f32.mrf.mxu3 }
 0x67d   : > { %v2037_v14 = vpop.f32.mrf.mxu1  ;;  %v2052_v29 = vadd.f32 %v2051_v63, %v2033_v50 }
 0x67e   : > { %v2038_v41 = vadd.f32 %v2037_v14, %v5436_v25 }
 0x684   : > { %v2089_v13 = vpop.f32.mrf.mxu2  ;;  %v2053_v31 = vpop.f32.mrf.mxu3 }
 0x685   : > { %v2039_v18 = vpop.f32.mrf.mxu1  ;;  %v2090_v26 = vadd.f32 %v2089_v13, %v1745_v7  ;;  %v2054_v9 = vadd.f32 %v2053_v31, %v2035_v52 }
 0x686   : > { %v2070_v40 = vpop.f32.mrf.mxu0  ;;  %v2040_v58 = vadd.f32 %v2039_v18, %v5442_v43 }
 0x687   : > { %v2071_v19 = vadd.f32 %v2070_v40, %v2052_v29 }
 0x68c   : > { %v2091_v57 = vpop.f32.mrf.mxu2  ;;  %v2056_v2 = vpop.f32.mrf.mxu3 }
 0x68d   : > { %v2057_v48 = vadd.f32 %v2056_v2, %v2038_v41  ;;  %v2092_v33 = vadd.f32 %v2091_v57, %v1750_v51 }
 0x68e   : > { %v2072_v61 = vpop.f32.mrf.mxu0 }
 0x68f   : > { %v2073_v5 = vadd.f32 %v2072_v61, %v2054_v9 }
 0x694   : > { %v2094_v16 = vpop.f32.mrf.mxu2  ;;  %v2058_v17 = vpop.f32.mrf.mxu3 }
 0x695   : > { %v2095_v37 = vadd.f32 %v2094_v16, %v5436_v25  ;;  %v2059_v47 = vadd.f32 %v2058_v17, %v2040_v58 }
 0x696   : > { %v2075_v1 = vpop.f32.mrf.mxu0 }
 0x697   : > { %v2076_v32 = vadd.f32 %v2075_v1, %v2057_v48 }
 0x69c   : > { %v2096_v10 = vpop.f32.mrf.mxu2 }
 0x69d   : > { %v2108_v22 = vpop.f32.mrf.mxu1  ;;  %v2097_v8 = vadd.f32 %v2096_v10, %v5442_v43 }
 0x69e   : > { %v2077_v15 = vpop.f32.mrf.mxu0  ;;  %v2109_v24 = vadd.f32 %v2108_v22, %v2090_v26 }
 0x69f   : > { %v2078_v60 = vadd.f32 %v2077_v15, %v2059_v47 }
 0x6a4   : > { %v2127_v27 = vpop.f32.mrf.mxu3 }
 0x6a5   : > { %v5428_v46 = vpop.f32.mrf.mxu2  ;;  %v2110_v4 = vpop.f32.mrf.mxu1  ;;  %v2128_v53 = vadd.f32 %v2127_v27, %v2109_v24 }
 0x6a6   : > { %v2111_v44 = vadd.f32 %v2110_v4, %v2092_v33 }
 0x6a7   : > { %v5430_v42 = vpop.f32.mrf.mxu0  ;;  %v2251_v38 = vpack.c.bf16 %v2128_v53, %v2071_v19 }
 0x6a9   : > { %v2267_v10 = vunpack.c.l.b16 %v2251_v38  ;;  %v2268_v15 = vunpack.c.h.b16 %v2251_v38 }
 0x6ac   : > { %v2129_v28 = vpop.f32.mrf.mxu3 }
 0x6ad   : > { %v2113_v34 = vpop.f32.mrf.mxu1  ;;  %v5434_v36 = vpop.f32.mrf.mxu2  ;;  %v2130_v0 = vadd.f32 %v2129_v28, %v2111_v44 }
 0x6ae   : > { %v2114_v12 = vadd.f32 %v2113_v34, %v2095_v37  ;;  %v2147_v34 = vadd.f32 %v5430_v42, %v1745_v7 }
 0x6af   : > { %v5432_v11 = vpop.f32.mrf.mxu0  ;;  %v2253_v13 = vpack.c.bf16 %v2130_v0, %v2073_v5 }
 0x6b0   : > { %v2149_v37 = vadd.f32 %v5432_v11, %v1750_v51  ;;  %v2166_v58 = vadd.f32 %v5428_v46, %v2147_v34 }
 0x6b1   : > { %v2271_v31 = vunpack.c.l.b16 %v2253_v13  ;;  %v2272_v63 = vunpack.c.h.b16 %v2253_v13 }
 0x6b3   : > { %v2283_v22 = vpack.c.b16 %v2271_v31, %v2267_v10  ;;  %v2284_v27 = vpack.c.b16 %v2272_v63, %v2268_v15 }
 0x6b4   : > { %v2132_v59 = vpop.f32.mrf.mxu3 }
 0x6b5   : > { %v2115_v45 = vpop.f32.mrf.mxu1  ;;  %v2133_v20 = vadd.f32 %v2132_v59, %v2114_v12  ;;  %v5446_v3 = vpop.f32.mrf.mxu2 }
 0x6b6   : > { %v2116_v62 = vadd.f32 %v2115_v45, %v2097_v8  ;;  %v2168_v8 = vadd.f32 %v5434_v36, %v2149_v37 }
 0x6b7   : > { %v5440_v30 = vpop.f32.mrf.mxu0  ;;  %v2255_v49 = vpack.c.bf16 %v2133_v20, %v2076_v32 }
 0x6b8   : > { %v2152_v36 = vadd.f32 %v5440_v30, %v5436_v25 }
 0x6b9   : > { %v2275_v6 = vunpack.c.l.b16 %v2255_v49  ;;  %v2276_v21 = vunpack.c.h.b16 %v2255_v49 }
 0x6ba   : > { %v2171_v0 = vadd.f32 %v5446_v3, %v2152_v36 }
 0x6bc   : > { %v2134_v23 = vpop.f32.mrf.mxu3 }
 0x6bd   : > { %v2135_v54 = vadd.f32 %v2134_v23, %v2116_v62  ;;  %v2172_v18 = vpop.f32.mrf.mxu2  ;;  %v2184_v1 = vpop.f32.mrf.mxu1 }
 0x6be   : > { %v2185_v20 = vadd.f32 %v2184_v1, %v2166_v58  ;;  %v1504_v58 = vld [vmem:[%s665_s24 + $0x10] sm:$0xff] }
 0x6bf   : > { %v2257_v35 = vpack.c.bf16 %v2135_v54, %v2078_v60  ;;  %v2153_v56 = vpop.f32.mrf.mxu0 }
 0x6c0   : > { %v2154_v54 = vadd.f32 %v2153_v56, %v5442_v43 }
 0x6c1   : > { %v2279_v14 = vunpack.c.l.b16 %v2257_v35  ;;  %v2280_v57 = vunpack.c.h.b16 %v2257_v35 }
 0x6c2   : > { %v2173_v5 = vadd.f32 %v2172_v18, %v2154_v54 }
 0x6c3   : > { %v2287_v2 = vpack.c.b16 %v2279_v14, %v2275_v6  ;;  %v2288_v16 = vpack.c.b16 %v2280_v57, %v2276_v21 }
 0x6c4   : > { %v2203_v17 = vpop.f32.mrf.mxu3 }
 0x6c5   : > { %2301 = vrot.lane.b32.xlu0 %v2288_v16, %s6660_s18  ;;  %2299 = vrot.lane.b32.xlu2 %v2287_v2, %s6660_s18  ;;  %v2204_v4 = vadd.f32 %v2203_v17, %v1745_v7  ;;  %v2186_v59 = vpop.f32.mrf.mxu1 }
 0x6c6   : > { %v2187_v42 = vadd.f32 %v2186_v59, %v2168_v8  ;;  %v1502_v8 = vld [vmem:[%s665_s24] sm:$0xff] }
 0x6c7   : > { %v2222_v61 = vpop.f32.mrf.mxu0 }
 0x6c8   : > { %v2223_v41 = vadd.f32 %v2222_v61, %v2204_v4 }
 0x6cb   : > { %v2241_v28 = vpop.f32.mrf.mxu2 }
 0x6cc   : > { %v2205_v40 = vpop.f32.mrf.mxu3  ;;  %v2242_v48 = vadd.f32 %v2241_v28, %v2223_v41 }
 0x6cd   : > { %2293 = vrot.lane.b32.xlu0 %v2284_v27, %s6660_s18  ;;  %2291 = vrot.lane.b32.xlu2 %v2283_v22, %s6660_s18  ;;  %v2206_v12 = vadd.f32 %v2205_v40, %v1750_v51  ;;  %v2189_v23 = vpop.f32.mrf.mxu1 }
 0x6ce   : > { %v2252_v7 = vpack.c.bf16 %v2242_v48, %v2185_v20  ;;  %v2190_v53 = vadd.f32 %v2189_v23, %v2171_v0  ;;  %v1503_v48 = vld [vmem:[%s665_s24 + $0x8] sm:$0xff]  ;;  %v1505_v20 = vld [vmem:[%s665_s24 + $0x18] sm:$0xff] }
 0x6cf   : > { %v2224_v45 = vpop.f32.mrf.mxu0 }
 0x6d0   : > { %v2225_v33 = vadd.f32 %v2224_v45, %v2206_v12  ;;  %v2270_v60 = vunpack.c.h.b16 %v2252_v7  ;;  %v2269_v3 = vunpack.c.l.b16 %v2252_v7 }
 0x6d3   : > { %v2243_v32 = vpop.f32.mrf.mxu2 }
 0x6d4   : > { %v2208_v47 = vpop.f32.mrf.mxu3  ;;  %v2244_v62 = vadd.f32 %v2243_v32, %v2225_v33 }
 0x6d5   : > { %v2209_v51 = vadd.f32 %v2208_v47, %v5436_v25  ;;  %v2191_v29 = vpop.f32.mrf.mxu1 }
 0x6d6   : > { %v2254_v52 = vpack.c.bf16 %v2244_v62, %v2187_v42  ;;  %v2192_v14 = vadd.f32 %v2191_v29, %v2173_v5 }
 0x6d7   : > { %v2227_v26 = vpop.f32.mrf.mxu0 }
 0x6d8   : > { %v2274_v11 = vunpack.c.h.b16 %v2254_v52  ;;  %v2228_v50 = vadd.f32 %v2227_v26, %v2209_v51 }
 0x6da   : > { %v2286_v44 = vpack.c.b16 %v2274_v11, %v2270_v60 }
 0x6db   : > { %v2246_v46 = vpop.f32.mrf.mxu2 }
 0x6dc   : > { %v2210_v49 = vpop.f32.mrf.mxu3  ;;  %2297 = vrot.lane.b32.xlu0 %v2286_v44, %s6660_s18  ;;  %v2247_v35 = vadd.f32 %v2246_v46, %v2228_v50 }
 0x6dd   : > { %v2211_v9 = vadd.f32 %v2210_v49, %v5442_v43  ;;  %v2273_v43 = vunpack.c.l.b16 %v2254_v52 }
 0x6de   : > { %v2256_v57 = vpack.c.bf16 %v2247_v35, %v2190_v53 }
 0x6df   : > { %v2229_v24 = vpop.f32.mrf.mxu0  ;;  %v2285_v18 = vpack.c.b16 %v2273_v43, %v2269_v3 }
 0x6e0   : > { %v2230_v6 = vadd.f32 %v2229_v24, %v2211_v9  ;;  %v2277_v30 = vunpack.c.l.b16 %v2256_v57  ;;  %v2278_v13 = vunpack.c.h.b16 %v2256_v57 }
 0x6e3   : > { %v2248_v21 = vpop.f32.mrf.mxu2 }
 0x6e4   : > { %v2249_v19 = vadd.f32 %v2248_v21, %v2230_v6 }
 0x6e6   : > { %v2258_v25 = vpack.c.bf16 %v2249_v19, %v2192_v14 }
 0x6e8   : > { %v2281_v2 = vunpack.c.l.b16 %v2258_v25  ;;  %v2282_v56 = vunpack.c.h.b16 %v2258_v25 }
 0x6ea   : > { %v2289_v16 = vpack.c.b16 %v2281_v2, %v2277_v30  ;;  %v2290_v1 = vpack.c.b16 %v2282_v56, %v2278_v13  ;;  %v5556_v30 = vld [vmem:[%s5547_s21] sm:$0xff] }
 0x6ec   : > { %2303 = vrot.lane.b32.xlu1 %v2289_v16, %s6660_s18  ;;  %2305 = vrot.lane.b32.xlu2 %v2290_v1, %s6660_s18  ;;  %v2497_v16 = vlaneseq }
 0x6ee   : > { %v5571_v1 = vshrl.u32 %v2497_v16, 7  ;;  %v5574_v43 = vand.u32 127, %v2497_v16 }
 0x6f4   : > { %2295 = vrot.lane.b32.xlu1 %v2285_v18, %s6660_s18  ;;  %v5580_v18 = vadd.s32 120, %v5571_v1 }
 0x71f   : > { %v5466_v17 = vpop.permute.xlu2 %2299 }
 0x720   : > { %v2323_v22 = vsel %vm6643_vm8, 0, %v5466_v17 }
 0x727   : > { %v5468_v38 = vpop.permute.xlu2 %2291 }
 0x728   : > { %v2320_v31 = vsel %vm6643_vm8, 0, %v5468_v38 }
 0x729   : > { %2369 = vrot.lane.b32.xlu1 %v2320_v31, %s6651_s20 }
 0x737   : > { %v2302_v63 = vpop.permute.xlu0 %2301 }
 0x738   : > { %v5475_v61 = vsel %vm6643_vm8, %v5466_v17, %v2302_v63 }
 0x739   : > { %2381 = vrot.lane.b32.xlu1 %v5475_v61, %s6651_s20 }
 0x73f   : > { %v2294_v10 = vpop.permute.xlu0 %2293 }
 0x740   : > { %v5481_v15 = vsel %vm6643_vm8, %v5468_v38, %v2294_v10 }
 0x741   : > { %2379 = vrot.lane.b32.xlu1 %v2323_v22, %s6651_s20  ;;  %2335 = vrot.lane.b32.xlu2 %v5481_v15, %s6657_s23 }
 0x742   : > { %2371 = vrot.lane.b32.xlu0 %v5481_v15, %s6651_s20 }
 0x746   : > { %v2306_v37 = vpop.permute.xlu2 %2305 }
 0x747   : > { %v2328_v45 = vsel %vm6643_vm8, %v2306_v37, 0 }
 0x749   : > { %2345 = vrot.lane.b32.xlu2 %v5475_v61, %s6657_s23 }
 0x74e   : > { %v2298_v40 = vpop.permute.xlu0 %2297 }
 0x74f   : > { %v2326_v41 = vsel %vm6643_vm8, %v2298_v40, 0 }
 0x75e   : > { %v2304_v27 = vpop.permute.xlu1 %2303 }
 0x75f   : > { %v5493_v4 = vsel %vm6643_vm8, %v2302_v63, %v2304_v27  ;;  %v5511_v12 = vsel %vm6643_vm8, %v2304_v27, %v2306_v37  ;;  %v5592_v63 = vadd.s32 248, %v5571_v1  ;;  %v5614_v27 = vadd.s32 240, %v5571_v1 }
 0x760   : > { %2383 = vrot.lane.b32.xlu2 %v5493_v4, %s6651_s20  ;;  %v5633_v37 = vadd.s32 80, %v5571_v1 }
 0x766   : > { %v2296_v28 = vpop.permute.xlu1 %2295 }
 0x767   : > { %v5498_v34 = vsel %vm6643_vm8, %v2294_v10, %v2296_v28  ;;  %v5501_v59 = vsel %vm6643_vm8, %v2296_v28, %v2298_v40  ;;  %v4393_v10 = vmov 1.0   ;;  %v5622_v40 = vadd.s32 376, %v5571_v1 }
 0x768   : > { %2375 = vrot.lane.b32.xlu2 %v5501_v59, %s6651_s20  ;;  %2337 = vrot.lane.b32.xlu0 %v5498_v34, %s6657_s23  ;;  %v5625_v28 = vadd.s32 224, %v5571_v1 }
 0x769   : > { %2373 = vrot.lane.b32.xlu1 %v5498_v34, %s6651_s20 }
 0x770   : > { %2385 = vrot.lane.b32.xlu2 %v5511_v12, %s6651_s20  ;;  %2377 = vrot.lane.b32.xlu0 %v2326_v41, %s6651_s20 }
 0x771   : > { %2343 = vrot.lane.b32.xlu1 %v2323_v22, %s6657_s23  ;;  %v5610_v22 = vadd.s32 88, %v5571_v1 }
 0x778   : > { %2349 = vrot.lane.b32.xlu2 %v5511_v12, %s6657_s23  ;;  %2347 = vrot.lane.b32.xlu0 %v5493_v4, %s6657_s23 }
 0x779   : > { %2333 = vrot.lane.b32.xlu1 %v2320_v31, %s6657_s23  ;;  %v5589_v31 = vadd.s32 104, %v5571_v1 }
 0x780   : > { %2341 = vrot.lane.b32.xlu2 %v2326_v41, %s6657_s23  ;;  %2387 = vrot.lane.b32.xlu0 %v2328_v45, %s6651_s20  ;;  %v5644_v41 = vadd.s32 216, %v5571_v1 }
 0x781   : > { %2339 = vrot.lane.b32.xlu1 %v5501_v59, %s6657_s23 }
 0x788   : > { %2963 = vperm.xlu2 %4335, %v1504_v58   ;;  %2351 = vrot.lane.b32.xlu0 %v2328_v45, %s6657_s23  ;;  %v5657_v45 = vadd.s32 360, %v5571_v1  ;;  %v5664_v58 = vadd.s32 208, %v5571_v1 }
 0x789   : > { %2958 = vperm.xlu1 %4334, %v1503_v48   ;;  %v5667_v48 = vadd.s32 352, %v5571_v1 }
 0x790   : > { %2953 = vperm.xlu0 %4333, %v1502_v8   ;;  %v5672_v8 = vadd.s32 64, %v5571_v1 }
 0x798   : > { %2968 = vperm.xlu0 %4333, %v1505_v20   ;;  %v5691_v20 = vadd.s32 56, %v5571_v1 }
 0x79b   : > { %v2370_v33 = vpop.permute.xlu1 %2369  ;;  %v2336_v47 = vpop.permute.xlu2 %2335 }
 0x7a3   : > { %v2346_v42 = vpop.permute.xlu2 %2345 }
 0x7ab   : > { %v2382_v32 = vpop.permute.xlu1 %2381 }
 0x7b3   : > { %v2380_v7 = vpop.permute.xlu1 %2379 }
 0x7b4   : > { %v2393_v62 = vsel %vm6640_vm1, %v2380_v7, %v2382_v32  ;;  %v2372_v52 = vpop.permute.xlu0 %2371  ;;  %v5727_v7 = vadd.s32 48, %v5571_v1 }
 0x7b5   : > { %2423 = vmatpush.bf16.msra.mxu1 %v2393_v62  ;;  %v2389_v26 = vsel %vm6640_vm1, %v2370_v33, %v2372_v52  ;;  %v5696_v33 = vadd.s32 200, %v5571_v1  ;;  %v5733_v62 = vadd.s32 328, %v5571_v1 }
 0x7b9   : > { %2424 = vmatpush.bf16.msra.mxu1 %v2389_v26  ;;  %v5749_v26 = vadd.s32 40, %v5571_v1 }
 0x7ba   : > { %v2384_v23 = vpop.permute.xlu2 %2383 }
 0x7bb   : > { %v2394_v60 = vsel %vm6640_vm1, %v2382_v32, %v2384_v23  ;;  %v5719_v32 = vadd.s32 192, %v5571_v1 }
 0x7bc   : > { %2442 = vmatpush.bf16.msra.mxu3 %v2394_v60  ;;  %v5761_v60 = vadd.s32 320, %v5571_v1 }
 0x7c2   : > { %v2376_v11 = vpop.permute.xlu2 %2375 }
 0x7ca   : > { %v2386_v51 = vpop.permute.xlu2 %2385 }
 0x7cb   : > { %v2395_v44 = vsel %vm6640_vm1, %v2384_v23, %v2386_v51  ;;  %v5758_v23 = vadd.s32 496, %v5571_v1 }
 0x7cc   : > { %2461 = vmatpush.bf16.msra.mxu0 %v2395_v44  ;;  %v5794_v44 = vadd.s32 24, %v5571_v1 }
 0x7d2   : > { %v2350_v0 = vpop.permute.xlu2 %2349 }
 0x7da   : > { %v2338_v49 = vpop.permute.xlu0 %2337  ;;  %v2342_v55 = vpop.permute.xlu2 %2341 }
 0x7db   : > { %v2374_v46 = vpop.permute.xlu1 %2373  ;;  %v2354_v21 = vsel %vm6641_vm5, %v2336_v47, %v2338_v49 }
 0x7dc   : > { %v2390_v36 = vsel %vm6640_vm1, %v2372_v52, %v2374_v46  ;;  %v2391_v54 = vsel %vm6640_vm1, %v2374_v46, %v2376_v11  ;;  %v5742_v52 = vadd.s32 184, %v5571_v1  ;;  %v5815_v46 = vadd.s32 8, %v5571_v1 }
 0x7dd   : > { %2443 = vmatpush.bf16.msra.mxu3 %v2390_v36  ;;  %2462 = vmatpush.bf16.msra.mxu0 %v2391_v54  ;;  %v5829_v36 = vadd.s32 312, %v5571_v1  ;;  %v5834_v54 = vadd.s32 304, %v5571_v1 }
 0x7e2   : > { %v2378_v50 = vpop.permute.xlu0 %2377 }
 0x7e3   : > { %v2344_v9 = vpop.permute.xlu1 %2343  ;;  %v2392_v13 = vsel %vm6640_vm1, %v2376_v11, %v2378_v50  ;;  %v5771_v11 = vadd.s32 176, %v5571_v1  ;;  %v5840_v50 = vadd.s32 296, %v5571_v1 }
 0x7e4   : > { %v2357_v24 = vsel %vm6641_vm5, %v2344_v9, %v2346_v42  ;;  %v5844_v9 = vadd.s32 168, %v5571_v1 }
 0x7e5   : > { %2425 = vmatpush.bf16.msra.mxu1 %v2357_v24  ;;  %v5847_v24 = vadd.s32 488, %v5571_v1 }
 0x7ea   : > { %v2348_v35 = vpop.permute.xlu0 %2347 }
 0x7eb   : > { %v2334_v29 = vpop.permute.xlu1 %2333  ;;  %v2358_v5 = vsel %vm6641_vm5, %v2346_v42, %v2348_v35  ;;  %v2359_v53 = vsel %vm6641_vm5, %v2348_v35, %v2350_v0  ;;  %v5722_v42 = vadd.s32 504, %v5571_v1  ;;  %v5854_v35 = vadd.s32 288, %v5571_v1 }
 0x7ec   : > { %v2353_v6 = vsel %vm6641_vm5, %v2334_v29, %v2336_v47  ;;  %2444 = vmatpush.bf16.msra.mxu3 %v2358_v5  ;;  %2463 = vmatpush.bf16.msra.mxu0 %v2359_v53  ;;  %v5709_v47 = vadd.s32 336, %v5571_v1  ;;  %v5863_v29 = vadd.s32 160, %v5571_v1  ;;  %v5868_v5 = vadd.s32 480, %v5571_v1 }
 0x7ed   : > { %2426 = vmatpush.bf16.msra.mxu1 %v2353_v6  ;;  %v5873_v6 = vadd.s32 152, %v5571_v1 }
 0x7f0   : > { %2445 = vmatpush.bf16.msra.mxu3 %v2354_v21  ;;  %v5876_v21 = vadd.s32 472, %v5571_v1 }
 0x7f1   : > { %3952 = vmatpush.bf16.msk.msra.mxu1 %vm4828_vm10, %v5466_v17  ;;  %v5583_v17 = vmul.u32 2, %v5574_v43 }
 0x7f2   : > { %v2388_v14 = vpop.permute.xlu0 %2387 }
 0x7f3   : > { %v2396_v57 = vsel %vm6640_vm1, %v2386_v51, %v2388_v14  ;;  %v2340_v19 = vpop.permute.xlu1 %2339  ;;  %vm2597_vm3 = vcmp.eq.s32.totalorder %v5580_v18, %v5583_v17  ;;  %vm2629_vm6 = vcmp.eq.s32.totalorder %v5592_v63, %v5583_v17  ;;  %vm2627_vm7 = vcmp.eq.s32.totalorder %v5614_v27, %v5583_v17 }
 0x7f4   : > { %2446 = vmatpush.bf16.msra.mxu3 %v5475_v61  ;;  %v2355_v25 = vsel %vm6641_vm5, %v2338_v49, %v2340_v19  ;;  %2480 = vmatpush.bf16.msra.mxu2 %v2396_v57  ;;  %v2356_v3 = vsel %vm6641_vm5, %v2340_v19, %v2342_v55  ;;  %v5599_v61 = vadd.s32 96, %v5571_v1  ;;  %vm2661_vm12 = vcmp.eq.s32.totalorder %v5622_v40, %v5583_v17 }
 0x7f5   : > { %3954 = vmatpush.bf16.msk.msra.mxu1 %vm4828_vm10, %v5468_v38  ;;  %2464 = vmatpush.bf16.msra.mxu0 %v2355_v25  ;;  %v5586_v38 = vadd.s32 112, %v5571_v1  ;;  %vm2593_vm10 = vcmp.eq.s32.totalorder %v5589_v31, %v5583_v17  ;;  %vm2589_vm13 = vcmp.eq.s32.totalorder %v5610_v22, %v5583_v17  ;;  %vm2623_vm0 = vcmp.eq.s32.totalorder %v5625_v28, %v5583_v17 }
 0x7f6   : > { %vm2591_vm15 = vcmp.eq.s32.totalorder %v5599_v61, %v5583_v17  ;;  %v5776_v51 = vadd.s32 32, %v5571_v1  ;;  %v5807_v49 = vadd.s32 16, %v5571_v1  ;;  %v5882_v14 = vadd.s32 144, %v5571_v1 }
 0x7f7   : > { %vm2595_vm4 = vcmp.eq.s32.totalorder %v5586_v38, %v5583_v17  ;;  %v5885_v57 = vadd.s32 464, %v5571_v1  ;;  %v5905_v19 = vadd.s32 280, %v5571_v1  ;;  %v5914_v25 = vadd.s32 272, %v5571_v1 }
 0x7f8   : > { %3955 = vmatmul.msk.bf16.vlgmr.msra.gmra.mxu1 %vm1339_vm9, %v5556_v30  ;;  %2447 = vmatpush.bf16.msra.mxu3 %v5481_v15  ;;  %v5605_v15 = vld [vmem:[%s5547_s21 + $0x8] sm:$0xff]  ;;  %v5947_v55 = vadd.s32 128, %v5571_v1  ;;  %s3848_s21 = sshll.u32 %s689_s17, 3 }
 0x7f9   : > { %2465 = vmatpush.bf16.msra.mxu0 %v5493_v4  ;;  %2481 = vmatpush.bf16.msra.mxu2 %v2392_v13  ;;  %v5617_v4 = vadd.s32 232, %v5571_v1  ;;  %v5922_v13 = vadd.s32 136, %v5571_v1  ;;  %s6470_s20 = scalar_lea.vmem %s6626_s12, %s3848_s21 }
 0x7fa   : > { %v2352_v2 = vpop.permute.xlu0 %2351  ;;  %4091 = vmatpush.msk.msrb.mxu1 %vm2597_vm3, %v4393_v10  ;;  %vm2587_vm3 = vcmp.eq.s32.totalorder %v5633_v37, %v5583_v17 }
 0x7fb   : > { %3957 = vmatmul.msk.bf16.vlgmr.msra.gmra.mxu3 %vm1339_vm9, %v5556_v30  ;;  %v2360_v56 = vsel %vm6641_vm5, %v2350_v0, %v2352_v2  ;;  %vm2625_vm11 = vcmp.eq.s32.totalorder %v5617_v4, %v5583_v17  ;;  %v2564_v0 = vadd.s32 128, %v5574_v43  ;;  %v5925_v2 = vadd.s32 456, %v5571_v1 }
 0x7fc   : > { %4107 = vmatpush.msk.msrb.mxu3 %vm2629_vm6, %v4393_v10  ;;  %4092 = vmatpush.msk.msrb.mxu1 %vm2595_vm4, %v4393_v10  ;;  %vm2657_vm4 = vcmp.eq.s32.totalorder %v5657_v45, %v5583_v17  ;;  %vm2621_vm6 = vcmp.eq.s32.totalorder %v5644_v41, %v5583_v17  ;;  %v5951_v43 = vadd.s32 448, %v5571_v1 }
 0x7fd   : > { %2466 = vmatpush.bf16.msra.mxu0 %v5498_v34  ;;  %2482 = vmatpush.bf16.msra.mxu2 %v2360_v56  ;;  %v5628_v34 = vadd.s32 368, %v5571_v1  ;;  %v5870_v53 = vmul.u32 2, %v2564_v0  ;;  %v5930_v56 = vadd.s32 256, %v5571_v1 }
 0x7fe   : > { %4093 = vmatpush.msk.msrb.mxu1 %vm2593_vm10, %v4393_v10  ;;  %4108 = vmatpush.msk.msrb.mxu3 %vm2627_vm7, %v4393_v10  ;;  %vm2619_vm7 = vcmp.eq.s32.totalorder %v5664_v58, %v5583_v17 }
 0x7ff   : > { %vm2659_vm14 = vcmp.eq.s32.totalorder %v5628_v34, %v5583_v17  ;;  %vm2578_vm1 = vcmp.eq.s32.totalorder %v5749_v26, %v5870_v53  ;;  %vm2572_vm5 = vcmp.eq.s32.totalorder %v5807_v49, %v5870_v53  ;;  %vm2614_vm2 = vcmp.eq.s32.totalorder %v5742_v52, %v5870_v53 }
 0x800   : > { %3959 = vmatmul.msk.bf16.vlgmr.msra.gmra.mxu0 %vm1339_vm9, %v5556_v30  ;;  %4094 = vmatpush.msk.msrb.mxu1 %vm2591_vm15, %v4393_v10  ;;  %vm2655_vm15 = vcmp.eq.s32.totalorder %v5667_v48, %v5583_v17  ;;  %vm2570_vm8 = vcmp.eq.s32.totalorder %v5815_v46, %v5870_v53 }
 0x801   : > { %2483 = vmatpush.bf16.msra.mxu2 %v2356_v3  ;;  %4123 = vmatpush.msk.msrb.mxu0 %vm2661_vm12, %v4393_v10  ;;  %v5961_v3 = vadd.s32 440, %v5571_v1 }
 0x802   : > { %4109 = vmatpush.msk.msrb.mxu3 %vm2625_vm11, %v4393_v10  ;;  %4095 = vmatpush.msk.msrb.mxu1 %vm2589_vm13, %v4393_v10  ;;  %vm2583_vm11 = vcmp.eq.s32.totalorder %v5672_v8, %v5583_v17  ;;  %vm2581_vm13 = vcmp.eq.s32.totalorder %v5691_v20, %v5583_v17 }
 0x803   : > { %4124 = vmatpush.msk.msrb.mxu0 %vm2659_vm14, %v4393_v10  ;;  %vm2617_vm14 = vcmp.eq.s32.totalorder %v5696_v33, %v5583_v17 }
 0x804   : > { %4110 = vmatpush.msk.msrb.mxu3 %vm2623_vm0, %v4393_v10  ;;  %4096 = vmatpush.msk.msrb.mxu1 %vm2587_vm3, %v4393_v10  ;;  %vm2693_vm0 = vcmp.eq.s32.totalorder %v5722_v42, %v5583_v17  ;;  %vm2651_vm3 = vcmp.eq.s32.totalorder %v5709_v47, %v5583_v17 }
 0x805   : > { %2484 = vmatpush.bf16.msra.mxu2 %v5511_v12  ;;  %v5651_v12 = vadd.s32 72, %v5571_v1  ;;  %4125 = vmatpush.msk.msrb.mxu0 %vm2657_vm4, %v4393_v10  ;;  %vm2615_vm4 = vcmp.eq.s32.totalorder %v5719_v32, %v5583_v17 }
 0x806   : > { %4111 = vmatpush.msk.msrb.mxu3 %vm2621_vm6, %v4393_v10  ;;  %vm2579_vm6 = vcmp.eq.s32.totalorder %v5727_v7, %v5583_v17 }
 0x807   : > { %vm2585_vm10 = vcmp.eq.s32.totalorder %v5651_v12, %v5583_v17  ;;  %4126 = vmatpush.msk.msrb.mxu0 %vm2655_vm15, %v4393_v10  ;;  %vm2691_vm15 = vcmp.eq.s32.totalorder %v5758_v23, %v5583_v17 }
 0x808   : > { %3956 = vmatmul.msk.bf16.gmra.mxu1 %vm1339_vm9, %v5605_v15  ;;  %4112 = vmatpush.msk.msrb.mxu3 %vm2619_vm7, %v4393_v10  ;;  %vm2613_vm7 = vcmp.eq.s32.totalorder %v5742_v52, %v5583_v17 }
 0x809   : > { %2485 = vmatpush.bf16.msra.mxu2 %v5501_v59  ;;  %v5682_v59 = vadd.s32 344, %v5571_v1  ;;  %4097 = vmatpush.msk.msrb.mxu1 %vm2585_vm10, %v4393_v10  ;;  %vm2649_vm10 = vcmp.eq.s32.totalorder %v5733_v62, %v5583_v17 }
 0x80a   : > { %4113 = vmatpush.msk.msrb.mxu3 %vm2617_vm14, %v4393_v10  ;;  %vm2575_vm14 = vcmp.eq.s32.totalorder %v5776_v51, %v5583_v17 }
 0x80b   : > { %3958 = vmatmul.msk.bf16.gmra.mxu3 %vm1339_vm9, %v5605_v15  ;;  %vm2653_vm12 = vcmp.eq.s32.totalorder %v5682_v59, %v5583_v17  ;;  %4098 = vmatpush.msk.msrb.mxu1 %vm2583_vm11, %v4393_v10  ;;  %vm2577_vm11 = vcmp.eq.s32.totalorder %v5749_v26, %v5583_v17 }
 0x80c   : > { %3961 = vmatmul.msk.bf16.vlgmr.msra.gmra.mxu2 %vm1339_vm9, %v5556_v30  ;;  %4127 = vmatpush.msk.msrb.mxu0 %vm2653_vm12, %v4393_v10  ;;  %vm2647_vm12 = vcmp.eq.s32.totalorder %v5761_v60, %v5583_v17  ;;  %v5917_v30 = vadd.s32 264, %v5571_v1 }
 0x80d   : > { %4139 = vmatpush.msk.msrb.mxu2 %vm2693_vm0, %v4393_v10  ;;  %4099 = vmatpush.msk.msrb.mxu1 %vm2581_vm13, %v4393_v10  ;;  %vm2611_vm13 = vcmp.eq.s32.totalorder %v5771_v11, %v5583_v17  ;;  %vm2573_vm0 = vcmp.eq.s32.totalorder %v5794_v44, %v5583_v17 }
 0x80e   : > { %4128 = vmatpush.msk.msrb.mxu0 %vm2651_vm3, %v4393_v10  ;;  %4114 = vmatpush.msk.msrb.mxu3 %vm2615_vm4, %v4393_v10  ;;  %vm2571_vm3 = vcmp.eq.s32.totalorder %v5807_v49, %v5583_v17  ;;  %vm2569_vm4 = vcmp.eq.s32.totalorder %v5815_v46, %v5583_v17 }
 0x80f   : > { %4140 = vmatpush.msk.msrb.mxu2 %vm2691_vm15, %v4393_v10  ;;  %4100 = vmatpush.msk.msrb.mxu1 %vm2579_vm6, %v4393_v10  ;;  %vm2645_vm6 = vcmp.eq.s32.totalorder %v5829_v36, %v5583_v17  ;;  %vm2567_vm15 = vcmp.eq.s32.totalorder %v5571_v1, %v5583_v17 }
 0x810   : > { %3960 = vmatmul.msk.bf16.gmra.mxu0 %vm1339_vm9, %v5605_v15  ;;  %4115 = vmatpush.msk.msrb.mxu3 %vm2613_vm7, %v4393_v10  ;;  %vm2609_vm7 = vcmp.eq.s32.totalorder %v5844_v9, %v5583_v17 }
 0x811   : > { %4129 = vmatpush.msk.msrb.mxu0 %vm2649_vm10, %v4393_v10  ;;  %4101 = vmatpush.msk.msrb.mxu1 %vm2577_vm11, %v4393_v10  ;;  %vm2641_vm10 = vcmp.eq.s32.totalorder %v5840_v50, %v5583_v17  ;;  %vm2689_vm11 = vcmp.eq.s32.totalorder %v5847_v24, %v5583_v17 }
 0x812   : > { %4116 = vmatpush.msk.msrb.mxu3 %vm2611_vm13, %v4393_v10  ;;  %4141 = vmatpush.msk.msrb.mxu2 %vm2689_vm11, %v4393_v10  ;;  %vm2639_vm13 = vcmp.eq.s32.totalorder %v5854_v35, %v5583_v17  ;;  %vm2635_vm11 = vcmp.eq.s32.totalorder %v5914_v25, %v5583_v17 }
 0x813   : > { %4130 = vmatpush.msk.msrb.mxu0 %vm2647_vm12, %v4393_v10  ;;  %4102 = vmatpush.msk.msrb.mxu1 %vm2575_vm14, %v4393_v10  ;;  %vm2607_vm12 = vcmp.eq.s32.totalorder %v5863_v29, %v5583_v17  ;;  %vm2687_vm14 = vcmp.eq.s32.totalorder %v5868_v5, %v5583_v17 }
 0x814   : > { %4117 = vmatpush.msk.msrb.mxu3 %vm2609_vm7, %v4393_v10  ;;  %4142 = vmatpush.msk.msrb.mxu2 %vm2687_vm14, %v4393_v10  ;;  %vm2637_vm7 = vcmp.eq.s32.totalorder %v5905_v19, %v5583_v17  ;;  %vm2681_vm14 = vcmp.eq.s32.totalorder %v5925_v2, %v5583_v17 }
 0x815   : > { %4103 = vmatpush.msk.msrb.mxu1 %vm2573_vm0, %v4393_v10  ;;  %4131 = vmatpush.msk.msrb.mxu0 %vm2645_vm6, %v4393_v10  ;;  %vm2598_vm0 = vcmp.eq.s32.totalorder %v5580_v18, %v5870_v53  ;;  %vm2596_vm6 = vcmp.eq.s32.totalorder %v5586_v38, %v5870_v53  ;;  %v5977_v18 = vadd.s32 432, %v5571_v1  ;;  %v5996_v38 = vadd.s32 424, %v5571_v1 }
 0x816   : > { %4118 = vmatpush.msk.msrb.mxu3 %vm2607_vm12, %v4393_v10  ;;  %vm2633_vm12 = vcmp.eq.s32.totalorder %v5917_v30, %v5583_v17 }
 0x817   : > { %4104 = vmatpush.msk.msrb.mxu1 %vm2571_vm3, %v4393_v10  ;;  %vm2605_vm3 = vcmp.eq.s32.totalorder %v5873_v6, %v5583_v17 }
 0x818   : > { %4119 = vmatpush.msk.msrb.mxu3 %vm2605_vm3, %v4393_v10  ;;  %vm2590_vm3 = vcmp.eq.s32.totalorder %v5610_v22, %v5870_v53  ;;  %v6088_v22 = vadd.s32 384, %v5571_v1 }
 0x819   : > { %4105 = vmatpush.msk.msrb.mxu1 %vm2569_vm4, %v4393_v10  ;;  %vm2685_vm4 = vcmp.eq.s32.totalorder %v5876_v21, %v5583_v17 }
 0x81a   : > { %4143 = vmatpush.msk.msrb.mxu2 %vm2685_vm4, %v4393_v10  ;;  %vm2599_vm4 = vcmp.eq.s32.totalorder %v5947_v55, %v5583_v17 }
 0x81b   : > { %4106 = vmatpush.msk.msrb.mxu1 %vm2567_vm15, %v4393_v10  ;;  %vm2594_vm15 = vcmp.eq.s32.totalorder %v5589_v31, %v5870_v53  ;;  %v6016_v31 = vadd.s32 416, %v5571_v1 }
 0x81c   : > { %3962 = vmatmul.msk.bf16.gmra.mxu2 %vm1339_vm9, %v5605_v15  ;;  %vm2643_vm9 = vcmp.eq.s32.totalorder %v5834_v54, %v5583_v17  ;;  %v6068_v15 = vadd.s32 392, %v5571_v1 }
 0x81d   : > { %4132 = vmatpush.msk.msrb.mxu0 %vm2643_vm9, %v4393_v10  ;;  %4155 = vmatpush.msk.msra.mxu1 %vm2598_vm0, %v4393_v10  ;;  %vm2603_vm9 = vcmp.eq.s32.totalorder %v5882_v14, %v5583_v17  ;;  %vm2592_vm0 = vcmp.eq.s32.totalorder %v5599_v61, %v5870_v53  ;;  %v6046_v61 = vadd.s32 400, %v5571_v1 }
 0x81e   : > { %4120 = vmatpush.msk.msrb.mxu3 %vm2603_vm9, %v4393_v10  ;;  %vm2631_vm9 = vcmp.eq.s32.totalorder %v5930_v56, %v5583_v17 }
 0x81f   : > { %4133 = vmatpush.msk.msrb.mxu0 %vm2641_vm10, %v4393_v10  ;;  %vm2683_vm10 = vcmp.eq.s32.totalorder %v5885_v57, %v5583_v17  ;;  %4156 = vmatpush.msk.msra.mxu1 %vm2596_vm6, %v4393_v10  ;;  %vm2630_vm6 = vcmp.eq.s32.totalorder %v5592_v63, %v5870_v53  ;;  %v6032_v63 = vadd.s32 408, %v5571_v1 }
 0x820   : > { %4144 = vmatpush.msk.msrb.mxu2 %vm2683_vm10, %v4393_v10  ;;  %vm2679_vm10 = vcmp.eq.s32.totalorder %v5951_v43, %v5583_v17 }
 0x821   : > { %4134 = vmatpush.msk.msrb.mxu0 %vm2639_vm13, %v4393_v10  ;;  %4157 = vmatpush.msk.msra.mxu1 %vm2594_vm15, %v4393_v10  ;;  %vm2601_vm13 = vcmp.eq.s32.totalorder %v5922_v13, %v5583_v17  ;;  %vm2588_vm15 = vcmp.eq.s32.totalorder %v5633_v37, %v5870_v53 }
 0x822   : > { %4121 = vmatpush.msk.msrb.mxu3 %vm2601_vm13, %v4393_v10  ;;  %4145 = vmatpush.msk.msrb.mxu2 %vm2681_vm14, %v4393_v10  ;;  %vm2662_vm13 = vcmp.eq.s32.totalorder %v5622_v40, %v5870_v53  ;;  %vm2586_vm14 = vcmp.eq.s32.totalorder %v5651_v12, %v5870_v53 }
 0x823   : > { %4135 = vmatpush.msk.msrb.mxu0 %vm2637_vm7, %v4393_v10  ;;  %4158 = vmatpush.msk.msra.mxu1 %vm2592_vm0, %v4393_v10  ;;  %vm2677_vm7 = vcmp.eq.s32.totalorder %v5961_v3, %v5583_v17  ;;  %vm2660_vm0 = vcmp.eq.s32.totalorder %v5628_v34, %v5870_v53 }
 0x824   : > { %4122 = vmatpush.msk.msrb.mxu3 %vm2599_vm4, %v4393_v10  ;;  %4146 = vmatpush.msk.msrb.mxu2 %vm2679_vm10, %v4393_v10  ;;  %vm2673_vm4 = vcmp.eq.s32.totalorder %v5996_v38, %v5583_v17  ;;  %vm2582_vm10 = vcmp.eq.s32.totalorder %v5691_v20, %v5870_v53 }
 0x825   : > { %4136 = vmatpush.msk.msrb.mxu0 %vm2635_vm11, %v4393_v10  ;;  %4159 = vmatpush.msk.msra.mxu1 %vm2590_vm3, %v4393_v10  ;;  %vm2628_vm11 = vcmp.eq.s32.totalorder %v5614_v27, %v5870_v53  ;;  %vm2658_vm3 = vcmp.eq.s32.totalorder %v5657_v45, %v5870_v53 }
 0x826   : > { %4171 = vmatpush.msk.msra.mxu3 %vm2630_vm6, %v4393_v10  ;;  %4147 = vmatpush.msk.msrb.mxu2 %vm2677_vm7, %v4393_v10  ;;  %vm2584_vm6 = vcmp.eq.s32.totalorder %v5672_v8, %v5870_v53  ;;  %vm2671_vm7 = vcmp.eq.s32.totalorder %v6016_v31, %v5583_v17 }
 0x827   : > { %4137 = vmatpush.msk.msrb.mxu0 %vm2633_vm12, %v4393_v10  ;;  %vm2675_vm12 = vcmp.eq.s32.totalorder %v5977_v18, %v5583_v17  ;;  %4160 = vmatpush.msk.msra.mxu1 %vm2588_vm15, %v4393_v10  ;;  %vm2624_vm15 = vcmp.eq.s32.totalorder %v5625_v28, %v5870_v53 }
 0x828   : > { %4172 = vmatpush.msk.msra.mxu3 %vm2628_vm11, %v4393_v10  ;;  %4148 = vmatpush.msk.msrb.mxu2 %vm2675_vm12, %v4393_v10  ;;  %vm2622_vm11 = vcmp.eq.s32.totalorder %v5644_v41, %v5870_v53  ;;  %vm2656_vm12 = vcmp.eq.s32.totalorder %v5667_v48, %v5870_v53 }
 0x829   : > { %4138 = vmatpush.msk.msrb.mxu0 %vm2631_vm9, %v4393_v10  ;;  %4161 = vmatpush.msk.msra.mxu1 %vm2586_vm14, %v4393_v10  ;;  %vm2626_vm9 = vcmp.eq.s32.totalorder %v5617_v4, %v5870_v53  ;;  %vm2580_vm14 = vcmp.eq.s32.totalorder %v5727_v7, %v5870_v53  ;;  %v4395_v7 = vmov 2  }
 0x82a   : > { %4173 = vmatpush.msk.msra.mxu3 %vm2626_vm9, %v4393_v10  ;;  %4149 = vmatpush.msk.msrb.mxu2 %vm2673_vm4, %v4393_v10  ;;  %vm2669_vm4 = vcmp.eq.s32.totalorder %v6032_v63, %v5583_v17  ;;  %vm2654_vm9 = vcmp.eq.s32.totalorder %v5682_v59, %v5870_v53 }
 0x82b   : > { %4187 = vmatpush.msk.msra.mxu0 %vm2662_vm13, %v4393_v10  ;;  %4162 = vmatpush.msk.msra.mxu1 %vm2584_vm6, %v4393_v10  ;;  %vm2620_vm6 = vcmp.eq.s32.totalorder %v5664_v58, %v5870_v53 }
 0x82c   : > { %4174 = vmatpush.msk.msra.mxu3 %vm2624_vm15, %v4393_v10  ;;  %4150 = vmatpush.msk.msrb.mxu2 %vm2671_vm7, %v4393_v10  ;;  %vm2667_vm15 = vcmp.eq.s32.totalorder %v6046_v61, %v5583_v17  ;;  %vm6646_vm7 = vcmp.eq.s32.totalorder %v5733_v62, %v5870_v53 }
 0x82d   : > { %4188 = vmatpush.msk.msra.mxu0 %vm2660_vm0, %v4393_v10  ;;  %4163 = vmatpush.msk.msra.mxu1 %vm2582_vm10, %v4393_v10  ;;  %vm2652_vm10 = vcmp.eq.s32.totalorder %v5709_v47, %v5870_v53  ;;  %v4394_v47 = vmov 1  }
 0x82e   : > { %4175 = vmatpush.msk.msra.mxu3 %vm2622_vm11, %v4393_v10  ;;  %4151 = vmatpush.msk.msrb.mxu2 %vm2669_vm4, %v4393_v10  ;;  %vm2665_vm11 = vcmp.eq.s32.totalorder %v6068_v15, %v5583_v17  ;;  %vm2618_vm4 = vcmp.eq.s32.totalorder %v5696_v33, %v5870_v53  ;;  %v6452_v33 = vld [vmem:[%s6449_s22 + $0x8] sm:$0xff] }
 0x82f   : > { %4189 = vmatpush.msk.msra.mxu0 %vm2658_vm3, %v4393_v10  ;;  %4164 = vmatpush.msk.msra.mxu1 %vm2580_vm14, %v4393_v10  ;;  %vm2576_vm14 = vcmp.eq.s32.totalorder %v5776_v51, %v5870_v53 }
 0x830   : > { %4176 = vmatpush.msk.msra.mxu3 %vm2620_vm6, %v4393_v10  ;;  %4152 = vmatpush.msk.msrb.mxu2 %vm2667_vm15, %v4393_v10  ;;  %vm2663_vm6 = vcmp.eq.s32.totalorder %v6088_v22, %v5583_v17  ;;  %vm2574_vm15 = vcmp.eq.s32.totalorder %v5794_v44, %v5870_v53 }
 0x831   : > { %4190 = vmatpush.msk.msra.mxu0 %vm2656_vm12, %v4393_v10  ;;  %4165 = vmatpush.msk.msra.mxu1 %vm2578_vm1, %v4393_v10  ;;  %vm6645_vm1 = vcmp.eq.s32.totalorder %v5761_v60, %v5870_v53 }
 0x832   : > { %4177 = vmatpush.msk.msra.mxu3 %vm2618_vm4, %v4393_v10  ;;  %4153 = vmatpush.msk.msrb.mxu2 %vm2665_vm11, %v4393_v10  ;;  %vm2616_vm4 = vcmp.eq.s32.totalorder %v5719_v32, %v5870_v53  ;;  %vm2694_vm11 = vcmp.eq.s32.totalorder %v5722_v42, %v5870_v53  ;;  %v6460_v42 = vld [vmem:[%s6449_s22] sm:$0xff] }
 0x833   : > { %4191 = vmatpush.msk.msra.mxu0 %vm2654_vm9, %v4393_v10  ;;  %4166 = vmatpush.msk.msra.mxu1 %vm2576_vm14, %v4393_v10  ;;  %vm2612_vm14 = vcmp.eq.s32.totalorder %v5771_v11, %v5870_v53  ;;  %v2954_v11 = vpop.permute.xlu0 %2953 }
 0x834   : > { %4178 = vmatpush.msk.msra.mxu3 %vm2616_vm4, %v4393_v10  ;;  %4154 = vmatpush.msk.msrb.mxu2 %vm2663_vm6, %v4393_v10  ;;  %vm2692_vm4 = vcmp.eq.s32.totalorder %v5758_v23, %v5870_v53  ;;  %vm2610_vm6 = vcmp.eq.s32.totalorder %v5844_v9, %v5870_v53 }
 0x835   : > { %4192 = vmatpush.msk.msra.mxu0 %vm2652_vm10, %v4393_v10  ;;  %4167 = vmatpush.msk.msra.mxu1 %vm2574_vm15, %v4393_v10  ;;  %vm2690_vm15 = vcmp.eq.s32.totalorder %v5847_v24, %v5870_v53 }
 0x836   : > { %4179 = vmatpush.msk.msra.mxu3 %vm2614_vm2, %v4393_v10  ;;  %4203 = vmatpush.msk.msra.mxu2 %vm2694_vm11, %v4393_v10  ;;  %vm6644_vm2 = vcmp.eq.s32.totalorder %v5829_v36, %v5870_v53 }
 0x837   : > { %4193 = vmatpush.msk.msra.mxu0 %vm6646_vm7, %v4393_v10  ;;  %4168 = vmatpush.msk.msra.mxu1 %vm2572_vm5, %v4393_v10  ;;  %vm2568_vm5 = vcmp.eq.s32.totalorder %v5571_v1, %v5870_v53  ;;  %vm2604_vm7 = vcmp.eq.s32.totalorder %v5882_v14, %v5870_v53 }
 0x838   : > { %4180 = vmatpush.msk.msra.mxu3 %vm2612_vm14, %v4393_v10  ;;  %4204 = vmatpush.msk.msra.mxu2 %vm2692_vm4, %v4393_v10  ;;  %vm6647_vm14 = vcmp.eq.s32.totalorder %v5834_v54, %v5870_v53 }
 0x839   : > { %4194 = vmatpush.msk.msra.mxu0 %vm6645_vm1, %v4393_v10  ;;  %4169 = vmatpush.msk.msra.mxu1 %vm2570_vm8, %v4393_v10  ;;  %vm2608_vm8 = vcmp.eq.s32.totalorder %v5863_v29, %v5870_v53  ;;  %vm6649_vm1 = vcmp.eq.s32.totalorder %v5840_v50, %v5870_v53 }
 0x83a   : > { %4181 = vmatpush.msk.msra.mxu3 %vm2610_vm6, %v4393_v10  ;;  %4205 = vmatpush.msk.msra.mxu2 %vm2690_vm15, %v4393_v10  ;;  %vm2606_vm6 = vcmp.eq.s32.totalorder %v5873_v6, %v5870_v53 }
 0x83b   : > { %4195 = vmatpush.msk.msra.mxu0 %vm6644_vm2, %v4393_v10  ;;  %4170 = vmatpush.msk.msra.mxu1 %vm2568_vm5, %v4393_v10  ;;  %vm2688_vm2 = vcmp.eq.s32.totalorder %v5868_v5, %v5870_v53  ;;  %vm2686_vm5 = vcmp.eq.s32.totalorder %v5876_v21, %v5870_v53 }
 0x83c   : > { %4182 = vmatpush.msk.msra.mxu3 %vm2608_vm8, %v4393_v10  ;;  %4206 = vmatpush.msk.msra.mxu2 %vm2688_vm2, %v4393_v10  ;;  %vm6648_vm8 = vcmp.eq.s32.totalorder %v5854_v35, %v5870_v53 }
 0x83d   : > { %4196 = vmatpush.msk.msra.mxu0 %vm6647_vm14, %v4393_v10  ;;  %vm2684_vm14 = vcmp.eq.s32.totalorder %v5885_v57, %v5870_v53  ;;  %4337 = vset.pattern.permute.xlu0 %v4394_v47  ;;  %v2964_v57 = vpop.permute.xlu2 %2963 }
 0x83e   : > { %4183 = vmatpush.msk.msra.mxu3 %vm2606_vm6, %v4393_v10  ;;  %4207 = vmatpush.msk.msra.mxu2 %vm2686_vm5, %v4393_v10  ;;  %vm2600_vm6 = vcmp.eq.s32.totalorder %v5947_v55, %v5870_v53  ;;  %v2969_v55 = vpop.permute.xlu0 %2968 }
 0x83f   : > { %4197 = vmatpush.msk.msra.mxu0 %vm6649_vm1, %v4393_v10  ;;  %vm2678_vm1 = vcmp.eq.s32.totalorder %v5961_v3, %v5870_v53  ;;  %4338 = vset.pattern.permute.xlu1 %v4394_v47 }
 0x840   : > { %4184 = vmatpush.msk.msra.mxu3 %vm2604_vm7, %v4393_v10  ;;  %4208 = vmatpush.msk.msra.mxu2 %vm2684_vm14, %v4393_v10  ;;  %vm2638_vm7 = vcmp.eq.s32.totalorder %v5905_v19, %v5870_v53 }
 0x841   : > { %4198 = vmatpush.msk.msra.mxu0 %vm6648_vm8, %v4393_v10  ;;  %vm2680_vm8 = vcmp.eq.s32.totalorder %v5951_v43, %v5870_v53  ;;  %3340 = vperm.xlu0 %4337, %v6452_v33  }
 0x842   : > { %4336 = vset.pattern.permute.xlu2 %v4394_v47 }
 0x843   : > { %4199 = vmatpush.msk.msra.mxu0 %vm2638_vm7, %v4393_v10  ;;  %3336 = vperm.xlu2 %4336, %v6460_v42  }
 0x849   : > { %4340 = vset.pattern.permute.xlu0 %v4395_v7 }
 0x84a   : > { %3420 = vperm.xlu0 %4340, %v6452_v33  }
 0x84b   : > { %4339 = vset.pattern.permute.xlu2 %v4395_v7 }
 0x84c   : > { %3416 = vperm.xlu2 %4339, %v6460_v42  }
 0x875   : > { %v6147_v17 = vpop.f32.mrf.mxu1 }
 0x876   : > { %2987 = vmatmul.f32.vlgmr.msrb.gmra.mxu1 %v6147_v17 }
 0x877   : > { %4248 = vmatpush.msk.msrb.mxu1 %vm2662_vm13, %v4393_v10  ;;  %vm6650_vm13 = vcmp.eq.s32.totalorder %v5925_v2, %v5870_v53 }
 0x878   : > { %4209 = vmatpush.msk.msra.mxu2 %vm6650_vm13, %v4393_v10  ;;  %vm2634_vm13 = vcmp.eq.s32.totalorder %v5917_v30, %v5870_v53 }
 0x879   : > { %4249 = vmatpush.msk.msrb.mxu1 %vm2660_vm0, %v4393_v10  ;;  %vm2602_vm0 = vcmp.eq.s32.totalorder %v5922_v13, %v5870_v53 }
 0x87a   : > { %4185 = vmatpush.msk.msra.mxu3 %vm2602_vm0, %v4393_v10  ;;  %4210 = vmatpush.msk.msra.mxu2 %vm2680_vm8, %v4393_v10  ;;  %vm2676_vm0 = vcmp.eq.s32.totalorder %v5977_v18, %v5870_v53 }
 0x87b   : > { %4250 = vmatpush.msk.msrb.mxu1 %vm2658_vm3, %v4393_v10  ;;  %vm2636_vm3 = vcmp.eq.s32.totalorder %v5914_v25, %v5870_v53 }
 0x87c   : > { %4186 = vmatpush.msk.msra.mxu3 %vm2600_vm6, %v4393_v10  ;;  %4200 = vmatpush.msk.msra.mxu0 %vm2636_vm3, %v4393_v10  ;;  %vm2664_vm6 = vcmp.eq.s32.totalorder %v6088_v22, %v5870_v53 }
 0x87d   : > { %v6212_v1 = vpop.f32.mrf.mxu1  ;;  %v6214_v27 = vpop.f32.mrf.mxu0  ;;  %4251 = vmatpush.msk.msrb.mxu1 %vm2656_vm12, %v4393_v10  ;;  %4211 = vmatpush.msk.msra.mxu2 %vm2678_vm1, %v4393_v10  ;;  %vm2632_vm12 = vcmp.eq.s32.totalorder %v5930_v56, %v5870_v53 }
 0x87e   : > { %2990 = vmatmul.f32.gmra.mxu1 %v6212_v1  ;;  %v6229_v4 = vpop.f32.mrf.mxu3  ;;  %3045 = vmatmul.f32.vlgmr.msrb.gmra.mxu0 %v6214_v27 }
 0x87f   : > { %3016 = vmatmul.f32.vlgmr.msrb.gmra.mxu3 %v6229_v4  ;;  %4201 = vmatpush.msk.msra.mxu0 %vm2634_vm13, %v4393_v10 }
 0x880   : > { %4264 = vmatpush.msk.msrb.mxu3 %vm2694_vm11, %v4393_v10  ;;  %4252 = vmatpush.msk.msrb.mxu1 %vm2654_vm9, %v4393_v10  ;;  %vm2674_vm11 = vcmp.eq.s32.totalorder %v5996_v38, %v5870_v53  ;;  %vm2672_vm9 = vcmp.eq.s32.totalorder %v6016_v31, %v5870_v53 }
 0x881   : > { %4212 = vmatpush.msk.msra.mxu2 %vm2676_vm0, %v4393_v10  ;;  %4202 = vmatpush.msk.msra.mxu0 %vm2632_vm12, %v4393_v10 }
 0x882   : > { %4265 = vmatpush.msk.msrb.mxu3 %vm2692_vm4, %v4393_v10  ;;  %4253 = vmatpush.msk.msrb.mxu1 %vm2652_vm10, %v4393_v10  ;;  %vm2670_vm4 = vcmp.eq.s32.totalorder %v6032_v63, %v5870_v53  ;;  %vm2668_vm10 = vcmp.eq.s32.totalorder %v6046_v61, %v5870_v53 }
 0x883   : > { %4213 = vmatpush.msk.msra.mxu2 %vm2674_vm11, %v4393_v10 }
 0x884   : > { %4266 = vmatpush.msk.msrb.mxu3 %vm2690_vm15, %v4393_v10  ;;  %vm6661_vm15 = vcmp.eq.s32.totalorder %v5733_v62, %v5870_v53 }
 0x885   : > { %v6285_v40 = vpop.f32.mrf.mxu1  ;;  %v6287_v28 = vpop.f32.mrf.mxu0  ;;  %4214 = vmatpush.msk.msra.mxu2 %vm2672_vm9, %v4393_v10  ;;  %4254 = vmatpush.msk.msrb.mxu1 %vm6661_vm15, %v4393_v10  ;;  %vm6663_vm15 = vcmp.eq.s32.totalorder %v5829_v36, %v5870_v53 }
 0x886   : > { %2993 = vmatmul.f32.gmra.mxu1 %v6285_v40  ;;  %v2451_v34 = vpop.f32.mrf.mxu3  ;;  %3048 = vmatmul.f32.gmra.mxu0 %v6287_v28 }
 0x887   : > { %3019 = vmatmul.f32.gmra.mxu3 %v2451_v34  ;;  %4215 = vmatpush.msk.msra.mxu2 %vm2670_vm4, %v4393_v10 }
 0x888   : > { %4267 = vmatpush.msk.msrb.mxu3 %vm2688_vm2, %v4393_v10  ;;  %vm6662_vm2 = vcmp.eq.s32.totalorder %v5761_v60, %v5870_v53 }
 0x889   : > { %4255 = vmatpush.msk.msrb.mxu1 %vm6662_vm2, %v4393_v10  ;;  %4216 = vmatpush.msk.msra.mxu2 %vm2668_vm10, %v4393_v10  ;;  %vm6664_vm2 = vcmp.eq.s32.totalorder %v5925_v2, %v5870_v53 }
 0x88a   : > { %4268 = vmatpush.msk.msrb.mxu3 %vm2686_vm5, %v4393_v10  ;;  %vm2666_vm5 = vcmp.eq.s32.totalorder %v6068_v15, %v5870_v53 }
 0x88b   : > { %4217 = vmatpush.msk.msra.mxu2 %vm2666_vm5, %v4393_v10  ;;  %4256 = vmatpush.msk.msrb.mxu1 %vm6663_vm15, %v4393_v10  ;;  %vm6666_vm15 = vcmp.eq.s32.totalorder %v5840_v50, %v5870_v53  ;;  %v2959_v50 = vpop.permute.xlu1 %2958 }
 0x88c   : > { %4269 = vmatpush.msk.msrb.mxu3 %vm2684_vm14, %v4393_v10  ;;  %vm6665_vm14 = vcmp.eq.s32.totalorder %v5834_v54, %v5870_v53 }
 0x88d   : > { %v2437_v37 = vpop.f32.mrf.mxu1  ;;  %v2473_v41 = vpop.f32.mrf.mxu0  ;;  %4218 = vmatpush.msk.msra.mxu2 %vm2664_vm6, %v4393_v10  ;;  %4257 = vmatpush.msk.msrb.mxu1 %vm6665_vm14, %v4393_v10 }
 0x88e   : > { %2996 = vmatmul.f32.gmra.mxu1 %v2437_v37  ;;  %v2454_v12 = vpop.f32.mrf.mxu3  ;;  %3051 = vmatmul.f32.gmra.mxu0 %v2473_v41 }
 0x88f   : > { %v2487_v45 = vpop.f32.mrf.mxu2  ;;  %3022 = vmatmul.f32.gmra.mxu3 %v2454_v12  ;;  %4258 = vmatpush.msk.msrb.mxu1 %vm6666_vm15, %v4393_v10 }
 0x890   : > { %3074 = vmatmul.f32.vlgmr.msrb.gmra.mxu2 %v2487_v45  ;;  %4270 = vmatpush.msk.msrb.mxu3 %vm6664_vm2, %v4393_v10  ;;  %vm6667_vm2 = vcmp.eq.s32.totalorder %v5854_v35, %v5870_v53 }
 0x891   : > { %4259 = vmatpush.msk.msrb.mxu1 %vm6667_vm2, %v4393_v10 }
 0x892   : > { %4271 = vmatpush.msk.msrb.mxu3 %vm2680_vm8, %v4393_v10 }
 0x893   : > { %4260 = vmatpush.msk.msrb.mxu1 %vm2638_vm7, %v4393_v10 }
 0x894   : > { %4272 = vmatpush.msk.msrb.mxu3 %vm2678_vm1, %v4393_v10 }
 0x895   : > { %v2475_v58 = vpop.f32.mrf.mxu0  ;;  %4261 = vmatpush.msk.msrb.mxu1 %vm2636_vm3, %v4393_v10 }
 0x896   : > { %3103 = vmatmul.f32.vlgmr.msra.gmra.mxu1 %v6147_v17  ;;  %v2456_v48 = vpop.f32.mrf.mxu3  ;;  %3054 = vmatmul.f32.gmra.mxu0 %v2475_v58  ;;  %v6477_v17 = vld [vmem:[%s6449_s22 + $0x18] sm:$0xff] }
 0x897   : > { %v2489_v8 = vpop.f32.mrf.mxu2  ;;  %3025 = vmatmul.f32.gmra.mxu3 %v2456_v48  ;;  %4262 = vmatpush.msk.msrb.mxu1 %vm2634_vm13, %v4393_v10 }
 0x898   : > { %3077 = vmatmul.f32.gmra.mxu2 %v2489_v8  ;;  %4273 = vmatpush.msk.msrb.mxu3 %vm2676_vm0, %v4393_v10 }
 0x899   : > { %4263 = vmatpush.msk.msrb.mxu1 %vm2632_vm12, %v4393_v10 }
 0x89a   : > { %4274 = vmatpush.msk.msrb.mxu3 %vm2674_vm11, %v4393_v10 }
 0x89c   : > { %4275 = vmatpush.msk.msrb.mxu3 %vm2672_vm9, %v4393_v10  ;;  %vm6668_vm9 = vcmask 7168  }
 0x89e   : > { %3106 = vmatmul.f32.gmra.mxu1 %v6212_v1  ;;  %3161 = vmatmul.f32.vlgmr.msra.gmra.mxu0 %v6214_v27 }
 0x89f   : > { %v2492_v59 = vpop.f32.mrf.mxu2  ;;  %3132 = vmatmul.f32.vlgmr.msra.gmra.mxu3 %v6229_v4 }
 0x8a0   : > { %3080 = vmatmul.f32.gmra.mxu2 %v2492_v59  ;;  %4276 = vmatpush.msk.msrb.mxu3 %vm2670_vm4, %v4393_v10  ;;  %vm6669_vm4 = vmmov %vm6668_vm9 }
 0x8a1   : > { %vm6672_vm14 = vmmov %vm6669_vm4 }
 0x8a2   : > { %4277 = vmatpush.msk.msrb.mxu3 %vm2668_vm10, %v4393_v10  ;;  %vm6670_vm10 = vmmov %vm6669_vm4 }
 0x8a3   : > { %vm6673_vm15 = vmmov %vm6669_vm4 }
 0x8a4   : > { %4278 = vmatpush.msk.msrb.mxu3 %vm2666_vm5, %v4393_v10  ;;  %vm3443_vm5 = vcmask 1047568   ;;  %vm6674_vm2 = vmmov %vm6669_vm4 }
 0x8a6   : > { %3109 = vmatmul.f32.gmra.mxu1 %v6285_v40  ;;  %3164 = vmatmul.f32.gmra.mxu0 %v6287_v28 }
 0x8a7   : > { %v2494_v20 = vpop.f32.mrf.mxu2  ;;  %3135 = vmatmul.f32.gmra.mxu3 %v2451_v34 }
 0x8a8   : > { %3083 = vmatmul.f32.gmra.mxu2 %v2494_v20  ;;  %4279 = vmatpush.msk.msrb.mxu3 %vm2664_vm6, %v4393_v10  ;;  %v6455_v10 = vld [vmem:[%s6449_s22 + $0x10] sm:$0xff]  ;;  %vm6671_vm6 = vmmov %vm6669_vm4  ;;  %s673_s22 = scalar_lea.vmem %s6624_s10, %s6706_s25 }
 0x8a9   : > { %3344 = vperm.xlu1 %4338, %v6455_v10  }
 0x8ae   : > { %3112 = vmatmul.f32.gmra.mxu1 %v2437_v37  ;;  %3167 = vmatmul.f32.gmra.mxu0 %v2473_v41 }
 0x8af   : > { %3138 = vmatmul.f32.gmra.mxu3 %v2454_v12 }
 0x8b0   : > { %3190 = vmatmul.f32.vlgmr.msra.gmra.mxu2 %v2487_v45 }
 0x8b6   : > { %3170 = vmatmul.f32.vlgmr.msrb.gmra.mxu1 %v2475_v58 }
 0x8b7   : > { %3141 = vmatmul.f32.gmra.mxu3 %v2456_v48 }
 0x8b8   : > { %3193 = vmatmul.f32.gmra.mxu2 %v2489_v8 }
 0x8bf   : > { %3199 = vmatmul.f32.vlgmr.msrb.gmra.mxu3 %v2494_v20 }
 0x8c0   : > { %3196 = vmatmul.f32.gmra.mxu2 %v2492_v59 }
 0x8f3   : > { %v2988_v32 = vpop.f32.mrf.mxu1 }
 0x8f4   : > { %v2989_v51 = vadd.f32 %v2988_v32, %v2954_v11 }
 0x8fb   : > { %v2991_v62 = vpop.f32.mrf.mxu1  ;;  %v3046_v23 = vpop.f32.mrf.mxu0 }
 0x8fc   : > { %v2992_v24 = vadd.f32 %v2991_v62, %v2959_v50 }
 0x902   : > { %v3017_v52 = vpop.f32.mrf.mxu3 }
 0x903   : > { %v2994_v26 = vpop.f32.mrf.mxu1  ;;  %v3018_v44 = vadd.f32 %v3017_v52, %v2989_v51  ;;  %v3049_v46 = vpop.f32.mrf.mxu0 }
 0x904   : > { %v2995_v25 = vadd.f32 %v2994_v26, %v2964_v57 }
 0x905   : > { %v3047_v54 = vadd.f32 %v3046_v23, %v3018_v44 }
 0x90a   : > { %v3020_v60 = vpop.f32.mrf.mxu3 }
 0x90b   : > { %v2997_v49 = vpop.f32.mrf.mxu1  ;;  %v3021_v35 = vadd.f32 %v3020_v60, %v2992_v24  ;;  %v3052_v6 = vpop.f32.mrf.mxu0 }
 0x90c   : > { %v2998_v63 = vadd.f32 %v2997_v49, %v2969_v55 }
 0x90d   : > { %v3050_v14 = vadd.f32 %v3049_v46, %v3021_v35 }
 0x912   : > { %v3023_v36 = vpop.f32.mrf.mxu3 }
 0x913   : > { %v3075_v9 = vpop.f32.mrf.mxu2  ;;  %v3104_v5 = vpop.f32.mrf.mxu1  ;;  %v3024_v13 = vadd.f32 %v3023_v36, %v2995_v25 }
 0x914   : > { %v3076_v0 = vadd.f32 %v3075_v9, %v3047_v54  ;;  %v3055_v38 = vpop.f32.mrf.mxu0  ;;  %v3105_v28 = vadd.f32 %v3104_v5, %v2954_v11 }
 0x915   : > { %v3053_v3 = vadd.f32 %v3052_v6, %v3024_v13  ;;  %v3341_v13 = vpop.permute.xlu0 %3340 }
 0x916   : > { %vm3203_vm1 = vcmp.ge.f32.partialorder %v3076_v0, 0.0  ;;  %v3211_v29 = vmul.f32 0.2, %v3076_v0 }
 0x918   : > { %v3219_v53 = vsel %vm3203_vm1, %v3076_v0, %v3211_v29  ;;  %vm6675_vm1 = vmmov %vm6674_vm2 }
 0x919   : > { %3247 = vrot.lane.b32.xlu1 %v3219_v53, %s6660_s18  ;;  %3227 = vst [vmem:[%s6470_s20] sm:$0xff] %v3219_v53 }
 0x91a   : > { %v3026_v21 = vpop.f32.mrf.mxu3 }
 0x91b   : > { %v3078_v19 = vpop.f32.mrf.mxu2  ;;  %v3107_v43 = vpop.f32.mrf.mxu1  ;;  %v3027_v15 = vadd.f32 %v3026_v21, %v2998_v63 }
 0x91c   : > { %v3079_v30 = vadd.f32 %v3078_v19, %v3050_v14  ;;  %v3162_v41 = vpop.f32.mrf.mxu0  ;;  %v3108_v20 = vadd.f32 %v3107_v43, %v2959_v50 }
 0x91d   : > { %v3056_v27 = vadd.f32 %v3055_v38, %v3027_v15 }
 0x91e   : > { %vm3205_vm8 = vcmp.ge.f32.partialorder %v3079_v30, 0.0  ;;  %v3213_v2 = vmul.f32 0.2, %v3079_v30 }
 0x920   : > { %v3221_v56 = vsel %vm3205_vm8, %v3079_v30, %v3213_v2  ;;  %vm6676_vm8 = vmmov %vm6675_vm1 }
 0x921   : > { %3251 = vrot.lane.b32.xlu0 %v3221_v56, %s6660_s18  ;;  %3229 = vst [vmem:[%s6470_s20 + $0x10] sm:$0xff] %v3221_v56  ;;  %v6503_v56 = vpop.permute.xlu1 %3344 }
 0x922   : > { %v3133_v18 = vpop.f32.mrf.mxu3 }
 0x923   : > { %v3081_v31 = vpop.f32.mrf.mxu2  ;;  %v3110_v34 = vpop.f32.mrf.mxu1  ;;  %v3134_v12 = vadd.f32 %v3133_v18, %v3105_v28 }
 0x924   : > { %v3082_v61 = vadd.f32 %v3081_v31, %v3053_v3  ;;  %v3165_v52 = vpop.f32.mrf.mxu0  ;;  %v3111_v44 = vadd.f32 %v3110_v34, %v2964_v57 }
 0x925   : > { %v3163_v8 = vadd.f32 %v3162_v41, %v3134_v12 }
 0x926   : > { %vm3207_vm13 = vcmp.ge.f32.partialorder %v3082_v61, 0.0  ;;  %v3215_v22 = vmul.f32 0.2, %v3082_v61 }
 0x928   : > { %v3223_v1 = vsel %vm3207_vm13, %v3082_v61, %v3215_v22  ;;  %vm6677_vm13 = vmmov %vm6675_vm1 }
 0x929   : > { %3255 = vrot.lane.b32.xlu2 %v3223_v1, %s6660_s18  ;;  %3231 = vst [vmem:[%s6470_s20 + $0x20] sm:$0xff] %v3223_v1  ;;  %3428 = vperm.xlu0 %4340, %v6477_v17  }
 0x92a   : > { %v3136_v4 = vpop.f32.mrf.mxu3 }
 0x92b   : > { %v3084_v40 = vpop.f32.mrf.mxu2  ;;  %v3113_v32 = vpop.f32.mrf.mxu1  ;;  %v3137_v7 = vadd.f32 %v3136_v4, %v3108_v20 }
 0x92c   : > { %v3085_v37 = vadd.f32 %v3084_v40, %v3056_v27  ;;  %v3114_v11 = vadd.f32 %v3113_v32, %v2969_v55  ;;  %v3168_v24 = vpop.f32.mrf.mxu0  ;;  %v3421_v55 = vpop.permute.xlu0 %3420 }
 0x92d   : > { %v3166_v60 = vadd.f32 %v3165_v52, %v3137_v7 }
 0x92e   : > { %vm3209_vm7 = vcmp.ge.f32.partialorder %v3085_v37, 0.0  ;;  %v3217_v45 = vmul.f32 0.2, %v3085_v37 }
 0x930   : > { %v3225_v58 = vsel %vm3209_vm7, %v3085_v37, %v3217_v45  ;;  %vm3363_vm7 = vcmask 1047560  }
 0x931   : > { %3233 = vst [vmem:[%s6470_s20 + $0x30] sm:$0xff] %v3225_v58  ;;  %3259 = vrot.lane.b32.xlu2 %v3225_v58, %s6660_s18  ;;  %4343 = vset.pattern.permute.xlu0 %v4391_v39 }
 0x932   : > { %3299 = vperm.xlu0 %4343, %v6455_v10   ;;  %v3139_v48 = vpop.f32.mrf.mxu3 }
 0x933   : > { %v3191_v59 = vpop.f32.mrf.mxu2  ;;  %v3140_v36 = vadd.f32 %v3139_v48, %v3111_v44  ;;  %v3171_v50 = vpop.f32.mrf.mxu1 }
 0x934   : > { %v3192_v47 = vadd.f32 %v3191_v59, %v3163_v8 }
 0x935   : > { %v3169_v35 = vadd.f32 %v3168_v24, %v3140_v36 }
 0x936   : > { %vm3204_vm3 = vcmp.ge.f32.partialorder %v3192_v47, 0.0  ;;  %v3212_v62 = vmul.f32 0.2, %v3192_v47 }
 0x938   : > { %v3220_v26 = vsel %vm3204_vm3, %v3192_v47, %v3212_v62  ;;  %vm6678_vm3 = vcmask 15360  }
 0x939   : > { %3228 = vst [vmem:[%s6470_s20 + $0x8] sm:$0xff] %v3220_v26  ;;  %3249 = vrot.lane.b32.xlu2 %v3220_v26, %s6660_s18 }
 0x93a   : > { %v3142_v23 = vpop.f32.mrf.mxu3 }
 0x93b   : > { %v3194_v51 = vpop.f32.mrf.mxu2  ;;  %v3143_v46 = vadd.f32 %v3142_v23, %v3114_v11 }
 0x93c   : > { %v3195_v49 = vadd.f32 %v3194_v51, %v3166_v60 }
 0x93d   : > { %v3172_v0 = vadd.f32 %v3171_v50, %v3143_v46 }
 0x93e   : > { %vm3206_vm0 = vcmp.ge.f32.partialorder %v3195_v49, 0.0  ;;  %v3214_v54 = vmul.f32 0.2, %v3195_v49 }
 0x940   : > { %v3222_v9 = vsel %vm3206_vm0, %v3195_v49, %v3214_v54  ;;  %vm6679_vm0 = vmmov %vm6678_vm3 }
 0x941   : > { %3424 = vperm.xlu2 %4339, %v6455_v10   ;;  %3253 = vrot.lane.b32.xlu1 %v3222_v9, %s6660_s18  ;;  %3230 = vst [vmem:[%s6470_s20 + $0x18] sm:$0xff] %v3222_v9  ;;  %v6501_v10 = vpop.permute.xlu2 %3336 }
 0x942   : > { %v3200_v29 = vpop.f32.mrf.mxu3 }
 0x943   : > { %v3197_v5 = vpop.f32.mrf.mxu2  ;;  %v3201_v53 = vadd.f32 %v3200_v29, %v3172_v0 }
 0x944   : > { %v3198_v6 = vadd.f32 %v3197_v5, %v3169_v35 }
 0x945   : > { %vm3210_vm12 = vcmp.ge.f32.partialorder %v3201_v53, 0.0  ;;  %v3218_v21 = vmul.f32 0.2, %v3201_v53 }
 0x946   : > { %vm3208_vm11 = vcmp.ge.f32.partialorder %v3198_v6, 0.0  ;;  %v3216_v14 = vmul.f32 0.2, %v3198_v6 }
 0x947   : > { %v3226_v57 = vsel %vm3210_vm12, %v3201_v53, %v3218_v21  ;;  %vm6680_vm12 = vmmov %vm6675_vm1 }
 0x948   : > { %v3224_v19 = vsel %vm3208_vm11, %v3198_v6, %v3216_v14  ;;  %3234 = vst [vmem:[%s6470_s20 + $0x38] sm:$0xff] %v3226_v57  ;;  %vm6681_vm11 = vmmov %vm6675_vm1 }
 0x949   : > { %4342 = vset.pattern.permute.xlu2 %v4391_v39  ;;  %3232 = vst [vmem:[%s6470_s20 + $0x28] sm:$0xff] %v3224_v19  ;;  %3257 = vrot.lane.b32.xlu1 %v3224_v19, %s6660_s18  ;;  %v3417_v25 = vpop.permute.xlu2 %3416  ;;  %s6688_s20 = smov 126  }
 0x94a   : > { %3294 = vperm.xlu2 %4342, %v6452_v33  }
 0x951   : > { %3261 = vrot.lane.b32.xlu1 %v3226_v57, %s6660_s18 }
 0x959   : > { %3348 = vperm.xlu1 %4338, %v6477_v17  }
 0x961   : > { %4341 = vset.pattern.permute.xlu1 %v4391_v39 }
 0x962   : > { %3289 = vperm.xlu1 %4341, %v6460_v42  }
 0x96a   : > { %3304 = vperm.xlu1 %4341, %v6477_v17  }
 0x983   : > { %v3256_v30 = vpop.permute.xlu2 %3255 }
 0x984   : > { %v6513_v63 = vsel %vm6670_vm10, 0.0, %v3256_v30  ;;  %vm6684_vm10 = vmmov %vm6675_vm1 }
 0x985   : > { %v3357_v14 = vmul.f32 %v6503_v56, %v6513_v63 }
 0x98b   : > { %v3260_v2 = vpop.permute.xlu2 %3259  ;;  %v3248_v43 = vpop.permute.xlu1 %3247 }
 0x98c   : > { %v6509_v39 = vsel %vm6669_vm4, 0.0, %v3248_v43  ;;  %v6521_v4 = vsel %vm6671_vm6, 0.0, %v3260_v2  ;;  %vm6683_vm4 = vmmov %vm6679_vm0 }
 0x98d   : > { %v3431_v61 = vmul.f32 %v3417_v25, %v6509_v39  ;;  %v3351_v23 = vmul.f32 %v6501_v10, %v6509_v39  ;;  %vm6686_vm6 = vmmov %vm6675_vm1 }
 0x98f   : > { %v3444_v1 = vsel %vm3443_vm5, %v3431_v61, 0.0  ;;  %v3364_v57 = vsel %vm3363_vm7, %v3351_v23, 0.0 }
 0x993   : > { %v3250_v33 = vpop.permute.xlu2 %3249  ;;  %v3252_v3 = vpop.permute.xlu0 %3251 }
 0x994   : > { %v6506_v18 = vsel %vm6668_vm9, 0.0, %v3252_v3  ;;  %v3283_v37 = vsel %vm6672_vm14, %v3250_v33, 0.0  ;;  %v6530_v58 = vsel %vm6675_vm1, %v3248_v43, %v3250_v33  ;;  %vm6682_vm9 = vmmov %vm6679_vm0 }
 0x995   : > { %v3434_v38 = vmul.f32 %v3421_v55, %v6506_v18  ;;  %v3433_v59 = vmul.f32 %v3417_v25, %v3283_v37  ;;  %v3432_v62 = vmul.f32 %v3417_v25, %v6530_v58  ;;  %v3354_v60 = vmul.f32 %v3341_v13, %v6506_v18  ;;  %vm6687_vm14 = vmmov %vm6675_vm1 }
 0x996   : > { %v3353_v11 = vmul.f32 %v6501_v10, %v3283_v37 }
 0x997   : > { %v3445_v22 = vsel %vm3443_vm5, %v3434_v38, 0.0  ;;  %v3467_v51 = vsel %vm6678_vm3, %v3433_v59, 0.0  ;;  %v3365_v5 = vsel %vm3363_vm7, %v3354_v60, 0.0 }
 0x998   : > { %v3446_v40 = vadd.f32 %v3445_v22, %v3444_v1  ;;  %v3366_v33 = vadd.f32 %v3365_v5, %v3364_v57 }
 0x99b   : > { %v3425_v42 = vpop.permute.xlu2 %3424  ;;  %v3429_v17 = vpop.permute.xlu0 %3428 }
 0x99c   : > { %v3437_v15 = vmul.f32 %v3425_v42, %v6513_v63  ;;  %v3440_v28 = vmul.f32 %v3429_v17, %v6521_v4 }
 0x99e   : > { %v3447_v27 = vsel %vm3443_vm5, %v3437_v15, 0.0  ;;  %v3449_v20 = vsel %vm3443_vm5, %v3440_v28, 0.0  ;;  %vm6685_vm5 = vmmov %vm6675_vm1  ;;  %v3367_v15 = vsel %vm3363_vm7, %v3357_v14, 0.0  ;;  %vm6691_vm1 = vcmask 1031168  }
 0x99f   : > { %v3448_v41 = vadd.f32 %v3447_v27, %v3446_v40 }
 0x9a1   : > { %v3450_v7 = vadd.f32 %v3449_v20, %v3448_v41  ;;  %v3368_v41 = vadd.f32 %v3367_v15, %v3366_v33 }
 0x9a3   : > { %v3451_v36 = vrot.slane %v3450_v7, 4 }
 0x9a5   : > { %v3452_v43 = vadd.f32 %v3451_v36, %v3450_v7 }
 0x9a7   : > { %v3453_v28 = vrot.slane %v3452_v43, 2 }
 0x9b3   : > { %v3254_v31 = vpop.permute.xlu1 %3253 }
 0x9b4   : > { %v6526_v12 = vsel %vm6673_vm15, %v3252_v3, %v3254_v31  ;;  %v3284_v45 = vsel %vm6674_vm2, %v3254_v31, 0.0  ;;  %vm6689_vm15 = vcmask 1039360  }
 0x9b5   : > { %v3435_v47 = vmul.f32 %v3421_v55, %v6526_v12  ;;  %v3436_v32 = vmul.f32 %v3421_v55, %v3284_v45  ;;  %v3356_v54 = vmul.f32 %v3341_v13, %v3284_v45  ;;  %v3355_v53 = vmul.f32 %v3341_v13, %v6526_v12  ;;  %vm6690_vm2 = vmmov %vm6689_vm15 }
 0x9b7   : > { %v3457_v44 = vadd.f32 %v3435_v47, %v3432_v62  ;;  %v3468_v49 = vsel %vm6679_vm0, %v3436_v32, 0.0 }
 0x9b8   : > { %v3469_v6 = vadd.f32 %v3468_v49, %v3467_v51  ;;  %v3454_v51 = vadd.f32 %v3453_v28, %v3452_v43 }
 0x9ba   : > { %v3455_v57 = vrot.slane %v3454_v51, 1 }
 0x9bb   : > { %v3258_v34 = vpop.permute.xlu1 %3257 }
 0x9bc   : > { %v6533_v48 = vsel %vm6676_vm8, %v3256_v30, %v3258_v34  ;;  %v3285_v8 = vsel %vm6677_vm13, %v3258_v34, 0.0  ;;  %v3352_v30 = vmul.f32 %v6501_v10, %v6530_v58  ;;  %vm6692_vm8 = vmmov %vm6691_vm1  ;;  %vm3508_vm13 = vcmask 1040384  }
 0x9bd   : > { %v3438_v52 = vmul.f32 %v3425_v42, %v6533_v48  ;;  %v3439_v26 = vmul.f32 %v3425_v42, %v3285_v8  ;;  %v3359_v21 = vmul.f32 %v6503_v56, %v3285_v8  ;;  %v3358_v55 = vmul.f32 %v6503_v56, %v6533_v48 }
 0x9be   : > { %v3386_v42 = vsel %vm6685_vm5, %v3353_v11, 0.0  ;;  %v3377_v38 = vadd.f32 %v3355_v53, %v3352_v30 }
 0x9bf   : > { %v3458_v24 = vadd.f32 %v3457_v44, %v3438_v52  ;;  %v3470_v0 = vsel %vm6682_vm9, %v3439_v26, 0.0  ;;  %v3389_v31 = vsel %vm6686_vm6, %v3359_v21, 0.0  ;;  %v3295_v52 = vpop.permute.xlu2 %3294  ;;  %v3300_v44 = vpop.permute.xlu0 %3299 }
 0x9c0   : > { %v3471_v13 = vadd.f32 %v3470_v0, %v3469_v6  ;;  %v3378_v1 = vadd.f32 %v3377_v38, %v3358_v55  ;;  %v3311_v6 = vmul.f32 %v3300_v44, %v6513_v63  ;;  %v3312_v21 = vmul.f32 %v3300_v44, %v6533_v48 }
 0x9c3   : > { %v3262_v46 = vpop.permute.xlu1 %3261 }
 0x9c4   : > { %v6547_v50 = vsel %vm6680_vm12, %v3260_v2, %v3262_v46  ;;  %v3286_v9 = vsel %vm6681_vm11, %v3262_v46, 0.0  ;;  %v3387_v2 = vsel %vm6684_vm10, %v3356_v54, 0.0  ;;  %v3309_v54 = vmul.f32 %v3295_v52, %v6506_v18 }
 0x9c5   : > { %v3441_v35 = vmul.f32 %v3429_v17, %v6547_v50  ;;  %v3442_v29 = vmul.f32 %v3429_v17, %v3286_v9  ;;  %v3388_v22 = vadd.f32 %v3387_v2, %v3386_v42 }
 0x9c7   : > { %v3459_v19 = vadd.f32 %v3458_v24, %v3441_v35  ;;  %v3472_v25 = vsel %vm6683_vm4, %v3442_v29, 0.0  ;;  %v3390_v34 = vadd.f32 %v3389_v31, %v3388_v22 }
 0x9c8   : > { %v3473_v61 = vadd.f32 %v3472_v25, %v3471_v13 }
 0x9c9   : > { %v3460_v3 = vrot.slane %v3459_v19, 4 }
 0x9ca   : > { %v3474_v45 = vrot.slane %v3473_v61, 4 }
 0x9cb   : > { %v3461_v17 = vadd.f32 %v3460_v3, %v3459_v19  ;;  %v3349_v10 = vpop.permute.xlu1 %3348 }
 0x9cc   : > { %v3360_v27 = vmul.f32 %v3349_v10, %v6521_v4  ;;  %v3361_v56 = vmul.f32 %v3349_v10, %v6547_v50  ;;  %v3362_v40 = vmul.f32 %v3349_v10, %v3286_v9  ;;  %v3475_v11 = vadd.f32 %v3474_v45, %v3473_v61 }
 0x9cd   : > { %v3462_v37 = vrot.slane %v3461_v17, 2  ;;  %v3310_v9 = vmul.f32 %v3295_v52, %v6526_v12 }
 0x9ce   : > { %v3369_v8 = vsel %vm3363_vm7, %v3360_v27, 0.0  ;;  %v3379_v59 = vadd.f32 %v3378_v1, %v3361_v56  ;;  %v3391_v20 = vsel %vm6687_vm14, %v3362_v40, 0.0  ;;  %v3476_v14 = vrot.slane %v3475_v11, 2 }
 0x9cf   : > { %v3370_v47 = vadd.f32 %v3369_v8, %v3368_v41  ;;  %v3392_v32 = vadd.f32 %v3391_v20, %v3390_v34  ;;  %v3463_v7 = vadd.f32 %v3462_v37, %v3461_v17  ;;  %vm3513_vm7 = vcmp.lt.s32.totalorder %v2497_v16, 256 }
 0x9d0   : > { %v3380_v62 = vrot.slane %v3379_v59, 4  ;;  %v3477_v3 = vadd.f32 %v3476_v14, %v3475_v11 }
 0x9d1   : > { %v3371_v26 = vrot.slane %v3370_v47, 4  ;;  %v3393_v23 = vrot.slane %v3392_v32, 4  ;;  %v3464_v60 = vrot.slane %v3463_v7, 1 }
 0x9d2   : > { %v3381_v24 = vadd.f32 %v3380_v62, %v3379_v59  ;;  %v3478_v31 = vrot.slane %v3477_v3, 1 }
 0x9d3   : > { %v3372_v49 = vadd.f32 %v3371_v26, %v3370_v47  ;;  %v3394_v46 = vadd.f32 %v3393_v23, %v3392_v32  ;;  %v3465_v36 = vadd.f32 %v3464_v60, %v3463_v7 }
 0x9d4   : > { %v3290_v0 = vpop.permute.xlu1 %3289  ;;  %v3382_v30 = vrot.slane %v3381_v24, 2  ;;  %v3479_v15 = vadd.f32 %v3478_v31, %v3477_v3 }
 0x9d5   : > { %v3373_v35 = vrot.slane %v3372_v49, 2  ;;  %v3395_v29 = vrot.slane %v3394_v46, 2  ;;  %v3307_v5 = vmul.f32 %v3290_v0, %v6509_v39  ;;  %v3308_v53 = vmul.f32 %v3290_v0, %v6530_v58  ;;  %3485 = vrot.lane.b32.xlu0 %v3465_v36, %s6688_s20 }
 0x9d6   : > { %v3456_v39 = vadd.f32 %v3455_v57, %v3454_v51  ;;  %v3383_v63 = vadd.f32 %v3382_v30, %v3381_v24 }
 0x9d7   : > { %v3315_v19 = vadd.f32 %v3309_v54, %v3307_v5  ;;  %v3324_v18 = vadd.f32 %v3310_v9, %v3308_v53  ;;  %v3396_v25 = vadd.f32 %v3395_v29, %v3394_v46  ;;  %v3374_v12 = vadd.f32 %v3373_v35, %v3372_v49 }
 0x9d8   : > { %v3384_v61 = vrot.slane %v3383_v63, 1 }
 0x9d9   : > { %v3316_v2 = vadd.f32 %v3315_v19, %v3311_v6  ;;  %v3325_v55 = vadd.f32 %v3324_v18, %v3312_v21  ;;  %v3397_v13 = vrot.slane %v3396_v25, 1  ;;  %v3375_v33 = vrot.slane %v3374_v12, 1 }
 0x9da   : > { %v3385_v22 = vadd.f32 %v3384_v61, %v3383_v63 }
 0x9db   : > { %v3398_v43 = vadd.f32 %v3397_v13, %v3396_v25  ;;  %v3376_v58 = vadd.f32 %v3375_v33, %v3374_v12 }
 0x9dc   : > { %v3305_v42 = vpop.permute.xlu1 %3304 }
 0x9dd   : > { %v3314_v48 = vmul.f32 %v3305_v42, %v6547_v50  ;;  %3483 = vrot.lane.b32.xlu0 %v3456_v39, %s6688_s20  ;;  %3406 = vrot.lane.b32.xlu1 %v3398_v43, %s6657_s23  ;;  %v3496_v50 = vld [vmem:[%s673_s22] sm:$0x1]  ;;  %v3313_v17 = vmul.f32 %v3305_v42, %v6521_v4 }
 0x9de   : > { %3402 = vrot.lane.b32.xlu2 %v3376_v58, %s6657_s23 }
 0x9df   : > { %v3326_v38 = vadd.f32 %v3325_v55, %v3314_v48  ;;  %v3317_v10 = vadd.f32 %v3316_v2, %v3313_v17 }
 0x9e1   : > { %v3318_v1 = vrot.slane %v3317_v10, 4  ;;  %v3327_v27 = vrot.slane %v3326_v38, 4 }
 0x9e3   : > { %v3319_v40 = vadd.f32 %v3318_v1, %v3317_v10  ;;  %v3328_v28 = vadd.f32 %v3327_v27, %v3326_v38 }
 0x9e5   : > { %3487 = vrot.lane.b32.xlu1 %v3479_v15, %s6688_s20  ;;  %v3320_v34 = vrot.slane %v3319_v40, 2  ;;  %v3329_v37 = vrot.slane %v3328_v28, 2 }
 0x9e6   : > { %3404 = vrot.lane.b32.xlu2 %v3385_v22, %s6657_s23  ;;  %s3849_s23 = sshll.u32 %s6704_s26, 1 }
 0x9e7   : > { %v3321_v8 = vadd.f32 %v3320_v34, %v3319_v40  ;;  %v3330_v59 = vadd.f32 %v3329_v37, %v3328_v28  ;;  %s698_s17 = sadd.s32 %s3850_s16, %s3849_s23 }
 0x9e8   : > { %s699_s24 = scalar_lea.vmem %s6627_s13, %s698_s17 }
 0x9e9   : > { %v3322_v47 = vrot.slane %v3321_v8, 1  ;;  %v3331_v32 = vrot.slane %v3330_v59, 1 }
 0x9eb   : > { %v3323_v52 = vadd.f32 %v3322_v47, %v3321_v8  ;;  %v3332_v26 = vadd.f32 %v3331_v32, %v3330_v59 }
 0x9ee   : > { %3499 = vperm.xlu2 %4342, %v3496_v50  }
 0xa38   : > { %v3403_v56 = vpop.permute.xlu2 %3402 }
 0xa40   : > { %v3405_v45 = vpop.permute.xlu2 %3404 }
 0xa41   : > { %v3409_v4 = vsel %vm6689_vm15, %v3403_v56, %v3405_v45 }
 0xa42   : > { %v3413_v11 = vadd.f32 %v3409_v4, %v3323_v52 }
 0xa47   : > { %v3486_v41 = vpop.permute.xlu0 %3485 }
 0xa48   : > { %v3500_v60 = vpop.permute.xlu2 %3499 }
 0xa49   : > { %v3502_v36 = vperm.slane %v3500_v60, 0 }
 0xa4f   : > { %v3407_v20 = vpop.permute.xlu1 %3406  ;;  %v3484_v7 = vpop.permute.xlu0 %3483 }
 0xa50   : > { %v3410_v62 = vsel %vm6690_vm2, %v3405_v45, %v3407_v20  ;;  %v3490_v23 = vsel %vm6691_vm1, %v3484_v7, %v3486_v41 }
 0xa51   : > { %v3414_v51 = vadd.f32 %v3410_v62, %v3332_v26  ;;  %v3494_v46 = vadd.f32 %v3490_v23, %v3413_v11 }
 0xa53   : > { %v3503_v24 = vadd.f32 %v3502_v36, %v3494_v46 }
 0xa57   : > { %v3488_v44 = vpop.permute.xlu1 %3487 }
 0xa58   : > { %v3491_v49 = vsel %vm6692_vm8, %v3486_v41, %v3488_v44 }
 0xa59   : > { %v3495_v54 = vadd.f32 %v3491_v49, %v3414_v51 }
 0xa5b   : > { %v3504_v9 = vadd.f32 %v3502_v36, %v3495_v54 }
 0xa5d   : > { %v3507_v0 = vrot.slane %v3504_v9, 7 }
 0xa5f   : > { %v3509_v35 = vsel %vm3508_vm13, %v3503_v24, %v3507_v0 }
 0xa60   : > { %3515 = vst.msk [vmem:[%s699_s24] sm:$0x3] %vm3513_vm7, %v3509_v35 }
 0xa61 PF: > { %s24_s29 = sadd.s32 1, %s4382_s29   ;;  %s6693_s25 = smov %s4374_s27 }
 0xa62   : > { %p21_p7 = scmp.ge.s32.totalorder %s24_s29, 8   ;;  %s6694_s26 = smov %s4378_s28 }
 0xa63   : > { %s6695_s27 = smov %s6698_s30  ;;  %s6696_s28 = smov %s6702_s14 }
 0xa64   :  { %23 = sbr.rel (!%p21_p7) target bundleno = 3 (0x3), region = 148 }

// kernel: msbd_forward.4
= control target key start
LH: loop header
LB: loop body
LE: loop exit
PB: predicated region body
PF: predicated region fallthrough
CT: control target
= control target key end

     0   :  { %s798_s9 = smov 0   ;;  %s927_s0 = inlined_call_operand.vmem [shape: bf16[64,320], index: 0, kind: input, shape index: {}]   ;;  %s928_s1 = inlined_call_operand.vmem [shape: bf16[2,320,128], index: 1, kind: input, shape index: {}]   ;;  %s929_s2 = inlined_call_operand.vmem [shape: bf16[2,64,128], index: 2, kind: output, shape index: {}]  }
   0x1 LB: > { %s552_s10 = sadd.s32 4294967295, %s781_s9   ;;  %p556_p0 = scmp.ge.s32.totalorder %s781_s9, 1  ;;  %s781_s9 = sphi %s798_s9, %s12_s9  }
   0x2   : > { %p112_p1 = scmp.lt.s32.totalorder %s781_s9, 3 }
   0x4   : > { %p113_p2 = pnand %p556_p0, %p112_p1 }
   0x5   : > { %p134_p3 = scmp.lt.s32.totalorder (!%p113_p2), %s552_s10, 1 }
   0x6   : > { %116 = sbr.rel (%p113_p2) target bundleno = 226 (0xe2), region = 28 }
   0xb   : > { %s931_s10 = smov (!%p134_p3, %s552_s10), 1  ;;  %v570_v10 = vld [vmem:[%s927_s0 + $0x8] sm:$0xf]  ;;  %v697_v13 = vld [vmem:[%s927_s0 + $0x10] sm:$0xf0]  ;;  %vm381_vm0 = vcmask 523264  }
   0xc   : > { %s766_s11 = smul.u32 160, %s931_s10  ;;  %v571_v14 = vor.u32 %v697_v13, %v570_v10  ;;  %v574_v21 = vld [vmem:[%s927_s0 + $0x18] sm:$0xf]  ;;  %v699_v22 = vld [vmem:[%s927_s0 + $0x20] sm:$0xf0] }
   0xd   : > { %v562_v24 = vld [vmem:[%s927_s0] sm:$0xf]  ;;  %v696_v25 = vld [vmem:[%s927_s0 + $0x8] sm:$0xf0]  ;;  %v698_v27 = vld [vmem:[%s927_s0 + $0x1c] sm:$0xf]  ;;  %v575_v32 = vor.u32 %v699_v22, %v574_v21 }
   0xe   : > { %s812_s14 = scalar_lea.vmem %s928_s1, %s766_s11  ;;  %v576_v28 = vld [vmem:[%s927_s0 + $0x24] sm:$0xf0]  ;;  %v582_v29 = vld [vmem:[%s927_s0 + $0x20] sm:$0xf]  ;;  %v700_v30 = vld [vmem:[%s927_s0 + $0x28] sm:$0xf0]  ;;  %v563_v31 = vor.u32 %v696_v25, %v562_v24 }
   0xf   : > { %v714_v0 = vld [vmem:[%s812_s14 + $0x38] sm:$0xff]  ;;  %v713_v3 = vld [vmem:[%s812_s14 + $0x30] sm:$0xff]  ;;  %v712_v6 = vld [vmem:[%s812_s14 + $0x28] sm:$0xff]  ;;  %v579_v33 = vor.u32 %v698_v27, %v576_v28  ;;  %v583_v34 = vor.u32 %v700_v30, %v582_v29  ;;  %s694_s11 = sshll.u32 %s931_s10, 5 }
  0x10   : > { %v816_v1 = vld [vmem:[%s812_s14 + $0x78] sm:$0xff]  ;;  %394 = vmatpush.bf16.msra.mxu0 %v714_v0  ;;  %750 = vmatpush.bf16.msra.mxu3 %v714_v0  ;;  %v721_v4 = vld [vmem:[%s812_s14 + $0x70] sm:$0xff]  ;;  %v720_v7 = vld [vmem:[%s812_s14 + $0x68] sm:$0xff] }
  0x11   : > { %v726_v2 = vld [vmem:[%s812_s14 + $0x98] sm:$0xff]  ;;  %758 = vmatpush.bf16.msra.mxu1 %v816_v1  ;;  %v725_v5 = vld [vmem:[%s812_s14 + $0x90] sm:$0xff]  ;;  %v724_v8 = vld [vmem:[%s812_s14 + $0x88] sm:$0xff] }
  0x12   : > { %456 = vmatpush.bf16.msra.mxu2 %v726_v2  ;;  %v711_v9 = vld [vmem:[%s812_s14 + $0x20] sm:$0xff]  ;;  %v710_v15 = vld [vmem:[%s812_s14 + $0x18] sm:$0xff]  ;;  %v709_v17 = vld [vmem:[%s812_s14 + $0x10] sm:$0xff] }
  0x13   : > { %v719_v11 = vld [vmem:[%s812_s14 + $0x60] sm:$0xff]  ;;  %v718_v16 = vld [vmem:[%s812_s14 + $0x58] sm:$0xff]  ;;  %v717_v18 = vld [vmem:[%s812_s14 + $0x50] sm:$0xff] }
  0x14   : > { %395 = vmatpush.bf16.msra.mxu0 %v713_v3  ;;  %751 = vmatpush.bf16.msra.mxu3 %v713_v3  ;;  %v723_v12 = vld [vmem:[%s812_s14 + $0x80] sm:$0xff]  ;;  %v708_v19 = vld [vmem:[%s812_s14 + $0x8] sm:$0xff]  ;;  %v586_v35 = vld [vmem:[%s927_s0 + $0x30] sm:$0xf] }
  0x15   : > { %759 = vmatpush.bf16.msra.mxu1 %v721_v4  ;;  %v716_v20 = vld [vmem:[%s812_s14 + $0x48] sm:$0xff]  ;;  %v707_v23 = vld [vmem:[%s812_s14] sm:$0xff]  ;;  %v702_v36 = vld [vmem:[%s927_s0 + $0x38] sm:$0xf0] }
  0x16   : > { %457 = vmatpush.bf16.msra.mxu2 %v725_v5  ;;  %v715_v26 = vld [vmem:[%s812_s14 + $0x40] sm:$0xff]  ;;  %v701_v37 = vld [vmem:[%s927_s0 + $0x34] sm:$0xf]  ;;  %v594_v39 = vld [vmem:[%s927_s0 + $0x38] sm:$0xf]  ;;  %v587_v41 = vor.u32 %v702_v36, %v586_v35  ;;  %s918_s14 = scalar_lea.vmem %s929_s2, %s694_s11 }
  0x17   : > { %v588_v38 = vld [vmem:[%s927_s0 + $0x3c] sm:$0xf0]  ;;  %v703_v40 = vld [vmem:[%s927_s0 + $0x40] sm:$0xf0]  ;;  %v564_v45 = vld [vmem:[%s927_s0 + $0xc] sm:$0xf0] }
  0x18   : > { %396 = vmatpush.bf16.msra.mxu0 %v712_v6  ;;  %752 = vmatpush.bf16.msra.mxu3 %v712_v6  ;;  %v591_v42 = vor.u32 %v701_v37, %v588_v38  ;;  %v595_v43 = vor.u32 %v703_v40, %v594_v39  ;;  %v695_v44 = vld [vmem:[%s927_s0 + $0x4] sm:$0xf]  ;;  %v598_v46 = vld [vmem:[%s927_s0 + $0x48] sm:$0xf]  ;;  %v705_v48 = vld [vmem:[%s927_s0 + $0x50] sm:$0xf0] }
  0x19   : > { %760 = vmatpush.bf16.msra.mxu1 %v720_v7  ;;  %v567_v47 = vor.u32 %v695_v44, %v564_v45  ;;  %v704_v49 = vld [vmem:[%s927_s0 + $0x4c] sm:$0xf]  ;;  %v600_v50 = vld [vmem:[%s927_s0 + $0x54] sm:$0xf0]  ;;  %v606_v51 = vld [vmem:[%s927_s0 + $0x50] sm:$0xf]  ;;  %v599_v53 = vor.u32 %v705_v48, %v598_v46 }
  0x1a   : > { %458 = vmatpush.bf16.msra.mxu2 %v724_v8  ;;  %v706_v52 = vld [vmem:[%s927_s0 + $0x58] sm:$0xf0]  ;;  %v603_v54 = vor.u32 %v704_v49, %v600_v50 }
  0x1b   : > { %v607_v55 = vor.u32 %v706_v52, %v606_v51 }
  0x1c   : > { %397 = vmatpush.bf16.msra.mxu0 %v711_v9  ;;  %753 = vmatpush.bf16.msra.mxu3 %v711_v9 }
  0x1d   : > { %761 = vmatpush.bf16.msra.mxu1 %v719_v11 }
  0x1e   : > { %459 = vmatpush.bf16.msra.mxu2 %v723_v12 }
  0x20   : > { %398 = vmatpush.bf16.msra.mxu0 %v710_v15  ;;  %754 = vmatpush.bf16.msra.mxu3 %v710_v15 }
  0x21   : > { %688 = vmatmul.msk.bf16.vlgmr.msra.gmra.mxu2 %vm381_vm0, %v571_v14  ;;  %762 = vmatpush.bf16.msra.mxu1 %v718_v16 }
  0x24   : > { %399 = vmatpush.bf16.msra.mxu0 %v709_v17  ;;  %755 = vmatpush.bf16.msra.mxu3 %v709_v17 }
  0x25   : > { %763 = vmatpush.bf16.msra.mxu1 %v717_v18 }
  0x28   : > { %400 = vmatpush.bf16.msra.mxu0 %v708_v19  ;;  %756 = vmatpush.bf16.msra.mxu3 %v708_v19 }
  0x29   : > { %764 = vmatpush.bf16.msra.mxu1 %v716_v20 }
  0x2c   : > { %401 = vmatpush.bf16.msra.mxu0 %v707_v23  ;;  %757 = vmatpush.bf16.msra.mxu3 %v707_v23 }
  0x2d   : > { %765 = vmatpush.bf16.msra.mxu1 %v715_v26 }
  0x2f   : > { %402 = vmatmul.bf16.vlgmr.msra.gmra.mxu0 %v563_v31  ;;  %407 = vmatmul.bf16.vlgmr.msra.gmra.mxu3 %v575_v32 }
  0x30   : > { %423 = vmatpush.bf16.msrb.mxu0 %v816_v1  ;;  %436 = vmatmul.bf16.vlgmr.msra.gmra.mxu1 %v579_v33 }
  0x31   : > { %689 = vmatmul.msk.bf16.gmra.mxu2 %vm381_vm0, %v583_v34 }
  0x34   : > { %424 = vmatpush.bf16.msrb.mxu0 %v721_v4 }
  0x38   : > { %425 = vmatpush.bf16.msrb.mxu0 %v720_v7 }
  0x3c   : > { %426 = vmatpush.bf16.msrb.mxu0 %v719_v11 }
  0x3f   : > { %412 = vmatmul.bf16.gmra.mxu3 %v587_v41 }
  0x40   : > { %427 = vmatpush.bf16.msrb.mxu0 %v718_v16  ;;  %441 = vmatmul.bf16.gmra.mxu1 %v591_v42 }
  0x41   : > { %690 = vmatmul.msk.bf16.gmra.mxu2 %vm381_vm0, %v595_v43 }
  0x44   : > { %428 = vmatpush.bf16.msrb.mxu0 %v717_v18 }
  0x48   : > { %429 = vmatpush.bf16.msrb.mxu0 %v716_v20 }
  0x4c   : > { %430 = vmatpush.bf16.msrb.mxu0 %v715_v26 }
  0x4f   : > { %431 = vmatmul.bf16.vlgmr.msrb.gmra.mxu0 %v567_v47  ;;  %417 = vmatmul.bf16.gmra.mxu3 %v599_v53 }
  0x50   : > { %446 = vmatmul.bf16.gmra.mxu1 %v603_v54 }
  0x51   : > { %691 = vmatmul.msk.bf16.gmra.mxu2 %vm381_vm0, %v607_v55 }
  0xa4   : > { %v461_v56 = vpop.f32.mrf.mxu2 }
  0xac   : > { %v463_v57 = vpop.f32.mrf.mxu2  ;;  %v403_v62 = vpop.f32.mrf.mxu0 }
  0xad   : > { %v437_v58 = vpop.f32.mrf.mxu1 }
  0xb2   : > { %v408_v59 = vpop.f32.mrf.mxu3 }
  0xb3   : > { %v438_v63 = vadd.f32 %v437_v58, %v408_v59 }
  0xb4   : > { %v466_v60 = vpop.f32.mrf.mxu2  ;;  %v405_v7 = vpop.f32.mrf.mxu0 }
  0xb5   : > { %v439_v61 = vpop.f32.mrf.mxu1  ;;  %v467_v4 = vadd.f32 %v466_v60, %v438_v63 }
  0xba   : > { %v410_v0 = vpop.f32.mrf.mxu3 }
  0xbb   : > { %v440_v1 = vadd.f32 %v439_v61, %v410_v0 }
  0xbc   : > { %v468_v2 = vpop.f32.mrf.mxu2 }
  0xbd   : > { %v442_v3 = vpop.f32.mrf.mxu1  ;;  %v469_v5 = vadd.f32 %v468_v2, %v440_v1 }
  0xbf   : > { %v735_v6 = vpack.c.bf16 %v469_v5, %v467_v4 }
  0xc1   : > { %747 = vst [vmem:[%s918_s14 + $0x8] sm:$0xff] %v735_v6  }
  0xc2   : > { %v413_v8 = vpop.f32.mrf.mxu3 }
  0xc3   : > { %v443_v11 = vadd.f32 %v442_v3, %v413_v8 }
  0xc4   : > { %v471_v9 = vpop.f32.mrf.mxu2 }
  0xc5   : > { %v444_v10 = vpop.f32.mrf.mxu1  ;;  %v472_v16 = vadd.f32 %v471_v9, %v443_v11 }
  0xca   : > { %v415_v13 = vpop.f32.mrf.mxu3 }
  0xcb   : > { %v445_v14 = vadd.f32 %v444_v10, %v415_v13 }
  0xcc   : > { %v432_v12 = vpop.f32.mrf.mxu0  ;;  %v473_v15 = vpop.f32.mrf.mxu2 }
  0xcd   : > { %v474_v17 = vadd.f32 %v473_v15, %v445_v14  ;;  %v433_v19 = vadd.f32 %v432_v12, %v403_v62  ;;  %v447_v20 = vpop.f32.mrf.mxu1 }
  0xcf   : > { %v740_v18 = vpack.c.bf16 %v474_v17, %v472_v16  ;;  %v462_v25 = vadd.f32 %v461_v56, %v433_v19 }
  0xd1   : > { %748 = vst [vmem:[%s918_s14 + $0x10] sm:$0xff] %v740_v18  }
  0xd2   : > { %v418_v23 = vpop.f32.mrf.mxu3 }
  0xd3   : > { %v448_v28 = vadd.f32 %v447_v20, %v418_v23 }
  0xd4   : > { %v434_v21 = vpop.f32.mrf.mxu0  ;;  %v476_v24 = vpop.f32.mrf.mxu2 }
  0xd5   : > { %v435_v22 = vadd.f32 %v434_v21, %v405_v7  ;;  %v449_v29 = vpop.f32.mrf.mxu1  ;;  %v477_v33 = vadd.f32 %v476_v24, %v448_v28 }
  0xd7   : > { %v464_v26 = vadd.f32 %v463_v57, %v435_v22 }
  0xd9   : > { %v730_v27 = vpack.c.bf16 %v464_v26, %v462_v25 }
  0xda   : > { %v420_v30 = vpop.f32.mrf.mxu3 }
  0xdb   : > { %731 = vst [vmem:[%s918_s14] sm:$0xff] %v730_v27   ;;  %v450_v31 = vadd.f32 %v449_v29, %v420_v30 }
  0xdc   : > { %v478_v32 = vpop.f32.mrf.mxu2 }
  0xdd   : > { %v479_v34 = vadd.f32 %v478_v32, %v450_v31 }
  0xdf   : > { %v745_v35 = vpack.c.bf16 %v479_v34, %v477_v33 }
  0xe1   : > { %749 = vst [vmem:[%s918_s14 + $0x18] sm:$0xff] %v745_v35  }
  0xe2 PF: > { %s12_s9 = sadd.s32 1, %s781_s9  }
  0xe3   : > { %p9_p4 = scmp.ge.s32.totalorder %s12_s9, 4  }
  0xe5   :  { %11 = sbr.rel (!%p9_p4) target bundleno = 1 (0x1), region = 58 }

// kernel: msbd_forward.6
= control target key start
LH: loop header
LB: loop body
LE: loop exit
PB: predicated region body
PF: predicated region fallthrough
CT: control target
= control target key end

     0   :  { %s3106_s0 = inlined_call_operand.vmem [shape: bf16[2,128,64], index: 0, kind: input, shape index: {}]   ;;  %s3107_s1 = inlined_call_operand.vmem [shape: bf16[1,32,768], index: 1, kind: input, shape index: {}]   ;;  %s3108_s2 = inlined_call_operand.vmem [shape: f32[1,32,1], index: 2, kind: input, shape index: {}]   ;;  %s3109_s3 = inlined_call_operand.vmem [shape: bf16[1,32,96], index: 3, kind: input, shape index: {}]   ;;  %s3110_s4 = inlined_call_operand.vmem [shape: f32[1,32,1], index: 4, kind: input, shape index: {}]   ;;  %s3111_s5 = inlined_call_operand.vmem [shape: bf16[1,32,192], index: 5, kind: input, shape index: {}]   ;;  %s3112_s6 = inlined_call_operand.vmem [shape: f32[1,32,1], index: 6, kind: input, shape index: {}]   ;;  %s3113_s7 = inlined_call_operand.vmem [shape: bf16[1,32,96], index: 7, kind: input, shape index: {}]   ;;  %s3114_s8 = inlined_call_operand.vmem [shape: f32[1,32,1], index: 8, kind: input, shape index: {}]   ;;  %s3115_s9 = inlined_call_operand.vmem [shape: f32[1,32,3], index: 9, kind: input, shape index: {}]   ;;  %s3116_s10 = inlined_call_operand.<no memory space> [shape: f32[1,1,1], index: 10, kind: input, shape index: {}]   ;;  %s3117_s11 = inlined_call_operand.hbm [shape: f32[1,2,32,64], index: 11, kind: output, shape index: {0}]   ;;  %s3118_s12 = inlined_call_operand.hbm [shape: f32[1,2,32,32], index: 12, kind: output, shape index: {1}]   ;;  %s3119_s13 = inlined_call_operand.vmem [shape: f32[1,2,1,32], index: 13, kind: output, shape index: {2}]  }
   0x1   :  { %3133 = sst [smem:[#allocation11_spill]] %s3106_s0  ;;  %v19_v0 = vstv %s3116_s10 }
   0x2   :  { %3134 = sst [smem:[#allocation12_spill]] %s3107_s1  ;;  %20 = vst [vmem:[#allocation2] sm:$0x1] %v19_v0 }
   0x3   :  { %3135 = sst [smem:[#allocation13_spill]] %s3108_s2 }
   0x4   :  { %3136 = sst [smem:[#allocation14_spill]] %s3109_s3 }
   0x5   :  { %3137 = sst [smem:[#allocation15_spill]] %s3110_s4 }
   0x6   :  { %3138 = sst [smem:[#allocation16_spill]] %s3111_s5 }
   0x7   :  { %3139 = sst [smem:[#allocation17_spill]] %s3112_s6 }
   0x8   :  { %21 = vsyncpa [#allocation4], 0 }
   0x9   :  { %23 = vsyncpa [#allocation4 + $0x1], 0 }
   0xa   :  { %24 = vsyncpa [#allocation6], 0 }
   0xb   :  { %26 = vsyncpa [#allocation6 + $0x1], 0  ;;  %s2615_s27 = smov 0   ;;  %s2617_s28 = smov 0  }
   0xc   :  { %s2619_s29 = smov 0   ;;  %s2621_s30 = smov 0  }
   0xd   :  { %s2623_s14 = smov 0   ;;  %s2625_s15 = smov 0  }
   0xe LB: > { %3140 = sst [smem:[#allocation9_spill]] %s2525_s14  ;;  %s2138_s10 = sadd.s32 4294967295, %s2529_s15   ;;  %s2529_s15 = sphi %s2625_s15, %s32_s15   ;;  %s2525_s14 = sphi %s2623_s14, %s3158_s14   ;;  %s2521_s30 = sphi %s2621_s30, %s3157_s30   ;;  %s2517_s29 = sphi %s2619_s29, %s3161_s29   ;;  %s2513_s28 = sphi %s2617_s28, %s3160_s28   ;;  %s2509_s27 = sphi %s2615_s27, %s3159_s27  }
   0xf   : > { %s2139_s16 = sadd.s32 4294967294, %s2529_s15   ;;  %s44_s17 = sadd.s32 1, %s2525_s14 }
  0x10   : > { %s339_s18 = sadd.s32 1, %s2517_s29  ;;  %p46_p0 = scmp.ge.s32.totalorder %s44_s17, 2 }
  0x11   : > { %p349_p1 = scmp.ne.s32.totalorder %s2517_s29, %s2513_s28  ;;  %p350_p2 = scmp.eq.s32.totalorder %s2138_s10, 1 }
  0x12   : > { %p355_p3 = scmp.ne.s32.totalorder %s2513_s28, %s2509_s27  ;;  %s3163_s17 = smov (%p46_p0, %s44_s17), 0 }
  0x13   : > { %3141 = sst [smem:[#allocation10_spill]] %s3163_s17  ;;  %p2655_p4 = por %p350_p2, %p349_p1 }
  0x14   : > { %p356_p5 = scmp.eq.s32.totalorder %s2139_s16, 1  ;;  %s335_s20 = ssub.s32 %s2525_s14, %s3163_s17 }
  0x15   : > { %p2152_p6 = scmp.ge.s32.totalorder %s2529_s15, 1  ;;  %p337_p7 = scmp.eq.s32.totalorder %s335_s20, 0 }
  0x16   : > { %p2662_p8 = por %p356_p5, %p355_p3  ;;  %p516_p9 = scmp.lt.s32.totalorder %s2529_s15, 3 }
  0x17   : > { %s2668_s22 = scalar_select %p337_p7, %s2517_s29, %s339_s18  }
  0x18   : > { %p517_p10 = pnand %p2152_p6, %p516_p9 }
  0x19   : > { %p620_p11 = scmp.lt.s32.totalorder (!%p517_p10), %s2521_s30, 1  ;;  %s3144_s0 = sld [smem:[#allocation11_spill]] (!%p517_p10) }
  0x1a   : > { %520 = sbr.rel (%p517_p10) target bundleno = 2459 (0x99b), region = 64  ;;  %s3122_s16 = smov (!%p517_p10), 2  }
  0x1b   : > { %s3124_s18 = smov (!%p517_p10), 127   ;;  %s3126_s20 = smov (!%p517_p10), 126  }
  0x1c   : > { %s3120_s25 = smov (!%p517_p10), 125   ;;  %s3145_s1 = sld [smem:[#allocation12_spill]] (!%p517_p10) }
  0x1d   : > { %s3146_s2 = sld [smem:[#allocation13_spill]] (!%p517_p10)  ;;  %s3149_s26 = smov (!%p517_p10), 127  }
  0x1e   : > { %s3150_s4 = sld [smem:[#allocation15_spill]] (!%p517_p10)  ;;  %s3152_s14 = smov (!%p517_p10), 2  }
  0x1f   : > { %s2672_s23 = scalar_select %p620_p11, %s2521_s30, 1  ;;  %vm777_vm0 = vcmask 15360   ;;  %vm795_vm1 = vcmask 539648   ;;  %vm1192_vm2 = vcmask 7168   ;;  %vm1197_vm3 = vcmask 531456  }
  0x20   : > { %s3151_s3 = sld [smem:[#allocation14_spill]]  ;;  %vm1246_vm4 = vcmask 785408   ;;  %vm1284_vm6 = vcmask 523264   ;;  %s3153_s17 = smov 125  }
  0x21   : > { %s2303_s24 = sshll.u32 %s2672_s23, 6  ;;  %s3154_s6 = sld [smem:[#allocation17_spill]] }
  0x22   : > { %s624_s10 = scalar_lea.vmem %s3144_s0, %s2303_s24  ;;  %s3128_s24 = smov 1  }
  0x23   : > { %v2311_v1 = vld [vmem:[%s624_s10 + $0x38] sm:$0xff]  ;;  %v2309_v2 = vld [vmem:[%s624_s10 + $0x28] sm:$0xff]  ;;  %v2310_v4 = vld [vmem:[%s624_s10 + $0x30] sm:$0xff]  ;;  %s3147_s0 = smov 1   ;;  %s3155_s5 = sld [smem:[#allocation16_spill]] }
  0x24   : > { %v2307_v3 = vld [vmem:[%s624_s10 + $0x18] sm:$0xff]  ;;  %775 = vrot.lane.b32.xlu0 %v2311_v1, %s3122_s16  ;;  %771 = vrot.lane.b32.xlu1 %v2309_v2, %s3122_s16  ;;  %v2308_v5 = vld [vmem:[%s624_s10 + $0x20] sm:$0xff] }
  0x25   : > { %767 = vrot.lane.b32.xlu2 %v2307_v3, %s3122_s16  ;;  %v2306_v6 = vld [vmem:[%s624_s10 + $0x10] sm:$0xff]  ;;  %v2305_v7 = vld [vmem:[%s624_s10 + $0x8] sm:$0xff]  ;;  %v2304_v8 = vld [vmem:[%s624_s10] sm:$0xff] }
  0x2c   : > { %773 = vrot.lane.b32.xlu0 %v2310_v4, %s3122_s16  ;;  %769 = vrot.lane.b32.xlu1 %v2308_v5, %s3122_s16 }
  0x2d   : > { %765 = vrot.lane.b32.xlu2 %v2306_v6, %s3122_s16 }
  0x34   : > { %763 = vrot.lane.b32.xlu0 %v2305_v7, %s3122_s16  ;;  %761 = vrot.lane.b32.xlu1 %v2304_v8, %s3122_s16  ;;  %s2884_s16 = sand.u32 1, %s2513_s28  }
  0x7f   : > { %v768_v9 = vpop.permute.xlu2 %767 }
  0x80   : > { %v786_v25 = vsel %vm777_vm0, 0, %v768_v9 }
  0x81   : > { %v799_v26 = vsel %vm795_vm1, %v786_v25, 0 }
  0x87   : > { %v766_v16 = vpop.permute.xlu2 %765 }
  0x88   : > { %v784_v17 = vsel %vm777_vm0, 0, %v766_v16 }
  0x89   : > { %v798_v22 = vsel %vm795_vm1, %v784_v17, 0 }
  0x96   : > { %v776_v10 = vpop.permute.xlu0 %775  ;;  %v772_v11 = vpop.permute.xlu1 %771 }
  0x97   : > { %v794_v12 = vsel %vm777_vm0, 0, %v776_v10  ;;  %v790_v13 = vsel %vm777_vm0, 0, %v772_v11 }
  0x98   : > { %v803_v14 = vsel %vm795_vm1, %v794_v12, 0  ;;  %v801_v15 = vsel %vm795_vm1, %v790_v13, 0  ;;  %v2191_v12 = vld [vmem:[%s3145_s1] sm:$0xf]  ;;  %v2315_v13 = vld [vmem:[%s3145_s1 + $0x14] sm:$0xf0] }
  0x99   : > { %826 = vrot.lane.b32.xlu2 %v803_v14, %s3124_s18  ;;  %822 = vrot.lane.b32.xlu1 %v801_v15, %s3124_s18  ;;  %v2192_v16 = vor.u32 %v2315_v13, %v2191_v12 }
  0x9e   : > { %v774_v18 = vpop.permute.xlu0 %773  ;;  %v770_v19 = vpop.permute.xlu1 %769 }
  0x9f   : > { %v792_v20 = vsel %vm777_vm0, 0, %v774_v18  ;;  %v788_v21 = vsel %vm777_vm0, 0, %v770_v19  ;;  %v712_v19 = vld [vmem:[%s3146_s2 + $0x18] sm:$0xff] }
  0xa0   : > { %v802_v23 = vsel %vm795_vm1, %v792_v20, 0  ;;  %v800_v24 = vsel %vm795_vm1, %v788_v21, 0  ;;  %v2536_v21 = vmov 0  }
  0xa1   : > { %820 = vrot.lane.b32.xlu2 %v800_v24, %s3124_s18  ;;  %824 = vrot.lane.b32.xlu0 %v802_v23, %s3124_s18 }
  0xa2   : > { %816 = vrot.lane.b32.xlu1 %v798_v22, %s3124_s18  ;;  %2409 = vset.pattern.permute.xlu0 %v2536_v21 }
  0xa3   : > { %2410 = vset.pattern.permute.xlu1 %v2536_v21  ;;  %2411 = vset.pattern.permute.xlu2 %v2536_v21 }
  0xa6   : > { %v764_v27 = vpop.permute.xlu0 %763  ;;  %v762_v30 = vpop.permute.xlu1 %761 }
  0xa7   : > { %v782_v28 = vsel %vm777_vm0, 0, %v764_v27  ;;  %v780_v31 = vsel %vm777_vm0, 0, %v762_v30  ;;  %v2321_v27 = vld [vmem:[%s3145_s1 + $0x44] sm:$0xf0] }
  0xa8   : > { %v797_v29 = vsel %vm795_vm1, %v782_v28, 0  ;;  %v796_v32 = vsel %vm795_vm1, %v780_v31, 0  ;;  %v710_v30 = vld [vmem:[%s3146_s2 + $0x8] sm:$0xff] }
  0xa9   : > { %842 = vrot.lane.b32.xlu2 %v803_v14, %s3126_s20  ;;  %818 = vrot.lane.b32.xlu0 %v799_v26, %s3124_s18 }
  0xaa   : > { %814 = vrot.lane.b32.xlu1 %v797_v29, %s3124_s18 }
  0xb1   : > { %840 = vrot.lane.b32.xlu2 %v802_v23, %s3126_s20  ;;  %858 = vrot.lane.b32.xlu0 %v803_v14, %s3128_s24 }
  0xb2   : > { %812 = vrot.lane.b32.xlu1 %v796_v32, %s3124_s18 }
  0xb9   : > { %838 = vrot.lane.b32.xlu2 %v801_v15, %s3126_s20  ;;  %856 = vrot.lane.b32.xlu0 %v802_v23, %s3128_s24 }
  0xba   : > { %836 = vrot.lane.b32.xlu1 %v800_v24, %s3126_s20 }
  0xc1   : > { %874 = vrot.lane.b32.xlu2 %v803_v14, %s3120_s25  ;;  %854 = vrot.lane.b32.xlu0 %v801_v15, %s3128_s24 }
  0xc2   : > { %834 = vrot.lane.b32.xlu1 %v799_v26, %s3126_s20 }
  0xc9   : > { %872 = vrot.lane.b32.xlu2 %v802_v23, %s3120_s25  ;;  %852 = vrot.lane.b32.xlu0 %v800_v24, %s3128_s24  ;;  %v2193_v23 = vld [vmem:[%s3145_s1 + $0x18] sm:$0xf0] }
  0xca   : > { %848 = vrot.lane.b32.xlu1 %v798_v22, %s3128_s24 }
  0xd1   : > { %832 = vrot.lane.b32.xlu2 %v798_v22, %s3126_s20  ;;  %850 = vrot.lane.b32.xlu0 %v799_v26, %s3128_s24 }
  0xd2   : > { %868 = vrot.lane.b32.xlu1 %v800_v24, %s3120_s25 }
  0xd9   : > { %870 = vrot.lane.b32.xlu0 %v801_v15, %s3120_s25  ;;  %846 = vrot.lane.b32.xlu2 %v797_v29, %s3128_s24 }
  0xda   : > { %828 = vrot.lane.b32.xlu1 %v796_v32, %s3126_s20 }
  0xe1   : > { %866 = vrot.lane.b32.xlu2 %v799_v26, %s3120_s25  ;;  %830 = vrot.lane.b32.xlu0 %v797_v29, %s3126_s20  ;;  %v2215_v26 = vld [vmem:[%s3145_s1 + $0x30] sm:$0xf] }
  0xe2   : > { %862 = vrot.lane.b32.xlu1 %v797_v29, %s3120_s25  ;;  %v2216_v29 = vor.u32 %v2321_v27, %v2215_v26 }
  0xe9   : > { %864 = vrot.lane.b32.xlu2 %v798_v22, %s3120_s25  ;;  %844 = vrot.lane.b32.xlu0 %v796_v32, %s3128_s24  ;;  %v2312_v22 = vld [vmem:[%s3145_s1 + $0x4] sm:$0xf]  ;;  %s3148_s24 = smov 126  }
  0xea   : > { %860 = vrot.lane.b32.xlu1 %v796_v32, %s3120_s25  ;;  %v2196_v25 = vor.u32 %v2312_v22, %v2193_v23  ;;  %s3132_s25 = sshll.u32 %s2884_s16, 5 }
  0xeb   : > { %s2889_s10 = scalar_lea.vmem [#allocation3], %s3132_s25  ;;  %s3156_s25 = sshll.u32 %s2884_s16, 5 }
  0xf3   : > { %v827_v33 = vpop.permute.xlu2 %826 }
  0xf4   : > { %1060 = vmatpush.bf16.msra.mxu0 %v827_v33  ;;  %970 = vrot.lane.b32.xlu1 %v827_v33, %s3124_s18 }
  0xfb   : > { %v821_v34 = vpop.permute.xlu2 %820 }
  0xfc   : > { %964 = vrot.lane.b32.xlu1 %v821_v34, %s3124_s18 }
 0x103   : > { %v843_v35 = vpop.permute.xlu2 %842 }
 0x10b   : > { %v841_v36 = vpop.permute.xlu2 %840  ;;  %v823_v37 = vpop.permute.xlu1 %822 }
 0x10c   : > { %984 = vrot.lane.b32.xlu1 %v841_v36, %s3124_s18  ;;  %966 = vrot.lane.b32.xlu0 %v823_v37, %s3124_s18  ;;  %v2313_v36 = vld [vmem:[%s3145_s1 + $0xc] sm:$0xf] }
 0x113   : > { %v839_v38 = vpop.permute.xlu2 %838  ;;  %v825_v39 = vpop.permute.xlu0 %824 }
 0x114   : > { %v817_v40 = vpop.permute.xlu1 %816  ;;  %1061 = vmatpush.bf16.msra.mxu0 %v825_v39  ;;  %968 = vrot.lane.b32.xlu2 %v825_v39, %s3124_s18 }
 0x115   : > { %982 = vrot.lane.b32.xlu1 %v839_v38, %s3124_s18 }
 0x118   : > { %1062 = vmatpush.bf16.msra.mxu0 %v823_v37  ;;  %v2201_v37 = vld [vmem:[%s3145_s1 + $0x20] sm:$0xf0] }
 0x11b   : > { %v875_v41 = vpop.permute.xlu2 %874  ;;  %v819_v42 = vpop.permute.xlu0 %818 }
 0x11c   : > { %v815_v43 = vpop.permute.xlu1 %814  ;;  %1063 = vmatpush.bf16.msra.mxu0 %v821_v34  ;;  %962 = vrot.lane.b32.xlu0 %v819_v42, %s3124_s18  ;;  %v2318_v34 = vld [vmem:[%s3145_s1 + $0x34] sm:$0xf] }
 0x11d   : > { %1018 = vrot.lane.b32.xlu1 %v875_v41, %s3124_s18  ;;  %960 = vrot.lane.b32.xlu2 %v817_v40, %s3124_s18  ;;  %v2317_v41 = vld [vmem:[%s3145_s1 + $0x24] sm:$0xf0] }
 0x120   : > { %1064 = vmatpush.bf16.msra.mxu0 %v819_v42 }
 0x123   : > { %v873_v44 = vpop.permute.xlu2 %872  ;;  %v859_v45 = vpop.permute.xlu0 %858 }
 0x124   : > { %v813_v46 = vpop.permute.xlu1 %812  ;;  %986 = vrot.lane.b32.xlu0 %v843_v35, %s3124_s18  ;;  %1065 = vmatpush.bf16.msra.mxu0 %v817_v40  ;;  %v2217_v35 = vld [vmem:[%s3145_s1 + $0x48] sm:$0xf0]  ;;  %v2207_v40 = vld [vmem:[%s3145_s1 + $0x10] sm:$0xf] }
 0x125   : > { %1016 = vrot.lane.b32.xlu1 %v873_v44, %s3124_s18  ;;  %1002 = vrot.lane.b32.xlu2 %v859_v45, %s3124_s18  ;;  %v2220_v39 = vor.u32 %v2318_v34, %v2217_v35  ;;  %v2208_v44 = vor.u32 %v2317_v41, %v2207_v40  ;;  %v711_v45 = vld [vmem:[%s3146_s2 + $0x10] sm:$0xff] }
 0x128   : > { %1066 = vmatpush.bf16.msra.mxu0 %v815_v43 }
 0x12b   : > { %v857_v47 = vpop.permute.xlu0 %856  ;;  %v833_v55 = vpop.permute.xlu2 %832 }
 0x12c   : > { %v837_v48 = vpop.permute.xlu1 %836  ;;  %958 = vrot.lane.b32.xlu0 %v815_v43, %s3124_s18  ;;  %1067 = vmatpush.bf16.msra.mxu0 %v813_v46  ;;  %v2204_v43 = vor.u32 %v2313_v36, %v2201_v37 }
 0x12d   : > { %1000 = vrot.lane.b32.xlu2 %v857_v47, %s3124_s18 }
 0x12f   : > { %1068 = vmatmul.bf16.vlgmr.msra.gmra.mxu0 %v2192_v16 }
 0x133   : > { %v855_v49 = vpop.permute.xlu0 %854  ;;  %v847_v58 = vpop.permute.xlu2 %846 }
 0x134   : > { %v835_v50 = vpop.permute.xlu1 %834  ;;  %956 = vrot.lane.b32.xlu0 %v813_v46, %s3124_s18 }
 0x135   : > { %998 = vrot.lane.b32.xlu2 %v855_v49, %s3124_s18  ;;  %v2231_v49 = vld [vmem:[%s3145_s1 + $0x40] sm:$0xf] }
 0x13b   : > { %v853_v51 = vpop.permute.xlu0 %852  ;;  %v867_v61 = vpop.permute.xlu2 %866 }
 0x13c   : > { %v849_v52 = vpop.permute.xlu1 %848  ;;  %980 = vrot.lane.b32.xlu0 %v837_v48, %s3124_s18  ;;  %v709_v48 = vld [vmem:[%s3146_s2] sm:$0xff]  ;;  %s1826_s2 = sshll.u32 %s2889_s10, 4  ;;  %s1827_s2 = int_to_ptr.vmem [resolvable:$true] %s1826_s2 }
 0x13d   : > { %996 = vrot.lane.b32.xlu2 %v853_v51, %s3124_s18  ;;  %v2319_v51 = vld [vmem:[%s3145_s1 + $0x3c] sm:$0xf] }
 0x13f   : > { %1073 = vmatmul.bf16.gmra.mxu0 %v2216_v29 }
 0x143   : > { %v851_v53 = vpop.permute.xlu0 %850  ;;  %v865_v0 = vpop.permute.xlu2 %864 }
 0x144   : > { %v869_v54 = vpop.permute.xlu1 %868  ;;  %978 = vrot.lane.b32.xlu0 %v835_v50, %s3124_s18  ;;  %v2323_v50 = vld [vmem:[%s3145_s1 + $0x54] sm:$0xf0] }
 0x145   : > { %994 = vrot.lane.b32.xlu2 %v851_v53, %s3124_s18  ;;  %v2232_v53 = vor.u32 %v2323_v50, %v2231_v49 }
 0x14b   : > { %v871_v56 = vpop.permute.xlu0 %870 }
 0x14c   : > { %v829_v57 = vpop.permute.xlu1 %828  ;;  %1014 = vrot.lane.b32.xlu1 %v871_v56, %s3124_s18  ;;  %976 = vrot.lane.b32.xlu0 %v833_v55, %s3124_s18 }
 0x14d   : > { %992 = vrot.lane.b32.xlu2 %v849_v52, %s3124_s18  ;;  %v2225_v52 = vld [vmem:[%s3145_s1 + $0x50] sm:$0xf0] }
 0x14e   : > { %v2228_v56 = vor.u32 %v2319_v51, %v2225_v52 }
 0x153   : > { %v831_v59 = vpop.permute.xlu0 %830 }
 0x154   : > { %v863_v60 = vpop.permute.xlu1 %862  ;;  %974 = vrot.lane.b32.xlu0 %v831_v59, %s3124_s18  ;;  %1012 = vrot.lane.b32.xlu1 %v869_v54, %s3124_s18 }
 0x155   : > { %990 = vrot.lane.b32.xlu2 %v847_v58, %s3124_s18  ;;  %v2316_v58 = vld [vmem:[%s3145_s1 + $0x1c] sm:$0xf0] }
 0x15b   : > { %v845_v62 = vpop.permute.xlu0 %844 }
 0x15c   : > { %1010 = vrot.lane.b32.xlu1 %v867_v61, %s3124_s18  ;;  %972 = vrot.lane.b32.xlu0 %v829_v57, %s3124_s18  ;;  %v861_v63 = vpop.permute.xlu1 %860  ;;  %v2199_v57 = vld [vmem:[%s3145_s1 + $0x8] sm:$0xf] }
 0x15d   : > { %988 = vrot.lane.b32.xlu2 %v845_v62, %s3124_s18  ;;  %v2200_v61 = vor.u32 %v2316_v58, %v2199_v57 }
 0x164   : > { %1008 = vrot.lane.b32.xlu0 %v865_v0, %s3124_s18  ;;  %1006 = vrot.lane.b32.xlu1 %v863_v60, %s3124_s18  ;;  %v2223_v0 = vld [vmem:[%s3145_s1 + $0x38] sm:$0xf] }
 0x165   : > { %1004 = vrot.lane.b32.xlu2 %v861_v63, %s3124_s18 }
 0x166   : > { %v971_v1 = vpop.permute.xlu1 %970 }
 0x167   : > { %1079 = vmatpush.bf16.msra.mxu1 %v971_v1  ;;  %1136 = vmatpush.bf16.msrb.mxu0 %v971_v1  ;;  %v2322_v1 = vld [vmem:[%s3145_s1 + $0x4c] sm:$0xf0] }
 0x16c   : > { %893 = vperm.xlu1 %2410, %v712_v19   ;;  %888 = vperm.xlu0 %2409, %v711_v45  }
 0x16d   : > { %878 = vperm.xlu2 %2411, %v709_v48  }
 0x16e   : > { %v969_v2 = vpop.permute.xlu2 %968  ;;  %v965_v6 = vpop.permute.xlu1 %964 }
 0x16f   : > { %1080 = vmatpush.bf16.msra.mxu1 %v969_v2  ;;  %1137 = vmatpush.bf16.msrb.mxu0 %v969_v2  ;;  %v2314_v2 = vld [vmem:[%s3145_s1 + $0x14] sm:$0xf] }
 0x174   : > { %883 = vperm.xlu1 %2410, %v710_v30  }
 0x177   : > { %v961_v3 = vpop.permute.xlu2 %960 }
 0x17e   : > { %v967_v4 = vpop.permute.xlu0 %966  ;;  %v985_v8 = vpop.permute.xlu1 %984 }
 0x17f   : > { %v1003_v5 = vpop.permute.xlu2 %1002  ;;  %1081 = vmatpush.bf16.msra.mxu1 %v967_v4  ;;  %1138 = vmatpush.bf16.msrb.mxu0 %v967_v4 }
 0x180   : > { %1117 = vmatpush.bf16.msra.mxu3 %v1003_v5  ;;  %v2224_v5 = vor.u32 %v2322_v1, %v2223_v0 }
 0x183   : > { %1082 = vmatpush.bf16.msra.mxu1 %v965_v6  ;;  %1139 = vmatpush.bf16.msrb.mxu0 %v965_v6 }
 0x187   : > { %v1001_v7 = vpop.permute.xlu2 %1000  ;;  %v983_v14 = vpop.permute.xlu1 %982 }
 0x188   : > { %1118 = vmatpush.bf16.msra.mxu3 %v1001_v7  ;;  %v2320_v7 = vld [vmem:[%s3145_s1 + $0x44] sm:$0xf] }
 0x18e   : > { %v963_v9 = vpop.permute.xlu0 %962 }
 0x18f   : > { %v999_v10 = vpop.permute.xlu2 %998  ;;  %1083 = vmatpush.bf16.msra.mxu1 %v963_v9  ;;  %1140 = vmatpush.bf16.msrb.mxu0 %v963_v9  ;;  %v1019_v20 = vpop.permute.xlu1 %1018 }
 0x190   : > { %1119 = vmatpush.bf16.msra.mxu3 %v999_v10 }
 0x193   : > { %1084 = vmatpush.bf16.msra.mxu1 %v961_v3  ;;  %1141 = vmatpush.bf16.msrb.mxu0 %v961_v3  ;;  %v2209_v3 = vld [vmem:[%s3145_s1 + $0x28] sm:$0xf0] }
 0x194   : > { %v2212_v6 = vor.u32 %v2314_v2, %v2209_v3 }
 0x196   : > { %v987_v11 = vpop.permute.xlu0 %986 }
 0x197   : > { %v997_v15 = vpop.permute.xlu2 %996  ;;  %1098 = vmatpush.bf16.msra.mxu2 %v987_v11  ;;  %v1017_v31 = vpop.permute.xlu1 %1016 }
 0x198   : > { %1120 = vmatpush.bf16.msra.mxu3 %v997_v15 }
 0x19b   : > { %1099 = vmatpush.bf16.msra.mxu2 %v985_v8  ;;  %v2233_v8 = vld [vmem:[%s3145_s1 + $0x58] sm:$0xf0] }
 0x19c   : > { %v2236_v9 = vor.u32 %v2320_v7, %v2233_v8 }
 0x19e   : > { %v959_v17 = vpop.permute.xlu0 %958 }
 0x19f   : > { %v995_v18 = vpop.permute.xlu2 %994  ;;  %1085 = vmatpush.bf16.msra.mxu1 %v959_v17  ;;  %1100 = vmatpush.bf16.msra.mxu2 %v983_v14 }
 0x1a0   : > { %1121 = vmatpush.bf16.msra.mxu3 %v995_v18  ;;  %1142 = vmatpush.bf16.msrb.mxu0 %v959_v17 }
 0x1a6   : > { %v957_v24 = vpop.permute.xlu0 %956 }
 0x1a7   : > { %v993_v28 = vpop.permute.xlu2 %992  ;;  %1086 = vmatpush.bf16.msra.mxu1 %v957_v24  ;;  %1143 = vmatpush.bf16.msrb.mxu0 %v957_v24 }
 0x1a8   : > { %1122 = vmatpush.bf16.msra.mxu3 %v993_v28 }
 0x1aa   : > { %1087 = vmatmul.bf16.vlgmr.msra.gmra.mxu1 %v2196_v25  ;;  %1144 = vmatmul.bf16.vlgmr.msrb.gmra.mxu0 %v2208_v44 }
 0x1ab   : > { %1155 = vmatpush.bf16.msrb.mxu1 %v1019_v20 }
 0x1ac   : > { %v1069_v10 = vpop.f32.mrf.mxu0 }
 0x1ae   : > { %v981_v32 = vpop.permute.xlu0 %980 }
 0x1af   : > { %1156 = vmatpush.bf16.msrb.mxu1 %v1017_v31  ;;  %v991_v33 = vpop.permute.xlu2 %990  ;;  %1101 = vmatpush.bf16.msra.mxu2 %v981_v32 }
 0x1b0   : > { %1123 = vmatpush.bf16.msra.mxu3 %v991_v33 }
 0x1b4   : > { %v1071_v12 = vpop.f32.mrf.mxu0 }
 0x1b6   : > { %v979_v38 = vpop.permute.xlu0 %978 }
 0x1b7   : > { %v989_v42 = vpop.permute.xlu2 %988  ;;  %1102 = vmatpush.bf16.msra.mxu2 %v979_v38 }
 0x1b8   : > { %1124 = vmatpush.bf16.msra.mxu3 %v989_v42 }
 0x1ba   : > { %1092 = vmatmul.bf16.gmra.mxu1 %v2220_v39  ;;  %1149 = vmatmul.bf16.gmra.mxu0 %v2232_v53 }
 0x1bb   : > { %1125 = vmatmul.bf16.vlgmr.msra.gmra.mxu3 %v2204_v43 }
 0x1bc   : > { %v1074_v14 = vpop.f32.mrf.mxu0 }
 0x1be   : > { %v977_v46 = vpop.permute.xlu0 %976  ;;  %v1015_v47 = vpop.permute.xlu1 %1014 }
 0x1bf   : > { %1103 = vmatpush.bf16.msra.mxu2 %v977_v46  ;;  %1157 = vmatpush.bf16.msrb.mxu1 %v1015_v47  ;;  %v1005_v4 = vpop.permute.xlu2 %1004 }
 0x1c4   : > { %v1076_v17 = vpop.f32.mrf.mxu0 }
 0x1c6   : > { %v975_v54 = vpop.permute.xlu0 %974  ;;  %v1013_v55 = vpop.permute.xlu1 %1012 }
 0x1c7   : > { %1104 = vmatpush.bf16.msra.mxu2 %v975_v54  ;;  %1158 = vmatpush.bf16.msrb.mxu1 %v1013_v55  ;;  %v879_v18 = vpop.permute.xlu2 %878 }
 0x1c8   : > { %v1070_v20 = vadd.f32 %v1069_v10, %v879_v18  ;;  %v718_v18 = vld [vmem:[%s3150_s4 + $0x8] sm:$0xff] }
 0x1cb   : > { %1130 = vmatmul.bf16.gmra.mxu3 %v2228_v56 }
 0x1ce   : > { %v973_v59 = vpop.permute.xlu0 %972  ;;  %v1011_v60 = vpop.permute.xlu1 %1010 }
 0x1cf   : > { %1105 = vmatpush.bf16.msra.mxu2 %v973_v59  ;;  %1159 = vmatpush.bf16.msrb.mxu1 %v1011_v60 }
 0x1d2   : > { %1106 = vmatmul.bf16.vlgmr.msra.gmra.mxu2 %v2200_v61 }
 0x1d6   : > { %v1009_v62 = vpop.permute.xlu0 %1008  ;;  %v1007_v63 = vpop.permute.xlu1 %1006 }
 0x1d7   : > { %1160 = vmatpush.bf16.msrb.mxu1 %v1009_v62 }
 0x1db   : > { %1161 = vmatpush.bf16.msrb.mxu1 %v1007_v63 }
 0x1de   : > { %v894_v15 = vpop.permute.xlu1 %893  ;;  %v889_v35 = vpop.permute.xlu0 %888 }
 0x1df   : > { %1162 = vmatpush.bf16.msrb.mxu1 %v1005_v4  ;;  %v1075_v39 = vadd.f32 %v1074_v14, %v889_v35  ;;  %v1077_v45 = vadd.f32 %v1076_v17, %v894_v15  ;;  %v719_v17 = vld [vmem:[%s3150_s4 + $0x10] sm:$0xff] }
 0x1e2   : > { %1111 = vmatmul.bf16.gmra.mxu2 %v2224_v5  ;;  %1163 = vmatmul.bf16.vlgmr.msrb.gmra.mxu1 %v2212_v6 }
 0x1e6   : > { %v884_v22 = vpop.permute.xlu1 %883 }
 0x1e7   : > { %v1072_v26 = vadd.f32 %v1071_v12, %v884_v22 }
 0x1f2   : > { %1168 = vmatmul.bf16.gmra.mxu1 %v2236_v9 }
 0x227   : > { %v1088_v11 = vpop.f32.mrf.mxu1  ;;  %v1145_v25 = vpop.f32.mrf.mxu0 }
 0x228   : > { %v1089_v27 = vadd.f32 %v1088_v11, %v1070_v20 }
 0x22f   : > { %v1090_v13 = vpop.f32.mrf.mxu1  ;;  %v1147_v36 = vpop.f32.mrf.mxu0 }
 0x230   : > { %v1091_v29 = vadd.f32 %v1090_v13, %v1072_v26  ;;  %v720_v13 = vld [vmem:[%s3150_s4 + $0x18] sm:$0xff] }
 0x237   : > { %v1093_v16 = vpop.f32.mrf.mxu1  ;;  %v1150_v51 = vpop.f32.mrf.mxu0 }
 0x238   : > { %v1094_v47 = vadd.f32 %v1093_v16, %v1075_v39  ;;  %v717_v16 = vld [vmem:[%s3150_s4] sm:$0xff]  ;;  %s2332_s4 = sshll.u32 %s2521_s30, 5  ;;  %s1800_s30 = scalar_lea.sflag [#allocation4], %s2884_s16 }
 0x239   : > { %s3047_s1 = scalar_lea.hbm %s3118_s12, %s2332_s4 }
 0x23e   : > { %v1126_v19 = vpop.f32.mrf.mxu3 }
 0x23f   : > { %v1095_v24 = vpop.f32.mrf.mxu1  ;;  %v1152_v0 = vpop.f32.mrf.mxu0 }
 0x240   : > { %v1096_v52 = vadd.f32 %v1095_v24, %v1077_v45  ;;  %v2324_v24 = vld [vmem:[%s3151_s3] sm:$0xff] }
 0x246   : > { %v1128_v30 = vpop.f32.mrf.mxu3 }
 0x24e   : > { %v1131_v43 = vpop.f32.mrf.mxu3 }
 0x255   : > { %v1107_v23 = vpop.f32.mrf.mxu2 }
 0x256   : > { %v1108_v28 = vadd.f32 %v1107_v23, %v1089_v27  ;;  %v1133_v60 = vpop.f32.mrf.mxu3 }
 0x258   : > { %v1127_v32 = vadd.f32 %v1126_v19, %v1108_v28 }
 0x25a   : > { %v1146_v37 = vadd.f32 %v1145_v25, %v1127_v32  ;;  %v2325_v25 = vld [vmem:[%s3151_s3 + $0x8] sm:$0xff]  ;;  %s1847_s3 = sshll.u32 %s3047_s1, 4  ;;  %s1848_s3 = int_to_ptr.hbm [resolvable:$true] %s1847_s3 }
 0x25d   : > { %v1109_v31 = vpop.f32.mrf.mxu2 }
 0x25e   : > { %v1110_v33 = vadd.f32 %v1109_v31, %v1091_v29 }
 0x25f   : > { %v1164_v34 = vpop.f32.mrf.mxu1 }
 0x260   : > { %v1129_v38 = vadd.f32 %v1128_v30, %v1110_v33  ;;  %v1165_v40 = vadd.f32 %v1164_v34, %v1146_v37 }
 0x262   : > { %v1148_v42 = vadd.f32 %v1147_v36, %v1129_v38  ;;  %v1174_v46 = vpack.c.bf16 %v1165_v40, %v1165_v40 }
 0x264   : > { %v1182_v53 = vunpack.c.l.b16 %v1174_v46 }
 0x265   : > { %v1112_v41 = vpop.f32.mrf.mxu2 }
 0x266   : > { %v1113_v49 = vadd.f32 %v1112_v41, %v1094_v47 }
 0x267   : > { %v1166_v44 = vpop.f32.mrf.mxu1 }
 0x268   : > { %v1167_v48 = vadd.f32 %v1166_v44, %v1148_v42  ;;  %v1132_v56 = vadd.f32 %v1131_v43, %v1113_v49 }
 0x26a   : > { %v1175_v50 = vpack.c.bf16 %v1167_v48, %v1167_v48  ;;  %v1151_v61 = vadd.f32 %v1150_v51, %v1132_v56 }
 0x26c   : > { %v1183_v54 = vunpack.c.l.b16 %v1175_v50 }
 0x26d   : > { %v1114_v55 = vpop.f32.mrf.mxu2 }
 0x26e   : > { %v1186_v57 = vpack.c.b16 %v1183_v54, %v1182_v53  ;;  %v1115_v58 = vadd.f32 %v1114_v55, %v1096_v52 }
 0x26f   : > { %v1169_v59 = vpop.f32.mrf.mxu1 }
 0x270   : > { %1188 = vrot.lane.b32.xlu0 %v1186_v57, %s3147_s0  ;;  %v1134_v62 = vadd.f32 %v1133_v60, %v1115_v58  ;;  %v1170_v63 = vadd.f32 %v1169_v59, %v1151_v61 }
 0x272   : > { %v1153_v1 = vadd.f32 %v1152_v0, %v1134_v62  ;;  %v1176_v3 = vpack.c.bf16 %v1170_v63, %v1170_v63 }
 0x274   : > { %v1184_v6 = vunpack.c.l.b16 %v1176_v3 }
 0x277   : > { %v1171_v2 = vpop.f32.mrf.mxu1 }
 0x278   : > { %v1172_v4 = vadd.f32 %v1171_v2, %v1153_v1 }
 0x27a   : > { %v1177_v5 = vpack.c.bf16 %v1172_v4, %v1172_v4  ;;  %v1295_v4 = vld [vmem:[%s3154_s6 + $0x10] sm:$0xff] }
 0x27c   : > { %v1185_v7 = vunpack.c.l.b16 %v1177_v5  ;;  %v1294_v5 = vld [vmem:[%s3154_s6 + $0x8] sm:$0xff] }
 0x27e   : > { %v1187_v8 = vpack.c.b16 %v1185_v7, %v1184_v6 }
 0x280   : > { %1190 = vrot.lane.b32.xlu2 %v1187_v8, %s3147_s0  ;;  %v1296_v8 = vld [vmem:[%s3154_s6 + $0x18] sm:$0xff] }
 0x2da   : > { %v1191_v9 = vpop.permute.xlu2 %1190 }
 0x2db   : > { %v1196_v10 = vsel %vm1192_vm2, 0, %v1191_v9 }
 0x2dc   : > { %v1200_v11 = vsel %vm1197_vm3, %v1196_v10, 0 }
 0x2dd   : > { %1212 = vrot.lane.b32.xlu1 %v1200_v11, %s3148_s24  ;;  %1206 = vrot.lane.b32.xlu0 %v1200_v11, %s3149_s26 }
 0x2e2   : > { %v1189_v12 = vpop.permute.xlu0 %1188 }
 0x2e3   : > { %v1194_v14 = vsel %vm1192_vm2, 0, %v1189_v12 }
 0x2e4   : > { %v1198_v15 = vsel %vm1197_vm3, %v1194_v14, 0 }
 0x2e5   : > { %1233 = vperm.xlu0 %2409, %v720_v13   ;;  %1204 = vrot.lane.b32.xlu1 %v1198_v15, %s3149_s26 }
 0x2e6   : > { %1210 = vrot.lane.b32.xlu2 %v1198_v15, %s3148_s24 }
 0x2ed   : > { %1218 = vperm.xlu1 %2410, %v717_v16   ;;  %v2249_v16 = vld [vmem:[%s3155_s5] sm:$0xf] }
 0x2ee   : > { %1228 = vperm.xlu2 %2411, %v719_v17   ;;  %v2327_v17 = vld [vmem:[%s3155_s5 + $0x4] sm:$0xf0] }
 0x2f6   : > { %1223 = vperm.xlu2 %2411, %v718_v18   ;;  %v2250_v18 = vor.u32 %v2327_v17, %v2249_v16 }
 0x340   : > { %v1211_v20 = vpop.permute.xlu2 %1210 }
 0x348   : > { %v1229_v26 = vpop.permute.xlu2 %1228 }
 0x34f   : > { %v1213_v19 = vpop.permute.xlu1 %1212  ;;  %v1207_v22 = vpop.permute.xlu0 %1206 }
 0x350   : > { %1255 = vmatpush.bf16.msrb.mxu2 %v1213_v19  ;;  %v1224_v32 = vpop.permute.xlu2 %1223  ;;  %v2257_v19 = vld [vmem:[%s3155_s5 + $0x10] sm:$0xf] }
 0x354   : > { %1256 = vmatpush.bf16.msrb.mxu2 %v1211_v20  ;;  %v2329_v20 = vld [vmem:[%s3155_s5 + $0x14] sm:$0xf0] }
 0x357   : > { %v1205_v23 = vpop.permute.xlu1 %1204  ;;  %v1234_v46 = vpop.permute.xlu0 %1233 }
 0x358   : > { %1257 = vmatpush.bf16.msrb.mxu2 %v1207_v22  ;;  %v2258_v22 = vor.u32 %v2329_v20, %v2257_v19  ;;  %v2537_v19 = vmov 1.0  }
 0x35c   : > { %1258 = vmatpush.bf16.msrb.mxu2 %v1205_v23 }
 0x35f   : > { %v1219_v27 = vpop.permute.xlu1 %1218 }
 0x360   : > { %1259 = vmatpush.bf16.msrb.mxu2 %v1200_v11 }
 0x364   : > { %1260 = vmatpush.bf16.msrb.mxu2 %v1198_v15  ;;  %v1293_v15 = vld [vmem:[%s3154_s6] sm:$0xff] }
 0x367   : > { %2245 = vmatmul.msk.bf16.vlgmr.msrb.gmra.mxu2 %vm1246_vm4, %v2324_v24 }
 0x377   : > { %2246 = vmatmul.msk.bf16.gmra.mxu2 %vm1246_vm4, %v2325_v25  ;;  %v2326_v25 = vld [vmem:[%s3155_s5 + $0x4] sm:$0xf] }
 0x3ea   : > { %v1262_v28 = vpop.f32.mrf.mxu2 }
 0x3eb   : > { %v1263_v29 = vadd.f32 %v1262_v28, %v1219_v27  ;;  %v2328_v27 = vld [vmem:[%s3155_s5 + $0x14] sm:$0xf]  ;;  %v2259_v28 = vld [vmem:[%s3155_s5 + $0x18] sm:$0xf0] }
 0x3ed   : > { %vm1272_vm5 = vcmp.ge.f32.partialorder %v1263_v29, 0.0  ;;  %v1276_v30 = vmul.f32 0.2, %v1263_v29 }
 0x3ef   : > { %v1280_v31 = vsel %vm1272_vm5, %v1263_v29, %v1276_v30  ;;  %v2262_v30 = vor.u32 %v2328_v27, %v2259_v28  ;;  %v2538_v27 = vmov 1   ;;  %v2539_v28 = vmov 2  }
 0x3f0   : > { %1285 = vst.msk [vmem:[%s2889_s10] sm:$0xff] %vm1284_vm6, %v1280_v31  ;;  %v1305_v36 = vpack.c.bf16 %v1280_v31, %v1280_v31 }
 0x3f2   : > { %v1264_v33 = vpop.f32.mrf.mxu2  ;;  %v1313_v40 = vunpack.c.l.b16 %v1305_v36 }
 0x3f3   : > { %v1265_v34 = vadd.f32 %v1264_v33, %v1224_v32 }
 0x3f5   : > { %vm1273_vm7 = vcmp.ge.f32.partialorder %v1265_v34, 0.0  ;;  %v1277_v35 = vmul.f32 0.2, %v1265_v34 }
 0x3f7   : > { %v1281_v37 = vsel %vm1273_vm7, %v1265_v34, %v1277_v35 }
 0x3f8   : > { %1286 = vst.msk [vmem:[%s2889_s10 + $0x8] sm:$0xff] %vm1284_vm6, %v1281_v37  ;;  %v1306_v38 = vpack.c.bf16 %v1281_v37, %v1281_v37 }
 0x3fa   : > { %v1267_v39 = vpop.f32.mrf.mxu2  ;;  %v1314_v41 = vunpack.c.l.b16 %v1306_v38 }
 0x3fb   : > { %v1268_v42 = vadd.f32 %v1267_v39, %v1229_v26  ;;  %v2251_v26 = vld [vmem:[%s3155_s5 + $0x8] sm:$0xf0] }
 0x3fc   : > { %v1317_v43 = vpack.c.b16 %v1314_v41, %v1313_v40  ;;  %v2254_v29 = vor.u32 %v2326_v25, %v2251_v26  ;;  %v2331_v25 = vld [vmem:[%s3113_s7 + $0x8] sm:$0xff]  ;;  %v1644_v26 = vld [vmem:[%s3115_s9] sm:$0xff] }
 0x3fd   : > { %vm1274_vm8 = vcmp.ge.f32.partialorder %v1268_v42, 0.0  ;;  %v1278_v44 = vmul.f32 0.2, %v1268_v42 }
 0x3fe   : > { %1319 = vrot.lane.b32.xlu1 %v1317_v43, %s3152_s14 }
 0x3ff   : > { %v1282_v45 = vsel %vm1274_vm8, %v1268_v42, %v1278_v44  ;;  %vm1668_vm8 = vcmask 269312  }
 0x400   : > { %1287 = vst.msk [vmem:[%s2889_s10 + $0x10] sm:$0xff] %vm1284_vm6, %v1282_v45  ;;  %v1307_v50 = vpack.c.bf16 %v1282_v45, %v1282_v45 }
 0x402   : > { %v1269_v47 = vpop.f32.mrf.mxu2  ;;  %v1315_v53 = vunpack.c.l.b16 %v1307_v50 }
 0x403   : > { %v1270_v48 = vadd.f32 %v1269_v47, %v1234_v46 }
 0x405   : > { %vm1275_vm9 = vcmp.ge.f32.partialorder %v1270_v48, 0.0  ;;  %v1279_v49 = vmul.f32 0.2, %v1270_v48 }
 0x407   : > { %v1283_v51 = vsel %vm1275_vm9, %v1270_v48, %v1279_v49  ;;  %vm1731_vm9 = vcmask 269320  }
 0x408   : > { %1288 = vst.msk [vmem:[%s2889_s10 + $0x18] sm:$0xff] %vm1284_vm6, %v1283_v51  ;;  %v1308_v52 = vpack.c.bf16 %v1283_v51, %v1283_v51 }
 0x40a   : > { %v1316_v54 = vunpack.c.l.b16 %v1308_v52 }
 0x40c   : > { %v1318_v55 = vpack.c.b16 %v1316_v54, %v1315_v53 }
 0x40e   : > { %1321 = vrot.lane.b32.xlu0 %v1318_v55, %s3152_s14  ;;  %s1825_s14 = scalar_lea.hbm %s3117_s11, %s2332_s4 }
 0x40f   : > { %s1828_s10 = sshll.u32 %s1825_s14, 4  ;;  %s1829_s10 = int_to_ptr.hbm [resolvable:$true] %s1828_s10 }
 0x410   : > { %s2433_s4 = sshra.s32 %s1829_s10, 4  ;;  %s2434_s4 = int_to_ptr.hbm [resolvable:$true] %s2433_s4 }
 0x411   : > { %s2435_s18 = scalar_lea.hbm %s2434_s4, 32  ;;  %p2440_p1 = scmp.lt.s32.totalorder %s2434_s4, %s3117_s11 }
 0x412   : > { %p2436_p12 = scmp.ne.s32.totalorder %s2434_s4, %s2435_s18 }
 0x414   : > { %p2437_p13 = pnand %p2436_p12, %p2655_p4 }
 0x416   : > { %p2438_p0 = pneg %p2437_p13 }
 0x470   : > { %v1320_v56 = vpop.permute.xlu1 %1319 }
 0x471   : > { %v1324_v57 = vsel %vm777_vm0, 0, %v1320_v56 }
 0x472   : > { %v1327_v58 = vsel %vm795_vm1, %v1324_v57, 0 }
 0x473   : > { %1339 = vrot.lane.b32.xlu0 %v1327_v58, %s3147_s0 }
 0x480   : > { %v1322_v59 = vpop.permute.xlu0 %1321 }
 0x481   : > { %v1326_v60 = vsel %vm777_vm0, 0, %v1322_v59 }
 0x482   : > { %v1328_v61 = vsel %vm795_vm1, %v1326_v60, 0 }
 0x483   : > { %1341 = vrot.lane.b32.xlu2 %v1328_v61, %s3147_s0  ;;  %1337 = vrot.lane.b32.xlu1 %v1328_v61, %s3148_s24 }
 0x484   : > { %1333 = vrot.lane.b32.xlu0 %v1328_v61, %s3149_s26 }
 0x48b   : > { %1331 = vrot.lane.b32.xlu1 %v1327_v58, %s3149_s26  ;;  %1335 = vrot.lane.b32.xlu2 %v1327_v58, %s3148_s24 }
 0x4dd   : > { %v1342_v62 = vpop.permute.xlu2 %1341 }
 0x4de   : > { %1395 = vrot.lane.b32.xlu2 %v1342_v62, %s3149_s26 }
 0x4e5   : > { %v1340_v63 = vpop.permute.xlu0 %1339  ;;  %v1336_v0 = vpop.permute.xlu2 %1335 }
 0x4e6   : > { %1345 = vrot.lane.b32.xlu2 %v1328_v61, %s3153_s17  ;;  %1393 = vrot.lane.b32.xlu0 %v1340_v63, %s3149_s26 }
 0x4ee   : > { %1389 = vrot.lane.b32.xlu0 %v1336_v0, %s3149_s26  ;;  %v1301_v0 = vld [vmem:[%s3114_s8] sm:$0xff] }
 0x4f5   : > { %v1338_v1 = vpop.permute.xlu1 %1337 }
 0x4f6   : > { %v1334_v2 = vpop.permute.xlu0 %1333  ;;  %1391 = vrot.lane.b32.xlu1 %v1338_v1, %s3149_s26  ;;  %v1304_v1 = vld [vmem:[%s3114_s8 + $0x18] sm:$0xff] }
 0x4f7   : > { %1387 = vrot.lane.b32.xlu2 %v1334_v2, %s3149_s26 }
 0x4fd   : > { %v1332_v3 = vpop.permute.xlu1 %1331 }
 0x4fe   : > { %1343 = vrot.lane.b32.xlu1 %v1327_v58, %s3153_s17  ;;  %1385 = vrot.lane.b32.xlu0 %v1332_v3, %s3149_s26  ;;  %s3005_s17 = scalar_lea.vmem [#allocation5], %s3156_s25  ;;  %s2439_s25 = scalar_lea.hbm %s3117_s11, 64 }
 0x4ff   : > { %p2441_p2 = scmp.lt.s32.totalorder %s2439_s25, %s2435_s18 }
 0x501   : > { %p2442_p3 = por %p2441_p2, %p2440_p1 }
 0x503   : > { %p2443_p5 = pnand %p2442_p3, %p2438_p0 }
 0x506   : > { %1359 = vperm.xlu0 %2409, %v1295_v4  }
 0x50e   : > { %1354 = vperm.xlu0 %2409, %v1294_v5   ;;  %v1302_v5 = vld [vmem:[%s3114_s8 + $0x8] sm:$0xff] }
 0x538   : > { %v1396_v6 = vpop.permute.xlu2 %1395 }
 0x539   : > { %1417 = vmatpush.bf16.msrb.mxu3 %v1396_v6  ;;  %v1303_v6 = vld [vmem:[%s3114_s8 + $0x10] sm:$0xff] }
 0x540   : > { %v1346_v7 = vpop.permute.xlu2 %1345 }
 0x541   : > { %1399 = vrot.lane.b32.xlu1 %v1346_v7, %s3149_s26 }
 0x549   : > { %1364 = vperm.xlu1 %2410, %v1296_v8  }
 0x551   : > { %v1388_v12 = vpop.permute.xlu2 %1387 }
 0x558   : > { %v1394_v9 = vpop.permute.xlu0 %1393 }
 0x559   : > { %1418 = vmatpush.bf16.msrb.mxu3 %v1394_v9 }
 0x560   : > { %v1390_v11 = vpop.permute.xlu0 %1389 }
 0x568   : > { %v1392_v10 = vpop.permute.xlu1 %1391 }
 0x569   : > { %1419 = vmatpush.bf16.msrb.mxu3 %v1392_v10  ;;  %v1530_v10 = vlaneseq }
 0x56d   : > { %1420 = vmatpush.bf16.msrb.mxu3 %v1390_v11  ;;  %v1531_v11 = vshrl.u32 %v1530_v10, 7 }
 0x56f   : > { %v1537_v16 = vadd.s32 48, %v1531_v11  ;;  %v1536_v17 = vadd.s32 40, %v1531_v11  ;;  %v1534_v20 = vadd.s32 24, %v1531_v11 }
 0x570   : > { %v1344_v13 = vpop.permute.xlu1 %1343  ;;  %v1386_v14 = vpop.permute.xlu0 %1385 }
 0x571   : > { %1421 = vmatpush.bf16.msrb.mxu3 %v1388_v12  ;;  %1397 = vrot.lane.b32.xlu2 %v1344_v13, %s3149_s26 }
 0x575   : > { %1422 = vmatpush.bf16.msrb.mxu3 %v1386_v14 }
 0x578   : > { %v1360_v34 = vpop.permute.xlu0 %1359 }
 0x579   : > { %1423 = vmatpush.bf16.msrb.mxu3 %v1334_v2  ;;  %1349 = vperm.xlu2 %2411, %v1293_v15  }
 0x57d   : > { %1424 = vmatpush.bf16.msrb.mxu3 %v1332_v3 }
 0x580   : > { %1425 = vmatmul.bf16.vlgmr.msrb.gmra.mxu3 %v2250_v18  ;;  %v1355_v40 = vpop.permute.xlu0 %1354  ;;  %v1535_v18 = vadd.s32 32, %v1531_v11 }
 0x590   : > { %1430 = vmatmul.bf16.gmra.mxu3 %v2258_v22  ;;  %v1533_v22 = vadd.s32 16, %v1531_v11 }
 0x5b3   : > { %v1400_v23 = vpop.permute.xlu1 %1399 }
 0x5b4   : > { %1440 = vmatpush.bf16.msra.mxu0 %v1400_v23  ;;  %2334 = vmatpush.bf16.msra.mxu3 %v1400_v23  ;;  %v2330_v23 = vld [vmem:[%s3113_s7] sm:$0xff] }
 0x5bb   : > { %v1365_v49 = vpop.permute.xlu1 %1364 }
 0x5cb   : > { %v1398_v24 = vpop.permute.xlu2 %1397 }
 0x5cc   : > { %1441 = vmatpush.bf16.msra.mxu0 %v1398_v24  ;;  %2335 = vmatpush.bf16.msra.mxu3 %v1398_v24  ;;  %v1532_v24 = vadd.s32 8, %v1531_v11 }
 0x5d0   : > { %1442 = vmatpush.bf16.msra.mxu0 %v1388_v12  ;;  %2336 = vmatpush.bf16.msra.mxu3 %v1388_v12  ;;  %v1540_v12 = vand.u32 127, %v1530_v10 }
 0x5d2   : > { %v1541_v15 = vmul.u32 2, %v1540_v12 }
 0x5d3   : > { %v1350_v37 = vpop.permute.xlu2 %1349 }
 0x5d4   : > { %1443 = vmatpush.bf16.msra.mxu0 %v1386_v14  ;;  %2337 = vmatpush.bf16.msra.mxu3 %v1386_v14  ;;  %v1538_v14 = vadd.s32 56, %v1531_v11  ;;  %vm1548_vm11 = vcmp.eq.s32.totalorder %v1537_v16, %v1541_v15  ;;  %vm1547_vm12 = vcmp.eq.s32.totalorder %v1536_v17, %v1541_v15  ;;  %vm1546_vm13 = vcmp.eq.s32.totalorder %v1535_v18, %v1541_v15 }
 0x5d5   : > { %vm1545_vm14 = vcmp.eq.s32.totalorder %v1534_v20, %v1541_v15  ;;  %vm1544_vm15 = vcmp.eq.s32.totalorder %v1533_v22, %v1541_v15  ;;  %vm1543_vm0 = vcmp.eq.s32.totalorder %v1532_v24, %v1541_v15  ;;  %vm1542_vm1 = vcmp.eq.s32.totalorder %v1531_v11, %v1541_v15 }
 0x5d6   : > { %vm1549_vm10 = vcmp.eq.s32.totalorder %v1538_v14, %v1541_v15 }
 0x5d7   : > { %2263 = vmatmul.msk.bf16.vlgmr.msra.gmra.mxu0 %vm1284_vm6, %v2254_v29  ;;  %2264 = vmatmul.msk.bf16.vlgmr.msra.gmra.mxu3 %vm1284_vm6, %v2262_v30  ;;  %v1645_v29 = vld [vmem:[%s3115_s9 + $0x8] sm:$0xff] }
 0x5d8   : > { %2283 = vmatpush.msk.msra.mxu2 %vm1549_vm10, %v2537_v19  ;;  %vm1770_vm10 = vcmask 277520  }
 0x5da   : > { %2284 = vmatpush.msk.msra.mxu2 %vm1548_vm11, %v2537_v19 }
 0x5dc   : > { %2285 = vmatpush.msk.msra.mxu2 %vm1547_vm12, %v2537_v19 }
 0x5de   : > { %2286 = vmatpush.msk.msra.mxu2 %vm1546_vm13, %v2537_v19 }
 0x5e0   : > { %2287 = vmatpush.msk.msra.mxu2 %vm1545_vm14, %v2537_v19 }
 0x5e2   : > { %2288 = vmatpush.msk.msra.mxu2 %vm1544_vm15, %v2537_v19 }
 0x5e4   : > { %2289 = vmatpush.msk.msra.mxu2 %vm1543_vm0, %v2537_v19 }
 0x5e6   : > { %2290 = vmatpush.msk.msra.mxu2 %vm1542_vm1, %v2537_v19 }
 0x603   : > { %v1426_v31 = vpop.f32.mrf.mxu3 }
 0x604   : > { %v1427_v38 = vadd.f32 %v1426_v31, %v1350_v37  ;;  %v1646_v31 = vld [vmem:[%s3115_s9 + $0x10] sm:$0xff] }
 0x60b   : > { %v1428_v32 = vpop.f32.mrf.mxu3 }
 0x60c   : > { %v1429_v42 = vadd.f32 %v1428_v32, %v1355_v40 }
 0x613   : > { %v1431_v33 = vpop.f32.mrf.mxu3 }
 0x614   : > { %v1432_v44 = vadd.f32 %v1431_v33, %v1360_v34 }
 0x61b   : > { %v1433_v35 = vpop.f32.mrf.mxu3 }
 0x61c   : > { %v1434_v50 = vadd.f32 %v1433_v35, %v1365_v49 }
 0x654   : > { %v1445_v36 = vpop.f32.mrf.mxu0 }
 0x655   : > { %v1446_v39 = vadd.f32 %v1445_v36, %v1427_v38 }
 0x657   : > { %v1455_v45 = vpack.c.bf16 %v1446_v39, %v1446_v39 }
 0x659   : > { %v1463_v51 = vunpack.c.l.b16 %v1455_v45  ;;  %v1647_v45 = vld [vmem:[%s3115_s9 + $0x18] sm:$0xff] }
 0x65a   : > { %v1450_v41 = vpop.f32.mrf.mxu3 }
 0x65b   : > { %v1451_v47 = vadd.f32 %v1450_v41, %v1432_v44 }
 0x65c   : > { %v1447_v43 = vpop.f32.mrf.mxu0 }
 0x65d   : > { %v1448_v46 = vadd.f32 %v1447_v43, %v1429_v42  ;;  %v1457_v54 = vpack.c.bf16 %v1451_v47, %v1451_v47 }
 0x65f   : > { %v1456_v48 = vpack.c.bf16 %v1448_v46, %v1448_v46  ;;  %v1465_v58 = vunpack.c.l.b16 %v1457_v54 }
 0x661   : > { %v1464_v52 = vunpack.c.l.b16 %v1456_v48 }
 0x662   : > { %v1452_v53 = vpop.f32.mrf.mxu3 }
 0x663   : > { %v1467_v55 = vpack.c.b16 %v1464_v52, %v1463_v51  ;;  %v1453_v56 = vadd.f32 %v1452_v53, %v1434_v50 }
 0x665   : > { %v1458_v57 = vpack.c.bf16 %v1453_v56, %v1453_v56  ;;  %1469 = vrot.lane.b32.xlu2 %v1467_v55, %s3147_s0 }
 0x667   : > { %v1466_v59 = vunpack.c.l.b16 %v1458_v57 }
 0x669   : > { %v1468_v60 = vpack.c.b16 %v1466_v59, %v1465_v58  ;;  %v1789_v58 = vld [vmem:[#allocation2] sm:$0x1] }
 0x66b   : > { %1471 = vrot.lane.b32.xlu1 %v1468_v60, %s3147_s0 }
 0x6bf   : > { %v1470_v61 = vpop.permute.xlu2 %1469 }
 0x6c0   : > { %v1474_v62 = vsel %vm1192_vm2, 0, %v1470_v61 }
 0x6c1   : > { %v1477_v63 = vsel %vm1197_vm3, %v1474_v62, 0 }
 0x6c2   : > { %1489 = vrot.lane.b32.xlu1 %v1477_v63, %s3148_s24 }
 0x6ca   : > { %1568 = vperm.xlu1 %2410, %v1301_v0  }
 0x6d2   : > { %1583 = vperm.xlu1 %2410, %v1304_v1  }
 0x6da   : > { %2414 = vset.pattern.permute.xlu1 %v2539_v28 }
 0x6db   : > { %1751 = vperm.xlu1 %2414, %v1644_v26  }
 0x6dd   : > { %v1472_v2 = vpop.permute.xlu1 %1471 }
 0x6de   : > { %v1476_v3 = vsel %vm1192_vm2, 0, %v1472_v2 }
 0x6df   : > { %v1479_v4 = vsel %vm1197_vm3, %v1476_v3, 0 }
 0x6e0   : > { %1485 = vrot.lane.b32.xlu2 %v1479_v4, %s3149_s26  ;;  %1491 = vrot.lane.b32.xlu0 %v1479_v4, %s3148_s24 }
 0x6e8   : > { %1573 = vperm.xlu2 %2411, %v1302_v5   ;;  %1483 = vrot.lane.b32.xlu0 %v1477_v63, %s3149_s26 }
 0x6f0   : > { %1578 = vperm.xlu0 %2409, %v1303_v6   ;;  %2412 = vset.pattern.permute.xlu2 %v2538_v27 }
 0x6f1   : > { %1712 = vperm.xlu2 %2412, %v1644_v26  }
 0x6f8   : > { %2413 = vset.pattern.permute.xlu0 %v2538_v27 }
 0x6f9   : > { %1716 = vperm.xlu0 %2413, %v1645_v29   ;;  %1720 = vperm.xlu2 %2412, %v1646_v31  }
 0x701   : > { %2415 = vset.pattern.permute.xlu2 %v2539_v28 }
 0x702   : > { %1755 = vperm.xlu2 %2415, %v1645_v29  }
 0x734   : > { %v1490_v8 = vpop.permute.xlu1 %1489 }
 0x73a   : > { %v1486_v9 = vpop.permute.xlu2 %1485 }
 0x73c   : > { %v1569_v35 = vpop.permute.xlu1 %1568 }
 0x742   : > { %v1574_v40 = vpop.permute.xlu2 %1573 }
 0x744   : > { %v1584_v51 = vpop.permute.xlu1 %1583 }
 0x74b   : > { %v1713_v56 = vpop.permute.xlu2 %1712 }
 0x74d   : > { %v1752_v61 = vpop.permute.xlu1 %1751 }
 0x752   : > { %v1492_v7 = vpop.permute.xlu0 %1491 }
 0x753   : > { %1513 = vmatpush.bf16.msra.mxu1 %v1492_v7  ;;  %v1721_v57 = vpop.permute.xlu2 %1720 }
 0x757   : > { %1514 = vmatpush.bf16.msra.mxu1 %v1490_v8 }
 0x75a   : > { %v1484_v13 = vpop.permute.xlu0 %1483 }
 0x75b   : > { %1515 = vmatpush.bf16.msra.mxu1 %v1486_v9 }
 0x75c   : > { %v1756_v60 = vpop.permute.xlu2 %1755 }
 0x75f   : > { %1516 = vmatpush.bf16.msra.mxu1 %v1484_v13 }
 0x762   : > { %v1579_v46 = vpop.permute.xlu0 %1578 }
 0x763   : > { %1517 = vmatpush.bf16.msra.mxu1 %v1479_v4 }
 0x767   : > { %1518 = vmatpush.bf16.msra.mxu1 %v1477_v63 }
 0x76a   : > { %2273 = vmatmul.msk.bf16.vlgmr.msra.gmra.mxu1 %vm1246_vm4, %v2330_v23 }
 0x76b   : > { %v1717_v59 = vpop.permute.xlu0 %1716 }
 0x77a   : > { %2274 = vmatmul.msk.bf16.gmra.mxu1 %vm1246_vm4, %v2331_v25  ;;  %vm1639_vm4 = vcmask 261120  }
 0x7e7   : > { %v1520_v30 = vpop.f32.mrf.mxu1 }
 0x7e8   : > { %2291 = vmatmul.msk.f32.vlgmr.msra.gmra.mxu2 %vm1284_vm6, %v1520_v30 }
 0x7ef   : > { %v1522_v32 = vpop.f32.mrf.mxu1 }
 0x7f0   : > { %2292 = vmatmul.msk.f32.gmra.mxu2 %vm1284_vm6, %v1522_v32 }
 0x7f7   : > { %v1525_v33 = vpop.f32.mrf.mxu1 }
 0x7f8   : > { %2293 = vmatmul.msk.f32.gmra.mxu2 %vm1284_vm6, %v1525_v33 }
 0x7ff   : > { %v1527_v34 = vpop.f32.mrf.mxu1 }
 0x800   : > { %2294 = vmatmul.msk.f32.gmra.mxu2 %vm1284_vm6, %v1527_v34 }
 0x86b   : > { %v1615_v36 = vpop.f32.mrf.mxu2 }
 0x86c   : > { %v1616_v37 = vadd.f32 %v1615_v36, %v1569_v35 }
 0x86e   : > { %v1631_v38 = vmul.f32 0.2, %v1616_v37  ;;  %vm1627_vm3 = vcmp.ge.f32.partialorder %v1616_v37, 0.0 }
 0x870   : > { %v1635_v39 = vsel %vm1627_vm3, %v1616_v37, %v1631_v38 }
 0x871   : > { %1652 = vrot.lane.b32.xlu2 %v1635_v39, %s3147_s0  ;;  %1640 = vst.msk [vmem:[%s3005_s17] sm:$0xff] %vm1639_vm4, %v1635_v39 }
 0x873   : > { %v1618_v41 = vpop.f32.mrf.mxu2 }
 0x874   : > { %v1619_v42 = vadd.f32 %v1618_v41, %v1574_v40 }
 0x876   : > { %v1632_v43 = vmul.f32 0.2, %v1619_v42  ;;  %vm1628_vm5 = vcmp.ge.f32.partialorder %v1619_v42, 0.0 }
 0x878   : > { %v1636_v44 = vsel %vm1628_vm5, %v1619_v42, %v1632_v43 }
 0x879   : > { %1654 = vrot.lane.b32.xlu0 %v1636_v44, %s3147_s0  ;;  %1641 = vst.msk [vmem:[%s3005_s17 + $0x8] sm:$0xff] %vm1639_vm4, %v1636_v44  ;;  %1763 = vperm.xlu2 %2415, %v1647_v45  }
 0x87b   : > { %v1621_v47 = vpop.f32.mrf.mxu2 }
 0x87c   : > { %v1622_v48 = vadd.f32 %v1621_v47, %v1579_v46 }
 0x87e   : > { %v1633_v49 = vmul.f32 0.2, %v1622_v48  ;;  %vm1629_vm6 = vcmp.ge.f32.partialorder %v1622_v48, 0.0 }
 0x880   : > { %v1637_v50 = vsel %vm1629_vm6, %v1622_v48, %v1633_v49 }
 0x881   : > { %1724 = vperm.xlu0 %2413, %v1647_v45   ;;  %1656 = vrot.lane.b32.xlu1 %v1637_v50, %s3147_s0  ;;  %1642 = vst.msk [vmem:[%s3005_s17 + $0x10] sm:$0xff] %vm1639_vm4, %v1637_v50 }
 0x882   : > { %2418 = vset.pattern.permute.xlu2 %v2536_v21 }
 0x883   : > { %v1624_v52 = vpop.f32.mrf.mxu2  ;;  %1685 = vperm.xlu2 %2418, %v1646_v31  }
 0x884   : > { %v1625_v53 = vadd.f32 %v1624_v52, %v1584_v51 }
 0x886   : > { %v1634_v54 = vmul.f32 0.2, %v1625_v53  ;;  %vm1630_vm7 = vcmp.ge.f32.partialorder %v1625_v53, 0.0 }
 0x888   : > { %v1638_v55 = vsel %vm1630_vm7, %v1625_v53, %v1634_v54 }
 0x889   : > { %2416 = vset.pattern.permute.xlu0 %v2536_v21  ;;  %1658 = vrot.lane.b32.xlu1 %v1638_v55, %s3147_s0  ;;  %1643 = vst.msk [vmem:[%s3005_s17 + $0x18] sm:$0xff] %vm1639_vm4, %v1638_v55  ;;  %s1845_s0 = sshll.u32 %s3005_s17, 4  ;;  %s3038_s0 = int_to_ptr.vmem [resolvable:$true] %s1845_s0 }
 0x88a   : > { %1675 = vperm.xlu0 %2416, %v1644_v26  }
 0x891   : > { %1759 = vperm.xlu1 %2414, %v1646_v31  }
 0x899   : > { %2417 = vset.pattern.permute.xlu1 %v2536_v21 }
 0x89a   : > { %1680 = vperm.xlu1 %2417, %v1645_v29  }
 0x8a2   : > { %1690 = vperm.xlu1 %2417, %v1647_v45  }
 0x8aa   : > { %1792 = vperm.xlu1 %2417, %v1789_v58  }
 0x8cb   : > { %v1653_v63 = vpop.permute.xlu2 %1652 }
 0x8cc   : > { %v1664_v1 = vsel %vm1192_vm2, 0.0, %v1653_v63 }
 0x8cd   : > { %v1669_v4 = vsel %vm1668_vm8, %v1664_v1, 0.0 }
 0x8ce   : > { %v1727_v7 = vmul.f32 %v1713_v56, %v1669_v4  ;;  %v1766_v20 = vmul.f32 %v1752_v61, %v1669_v4 }
 0x8d0   : > { %v1732_v11 = vsel %vm1731_vm9, %v1727_v7, 0.0  ;;  %v1771_v28 = vsel %vm1770_vm10, %v1766_v20, 0.0 }
 0x8d3   : > { %v1764_v22 = vpop.permute.xlu2 %1763 }
 0x8dd   : > { %v1686_v40 = vpop.permute.xlu2 %1685 }
 0x8eb   : > { %v1655_v62 = vpop.permute.xlu0 %1654 }
 0x8ec   : > { %v1665_v0 = vsel %vm1192_vm2, 0.0, %v1655_v62 }
 0x8ed   : > { %v1670_v2 = vsel %vm1668_vm8, %v1665_v0, 0.0 }
 0x8ee   : > { %v1728_v6 = vmul.f32 %v1717_v59, %v1670_v2  ;;  %v1767_v17 = vmul.f32 %v1756_v60, %v1670_v2 }
 0x8f0   : > { %v1733_v9 = vsel %vm1731_vm9, %v1728_v6, 0.0  ;;  %v1772_v25 = vsel %vm1770_vm10, %v1767_v17, 0.0 }
 0x8f1   : > { %v1734_v14 = vadd.f32 %v1733_v9, %v1732_v11  ;;  %v1773_v31 = vadd.f32 %v1772_v25, %v1771_v28 }
 0x8f3   : > { %v1657_v3 = vpop.permute.xlu1 %1656  ;;  %v1725_v15 = vpop.permute.xlu0 %1724 }
 0x8f4   : > { %v1666_v21 = vsel %vm1192_vm2, 0.0, %v1657_v3 }
 0x8f5   : > { %v1671_v5 = vsel %vm1668_vm8, %v1666_v21, 0.0 }
 0x8f6   : > { %v1729_v8 = vmul.f32 %v1721_v57, %v1671_v5  ;;  %v1695_v45 = vmul.f32 %v1686_v40, %v1671_v5 }
 0x8f8   : > { %v1735_v12 = vsel %vm1731_vm9, %v1729_v8, 0.0 }
 0x8f9   : > { %v1736_v19 = vadd.f32 %v1735_v12, %v1734_v14 }
 0x8fb   : > { %v1659_v10 = vpop.permute.xlu1 %1658 }
 0x8fc   : > { %v1667_v13 = vsel %vm1192_vm2, 0.0, %v1659_v10  ;;  %v1676_v37 = vpop.permute.xlu0 %1675 }
 0x8fd   : > { %v3032_v16 = vsel %vm1668_vm8, %v1667_v13, 0.0  ;;  %v1693_v41 = vmul.f32 %v1676_v37, %v1669_v4 }
 0x8fe   : > { %v1730_v18 = vmul.f32 %v1725_v15, %v3032_v16  ;;  %v1769_v29 = vmul.f32 %v1764_v22, %v3032_v16 }
 0x8ff   : > { %v1697_v49 = vsel %vm1639_vm4, %v1693_v41, 0.0 }
 0x900   : > { %v1737_v23 = vsel %vm1731_vm9, %v1730_v18, 0.0  ;;  %v1776_v36 = vsel %vm1770_vm10, %v1769_v29, 0.0 }
 0x901   : > { %v1738_v24 = vadd.f32 %v1737_v23, %v1736_v19 }
 0x903   : > { %v1739_v26 = vrot.slane %v1738_v24, 4  ;;  %v1760_v27 = vpop.permute.xlu1 %1759 }
 0x904   : > { %v1768_v30 = vmul.f32 %v1760_v27, %v1671_v5 }
 0x905   : > { %v1740_v32 = vadd.f32 %v1739_v26, %v1738_v24 }
 0x906   : > { %v1774_v33 = vsel %vm1770_vm10, %v1768_v30, 0.0 }
 0x907   : > { %v1775_v34 = vadd.f32 %v1774_v33, %v1773_v31  ;;  %v1741_v35 = vrot.slane %v1740_v32, 2 }
 0x909   : > { %v1777_v38 = vadd.f32 %v1776_v36, %v1775_v34  ;;  %v1742_v39 = vadd.f32 %v1741_v35, %v1740_v32 }
 0x90b   : > { %v1778_v42 = vrot.slane %v1777_v38, 4  ;;  %v1743_v43 = vrot.slane %v1742_v39, 1 }
 0x90c   : > { %v1681_v44 = vpop.permute.xlu1 %1680 }
 0x90d   : > { %v1779_v46 = vadd.f32 %v1778_v42, %v1777_v38  ;;  %v1694_v47 = vmul.f32 %v1681_v44, %v1670_v2  ;;  %v1744_v48 = vadd.f32 %v1743_v43, %v1742_v39 }
 0x90f   : > { %v1698_v50 = vsel %vm1639_vm4, %v1694_v47, 0.0  ;;  %1746 = vrot.lane.b32.xlu2 %v1744_v48, %s3149_s26  ;;  %v1780_v51 = vrot.slane %v1779_v46, 2 }
 0x910   : > { %v1699_v52 = vadd.f32 %v1698_v50, %v1697_v49 }
 0x911   : > { %2446 = shalt.err (!%p2443_p5)
}
 0x912   : > { %s2540_s26 = smov 128   ;;  %s2541_s5 = smov 8   ;;  %v1700_v53 = vsel %vm1639_vm4, %v1695_v45, 0.0  ;;  %v1781_v54 = vadd.f32 %v1780_v51, %v1779_v46 }
 0x913   : > { %2338 = dma.vmem_to_hbm [thread:$0]  (%p2655_p4), %s1827_s2, 512, %s1829_s10, %s1800_s30, %s2540_s26, %s2540_s26, %s2541_s5   ;;  %v1701_v55 = vadd.f32 %v1700_v53, %v1699_v52 }
 0x914   : > { %s1805_s20 = scalar_lea.sflag [#allocation6], %s2884_s16  ;;  %s2461_s14 = sshra.s32 %s1848_s3, 4  ;;  %s2462_s14 = int_to_ptr.hbm [resolvable:$true] %s2461_s14 }
 0x915   : > { %s2463_s4 = scalar_lea.hbm %s2462_s14, 32  ;;  %s2467_s17 = scalar_lea.hbm %s3118_s12, 64 }
 0x916   : > { %p2464_p6 = scmp.ne.s32.totalorder %s2462_s14, %s2463_s4  ;;  %p2468_p10 = scmp.lt.s32.totalorder %s2462_s14, %s3118_s12 }
 0x917   : > { %p2469_p11 = scmp.lt.s32.totalorder %s2467_s17, %s2463_s4 }
 0x918   : > { %p2465_p7 = pnand %p2464_p6, %p2655_p4 }
 0x919   : > { %p2470_p12 = por %p2469_p11, %p2468_p10 }
 0x91a   : > { %p2466_p9 = pneg %p2465_p7 }
 0x91c   : > { %p2471_p13 = pnand %p2470_p12, %p2466_p9 }
 0x91e   : > { %2474 = shalt.err (!%p2471_p13)
}
 0x91f   : > { %2339 = dma.vmem_to_hbm [thread:$0]  (%p2655_p4), %s3038_s0, 512, %s1848_s3, %s1805_s20, %s2540_s26, %s2540_s26, %s2541_s5   ;;  %v1782_v56 = vrot.slane %v1781_v54, 1  ;;  %v1691_v57 = vpop.permute.xlu1 %1690  ;;  %vm1797_vm2 = vcmask 253952  }
 0x920   : > { %v1696_v58 = vmul.f32 %v1691_v57, %v3032_v16  ;;  %s679_s19 = scalar_lea.vmem %s3119_s13, %s2672_s23 }
 0x921   : > { %v1783_v59 = vadd.f32 %v1782_v56, %v1781_v54 }
 0x922   : > { %v1702_v60 = vsel %vm1639_vm4, %v1696_v58, 0.0 }
 0x923   : > { %1785 = vrot.lane.b32.xlu0 %v1783_v59, %s3148_s24  ;;  %v1703_v61 = vadd.f32 %v1702_v60, %v1701_v55 }
 0x925   : > { %v1704_v62 = vrot.slane %v1703_v61, 4 }
 0x927   : > { %v1705_v63 = vadd.f32 %v1704_v62, %v1703_v61  ;;  %v1793_v4 = vpop.permute.xlu1 %1792 }
 0x928   : > { %v1795_v7 = vperm.slane %v1793_v4, 0 }
 0x929   : > { %v1706_v0 = vrot.slane %v1705_v63, 2 }
 0x92b   : > { %v1707_v1 = vadd.f32 %v1706_v0, %v1705_v63 }
 0x92d   : > { %v1708_v2 = vrot.slane %v1707_v1, 1 }
 0x92f   : > { %v1709_v21 = vadd.f32 %v1708_v2, %v1707_v1 }
 0x969   : > { %v1747_v3 = vpop.permute.xlu2 %1746 }
 0x96a   : > { %v1749_v5 = vadd.f32 %v1747_v3, %v1709_v21 }
 0x995   : > { %v1786_v6 = vpop.permute.xlu0 %1785 }
 0x996   : > { %v1788_v8 = vadd.f32 %v1786_v6, %v1749_v5 }
 0x998   : > { %v1796_v9 = vadd.f32 %v1795_v7, %v1788_v8 }
 0x99a   : > { %1798 = vst.msk [vmem:[%s679_s19] sm:$0x1] %vm1797_vm2, %v1796_v9 }
 0x99b PF: > { %p2349_p4 = scmp.ge.s32.totalorder %s2529_s15, 2  ;;  %s1865_s24 = sand.u32 1, %s2509_s27  }
 0x99c   : > { %s1866_s16 = scalar_lea.sflag [#allocation4], %s1865_s24 }
 0x99d   : > { %p2343_p0 = pnand %p2349_p4, %p2662_p8 }
 0x99f   : > { %p2344_p1 = pneg %p2343_p0 }
 0x9a1   : > { %2500 = dma.done.wait (%p2344_p1), %s1866_s16, 512  }
 0x9a2   : > { %2502 = vsyncadd (%p2344_p1), %s1866_s16, 4294966784  ;;  %s1876_s0 = scalar_lea.sflag [#allocation6], %s1865_s24 }
 0x9a3   : > { %2504 = dma.done.wait (%p2344_p1), %s1876_s0, 512  }
 0x9a4   : > { %2506 = vsyncadd (%p2344_p1), %s1876_s0, 4294966784  ;;  %s32_s15 = sadd.s32 1, %s2529_s15   ;;  %s3157_s30 = sld [smem:[#allocation9_spill]] }
 0x9a5   : > { %p29_p2 = scmp.ge.s32.totalorder %s32_s15, 4   ;;  %s3158_s14 = sld [smem:[#allocation10_spill]] }
 0x9a6   : > { %s3159_s27 = smov %s2513_s28  ;;  %s3160_s28 = smov %s2517_s29 }
 0x9a7   : > { %s3161_s29 = smov %s2668_s22  ;;  %31 = sbr.rel (!%p29_p2) target bundleno = 14 (0xe), region = 158 }
 0x9ac   :  { %1892 = vsyncpa [#allocation4], 1 }
 0x9ad   :  { %1894 = vsyncpa [#allocation4 + $0x1], 1 }
 0x9ae   :  { %1895 = vsyncpa [#allocation6], 1 }
 0x9af   :  { %1897 = vsyncpa [#allocation6 + $0x1], 1 }

</bundles_post_ra>
